<compile_context>
chip_gen: v7x
topology: tpu7x:2x2x1
jax: 0.10.0
libtpu: 0.0.40
codegen_flags: <defaults>
</compile_context>

<pallas_src>
import functools

import jax
import jax.numpy as jnp
from jax.experimental import pallas as pl
from jax.experimental.pallas import tpu as pltpu


def _decoder_kernel(n_layers, hid_pad, batch_pad, *refs):
    """refs = [tok(SMEM), emb(HBM), h0, c0, (w_ih, w_hh, b)*L, w_lin_tile, b_lin_tile,
               pred_tile, h_out, c_out, emb_vmem, x_final, dma_sem]"""
    idx = 0
    tok_ref = refs[idx]; idx += 1              # (B_pad,) int32 in SMEM (scalar prefetch)
    emb_hbm = refs[idx]; idx += 1              # (V, E_pad) f32 in HBM (ANY)
    h0_ref = refs[idx]; idx += 1               # (L, B_pad, H_pad)
    c0_ref = refs[idx]; idx += 1               # (L, B_pad, H_pad)
    layer_refs = refs[idx: idx + 3 * n_layers]; idx += 3 * n_layers
    wlin_ref = refs[idx]; idx += 1             # (H_pad, V_TILE)  pre-transposed
    blin_ref = refs[idx]; idx += 1             # (1, V_TILE)
    pred_ref = refs[idx]; idx += 1             # (B_pad, V_TILE)
    hout_ref = refs[idx]; idx += 1             # (L, B_pad, H_pad)
    cout_ref = refs[idx]; idx += 1             # (L, B_pad, H_pad)
    emb_vmem = refs[idx]; idx += 1             # (B_pad, E_pad) scratch
    xfin_ref = refs[idx]; idx += 1             # (B_pad, H_pad) scratch (final layer h)
    sem = refs[idx]; idx += 1                  # DMA sems, shape (B_pad,)

    Hp = hid_pad
    hi = jax.lax.Precision.HIGHEST
    j = pl.program_id(0)

    # ---- LSTM step runs once (first vocab tile); state + final h stay resident ----
    @pl.when(j == 0)
    def _run_lstm():
        # Exact embedding gather: one row DMA per (padded) batch element.
        # All copies are started before any wait so the row fetches overlap.
        copies = [
            pltpu.make_async_copy(
                emb_hbm.at[pl.ds(tok_ref[b], 1)],   # (1, E_pad) row in HBM
                emb_vmem.at[pl.ds(b, 1)],           # (1, E_pad) row in VMEM
                sem.at[b])
            for b in range(batch_pad)
        ]
        for cp in copies:
            cp.start()
        for cp in copies:
            cp.wait()

        x = emb_vmem[...]                           # (B_pad, E_pad)
        # dropout(embedded) -> identity in eval mode

        for l in range(n_layers):
            w_ih = layer_refs[3 * l + 0][...]       # (in_pad, 4*Hp), gate blocks i,f,g,o
            w_hh = layer_refs[3 * l + 1][...]       # (Hp, 4*Hp)
            bias = layer_refs[3 * l + 2][...]       # (1, 4*Hp) pre-summed b_ih + b_hh
            h_prev = h0_ref[l]                      # (B_pad, Hp)
            c_prev = c0_ref[l]                      # (B_pad, Hp)

            gates = (jnp.dot(x, w_ih, preferred_element_type=jnp.float32, precision=hi)
                     + jnp.dot(h_prev, w_hh, preferred_element_type=jnp.float32, precision=hi)
                     + bias)                        # (B_pad, 4*Hp)

            # Lane-aligned gate slices (Hp is a multiple of 128) -> no relayout.
            i_g = jax.nn.sigmoid(gates[:, 0 * Hp:1 * Hp])
            f_g = jax.nn.sigmoid(gates[:, 1 * Hp:2 * Hp])
            g_g = jnp.tanh(gates[:, 2 * Hp:3 * Hp])
            o_g = jax.nn.sigmoid(gates[:, 3 * Hp:4 * Hp])

            c_new = f_g * c_prev + i_g * g_g
            h_new = o_g * jnp.tanh(c_new)

            hout_ref[l] = h_new                     # full (8,128k) unmasked stores
            cout_ref[l] = c_new
            x = h_new                               # inter-layer dropout = identity

        xfin_ref[...] = x

    # ---- output projection for this vocab tile (runs every grid step) ----
    pred_ref[...] = (jnp.dot(xfin_ref[...], wlin_ref[...],
                             preferred_element_type=jnp.float32, precision=hi)
                     + blin_ref[...])


def _round_up(x, m):
    return ((x + m - 1) // m) * m


def decoder_forward(tokens, hidden, cell, params, *, n_layers, hid_dim, v_tile=None):
    """tokens: (B,) int32; hidden/cell: (L, B, H) f32.  Returns (pred, h, c)."""
    B = tokens.shape[0]
    V, E = params["embedding"].shape
    H = hid_dim
    L = n_layers
    f32 = jnp.float32

    # Padded (lane/sublane aligned) shapes.
    B_pad = max(8, _round_up(B, 8))
    H_pad = _round_up(H, 128)
    E_pad = _round_up(E, 128)
    # Adaptive vocab tile: multiple of 256 (MXU width), 512 lanes for large vocabs
    # so per-grid-step overhead is amortized, no larger than needed for small ones.
    if v_tile is None:
        v_tile = min(512, _round_up(V, 256))
    V_pad = _round_up(V, v_tile)
    num_vt = V_pad // v_tile

    # ---- host-side layout prep (one-time, outside the hot path) ----
    tok_p = jnp.zeros((B_pad,), jnp.int32).at[:B].set(tokens.astype(jnp.int32))
    emb_p = jnp.pad(params["embedding"].astype(f32), ((0, 0), (0, E_pad - E)))
    h_p = jnp.pad(hidden.astype(f32), ((0, 0), (0, B_pad - B), (0, H_pad - H)))
    c_p = jnp.pad(cell.astype(f32), ((0, 0), (0, B_pad - B), (0, H_pad - H)))

    layer_args = []
    in_pads = []
    for l in range(L):
        in_dim = E if l == 0 else H
        in_pad = E_pad if l == 0 else H_pad
        # torch layout: w_ih (4H, in), gate order i,f,g,o.  Pad each gate block to H_pad,
        # pre-transpose so the kernel never transposes a loaded tile, and pre-sum biases.
        w_ih = params[f"w_ih_{l}"].astype(f32).reshape(4, H, in_dim)
        w_hh = params[f"w_hh_{l}"].astype(f32).reshape(4, H, H)
        b = (params[f"b_ih_{l}"] + params[f"b_hh_{l}"]).astype(f32).reshape(4, H)
        w_ih = jnp.pad(w_ih, ((0, 0), (0, H_pad - H), (0, in_pad - in_dim)))
        w_hh = jnp.pad(w_hh, ((0, 0), (0, H_pad - H), (0, H_pad - H)))
        b = jnp.pad(b, ((0, 0), (0, H_pad - H)))
        w_ih_t = jnp.transpose(w_ih, (2, 0, 1)).reshape(in_pad, 4 * H_pad)   # (in_pad, 4*H_pad)
        w_hh_t = jnp.transpose(w_hh, (2, 0, 1)).reshape(H_pad, 4 * H_pad)    # (H_pad, 4*H_pad)
        layer_args += [w_ih_t, w_hh_t, b.reshape(1, 4 * H_pad)]
        in_pads.append(in_pad)

    w_lin_t = jnp.pad(params["w_lin"].astype(f32).T,
                      ((0, H_pad - H), (0, V_pad - V)))                      # (H_pad, V_pad)
    b_lin_p = jnp.pad(params["b_lin"].astype(f32), (0, V_pad - V)).reshape(1, V_pad)

    # ---- specs ----
    const3 = lambda j, tok: (0, 0, 0)
    const2 = lambda j, tok: (0, 0)
    vtile2 = lambda j, tok: (0, j)

    in_specs = [
        pl.BlockSpec(memory_space=pl.ANY),                     # embedding table stays in HBM
        pl.BlockSpec((L, B_pad, H_pad), const3),               # h0 (resident, DMA'd once)
        pl.BlockSpec((L, B_pad, H_pad), const3),               # c0
    ]
    for l in range(L):
        in_specs += [
            pl.BlockSpec((in_pads[l], 4 * H_pad), const2),     # w_ih (pre-transposed)
            pl.BlockSpec((H_pad, 4 * H_pad), const2),          # w_hh (pre-transposed)
            pl.BlockSpec((1, 4 * H_pad), const2),              # pre-summed bias
        ]
    in_specs += [
        pl.BlockSpec((H_pad, v_tile), vtile2),                 # w_lin tile (double-buffered)
        pl.BlockSpec((1, v_tile), vtile2),                     # b_lin tile
    ]
    out_specs = (
        pl.BlockSpec((B_pad, v_tile), vtile2),                 # prediction, lane-dense tile
        pl.BlockSpec((L, B_pad, H_pad), const3),               # hidden out (resident)
        pl.BlockSpec((L, B_pad, H_pad), const3),               # cell out (resident)
    )
    out_shape = (
        jax.ShapeDtypeStruct((B_pad, V_pad), f32),
        jax.ShapeDtypeStruct((L, B_pad, H_pad), f32),
        jax.ShapeDtypeStruct((L, B_pad, H_pad), f32),
    )
    scratch_shapes = [
        pltpu.VMEM((B_pad, E_pad), f32),                       # gathered embedding rows
        pltpu.VMEM((B_pad, H_pad), f32),                       # final-layer hidden (carried)
        pltpu.SemaphoreType.DMA((B_pad,)),
    ]

    kernel = functools.partial(_decoder_kernel, L, H_pad, B_pad)
    grid_spec = pltpu.PrefetchScalarGridSpec(
        num_scalar_prefetch=1,
        grid=(num_vt,),
        in_specs=in_specs,
        out_specs=out_specs,
        scratch_shapes=scratch_shapes,
    )
    pred, h_out, c_out = pl.pallas_call(
        kernel,
        out_shape=out_shape,
        grid_spec=grid_spec,
        compiler_params=pltpu.CompilerParams(
            # "arbitrary": grid step 0 computes the LSTM state carried in scratch,
            # later vocab tiles depend on it -> must run sequentially on one core.
            dimension_semantics=("arbitrary",),
            vmem_limit_bytes=32 * 1024 * 1024,
        ),
    )(tok_p, emb_p, h_p, c_p, *layer_args, w_lin_t, b_lin_p)

    # strip padding
    return pred[:B, :V], h_out[:, :B, :H], c_out[:, :B, :H]


# ---------------------------- pure-JAX reference ----------------------------
def decoder_reference(tokens, hidden, cell, params, *, n_layers, hid_dim):
    H = hid_dim
    hi = jax.lax.Precision.HIGHEST
    x = params["embedding"][tokens]                      # (B, E)
    h_new, c_new = [], []
    for l in range(n_layers):
        h_prev, c_prev = hidden[l], cell[l]
        gates = (jnp.dot(x, params[f"w_ih_{l}"].T, precision=hi) + params[f"b_ih_{l}"]
                 + jnp.dot(h_prev, params[f"w_hh_{l}"].T, precision=hi) + params[f"b_hh_{l}"])
        i_g = jax.nn.sigmoid(gates[:, 0 * H:1 * H])
        f_g = jax.nn.sigmoid(gates[:, 1 * H:2 * H])
        g_g = jnp.tanh(gates[:, 2 * H:3 * H])
        o_g = jax.nn.sigmoid(gates[:, 3 * H:4 * H])
        c = f_g * c_prev + i_g * g_g
        h = o_g * jnp.tanh(c)
        h_new.append(h); c_new.append(c)
        x = h
    pred = jnp.dot(x, params["w_lin"].T, precision=hi) + params["b_lin"]
    return pred, jnp.stack(h_new), jnp.stack(c_new)


if __name__ == "__main__":
    # Small shapes consistent with the module's forward.
    OUTPUT_DIM = 64   # vocab size
    EMB_DIM = 32
    HID_DIM = 32
    N_LAYERS = 2
    BATCH = 2

    key = jax.random.PRNGKey(0)
    ks = jax.random.split(key, 4 + 4 * N_LAYERS + 2)
    k_it = iter(ks)

    def init(shape, k, scale=0.1):
        return (scale * jax.random.normal(k, shape)).astype(jnp.float32)

    params = {"embedding": init((OUTPUT_DIM, EMB_DIM), next(k_it))}
    for l in range(N_LAYERS):
        in_dim = EMB_DIM if l == 0 else HID_DIM
        params[f"w_ih_{l}"] = init((4 * HID_DIM, in_dim), next(k_it))
        params[f"w_hh_{l}"] = init((4 * HID_DIM, HID_DIM), next(k_it))
        params[f"b_ih_{l}"] = init((4 * HID_DIM,), next(k_it))
        params[f"b_hh_{l}"] = init((4 * HID_DIM,), next(k_it))
    params["w_lin"] = init((OUTPUT_DIM, HID_DIM), next(k_it))
    params["b_lin"] = init((OUTPUT_DIM,), next(k_it))

    tokens = jax.random.randint(next(k_it), (BATCH,), 0, OUTPUT_DIM, dtype=jnp.int32)
    hidden = init((N_LAYERS, BATCH, HID_DIM), next(k_it), scale=0.5)
    cell = init((N_LAYERS, BATCH, HID_DIM), next(k_it), scale=0.5)

    pred, h_out, c_out = decoder_forward(
        tokens, hidden, cell, params, n_layers=N_LAYERS, hid_dim=HID_DIM)
    jax.block_until_ready((pred, h_out, c_out))

    pred_ref, h_ref, c_ref = decoder_reference(
        tokens, hidden, cell, params, n_layers=N_LAYERS, hid_dim=HID_DIM)

    assert pred.shape == (BATCH, OUTPUT_DIM)
    assert h_out.shape == (N_LAYERS, BATCH, HID_DIM)
    assert c_out.shape == (N_LAYERS, BATCH, HID_DIM)
    assert jnp.allclose(pred, pred_ref, atol=1e-4), "prediction mismatch"
    assert jnp.allclose(h_out, h_ref, atol=1e-4), "hidden mismatch"
    assert jnp.allclose(c_out, c_ref, atol=1e-4), "cell mismatch"

    print("KERNEL_OK")
</pallas_src>

<mosaic_0001>
module attributes {stable_mosaic.version = 11 : i64} {
  func.func @_decoder_kernel(%arg0: i32, %arg1: memref<8xi32, #tpu.memory_space<smem>>, %arg2: memref<64x128xf32, #tpu.memory_space<any>>, %arg3: memref<2x8x128xf32, #tpu.memory_space<vmem>>, %arg4: memref<2x8x128xf32, #tpu.memory_space<vmem>>, %arg5: memref<128x512xf32, #tpu.memory_space<vmem>>, %arg6: memref<128x512xf32, #tpu.memory_space<vmem>>, %arg7: memref<1x512xf32, #tpu.memory_space<vmem>>, %arg8: memref<128x512xf32, #tpu.memory_space<vmem>>, %arg9: memref<128x512xf32, #tpu.memory_space<vmem>>, %arg10: memref<1x512xf32, #tpu.memory_space<vmem>>, %arg11: memref<128x256xf32, #tpu.memory_space<vmem>>, %arg12: memref<1x256xf32, #tpu.memory_space<vmem>>, %arg13: memref<8x256xf32, #tpu.memory_space<vmem>>, %arg14: memref<2x8x128xf32, #tpu.memory_space<vmem>>, %arg15: memref<2x8x128xf32, #tpu.memory_space<vmem>>, %arg16: memref<8x128xf32, #tpu.memory_space<vmem>>, %arg17: memref<8x128xf32, #tpu.memory_space<vmem>>, %arg18: memref<8x!tpu.dma_semaphore, #tpu.memory_space<semaphore_mem>>) attributes {dimension_semantics = [#tpu.dimension_semantics<arbitrary>], iteration_bounds = array<i64: 1>, scalar_prefetch = 1 : i64, scratch_operands = 3 : i64, tpu.core_type = #tpu.core_type<tc>, window_params = [{}, {pipeline_mode = #tpu.pipeline_mode<synchronous>, transform_indices = @transform_1, window_bounds = array<i64: 2, 8, 128>}, {pipeline_mode = #tpu.pipeline_mode<synchronous>, transform_indices = @transform_2, window_bounds = array<i64: 2, 8, 128>}, {pipeline_mode = #tpu.pipeline_mode<synchronous>, transform_indices = @transform_3, window_bounds = array<i64: 128, 512>}, {pipeline_mode = #tpu.pipeline_mode<synchronous>, transform_indices = @transform_4, window_bounds = array<i64: 128, 512>}, {pipeline_mode = #tpu.pipeline_mode<synchronous>, transform_indices = @transform_5, window_bounds = array<i64: 1, 512>}, {pipeline_mode = #tpu.pipeline_mode<synchronous>, transform_indices = @transform_6, window_bounds = array<i64: 128, 512>}, {pipeline_mode = #tpu.pipeline_mode<synchronous>, transform_indices = @transform_7, window_bounds = array<i64: 128, 512>}, {pipeline_mode = #tpu.pipeline_mode<synchronous>, transform_indices = @transform_8, window_bounds = array<i64: 1, 512>}, {transform_indices = @transform_9, window_bounds = array<i64: 128, 256>}, {transform_indices = @transform_10, window_bounds = array<i64: 1, 256>}, {transform_indices = @transform_11, window_bounds = array<i64: 8, 256>}, {pipeline_mode = #tpu.pipeline_mode<synchronous>, transform_indices = @transform_12, window_bounds = array<i64: 2, 8, 128>}, {pipeline_mode = #tpu.pipeline_mode<synchronous>, transform_indices = @transform_13, window_bounds = array<i64: 2, 8, 128>}]} {
    %c0_i32 = arith.constant 0 : i32
    %0 = arith.cmpi eq, %arg0, %c0_i32 : i32
    %1 = arith.extui %0 : i1 to i32
    %c0_i32_0 = arith.constant 0 : i32
    %2 = arith.cmpi ne, %1, %c0_i32_0 : i32
    scf.if %2 {
      %c0_8 = arith.constant 0 : index
      %10 = memref.load %arg1[%c0_8] : memref<8xi32, #tpu.memory_space<smem>>
      %c1 = arith.constant 1 : index
      %11 = memref.load %arg1[%c1] : memref<8xi32, #tpu.memory_space<smem>>
      %c2 = arith.constant 2 : index
      %12 = memref.load %arg1[%c2] : memref<8xi32, #tpu.memory_space<smem>>
      %c3 = arith.constant 3 : index
      %13 = memref.load %arg1[%c3] : memref<8xi32, #tpu.memory_space<smem>>
      %c4 = arith.constant 4 : index
      %14 = memref.load %arg1[%c4] : memref<8xi32, #tpu.memory_space<smem>>
      %c5 = arith.constant 5 : index
      %15 = memref.load %arg1[%c5] : memref<8xi32, #tpu.memory_space<smem>>
      %c6 = arith.constant 6 : index
      %16 = memref.load %arg1[%c6] : memref<8xi32, #tpu.memory_space<smem>>
      %c7 = arith.constant 7 : index
      %17 = memref.load %arg1[%c7] : memref<8xi32, #tpu.memory_space<smem>>
      %c0_i32_9 = arith.constant 0 : i32
      %c0_i32_10 = arith.constant 0 : i32
      %18 = tpu.memref_slice %arg2[%10, %c0_i32_10] : memref<64x128xf32, #tpu.memory_space<any>> -> memref<1x128xf32, #tpu.memory_space<any>>
      %c0_i32_11 = arith.constant 0 : i32
      %c0_i32_12 = arith.constant 0 : i32
      %19 = tpu.memref_slice %arg16[%c0_i32_11, %c0_i32_12] : memref<8x128xf32, #tpu.memory_space<vmem>> -> memref<1x128xf32, #tpu.memory_space<vmem>>
      %20 = tpu.memref_slice %arg18[%c0_i32_9] : memref<8x!tpu.dma_semaphore, #tpu.memory_space<semaphore_mem>> -> memref<1x!tpu.dma_semaphore, #tpu.memory_space<semaphore_mem>>
      %21 = tpu.memref_squeeze %20 : memref<1x!tpu.dma_semaphore, #tpu.memory_space<semaphore_mem>> -> memref<!tpu.dma_semaphore, #tpu.memory_space<semaphore_mem>>
      tpu.enqueue_dma source(%18 : memref<1x128xf32, #tpu.memory_space<any>>) target(%19 : memref<1x128xf32, #tpu.memory_space<vmem>>) target_semaphore(%21 : memref<!tpu.dma_semaphore, #tpu.memory_space<semaphore_mem>>)
      %c1_i32 = arith.constant 1 : i32
      %c0_i32_13 = arith.constant 0 : i32
      %22 = tpu.memref_slice %arg2[%11, %c0_i32_13] : memref<64x128xf32, #tpu.memory_space<any>> -> memref<1x128xf32, #tpu.memory_space<any>>
      %c1_i32_14 = arith.constant 1 : i32
      %c0_i32_15 = arith.constant 0 : i32
      %23 = tpu.memref_slice %arg16[%c1_i32_14, %c0_i32_15] : memref<8x128xf32, #tpu.memory_space<vmem>> -> memref<1x128xf32, #tpu.memory_space<vmem>>
      %24 = tpu.memref_slice %arg18[%c1_i32] : memref<8x!tpu.dma_semaphore, #tpu.memory_space<semaphore_mem>> -> memref<1x!tpu.dma_semaphore, #tpu.memory_space<semaphore_mem>>
      %25 = tpu.memref_squeeze %24 : memref<1x!tpu.dma_semaphore, #tpu.memory_space<semaphore_mem>> -> memref<!tpu.dma_semaphore, #tpu.memory_space<semaphore_mem>>
      tpu.enqueue_dma source(%22 : memref<1x128xf32, #tpu.memory_space<any>>) target(%23 : memref<1x128xf32, #tpu.memory_space<vmem>>) target_semaphore(%25 : memref<!tpu.dma_semaphore, #tpu.memory_space<semaphore_mem>>)
      %c2_i32 = arith.constant 2 : i32
      %c0_i32_16 = arith.constant 0 : i32
      %26 = tpu.memref_slice %arg2[%12, %c0_i32_16] : memref<64x128xf32, #tpu.memory_space<any>> -> memref<1x128xf32, #tpu.memory_space<any>>
      %c2_i32_17 = arith.constant 2 : i32
      %c0_i32_18 = arith.constant 0 : i32
      %27 = tpu.memref_slice %arg16[%c2_i32_17, %c0_i32_18] : memref<8x128xf32, #tpu.memory_space<vmem>> -> memref<1x128xf32, #tpu.memory_space<vmem>>
      %28 = tpu.memref_slice %arg18[%c2_i32] : memref<8x!tpu.dma_semaphore, #tpu.memory_space<semaphore_mem>> -> memref<1x!tpu.dma_semaphore, #tpu.memory_space<semaphore_mem>>
      %29 = tpu.memref_squeeze %28 : memref<1x!tpu.dma_semaphore, #tpu.memory_space<semaphore_mem>> -> memref<!tpu.dma_semaphore, #tpu.memory_space<semaphore_mem>>
      tpu.enqueue_dma source(%26 : memref<1x128xf32, #tpu.memory_space<any>>) target(%27 : memref<1x128xf32, #tpu.memory_space<vmem>>) target_semaphore(%29 : memref<!tpu.dma_semaphore, #tpu.memory_space<semaphore_mem>>)
      %c3_i32 = arith.constant 3 : i32
      %c0_i32_19 = arith.constant 0 : i32
      %30 = tpu.memref_slice %arg2[%13, %c0_i32_19] : memref<64x128xf32, #tpu.memory_space<any>> -> memref<1x128xf32, #tpu.memory_space<any>>
      %c3_i32_20 = arith.constant 3 : i32
      %c0_i32_21 = arith.constant 0 : i32
      %31 = tpu.memref_slice %arg16[%c3_i32_20, %c0_i32_21] : memref<8x128xf32, #tpu.memory_space<vmem>> -> memref<1x128xf32, #tpu.memory_space<vmem>>
      %32 = tpu.memref_slice %arg18[%c3_i32] : memref<8x!tpu.dma_semaphore, #tpu.memory_space<semaphore_mem>> -> memref<1x!tpu.dma_semaphore, #tpu.memory_space<semaphore_mem>>
      %33 = tpu.memref_squeeze %32 : memref<1x!tpu.dma_semaphore, #tpu.memory_space<semaphore_mem>> -> memref<!tpu.dma_semaphore, #tpu.memory_space<semaphore_mem>>
      tpu.enqueue_dma source(%30 : memref<1x128xf32, #tpu.memory_space<any>>) target(%31 : memref<1x128xf32, #tpu.memory_space<vmem>>) target_semaphore(%33 : memref<!tpu.dma_semaphore, #tpu.memory_space<semaphore_mem>>)
      %c4_i32 = arith.constant 4 : i32
      %c0_i32_22 = arith.constant 0 : i32
      %34 = tpu.memref_slice %arg2[%14, %c0_i32_22] : memref<64x128xf32, #tpu.memory_space<any>> -> memref<1x128xf32, #tpu.memory_space<any>>
      %c4_i32_23 = arith.constant 4 : i32
      %c0_i32_24 = arith.constant 0 : i32
      %35 = tpu.memref_slice %arg16[%c4_i32_23, %c0_i32_24] : memref<8x128xf32, #tpu.memory_space<vmem>> -> memref<1x128xf32, #tpu.memory_space<vmem>>
      %36 = tpu.memref_slice %arg18[%c4_i32] : memref<8x!tpu.dma_semaphore, #tpu.memory_space<semaphore_mem>> -> memref<1x!tpu.dma_semaphore, #tpu.memory_space<semaphore_mem>>
      %37 = tpu.memref_squeeze %36 : memref<1x!tpu.dma_semaphore, #tpu.memory_space<semaphore_mem>> -> memref<!tpu.dma_semaphore, #tpu.memory_space<semaphore_mem>>
      tpu.enqueue_dma source(%34 : memref<1x128xf32, #tpu.memory_space<any>>) target(%35 : memref<1x128xf32, #tpu.memory_space<vmem>>) target_semaphore(%37 : memref<!tpu.dma_semaphore, #tpu.memory_space<semaphore_mem>>)
      %c5_i32 = arith.constant 5 : i32
      %c0_i32_25 = arith.constant 0 : i32
      %38 = tpu.memref_slice %arg2[%15, %c0_i32_25] : memref<64x128xf32, #tpu.memory_space<any>> -> memref<1x128xf32, #tpu.memory_space<any>>
      %c5_i32_26 = arith.constant 5 : i32
      %c0_i32_27 = arith.constant 0 : i32
      %39 = tpu.memref_slice %arg16[%c5_i32_26, %c0_i32_27] : memref<8x128xf32, #tpu.memory_space<vmem>> -> memref<1x128xf32, #tpu.memory_space<vmem>>
      %40 = tpu.memref_slice %arg18[%c5_i32] : memref<8x!tpu.dma_semaphore, #tpu.memory_space<semaphore_mem>> -> memref<1x!tpu.dma_semaphore, #tpu.memory_space<semaphore_mem>>
      %41 = tpu.memref_squeeze %40 : memref<1x!tpu.dma_semaphore, #tpu.memory_space<semaphore_mem>> -> memref<!tpu.dma_semaphore, #tpu.memory_space<semaphore_mem>>
      tpu.enqueue_dma source(%38 : memref<1x128xf32, #tpu.memory_space<any>>) target(%39 : memref<1x128xf32, #tpu.memory_space<vmem>>) target_semaphore(%41 : memref<!tpu.dma_semaphore, #tpu.memory_space<semaphore_mem>>)
      %c6_i32 = arith.constant 6 : i32
      %c0_i32_28 = arith.constant 0 : i32
      %42 = tpu.memref_slice %arg2[%16, %c0_i32_28] : memref<64x128xf32, #tpu.memory_space<any>> -> memref<1x128xf32, #tpu.memory_space<any>>
      %c6_i32_29 = arith.constant 6 : i32
      %c0_i32_30 = arith.constant 0 : i32
      %43 = tpu.memref_slice %arg16[%c6_i32_29, %c0_i32_30] : memref<8x128xf32, #tpu.memory_space<vmem>> -> memref<1x128xf32, #tpu.memory_space<vmem>>
      %44 = tpu.memref_slice %arg18[%c6_i32] : memref<8x!tpu.dma_semaphore, #tpu.memory_space<semaphore_mem>> -> memref<1x!tpu.dma_semaphore, #tpu.memory_space<semaphore_mem>>
      %45 = tpu.memref_squeeze %44 : memref<1x!tpu.dma_semaphore, #tpu.memory_space<semaphore_mem>> -> memref<!tpu.dma_semaphore, #tpu.memory_space<semaphore_mem>>
      tpu.enqueue_dma source(%42 : memref<1x128xf32, #tpu.memory_space<any>>) target(%43 : memref<1x128xf32, #tpu.memory_space<vmem>>) target_semaphore(%45 : memref<!tpu.dma_semaphore, #tpu.memory_space<semaphore_mem>>)
      %c7_i32 = arith.constant 7 : i32
      %c0_i32_31 = arith.constant 0 : i32
      %46 = tpu.memref_slice %arg2[%17, %c0_i32_31] : memref<64x128xf32, #tpu.memory_space<any>> -> memref<1x128xf32, #tpu.memory_space<any>>
      %c7_i32_32 = arith.constant 7 : i32
      %c0_i32_33 = arith.constant 0 : i32
      %47 = tpu.memref_slice %arg16[%c7_i32_32, %c0_i32_33] : memref<8x128xf32, #tpu.memory_space<vmem>> -> memref<1x128xf32, #tpu.memory_space<vmem>>
      %48 = tpu.memref_slice %arg18[%c7_i32] : memref<8x!tpu.dma_semaphore, #tpu.memory_space<semaphore_mem>> -> memref<1x!tpu.dma_semaphore, #tpu.memory_space<semaphore_mem>>
      %49 = tpu.memref_squeeze %48 : memref<1x!tpu.dma_semaphore, #tpu.memory_space<semaphore_mem>> -> memref<!tpu.dma_semaphore, #tpu.memory_space<semaphore_mem>>
      tpu.enqueue_dma source(%46 : memref<1x128xf32, #tpu.memory_space<any>>) target(%47 : memref<1x128xf32, #tpu.memory_space<vmem>>) target_semaphore(%49 : memref<!tpu.dma_semaphore, #tpu.memory_space<semaphore_mem>>)
      %c0_i32_34 = arith.constant 0 : i32
      %c0_i32_35 = arith.constant 0 : i32
      %50 = tpu.memref_slice %arg2[%10, %c0_i32_35] : memref<64x128xf32, #tpu.memory_space<any>> -> memref<1x128xf32, #tpu.memory_space<any>>
      %c0_i32_36 = arith.constant 0 : i32
      %c0_i32_37 = arith.constant 0 : i32
      %51 = tpu.memref_slice %arg16[%c0_i32_36, %c0_i32_37] : memref<8x128xf32, #tpu.memory_space<vmem>> -> memref<1x128xf32, #tpu.memory_space<vmem>>
      %52 = tpu.memref_slice %arg18[%c0_i32_34] : memref<8x!tpu.dma_semaphore, #tpu.memory_space<semaphore_mem>> -> memref<1x!tpu.dma_semaphore, #tpu.memory_space<semaphore_mem>>
      %53 = tpu.memref_squeeze %52 : memref<1x!tpu.dma_semaphore, #tpu.memory_space<semaphore_mem>> -> memref<!tpu.dma_semaphore, #tpu.memory_space<semaphore_mem>>
      tpu.wait_dma2 semaphore(%53 : memref<!tpu.dma_semaphore, #tpu.memory_space<semaphore_mem>>) src(%50 : memref<1x128xf32, #tpu.memory_space<any>>) dst(%51 : memref<1x128xf32, #tpu.memory_space<vmem>>)
      %c1_i32_38 = arith.constant 1 : i32
      %c0_i32_39 = arith.constant 0 : i32
      %54 = tpu.memref_slice %arg2[%11, %c0_i32_39] : memref<64x128xf32, #tpu.memory_space<any>> -> memref<1x128xf32, #tpu.memory_space<any>>
      %c1_i32_40 = arith.constant 1 : i32
      %c0_i32_41 = arith.constant 0 : i32
      %55 = tpu.memref_slice %arg16[%c1_i32_40, %c0_i32_41] : memref<8x128xf32, #tpu.memory_space<vmem>> -> memref<1x128xf32, #tpu.memory_space<vmem>>
      %56 = tpu.memref_slice %arg18[%c1_i32_38] : memref<8x!tpu.dma_semaphore, #tpu.memory_space<semaphore_mem>> -> memref<1x!tpu.dma_semaphore, #tpu.memory_space<semaphore_mem>>
      %57 = tpu.memref_squeeze %56 : memref<1x!tpu.dma_semaphore, #tpu.memory_space<semaphore_mem>> -> memref<!tpu.dma_semaphore, #tpu.memory_space<semaphore_mem>>
      tpu.wait_dma2 semaphore(%57 : memref<!tpu.dma_semaphore, #tpu.memory_space<semaphore_mem>>) src(%54 : memref<1x128xf32, #tpu.memory_space<any>>) dst(%55 : memref<1x128xf32, #tpu.memory_space<vmem>>)
      %c2_i32_42 = arith.constant 2 : i32
      %c0_i32_43 = arith.constant 0 : i32
      %58 = tpu.memref_slice %arg2[%12, %c0_i32_43] : memref<64x128xf32, #tpu.memory_space<any>> -> memref<1x128xf32, #tpu.memory_space<any>>
      %c2_i32_44 = arith.constant 2 : i32
      %c0_i32_45 = arith.constant 0 : i32
      %59 = tpu.memref_slice %arg16[%c2_i32_44, %c0_i32_45] : memref<8x128xf32, #tpu.memory_space<vmem>> -> memref<1x128xf32, #tpu.memory_space<vmem>>
      %60 = tpu.memref_slice %arg18[%c2_i32_42] : memref<8x!tpu.dma_semaphore, #tpu.memory_space<semaphore_mem>> -> memref<1x!tpu.dma_semaphore, #tpu.memory_space<semaphore_mem>>
      %61 = tpu.memref_squeeze %60 : memref<1x!tpu.dma_semaphore, #tpu.memory_space<semaphore_mem>> -> memref<!tpu.dma_semaphore, #tpu.memory_space<semaphore_mem>>
      tpu.wait_dma2 semaphore(%61 : memref<!tpu.dma_semaphore, #tpu.memory_space<semaphore_mem>>) src(%58 : memref<1x128xf32, #tpu.memory_space<any>>) dst(%59 : memref<1x128xf32, #tpu.memory_space<vmem>>)
      %c3_i32_46 = arith.constant 3 : i32
      %c0_i32_47 = arith.constant 0 : i32
      %62 = tpu.memref_slice %arg2[%13, %c0_i32_47] : memref<64x128xf32, #tpu.memory_space<any>> -> memref<1x128xf32, #tpu.memory_space<any>>
      %c3_i32_48 = arith.constant 3 : i32
      %c0_i32_49 = arith.constant 0 : i32
      %63 = tpu.memref_slice %arg16[%c3_i32_48, %c0_i32_49] : memref<8x128xf32, #tpu.memory_space<vmem>> -> memref<1x128xf32, #tpu.memory_space<vmem>>
      %64 = tpu.memref_slice %arg18[%c3_i32_46] : memref<8x!tpu.dma_semaphore, #tpu.memory_space<semaphore_mem>> -> memref<1x!tpu.dma_semaphore, #tpu.memory_space<semaphore_mem>>
      %65 = tpu.memref_squeeze %64 : memref<1x!tpu.dma_semaphore, #tpu.memory_space<semaphore_mem>> -> memref<!tpu.dma_semaphore, #tpu.memory_space<semaphore_mem>>
      tpu.wait_dma2 semaphore(%65 : memref<!tpu.dma_semaphore, #tpu.memory_space<semaphore_mem>>) src(%62 : memref<1x128xf32, #tpu.memory_space<any>>) dst(%63 : memref<1x128xf32, #tpu.memory_space<vmem>>)
      %c4_i32_50 = arith.constant 4 : i32
      %c0_i32_51 = arith.constant 0 : i32
      %66 = tpu.memref_slice %arg2[%14, %c0_i32_51] : memref<64x128xf32, #tpu.memory_space<any>> -> memref<1x128xf32, #tpu.memory_space<any>>
      %c4_i32_52 = arith.constant 4 : i32
      %c0_i32_53 = arith.constant 0 : i32
      %67 = tpu.memref_slice %arg16[%c4_i32_52, %c0_i32_53] : memref<8x128xf32, #tpu.memory_space<vmem>> -> memref<1x128xf32, #tpu.memory_space<vmem>>
      %68 = tpu.memref_slice %arg18[%c4_i32_50] : memref<8x!tpu.dma_semaphore, #tpu.memory_space<semaphore_mem>> -> memref<1x!tpu.dma_semaphore, #tpu.memory_space<semaphore_mem>>
      %69 = tpu.memref_squeeze %68 : memref<1x!tpu.dma_semaphore, #tpu.memory_space<semaphore_mem>> -> memref<!tpu.dma_semaphore, #tpu.memory_space<semaphore_mem>>
      tpu.wait_dma2 semaphore(%69 : memref<!tpu.dma_semaphore, #tpu.memory_space<semaphore_mem>>) src(%66 : memref<1x128xf32, #tpu.memory_space<any>>) dst(%67 : memref<1x128xf32, #tpu.memory_space<vmem>>)
      %c5_i32_54 = arith.constant 5 : i32
      %c0_i32_55 = arith.constant 0 : i32
      %70 = tpu.memref_slice %arg2[%15, %c0_i32_55] : memref<64x128xf32, #tpu.memory_space<any>> -> memref<1x128xf32, #tpu.memory_space<any>>
      %c5_i32_56 = arith.constant 5 : i32
      %c0_i32_57 = arith.constant 0 : i32
      %71 = tpu.memref_slice %arg16[%c5_i32_56, %c0_i32_57] : memref<8x128xf32, #tpu.memory_space<vmem>> -> memref<1x128xf32, #tpu.memory_space<vmem>>
      %72 = tpu.memref_slice %arg18[%c5_i32_54] : memref<8x!tpu.dma_semaphore, #tpu.memory_space<semaphore_mem>> -> memref<1x!tpu.dma_semaphore, #tpu.memory_space<semaphore_mem>>
      %73 = tpu.memref_squeeze %72 : memref<1x!tpu.dma_semaphore, #tpu.memory_space<semaphore_mem>> -> memref<!tpu.dma_semaphore, #tpu.memory_space<semaphore_mem>>
      tpu.wait_dma2 semaphore(%73 : memref<!tpu.dma_semaphore, #tpu.memory_space<semaphore_mem>>) src(%70 : memref<1x128xf32, #tpu.memory_space<any>>) dst(%71 : memref<1x128xf32, #tpu.memory_space<vmem>>)
      %c6_i32_58 = arith.constant 6 : i32
      %c0_i32_59 = arith.constant 0 : i32
      %74 = tpu.memref_slice %arg2[%16, %c0_i32_59] : memref<64x128xf32, #tpu.memory_space<any>> -> memref<1x128xf32, #tpu.memory_space<any>>
      %c6_i32_60 = arith.constant 6 : i32
      %c0_i32_61 = arith.constant 0 : i32
      %75 = tpu.memref_slice %arg16[%c6_i32_60, %c0_i32_61] : memref<8x128xf32, #tpu.memory_space<vmem>> -> memref<1x128xf32, #tpu.memory_space<vmem>>
      %76 = tpu.memref_slice %arg18[%c6_i32_58] : memref<8x!tpu.dma_semaphore, #tpu.memory_space<semaphore_mem>> -> memref<1x!tpu.dma_semaphore, #tpu.memory_space<semaphore_mem>>
      %77 = tpu.memref_squeeze %76 : memref<1x!tpu.dma_semaphore, #tpu.memory_space<semaphore_mem>> -> memref<!tpu.dma_semaphore, #tpu.memory_space<semaphore_mem>>
      tpu.wait_dma2 semaphore(%77 : memref<!tpu.dma_semaphore, #tpu.memory_space<semaphore_mem>>) src(%74 : memref<1x128xf32, #tpu.memory_space<any>>) dst(%75 : memref<1x128xf32, #tpu.memory_space<vmem>>)
      %c7_i32_62 = arith.constant 7 : i32
      %c0_i32_63 = arith.constant 0 : i32
      %78 = tpu.memref_slice %arg2[%17, %c0_i32_63] : memref<64x128xf32, #tpu.memory_space<any>> -> memref<1x128xf32, #tpu.memory_space<any>>
      %c7_i32_64 = arith.constant 7 : i32
      %c0_i32_65 = arith.constant 0 : i32
      %79 = tpu.memref_slice %arg16[%c7_i32_64, %c0_i32_65] : memref<8x128xf32, #tpu.memory_space<vmem>> -> memref<1x128xf32, #tpu.memory_space<vmem>>
      %80 = tpu.memref_slice %arg18[%c7_i32_62] : memref<8x!tpu.dma_semaphore, #tpu.memory_space<semaphore_mem>> -> memref<1x!tpu.dma_semaphore, #tpu.memory_space<semaphore_mem>>
      %81 = tpu.memref_squeeze %80 : memref<1x!tpu.dma_semaphore, #tpu.memory_space<semaphore_mem>> -> memref<!tpu.dma_semaphore, #tpu.memory_space<semaphore_mem>>
      tpu.wait_dma2 semaphore(%81 : memref<!tpu.dma_semaphore, #tpu.memory_space<semaphore_mem>>) src(%78 : memref<1x128xf32, #tpu.memory_space<any>>) dst(%79 : memref<1x128xf32, #tpu.memory_space<vmem>>)
      %c0_66 = arith.constant 0 : index
      %c0_67 = arith.constant 0 : index
      %82 = vector.load %arg16[%c0_66, %c0_67] : memref<8x128xf32, #tpu.memory_space<vmem>>, vector<8x128xf32>
      %c0_68 = arith.constant 0 : index
      %c0_69 = arith.constant 0 : index
      %83 = vector.load %arg5[%c0_68, %c0_69] : memref<128x512xf32, #tpu.memory_space<vmem>>, vector<128x512xf32>
      %c0_70 = arith.constant 0 : index
      %c0_71 = arith.constant 0 : index
      %84 = vector.load %arg6[%c0_70, %c0_71] : memref<128x512xf32, #tpu.memory_space<vmem>>, vector<128x512xf32>
      %c0_72 = arith.constant 0 : index
      %c0_73 = arith.constant 0 : index
      %85 = vector.load %arg7[%c0_72, %c0_73] : memref<1x512xf32, #tpu.memory_space<vmem>>, vector<1x512xf32>
      %c0_74 = arith.constant 0 : index
      %c0_75 = arith.constant 0 : index
      %c0_76 = arith.constant 0 : index
      %86 = vector.load %arg3[%c0_74, %c0_75, %c0_76] : memref<2x8x128xf32, #tpu.memory_space<vmem>>, vector<1x8x128xf32>
      %87 = vector.shape_cast %86 : vector<1x8x128xf32> to vector<8x128xf32>
      %c0_77 = arith.constant 0 : index
      %c0_78 = arith.constant 0 : index
      %c0_79 = arith.constant 0 : index
      %88 = vector.load %arg4[%c0_77, %c0_78, %c0_79] : memref<2x8x128xf32, #tpu.memory_space<vmem>>, vector<1x8x128xf32>
      %89 = vector.shape_cast %88 : vector<1x8x128xf32> to vector<8x128xf32>
      %cst_80 = arith.constant dense<0.000000e+00> : vector<8x512xf32>
      %90 = tpu.matmul %82, %83, %cst_80 {dimension_numbers = #tpu.dot_dimension_numbers<[1], [0], [0], [1], [0, 0, 1, 1], [], []>, precision = #tpu.contract_precision<fp32>} : vector<8x128xf32>, vector<128x512xf32>, vector<8x512xf32> -> vector<8x512xf32>
      %cst_81 = arith.constant dense<0.000000e+00> : vector<8x512xf32>
      %91 = tpu.matmul %87, %84, %cst_81 {dimension_numbers = #tpu.dot_dimension_numbers<[1], [0], [0], [1], [0, 0, 1, 1], [], []>, precision = #tpu.contract_precision<fp32>} : vector<8x128xf32>, vector<128x512xf32>, vector<8x512xf32> -> vector<8x512xf32>
      %92 = arith.addf %90, %91 : vector<8x512xf32>
      %93 = vector.broadcast %85 : vector<1x512xf32> to vector<8x512xf32>
      %94 = arith.addf %92, %93 : vector<8x512xf32>
      %95 = vector.extract_strided_slice %94 {offsets = [0, 0], sizes = [8, 128], strides = [1, 1]} : vector<8x512xf32> to vector<8x128xf32>
      %96 = arith.negf %95 : vector<8x128xf32>
      %97 = math.exp %96 : vector<8x128xf32>
      %cst_82 = arith.constant 1.000000e+00 : f32
      %98 = vector.broadcast %cst_82 : f32 to vector<8x128xf32>
      %99 = arith.addf %98, %97 : vector<8x128xf32>
      %100 = arith.divf %98, %99 : vector<8x128xf32>
      %101 = vector.extract_strided_slice %94 {offsets = [0, 128], sizes = [8, 128], strides = [1, 1]} : vector<8x512xf32> to vector<8x128xf32>
      %102 = arith.negf %101 : vector<8x128xf32>
      %103 = math.exp %102 : vector<8x128xf32>
      %cst_83 = arith.constant 1.000000e+00 : f32
      %104 = vector.broadcast %cst_83 : f32 to vector<8x128xf32>
      %105 = arith.addf %104, %103 : vector<8x128xf32>
      %106 = arith.divf %104, %105 : vector<8x128xf32>
      %107 = vector.extract_strided_slice %94 {offsets = [0, 256], sizes = [8, 128], strides = [1, 1]} : vector<8x512xf32> to vector<8x128xf32>
      %108 = math.tanh %107 : vector<8x128xf32>
      %109 = vector.extract_strided_slice %94 {offsets = [0, 384], sizes = [8, 128], strides = [1, 1]} : vector<8x512xf32> to vector<8x128xf32>
      %110 = arith.negf %109 : vector<8x128xf32>
      %111 = math.exp %110 : vector<8x128xf32>
      %cst_84 = arith.constant 1.000000e+00 : f32
      %112 = vector.broadcast %cst_84 : f32 to vector<8x128xf32>
      %113 = arith.addf %112, %111 : vector<8x128xf32>
      %114 = arith.divf %112, %113 : vector<8x128xf32>
      %115 = arith.mulf %106, %89 : vector<8x128xf32>
      %116 = arith.mulf %100, %108 : vector<8x128xf32>
      %117 = arith.addf %115, %116 : vector<8x128xf32>
      %118 = math.tanh %117 : vector<8x128xf32>
      %119 = arith.mulf %114, %118 : vector<8x128xf32>
      %c0_85 = arith.constant 0 : index
      %c0_86 = arith.constant 0 : index
      %c0_87 = arith.constant 0 : index
      %120 = vector.load %arg14[%c0_85, %c0_86, %c0_87] : memref<2x8x128xf32, #tpu.memory_space<vmem>>, vector<1x8x128xf32>
      %121 = vector.shape_cast %120 : vector<1x8x128xf32> to vector<8x128xf32>
      %122 = vector.shape_cast %119 : vector<8x128xf32> to vector<1x8x128xf32>
      tpu.vector_store %arg14[%c0_85, %c0_86, %c0_87], %122 {strides = array<i32>} : memref<2x8x128xf32, #tpu.memory_space<vmem>>, vector<1x8x128xf32>,
      %c0_88 = arith.constant 0 : index
      %c0_89 = arith.constant 0 : index
      %c0_90 = arith.constant 0 : index
      %123 = vector.load %arg15[%c0_88, %c0_89, %c0_90] : memref<2x8x128xf32, #tpu.memory_space<vmem>>, vector<1x8x128xf32>
      %124 = vector.shape_cast %123 : vector<1x8x128xf32> to vector<8x128xf32>
      %125 = vector.shape_cast %117 : vector<8x128xf32> to vector<1x8x128xf32>
      tpu.vector_store %arg15[%c0_88, %c0_89, %c0_90], %125 {strides = array<i32>} : memref<2x8x128xf32, #tpu.memory_space<vmem>>, vector<1x8x128xf32>,
      %c0_91 = arith.constant 0 : index
      %c0_92 = arith.constant 0 : index
      %126 = vector.load %arg8[%c0_91, %c0_92] : memref<128x512xf32, #tpu.memory_space<vmem>>, vector<128x512xf32>
      %c0_93 = arith.constant 0 : index
      %c0_94 = arith.constant 0 : index
      %127 = vector.load %arg9[%c0_93, %c0_94] : memref<128x512xf32, #tpu.memory_space<vmem>>, vector<128x512xf32>
      %c0_95 = arith.constant 0 : index
      %c0_96 = arith.constant 0 : index
      %128 = vector.load %arg10[%c0_95, %c0_96] : memref<1x512xf32, #tpu.memory_space<vmem>>, vector<1x512xf32>
      %c1_97 = arith.constant 1 : index
      %c0_98 = arith.constant 0 : index
      %c0_99 = arith.constant 0 : index
      %129 = vector.load %arg3[%c1_97, %c0_98, %c0_99] : memref<2x8x128xf32, #tpu.memory_space<vmem>>, vector<1x8x128xf32>
      %130 = vector.shape_cast %129 : vector<1x8x128xf32> to vector<8x128xf32>
      %c1_100 = arith.constant 1 : index
      %c0_101 = arith.constant 0 : index
      %c0_102 = arith.constant 0 : index
      %131 = vector.load %arg4[%c1_100, %c0_101, %c0_102] : memref<2x8x128xf32, #tpu.memory_space<vmem>>, vector<1x8x128xf32>
      %132 = vector.shape_cast %131 : vector<1x8x128xf32> to vector<8x128xf32>
      %cst_103 = arith.constant dense<0.000000e+00> : vector<8x512xf32>
      %133 = tpu.matmul %119, %126, %cst_103 {dimension_numbers = #tpu.dot_dimension_numbers<[1], [0], [0], [1], [0, 0, 1, 1], [], []>, precision = #tpu.contract_precision<fp32>} : vector<8x128xf32>, vector<128x512xf32>, vector<8x512xf32> -> vector<8x512xf32>
      %cst_104 = arith.constant dense<0.000000e+00> : vector<8x512xf32>
      %134 = tpu.matmul %130, %127, %cst_104 {dimension_numbers = #tpu.dot_dimension_numbers<[1], [0], [0], [1], [0, 0, 1, 1], [], []>, precision = #tpu.contract_precision<fp32>} : vector<8x128xf32>, vector<128x512xf32>, vector<8x512xf32> -> vector<8x512xf32>
      %135 = arith.addf %133, %134 : vector<8x512xf32>
      %136 = vector.broadcast %128 : vector<1x512xf32> to vector<8x512xf32>
      %137 = arith.addf %135, %136 : vector<8x512xf32>
      %138 = vector.extract_strided_slice %137 {offsets = [0, 0], sizes = [8, 128], strides = [1, 1]} : vector<8x512xf32> to vector<8x128xf32>
      %139 = arith.negf %138 : vector<8x128xf32>
      %140 = math.exp %139 : vector<8x128xf32>
      %cst_105 = arith.constant 1.000000e+00 : f32
      %141 = vector.broadcast %cst_105 : f32 to vector<8x128xf32>
      %142 = arith.addf %141, %140 : vector<8x128xf32>
      %143 = arith.divf %141, %142 : vector<8x128xf32>
      %144 = vector.extract_strided_slice %137 {offsets = [0, 128], sizes = [8, 128], strides = [1, 1]} : vector<8x512xf32> to vector<8x128xf32>
      %145 = arith.negf %144 : vector<8x128xf32>
      %146 = math.exp %145 : vector<8x128xf32>
      %cst_106 = arith.constant 1.000000e+00 : f32
      %147 = vector.broadcast %cst_106 : f32 to vector<8x128xf32>
      %148 = arith.addf %147, %146 : vector<8x128xf32>
      %149 = arith.divf %147, %148 : vector<8x128xf32>
      %150 = vector.extract_strided_slice %137 {offsets = [0, 256], sizes = [8, 128], strides = [1, 1]} : vector<8x512xf32> to vector<8x128xf32>
      %151 = math.tanh %150 : vector<8x128xf32>
      %152 = vector.extract_strided_slice %137 {offsets = [0, 384], sizes = [8, 128], strides = [1, 1]} : vector<8x512xf32> to vector<8x128xf32>
      %153 = arith.negf %152 : vector<8x128xf32>
      %154 = math.exp %153 : vector<8x128xf32>
      %cst_107 = arith.constant 1.000000e+00 : f32
      %155 = vector.broadcast %cst_107 : f32 to vector<8x128xf32>
      %156 = arith.addf %155, %154 : vector<8x128xf32>
      %157 = arith.divf %155, %156 : vector<8x128xf32>
      %158 = arith.mulf %149, %132 : vector<8x128xf32>
      %159 = arith.mulf %143, %151 : vector<8x128xf32>
      %160 = arith.addf %158, %159 : vector<8x128xf32>
      %161 = math.tanh %160 : vector<8x128xf32>
      %162 = arith.mulf %157, %161 : vector<8x128xf32>
      %c1_108 = arith.constant 1 : index
      %c0_109 = arith.constant 0 : index
      %c0_110 = arith.constant 0 : index
      %163 = vector.load %arg14[%c1_108, %c0_109, %c0_110] : memref<2x8x128xf32, #tpu.memory_space<vmem>>, vector<1x8x128xf32>
      %164 = vector.shape_cast %163 : vector<1x8x128xf32> to vector<8x128xf32>
      %165 = vector.shape_cast %162 : vector<8x128xf32> to vector<1x8x128xf32>
      tpu.vector_store %arg14[%c1_108, %c0_109, %c0_110], %165 {strides = array<i32>} : memref<2x8x128xf32, #tpu.memory_space<vmem>>, vector<1x8x128xf32>,
      %c1_111 = arith.constant 1 : index
      %c0_112 = arith.constant 0 : index
      %c0_113 = arith.constant 0 : index
      %166 = vector.load %arg15[%c1_111, %c0_112, %c0_113] : memref<2x8x128xf32, #tpu.memory_space<vmem>>, vector<1x8x128xf32>
      %167 = vector.shape_cast %166 : vector<1x8x128xf32> to vector<8x128xf32>
      %168 = vector.shape_cast %160 : vector<8x128xf32> to vector<1x8x128xf32>
      tpu.vector_store %arg15[%c1_111, %c0_112, %c0_113], %168 {strides = array<i32>} : memref<2x8x128xf32, #tpu.memory_space<vmem>>, vector<1x8x128xf32>,
      %c0_114 = arith.constant 0 : index
      %c0_115 = arith.constant 0 : index
      %169 = vector.load %arg17[%c0_114, %c0_115] : memref<8x128xf32, #tpu.memory_space<vmem>>, vector<8x128xf32>
      tpu.vector_store %arg17[%c0_114, %c0_115], %162 {strides = array<i32>} : memref<8x128xf32, #tpu.memory_space<vmem>>, vector<8x128xf32>,
    } else {
    }
    %c0 = arith.constant 0 : index
    %c0_1 = arith.constant 0 : index
    %3 = vector.load %arg17[%c0, %c0_1] : memref<8x128xf32, #tpu.memory_space<vmem>>, vector<8x128xf32>
    %c0_2 = arith.constant 0 : index
    %c0_3 = arith.constant 0 : index
    %4 = vector.load %arg11[%c0_2, %c0_3] : memref<128x256xf32, #tpu.memory_space<vmem>>, vector<128x256xf32>
    %cst = arith.constant dense<0.000000e+00> : vector<8x256xf32>
    %5 = tpu.matmul %3, %4, %cst {dimension_numbers = #tpu.dot_dimension_numbers<[1], [0], [0], [1], [0, 0, 1, 1], [], []>, precision = #tpu.contract_precision<fp32>} : vector<8x128xf32>, vector<128x256xf32>, vector<8x256xf32> -> vector<8x256xf32>
    %c0_4 = arith.constant 0 : index
    %c0_5 = arith.constant 0 : index
    %6 = vector.load %arg12[%c0_4, %c0_5] : memref<1x256xf32, #tpu.memory_space<vmem>>, vector<1x256xf32>
    %7 = vector.broadcast %6 : vector<1x256xf32> to vector<8x256xf32>
    %8 = arith.addf %5, %7 : vector<8x256xf32>
    %c0_6 = arith.constant 0 : index
    %c0_7 = arith.constant 0 : index
    %9 = vector.load %arg13[%c0_6, %c0_7] : memref<8x256xf32, #tpu.memory_space<vmem>>, vector<8x256xf32>
    tpu.vector_store %arg13[%c0_6, %c0_7], %8 {strides = array<i32>} : memref<8x256xf32, #tpu.memory_space<vmem>>, vector<8x256xf32>,
    return
  }
  func.func @transform_1(%arg0: i32, %arg1: memref<8xi32, #tpu.memory_space<smem>>) -> (i32, i32, i32) {
    %c0_i32 = arith.constant 0 : i32
    %c0_i32_0 = arith.constant 0 : i32
    %c0_i32_1 = arith.constant 0 : i32
    %c0_i32_2 = arith.constant 0 : i32
    return %c0_i32, %c0_i32_0, %c0_i32_1 : i32, i32, i32
  }
  func.func @transform_2(%arg0: i32, %arg1: memref<8xi32, #tpu.memory_space<smem>>) -> (i32, i32, i32) {
    %c0_i32 = arith.constant 0 : i32
    %c0_i32_0 = arith.constant 0 : i32
    %c0_i32_1 = arith.constant 0 : i32
    %c0_i32_2 = arith.constant 0 : i32
    return %c0_i32, %c0_i32_0, %c0_i32_1 : i32, i32, i32
  }
  func.func @transform_3(%arg0: i32, %arg1: memref<8xi32, #tpu.memory_space<smem>>) -> (i32, i32) {
    %c0_i32 = arith.constant 0 : i32
    %c0_i32_0 = arith.constant 0 : i32
    %c0_i32_1 = arith.constant 0 : i32
    return %c0_i32, %c0_i32_0 : i32, i32
  }
  func.func @transform_4(%arg0: i32, %arg1: memref<8xi32, #tpu.memory_space<smem>>) -> (i32, i32) {
    %c0_i32 = arith.constant 0 : i32
    %c0_i32_0 = arith.constant 0 : i32
    %c0_i32_1 = arith.constant 0 : i32
    return %c0_i32, %c0_i32_0 : i32, i32
  }
  func.func @transform_5(%arg0: i32, %arg1: memref<8xi32, #tpu.memory_space<smem>>) -> (i32, i32) {
    %c0_i32 = arith.constant 0 : i32
    %c0_i32_0 = arith.constant 0 : i32
    %c0_i32_1 = arith.constant 0 : i32
    return %c0_i32, %c0_i32_0 : i32, i32
  }
  func.func @transform_6(%arg0: i32, %arg1: memref<8xi32, #tpu.memory_space<smem>>) -> (i32, i32) {
    %c0_i32 = arith.constant 0 : i32
    %c0_i32_0 = arith.constant 0 : i32
    %c0_i32_1 = arith.constant 0 : i32
    return %c0_i32, %c0_i32_0 : i32, i32
  }
  func.func @transform_7(%arg0: i32, %arg1: memref<8xi32, #tpu.memory_space<smem>>) -> (i32, i32) {
    %c0_i32 = arith.constant 0 : i32
    %c0_i32_0 = arith.constant 0 : i32
    %c0_i32_1 = arith.constant 0 : i32
    return %c0_i32, %c0_i32_0 : i32, i32
  }
  func.func @transform_8(%arg0: i32, %arg1: memref<8xi32, #tpu.memory_space<smem>>) -> (i32, i32) {
    %c0_i32 = arith.constant 0 : i32
    %c0_i32_0 = arith.constant 0 : i32
    %c0_i32_1 = arith.constant 0 : i32
    return %c0_i32, %c0_i32_0 : i32, i32
  }
  func.func @transform_9(%arg0: i32, %arg1: memref<8xi32, #tpu.memory_space<smem>>) -> (i32, i32) {
    %c0_i32 = arith.constant 0 : i32
    %c0_i32_0 = arith.constant 0 : i32
    return %c0_i32, %arg0 : i32, i32
  }
  func.func @transform_10(%arg0: i32, %arg1: memref<8xi32, #tpu.memory_space<smem>>) -> (i32, i32) {
    %c0_i32 = arith.constant 0 : i32
    %c0_i32_0 = arith.constant 0 : i32
    return %c0_i32, %arg0 : i32, i32
  }
  func.func @transform_11(%arg0: i32, %arg1: memref<8xi32, #tpu.memory_space<smem>>) -> (i32, i32) {
    %c0_i32 = arith.constant 0 : i32
    %c0_i32_0 = arith.constant 0 : i32
    return %c0_i32, %arg0 : i32, i32
  }
  func.func @transform_12(%arg0: i32, %arg1: memref<8xi32, #tpu.memory_space<smem>>) -> (i32, i32, i32) {
    %c0_i32 = arith.constant 0 : i32
    %c0_i32_0 = arith.constant 0 : i32
    %c0_i32_1 = arith.constant 0 : i32
    %c0_i32_2 = arith.constant 0 : i32
    return %c0_i32, %c0_i32_0, %c0_i32_1 : i32, i32, i32
  }
  func.func @transform_13(%arg0: i32, %arg1: memref<8xi32, #tpu.memory_space<smem>>) -> (i32, i32, i32) {
    %c0_i32 = arith.constant 0 : i32
    %c0_i32_0 = arith.constant 0 : i32
    %c0_i32_1 = arith.constant 0 : i32
    %c0_i32_2 = arith.constant 0 : i32
    return %c0_i32, %c0_i32_0, %c0_i32_1 : i32, i32, i32
  }
}

</mosaic_0001>

<bundles_post_ra>
// kernel: tpu_custom_call.1
= control target key start
LH: loop header
LB: loop body
LE: loop exit
PB: predicated region body
PF: predicated region fallthrough
CT: control target
= control target key end

     0   :  { %s16230_s0 = inlined_call_operand.hbm [shape: s32[8], index: 0, kind: input, shape index: {}]   ;;  %s16231_s1 = inlined_call_operand.hbm [shape: f32[64,128], index: 1, kind: input, shape index: {}]   ;;  %s16232_s2 = inlined_call_operand.hbm [shape: f32[2,8,128], index: 2, kind: input, shape index: {}]   ;;  %s16233_s3 = inlined_call_operand.hbm [shape: f32[2,8,128], index: 3, kind: input, shape index: {}]   ;;  %s16234_s4 = inlined_call_operand.hbm [shape: f32[128,512], index: 4, kind: input, shape index: {}]   ;;  %s16235_s5 = inlined_call_operand.hbm [shape: f32[128,512], index: 5, kind: input, shape index: {}]   ;;  %s16236_s6 = inlined_call_operand.vmem [shape: f32[1,512], index: 6, kind: input, shape index: {}]   ;;  %s16237_s7 = inlined_call_operand.hbm [shape: f32[128,512], index: 7, kind: input, shape index: {}]   ;;  %s16238_s8 = inlined_call_operand.hbm [shape: f32[128,512], index: 8, kind: input, shape index: {}]   ;;  %s16239_s9 = inlined_call_operand.vmem [shape: f32[1,512], index: 9, kind: input, shape index: {}]   ;;  %s16240_s10 = inlined_call_operand.hbm [shape: f32[128,256], index: 10, kind: input, shape index: {}]   ;;  %s16241_s11 = inlined_call_operand.vmem [shape: f32[1,256], index: 11, kind: input, shape index: {}]   ;;  %s16242_s12 = inlined_call_operand.hbm [shape: f32[8,256], index: 12, kind: output, shape index: {0}]   ;;  %s16243_s13 = inlined_call_operand.hbm [shape: f32[2,8,128], index: 13, kind: output, shape index: {1}]   ;;  %s16244_s14 = inlined_call_operand.hbm [shape: f32[2,8,128], index: 14, kind: output, shape index: {2}]  }
   0x1   :  { %s10435_s15 = scalar_lea.hbm %s16230_s0, 16 }
   0x2   :  { %p10436_p0 = scmp.ne.s32.totalorder %s16230_s0, %s10435_s15  ;;  %p10439_p1 = scmp.lt.u32.totalorder %s10435_s15, %s16230_s0 }
   0x4   :  { %p10441_p2 = pnand %p10439_p1, %p10436_p0 }
   0x6   :  { %10444 = shalt.err (!%p10441_p2)  }
   0x7   :  { %s10887_s20 = smov [#allocation6]  }
   0x8   :  { %21 = dma.hbm_to_smem %s16230_s0, 16, %s10887_s20, [#allocation5] }
   0x9   :  { %10857 = dma.done.wait [#allocation5], 16 }
   0xa   :  { %10858 = vsyncadd [#allocation5], 4294967280 }
   0xb   :  { %23 = sfence }
   0xc   :  { %24 = vsyncpa [#allocation8], 0 }
   0xd   :  { %25 = vsyncpa [#allocation11], 0 }
   0xe   :  { %26 = vsyncpa [#allocation14], 0 }
   0xf   :  { %27 = vsyncpa [#allocation17], 0 }
  0x10   :  { %28 = vsyncpa [#allocation9], 0 }
  0x11   :  { %29 = vsyncpa [#allocation21], 0  ;;  %s10888_s23 = smov [#allocation10]   ;;  %s10445_s27 = scalar_lea.hbm %s16233_s3, 256 }
  0x12   :  { %s47_s24 = sshll.u32 %s10888_s23, 4  ;;  %p10446_p3 = scmp.ne.s32.totalorder %s16233_s3, %s10445_s27  ;;  %s48_s24 = int_to_ptr.vmem [resolvable:$true] %s47_s24 }
  0x13   :  { %p10449_p4 = scmp.lt.u32.totalorder %s10445_s27, %s16233_s3 }
  0x15   :  { %p10451_p5 = pnand %p10449_p4, %p10446_p3 }
  0x17   :  { %10454 = shalt.err (!%p10451_p5)
}
  0x18   :  { %s10455_s15 = scalar_lea.vmem %s48_s24, 256  ;;  %p10460_p7 = scmp.lt.s32.totalorder %s48_s24, %s48_s24 }
  0x19   :  { %p10456_p6 = scmp.ne.s32.totalorder %s48_s24, %s10455_s15  ;;  %p10461_p8 = scmp.lt.s32.totalorder %s10455_s15, %s10455_s15 }
  0x1b   :  { %p10462_p9 = por %p10461_p8, %p10460_p7 }
  0x1d   :  { %p10463_p10 = pnand %p10462_p9, %p10456_p6 }
  0x1f   :  { %10466 = shalt.err (!%p10463_p10)
}
  0x20   :  { %s10889_s16 = smov 128   ;;  %s10890_s17 = smov 8  }
  0x21   :  { %53 = dma.hbm_to_vmem [thread:$0]  %s16233_s3, 256, %s48_s24, [#allocation11], %s10889_s16, %s10889_s16, %s10890_s17  }
  0x22   :  { %s10891_s20 = smov [#allocation13]   ;;  %s10892_s22 = smov [#allocation16]  }
  0x23   :  { %s71_s21 = sshll.u32 %s10891_s20, 4  ;;  %s97_s23 = sshll.u32 %s10892_s22, 4  ;;  %s72_s21 = int_to_ptr.vmem [resolvable:$true] %s71_s21  ;;  %s98_s23 = int_to_ptr.vmem [resolvable:$true] %s97_s23 }
  0x24   :  { %s10467_s27 = scalar_lea.hbm %s16235_s5, 8192 }
  0x25   :  { %p10468_p11 = scmp.ne.s32.totalorder %s16235_s5, %s10467_s27  ;;  %p10471_p12 = scmp.lt.u32.totalorder %s10467_s27, %s16235_s5 }
  0x27   :  { %p10473_p13 = pnand %p10471_p12, %p10468_p11 }
  0x29   :  { %10476 = shalt.err (!%p10473_p13)
}
  0x2a   :  { %s10477_s3 = scalar_lea.vmem %s72_s21, 8192  ;;  %p10482_p1 = scmp.lt.s32.totalorder %s72_s21, %s72_s21 }
  0x2b   :  { %p10478_p0 = scmp.ne.s32.totalorder %s72_s21, %s10477_s3  ;;  %p10483_p2 = scmp.lt.s32.totalorder %s10477_s3, %s10477_s3 }
  0x2d   :  { %p10484_p3 = por %p10483_p2, %p10482_p1 }
  0x2f   :  { %p10485_p4 = pnand %p10484_p3, %p10478_p0 }
  0x31   :  { %10488 = shalt.err (!%p10485_p4)
}
  0x32   :  { %s10893_s24 = smov 512   ;;  %s10894_s15 = smov 32  }
  0x33   :  { %77 = dma.hbm_to_vmem [thread:$0]  %s16235_s5, 8192, %s72_s21, [#allocation14], %s10893_s24, %s10893_s24, %s10894_s15  }
  0x34   :  { %s10489_s25 = scalar_lea.hbm %s16238_s8, 8192 }
  0x35   :  { %p10490_p5 = scmp.ne.s32.totalorder %s16238_s8, %s10489_s25  ;;  %p10493_p6 = scmp.lt.u32.totalorder %s10489_s25, %s16238_s8 }
  0x37   :  { %p10495_p7 = pnand %p10493_p6, %p10490_p5 }
  0x39   :  { %10498 = shalt.err (!%p10495_p7)
}
  0x3a   :  { %s10499_s0 = scalar_lea.vmem %s98_s23, 8192  ;;  %p10504_p9 = scmp.lt.s32.totalorder %s98_s23, %s98_s23 }
  0x3b   :  { %p10500_p8 = scmp.ne.s32.totalorder %s98_s23, %s10499_s0  ;;  %p10505_p10 = scmp.lt.s32.totalorder %s10499_s0, %s10499_s0 }
  0x3d   :  { %p10506_p11 = por %p10505_p10, %p10504_p9 }
  0x3f   :  { %p10507_p12 = pnand %p10506_p11, %p10500_p8 }
  0x41   :  { %10510 = shalt.err (!%p10507_p12)
}
  0x42   :  { %103 = dma.hbm_to_vmem [thread:$0]  %s16238_s8, 8192, %s98_s23, [#allocation17], %s10893_s24, %s10893_s24, %s10894_s15  }
  0x43   :  { %s10895_s30 = smov [#allocation7]   ;;  %s10896_s18 = smov [#allocation12]  }
  0x44   :  { %s35_s3 = sshll.u32 %s10895_s30, 4  ;;  %s59_s19 = sshll.u32 %s10896_s18, 4  ;;  %s36_s3 = int_to_ptr.vmem [resolvable:$true] %s35_s3  ;;  %s60_s19 = int_to_ptr.vmem [resolvable:$true] %s59_s19 }
  0x45   :  { %s10511_s25 = scalar_lea.hbm %s16232_s2, 256 }
  0x46   :  { %p10512_p13 = scmp.ne.s32.totalorder %s16232_s2, %s10511_s25  ;;  %p10515_p0 = scmp.lt.u32.totalorder %s10511_s25, %s16232_s2 }
  0x48   :  { %p10517_p1 = pnand %p10515_p0, %p10512_p13 }
  0x4a   :  { %10520 = shalt.err (!%p10517_p1)
}
  0x4b   :  { %s10521_s8 = scalar_lea.vmem %s36_s3, 256  ;;  %p10526_p3 = scmp.lt.s32.totalorder %s36_s3, %s36_s3 }
  0x4c   :  { %p10522_p2 = scmp.ne.s32.totalorder %s36_s3, %s10521_s8  ;;  %p10527_p4 = scmp.lt.s32.totalorder %s10521_s8, %s10521_s8 }
  0x4e   :  { %p10528_p5 = por %p10527_p4, %p10526_p3 }
  0x50   :  { %p10529_p6 = pnand %p10528_p5, %p10522_p2 }
  0x52   :  { %10532 = shalt.err (!%p10529_p6)
}
  0x53   :  { %41 = dma.hbm_to_vmem [thread:$0]  %s16232_s2, 256, %s36_s3, [#allocation8], %s10889_s16, %s10889_s16, %s10890_s17  }
  0x54   :  { %s10533_s30 = scalar_lea.hbm %s16234_s4, 8192 }
  0x55   :  { %p10534_p7 = scmp.ne.s32.totalorder %s16234_s4, %s10533_s30  ;;  %p10537_p8 = scmp.lt.u32.totalorder %s10533_s30, %s16234_s4 }
  0x57   :  { %p10539_p9 = pnand %p10537_p8, %p10534_p7 }
  0x59   :  { %10542 = shalt.err (!%p10539_p9)
}
  0x5a   :  { %s10543_s26 = scalar_lea.vmem %s60_s19, 8192  ;;  %p10548_p11 = scmp.lt.s32.totalorder %s60_s19, %s60_s19 }
  0x5b   :  { %p10544_p10 = scmp.ne.s32.totalorder %s60_s19, %s10543_s26  ;;  %p10549_p12 = scmp.lt.s32.totalorder %s10543_s26, %s10543_s26 }
  0x5d   :  { %p10550_p13 = por %p10549_p12, %p10548_p11 }
  0x5f   :  { %p10551_p0 = pnand %p10550_p13, %p10544_p10 }
  0x61   :  { %10554 = shalt.err (!%p10551_p0)
}
  0x62   :  { %65 = dma.hbm_to_vmem [thread:$0]  %s16234_s4, 8192, %s60_s19, [#allocation11], %s10893_s24, %s10893_s24, %s10894_s15  }
  0x63   :  { %s10897_s27 = smov [#allocation15]   ;;  %s10898_s29 = smov [#allocation18]  }
  0x64   :  { %s85_s28 = sshll.u32 %s10897_s27, 4  ;;  %s111_s8 = sshll.u32 %s10898_s29, 4  ;;  %s86_s28 = int_to_ptr.vmem [resolvable:$true] %s85_s28  ;;  %s112_s8 = int_to_ptr.vmem [resolvable:$true] %s111_s8 }
  0x65   :  { %s10555_s5 = scalar_lea.hbm %s16237_s7, 8192 }
  0x66   :  { %p10556_p1 = scmp.ne.s32.totalorder %s16237_s7, %s10555_s5  ;;  %p10559_p2 = scmp.lt.u32.totalorder %s10555_s5, %s16237_s7 }
  0x68   :  { %p10561_p3 = pnand %p10559_p2, %p10556_p1 }
  0x6a   :  { %10564 = shalt.err (!%p10561_p3)
}
  0x6b   :  { %s10565_s4 = scalar_lea.vmem %s86_s28, 8192  ;;  %p10570_p5 = scmp.lt.s32.totalorder %s86_s28, %s86_s28 }
  0x6c   :  { %p10566_p4 = scmp.ne.s32.totalorder %s86_s28, %s10565_s4  ;;  %p10571_p6 = scmp.lt.s32.totalorder %s10565_s4, %s10565_s4 }
  0x6e   :  { %p10572_p7 = por %p10571_p6, %p10570_p5 }
  0x70   :  { %p10573_p8 = pnand %p10572_p7, %p10566_p4 }
  0x72   :  { %10576 = shalt.err (!%p10573_p8)
}
  0x73   :  { %91 = dma.hbm_to_vmem [thread:$0]  %s16237_s7, 8192, %s86_s28, [#allocation14], %s10893_s24, %s10893_s24, %s10894_s15  }
  0x74   :  { %s10577_s2 = scalar_lea.hbm %s16240_s10, 4096 }
  0x75   :  { %p10578_p9 = scmp.ne.s32.totalorder %s16240_s10, %s10577_s2  ;;  %p10581_p10 = scmp.lt.u32.totalorder %s10577_s2, %s16240_s10 }
  0x77   :  { %p10583_p11 = pnand %p10581_p10, %p10578_p9 }
  0x79   :  { %10586 = shalt.err (!%p10583_p11)
}
  0x7a   :  { %s10587_s0 = scalar_lea.vmem %s112_s8, 4096  ;;  %p10592_p13 = scmp.lt.s32.totalorder %s112_s8, %s112_s8 }
  0x7b   :  { %p10588_p12 = scmp.ne.s32.totalorder %s112_s8, %s10587_s0  ;;  %p10593_p0 = scmp.lt.s32.totalorder %s10587_s0, %s10587_s0 }
  0x7d   :  { %p10594_p1 = por %p10593_p0, %p10592_p13 }
  0x7f   :  { %p10595_p2 = pnand %p10594_p1, %p10588_p12 }
  0x81   :  { %10598 = shalt.err (!%p10595_p2)
}
  0x82   :  { %s10899_s7 = smov 256   ;;  %s10900_s24 = smov 16  }
  0x83   :  { %117 = dma.hbm_to_vmem [thread:$0]  %s16240_s10, 4096, %s112_s8, [#allocation17], %s10899_s7, %s10899_s7, %s10900_s24  }
  0x84   :  { %10859 = dma.done.wait [#allocation8], 256  }
  0x85   :  { %10860 = vsyncadd [#allocation8], 4294967040 }
  0x86   :  { %10861 = dma.done.wait [#allocation11], 8448  }
  0x87   :  { %10862 = vsyncadd [#allocation11], 4294958848 }
  0x88   :  { %10863 = dma.done.wait [#allocation14], 16384  }
  0x89   :  { %10864 = vsyncadd [#allocation14], 4294950912 }
  0x8a   :  { %10865 = dma.done.wait [#allocation17], 12288  }
  0x8b   :  { %10866 = vsyncadd [#allocation17], 4294955008  ;;  %s145_s5 = sld [smem:[#allocation6]]  ;;  %s10901_s21 = smov [#allocation2]  }
  0x8c   :  { %s162_s30 = sshll.u32 %s10901_s21, 4  ;;  %s11104_s18 = sld [smem:[#allocation6 + $0x1]]  ;;  %s11102_s30 = int_to_ptr.vmem [resolvable:$true] %s162_s30 }
  0x8d   :  { %s10902_s20 = smov [#allocation2 + $0x1]   ;;  %s11106_s19 = sld [smem:[#allocation6 + $0x2]] }
  0x8e   :  { %s177_s4 = sshll.u32 %s10902_s20, 4  ;;  %s10903_s10 = smov [#allocation2 + $0x2]   ;;  %s11108_s4 = int_to_ptr.vmem [resolvable:$true] %s177_s4 }
  0x8f   :  { %s192_s8 = sshll.u32 %s10903_s10, 4  ;;  %s11110_s22 = sld [smem:[#allocation6 + $0x3]]  ;;  %s11112_s8 = int_to_ptr.vmem [resolvable:$true] %s192_s8 }
  0x90   :  { %s10904_s26 = smov [#allocation2 + $0x3]   ;;  %s11123_s15 = scalar_lea.hbm %s16231_s1, 1024 }
  0x91   :  { %s8527_s25 = sshll.u32 %s145_s5, 4  ;;  %s11114_s2 = sshll.u32 %s10904_s26, 4  ;;  %s208_s2 = int_to_ptr.vmem [resolvable:$true] %s11114_s2 }
  0x92   :  { %s154_s29 = scalar_lea.hbm %s16231_s1, %s8527_s25  ;;  %s8528_s23 = sshll.u32 %s11104_s18, 4 }
  0x93   :  { %s10599_s0 = scalar_lea.hbm %s154_s29, 16  ;;  %p10602_p4 = scmp.lt.u32.totalorder %s154_s29, %s16231_s1 }
  0x94   :  { %p10600_p3 = scmp.ne.s32.totalorder %s154_s29, %s10599_s0  ;;  %p10603_p5 = scmp.lt.u32.totalorder %s11123_s15, %s10599_s0 }
  0x95   :  { %p10605_p7 = scmp.lt.u32.totalorder %s10599_s0, %s154_s29 }
  0x96   :  { %p10604_p6 = por %p10603_p5, %p10602_p4 }
  0x98   :  { %p10606_p8 = por %p10605_p7, %p10604_p6 }
  0x9a   :  { %p10607_p9 = pnand %p10606_p8, %p10600_p3 }
  0x9c   :  { %10610 = shalt.err (!%p10607_p9)  }
  0x9d   :  { %s10611_s5 = scalar_lea.vmem %s11102_s30, 16  ;;  %s11132_s18 = scalar_lea.vmem %s11102_s30, 128 }
  0x9e   :  { %p10612_p10 = scmp.ne.s32.totalorder %s11102_s30, %s10611_s5  ;;  %p10616_p11 = scmp.lt.s32.totalorder %s11102_s30, %s11102_s30 }
  0x9f   :  { %p10617_p12 = scmp.lt.s32.totalorder %s11132_s18, %s10611_s5 }
  0xa1   :  { %p10618_p13 = por %p10617_p12, %p10616_p11 }
  0xa3   :  { %p10619_p0 = pnand %p10618_p13, %p10612_p10 }
  0xa5   :  { %10622 = shalt.err (!%p10619_p0)  }
  0xa6   :  { %165 = dma.hbm_to_vmem [thread:$0]  %s154_s29, 16, %s11102_s30, [#allocation4] }
  0xa7   :  { %s167_s25 = scalar_lea.hbm %s16231_s1, %s8528_s23  ;;  %s8529_s26 = sshll.u32 %s11106_s19, 4 }
  0xa8   :  { %s10623_s3 = scalar_lea.hbm %s167_s25, 16  ;;  %p10626_p2 = scmp.lt.u32.totalorder %s167_s25, %s16231_s1 }
  0xa9   :  { %p10624_p1 = scmp.ne.s32.totalorder %s167_s25, %s10623_s3  ;;  %p10627_p3 = scmp.lt.u32.totalorder %s11123_s15, %s10623_s3 }
  0xaa   :  { %p10629_p5 = scmp.lt.u32.totalorder %s10623_s3, %s167_s25 }
  0xab   :  { %p10628_p4 = por %p10627_p3, %p10626_p2 }
  0xad   :  { %p10630_p6 = por %p10629_p5, %p10628_p4 }
  0xaf   :  { %p10631_p7 = pnand %p10630_p6, %p10624_p1 }
  0xb1   :  { %10634 = shalt.err (!%p10631_p7)  }
  0xb2   :  { %s10635_s29 = scalar_lea.vmem %s11108_s4, 16  ;;  %p10640_p9 = scmp.lt.s32.totalorder %s11108_s4, %s11102_s30 }
  0xb3   :  { %p10636_p8 = scmp.ne.s32.totalorder %s11108_s4, %s10635_s29  ;;  %p10641_p10 = scmp.lt.s32.totalorder %s11132_s18, %s10635_s29 }
  0xb5   :  { %p10642_p11 = por %p10641_p10, %p10640_p9 }
  0xb7   :  { %p10643_p12 = pnand %p10642_p11, %p10636_p8 }
  0xb9   :  { %10646 = shalt.err (!%p10643_p12)  }
  0xba   :  { %180 = dma.hbm_to_vmem [thread:$0]  %s167_s25, 16, %s11108_s4, [#allocation4 + $0x1] }
  0xbb   :  { %s182_s7 = scalar_lea.hbm %s16231_s1, %s8529_s26  ;;  %s8530_s24 = sshll.u32 %s11110_s22, 4 }
  0xbc   :  { %s10647_s28 = scalar_lea.hbm %s182_s7, 16  ;;  %p10650_p0 = scmp.lt.u32.totalorder %s182_s7, %s16231_s1 }
  0xbd   :  { %p10648_p13 = scmp.ne.s32.totalorder %s182_s7, %s10647_s28  ;;  %p10651_p1 = scmp.lt.u32.totalorder %s11123_s15, %s10647_s28 }
  0xbe   :  { %p10653_p3 = scmp.lt.u32.totalorder %s10647_s28, %s182_s7 }
  0xbf   :  { %p10652_p2 = por %p10651_p1, %p10650_p0 }
  0xc1   :  { %p10654_p4 = por %p10653_p3, %p10652_p2 }
  0xc3   :  { %p10655_p5 = pnand %p10654_p4, %p10648_p13 }
  0xc5   :  { %10658 = shalt.err (!%p10655_p5)  }
  0xc6   :  { %s10659_s4 = scalar_lea.vmem %s11112_s8, 16  ;;  %p10664_p7 = scmp.lt.s32.totalorder %s11112_s8, %s11102_s30 }
  0xc7   :  { %p10660_p6 = scmp.ne.s32.totalorder %s11112_s8, %s10659_s4  ;;  %p10665_p8 = scmp.lt.s32.totalorder %s11132_s18, %s10659_s4 }
  0xc9   :  { %p10666_p9 = por %p10665_p8, %p10664_p7 }
  0xcb   :  { %p10667_p10 = pnand %p10666_p9, %p10660_p6 }
  0xcd   :  { %10670 = shalt.err (!%p10667_p10)  }
  0xce   :  { %195 = dma.hbm_to_vmem [thread:$0]  %s182_s7, 16, %s11112_s8, [#allocation4 + $0x2] }
  0xcf   :  { %s197_s10 = scalar_lea.hbm %s16231_s1, %s8530_s24 }
  0xd0   :  { %s10671_s25 = scalar_lea.hbm %s197_s10, 16  ;;  %p10674_p12 = scmp.lt.u32.totalorder %s197_s10, %s16231_s1 }
  0xd1   :  { %p10672_p11 = scmp.ne.s32.totalorder %s197_s10, %s10671_s25  ;;  %p10675_p13 = scmp.lt.u32.totalorder %s11123_s15, %s10671_s25 }
  0xd2   :  { %p10677_p1 = scmp.lt.u32.totalorder %s10671_s25, %s197_s10 }
  0xd3   :  { %p10676_p0 = por %p10675_p13, %p10674_p12 }
  0xd5   :  { %p10678_p2 = por %p10677_p1, %p10676_p0 }
  0xd7   :  { %p10679_p3 = pnand %p10678_p2, %p10672_p11 }
  0xd9   :  { %10682 = shalt.err (!%p10679_p3)  }
  0xda   :  { %s10683_s27 = scalar_lea.vmem %s208_s2, 16  ;;  %p10688_p5 = scmp.lt.s32.totalorder %s208_s2, %s11102_s30 }
  0xdb   :  { %p10684_p4 = scmp.ne.s32.totalorder %s208_s2, %s10683_s27  ;;  %p10689_p6 = scmp.lt.s32.totalorder %s11132_s18, %s10683_s27 }
  0xdd   :  { %p10690_p7 = por %p10689_p6, %p10688_p5 }
  0xdf   :  { %p10691_p8 = pnand %p10690_p7, %p10684_p4 }
  0xe1   :  { %10694 = shalt.err (!%p10691_p8)  }
  0xe2   :  { %210 = dma.hbm_to_vmem [thread:$0]  %s197_s10, 16, %s208_s2, [#allocation4 + $0x3] }
  0xe3   :  { %s8523_s8 = sld [smem:[#allocation6 + $0x4]]  ;;  %s10905_s0 = smov [#allocation2 + $0x4]  }
  0xe4   :  { %s222_s29 = sshll.u32 %s10905_s0, 4  ;;  %s11176_s19 = sld [smem:[#allocation6 + $0x5]]  ;;  %s223_s29 = int_to_ptr.vmem [resolvable:$true] %s222_s29 }
  0xe5   :  { %s10906_s23 = smov [#allocation2 + $0x5]   ;;  %s11178_s24 = sld [smem:[#allocation6 + $0x6]] }
  0xe6   :  { %s237_s7 = sshll.u32 %s10906_s23, 4  ;;  %s10907_s28 = smov [#allocation2 + $0x6]   ;;  %s11180_s7 = int_to_ptr.vmem [resolvable:$true] %s237_s7 }
  0xe7   :  { %s252_s21 = sshll.u32 %s10907_s28, 4  ;;  %s11182_s5 = sld [smem:[#allocation6 + $0x7]]  ;;  %s11184_s21 = int_to_ptr.vmem [resolvable:$true] %s252_s21 }
  0xe9   :  { %s8531_s4 = sshll.u32 %s8523_s8, 4 }
  0xea   :  { %s212_s20 = scalar_lea.hbm %s16231_s1, %s8531_s4  ;;  %s8532_s10 = sshll.u32 %s11176_s19, 4 }
  0xeb   :  { %s10695_s25 = scalar_lea.hbm %s212_s20, 16  ;;  %p10698_p10 = scmp.lt.u32.totalorder %s212_s20, %s16231_s1 }
  0xec   :  { %p10696_p9 = scmp.ne.s32.totalorder %s212_s20, %s10695_s25  ;;  %p10699_p11 = scmp.lt.u32.totalorder %s11123_s15, %s10695_s25 }
  0xed   :  { %p10701_p13 = scmp.lt.u32.totalorder %s10695_s25, %s212_s20 }
  0xee   :  { %p10700_p12 = por %p10699_p11, %p10698_p10 }
  0xf0   :  { %p10702_p0 = por %p10701_p13, %p10700_p12 }
  0xf2   :  { %p10703_p1 = pnand %p10702_p0, %p10696_p9 }
  0xf4   :  { %10706 = shalt.err (!%p10703_p1)  }
  0xf5   :  { %s10707_s27 = scalar_lea.vmem %s223_s29, 16  ;;  %p10712_p3 = scmp.lt.s32.totalorder %s223_s29, %s11102_s30 }
  0xf6   :  { %p10708_p2 = scmp.ne.s32.totalorder %s223_s29, %s10707_s27  ;;  %p10713_p4 = scmp.lt.s32.totalorder %s11132_s18, %s10707_s27 }
  0xf8   :  { %p10714_p5 = por %p10713_p4, %p10712_p3 }
  0xfa   :  { %p10715_p6 = pnand %p10714_p5, %p10708_p2 }
  0xfc   :  { %10718 = shalt.err (!%p10715_p6)  }
  0xfd   :  { %225 = dma.hbm_to_vmem [thread:$0]  %s212_s20, 16, %s223_s29, [#allocation4 + $0x4] }
  0xfe   :  { %s227_s19 = scalar_lea.hbm %s16231_s1, %s8532_s10  ;;  %s8533_s23 = sshll.u32 %s11178_s24, 4 }
  0xff   :  { %s10719_s28 = scalar_lea.hbm %s227_s19, 16  ;;  %p10722_p8 = scmp.lt.u32.totalorder %s227_s19, %s16231_s1 }
 0x100   :  { %p10720_p7 = scmp.ne.s32.totalorder %s227_s19, %s10719_s28  ;;  %p10723_p9 = scmp.lt.u32.totalorder %s11123_s15, %s10719_s28 }
 0x101   :  { %p10725_p11 = scmp.lt.u32.totalorder %s10719_s28, %s227_s19 }
 0x102   :  { %p10724_p10 = por %p10723_p9, %p10722_p8 }
 0x104   :  { %p10726_p12 = por %p10725_p11, %p10724_p10 }
 0x106   :  { %p10727_p13 = pnand %p10726_p12, %p10720_p7 }
 0x108   :  { %10730 = shalt.err (!%p10727_p13)  }
 0x109   :  { %s10731_s29 = scalar_lea.vmem %s11180_s7, 16  ;;  %p10736_p1 = scmp.lt.s32.totalorder %s11180_s7, %s11102_s30 }
 0x10a   :  { %p10732_p0 = scmp.ne.s32.totalorder %s11180_s7, %s10731_s29  ;;  %p10737_p2 = scmp.lt.s32.totalorder %s11132_s18, %s10731_s29 }
 0x10c   :  { %p10738_p3 = por %p10737_p2, %p10736_p1 }
 0x10e   :  { %p10739_p4 = pnand %p10738_p3, %p10732_p0 }
 0x110   :  { %10742 = shalt.err (!%p10739_p4)  }
 0x111   :  { %240 = dma.hbm_to_vmem [thread:$0]  %s227_s19, 16, %s11180_s7, [#allocation4 + $0x5] }
 0x112   :  { %s242_s20 = scalar_lea.hbm %s16231_s1, %s8533_s23  ;;  %s8534_s10 = sshll.u32 %s11182_s5, 4 }
 0x113   :  { %s10743_s25 = scalar_lea.hbm %s242_s20, 16  ;;  %p10746_p6 = scmp.lt.u32.totalorder %s242_s20, %s16231_s1 }
 0x114   :  { %p10744_p5 = scmp.ne.s32.totalorder %s242_s20, %s10743_s25  ;;  %p10747_p7 = scmp.lt.u32.totalorder %s11123_s15, %s10743_s25 }
 0x115   :  { %p10749_p9 = scmp.lt.u32.totalorder %s10743_s25, %s242_s20 }
 0x116   :  { %p10748_p8 = por %p10747_p7, %p10746_p6 }
 0x118   :  { %p10750_p10 = por %p10749_p9, %p10748_p8 }
 0x11a   :  { %p10751_p11 = pnand %p10750_p10, %p10744_p5 }
 0x11c   :  { %10754 = shalt.err (!%p10751_p11)  }
 0x11d   :  { %s10755_s7 = scalar_lea.vmem %s11184_s21, 16  ;;  %p10760_p13 = scmp.lt.s32.totalorder %s11184_s21, %s11102_s30 }
 0x11e   :  { %p10756_p12 = scmp.ne.s32.totalorder %s11184_s21, %s10755_s7  ;;  %p10761_p0 = scmp.lt.s32.totalorder %s11132_s18, %s10755_s7 }
 0x120   :  { %p10762_p1 = por %p10761_p0, %p10760_p13 }
 0x122   :  { %p10763_p2 = pnand %p10762_p1, %p10756_p12 }
 0x124   :  { %10766 = shalt.err (!%p10763_p2)  }
 0x125   :  { %255 = dma.hbm_to_vmem [thread:$0]  %s242_s20, 16, %s11184_s21, [#allocation4 + $0x6] }
 0x126   :  { %s257_s8 = scalar_lea.hbm %s16231_s1, %s8534_s10  ;;  %s10908_s0 = smov [#allocation2 + $0x7]  }
 0x127   :  { %s267_s19 = sshll.u32 %s10908_s0, 4  ;;  %s10767_s23 = scalar_lea.hbm %s257_s8, 16  ;;  %s268_s19 = int_to_ptr.vmem [resolvable:$true] %s267_s19 }
 0x128   :  { %p10768_p3 = scmp.ne.s32.totalorder %s257_s8, %s10767_s23  ;;  %p10770_p4 = scmp.lt.u32.totalorder %s257_s8, %s16231_s1 }
 0x129   :  { %p10771_p5 = scmp.lt.u32.totalorder %s11123_s15, %s10767_s23  ;;  %p10773_p7 = scmp.lt.u32.totalorder %s10767_s23, %s257_s8 }
 0x12b   :  { %p10772_p6 = por %p10771_p5, %p10770_p4 }
 0x12d   :  { %p10774_p8 = por %p10773_p7, %p10772_p6 }
 0x12f   :  { %p10775_p9 = pnand %p10774_p8, %p10768_p3 }
 0x131   :  { %10778 = shalt.err (!%p10775_p9)  }
 0x132   :  { %s10779_s21 = scalar_lea.vmem %s268_s19, 16  ;;  %p10784_p11 = scmp.lt.s32.totalorder %s268_s19, %s11102_s30 }
 0x133   :  { %p10780_p10 = scmp.ne.s32.totalorder %s268_s19, %s10779_s21  ;;  %p10785_p12 = scmp.lt.s32.totalorder %s11132_s18, %s10779_s21 }
 0x135   :  { %p10786_p13 = por %p10785_p12, %p10784_p11 }
 0x137   :  { %p10787_p0 = pnand %p10786_p13, %p10780_p10 }
 0x139   :  { %10790 = shalt.err (!%p10787_p0)  }
 0x13a   :  { %270 = dma.hbm_to_vmem [thread:$0]  %s257_s8, 16, %s268_s19, [#allocation4 + $0x7] }
 0x13b   :  { %10867 = dma.done.wait [#allocation4], 16 }
 0x13c   :  { %10868 = vsyncadd [#allocation4], 4294967280 }
 0x13d   :  { %10869 = dma.done.wait [#allocation4 + $0x1], 16 }
 0x13e   :  { %10870 = vsyncadd [#allocation4 + $0x1], 4294967280 }
 0x13f   :  { %10871 = dma.done.wait [#allocation4 + $0x2], 16 }
 0x140   :  { %10872 = vsyncadd [#allocation4 + $0x2], 4294967280 }
 0x141   :  { %10873 = dma.done.wait [#allocation4 + $0x3], 16 }
 0x142   :  { %10874 = vsyncadd [#allocation4 + $0x3], 4294967280 }
 0x143   :  { %10875 = dma.done.wait [#allocation4 + $0x4], 16 }
 0x144   :  { %10876 = vsyncadd [#allocation4 + $0x4], 4294967280 }
 0x145   :  { %10877 = dma.done.wait [#allocation4 + $0x5], 16 }
 0x146   :  { %10878 = vsyncadd [#allocation4 + $0x5], 4294967280 }
 0x147   :  { %10879 = dma.done.wait [#allocation4 + $0x6], 16 }
 0x148   :  { %10880 = vsyncadd [#allocation4 + $0x6], 4294967280 }
 0x149   :  { %10881 = dma.done.wait [#allocation4 + $0x7], 16 }
 0x14a   :  { %10882 = vsyncadd [#allocation4 + $0x7], 4294967280  ;;  %v16245_v0 = vmov 0.0   ;;  %v354_v1 = vld [vmem:[#allocation13 + $0x8] sm:$0xff]  ;;  %v353_v3 = vld [vmem:[#allocation13] sm:$0xff] }
 0x14b   :  { %516 = vmatprep.mubr.f32.mxu1 %v16245_v0  ;;  %993 = vmatprep.mubr.f32.mxu0 %v16245_v0  ;;  %v358_v2 = vld [vmem:[#allocation13 + $0x28] sm:$0xff]  ;;  %v420_v4 = vand.u32 4294901760, %v354_v1  ;;  %v357_v6 = vld [vmem:[#allocation13 + $0x20] sm:$0xff]  ;;  %v422_v7 = vand.u32 4294901760, %v353_v3 }
 0x14c   :  { %v424_v5 = vand.u32 4294901760, %v358_v2  ;;  %v362_v8 = vld [vmem:[#allocation13 + $0x48] sm:$0xff]  ;;  %v426_v10 = vand.u32 4294901760, %v357_v6  ;;  %v361_v13 = vld [vmem:[#allocation13 + $0x40] sm:$0xff] }
 0x14d   :  { %v366_v9 = vld [vmem:[#allocation13 + $0x68] sm:$0xff]  ;;  %v428_v11 = vand.u32 4294901760, %v362_v8  ;;  %v365_v14 = vld [vmem:[#allocation13 + $0x60] sm:$0xff]  ;;  %v11237_v17 = vsub.f32 %v354_v1, %v420_v4  ;;  %v11243_v23 = vsub.f32 %v353_v3, %v422_v7  ;;  %v430_v29 = vand.u32 4294901760, %v361_v13 }
 0x14e   :  { %v432_v12 = vand.u32 4294901760, %v366_v9  ;;  %v370_v15 = vld [vmem:[#allocation13 + $0x88] sm:$0xff]  ;;  %v11235_v16 = vpack.c.bf16 %v424_v5, %v420_v4  ;;  %v11239_v18 = vsub.f32 %v358_v2, %v424_v5  ;;  %v369_v20 = vld [vmem:[#allocation13 + $0x80] sm:$0xff]  ;;  %v11241_v22 = vpack.c.bf16 %v426_v10, %v422_v7 }
 0x14f   :  { %v374_v19 = vld [vmem:[#allocation13 + $0xa8] sm:$0xff]  ;;  %v373_v21 = vld [vmem:[#allocation13 + $0xa0] sm:$0xff]  ;;  %v11245_v24 = vsub.f32 %v357_v6, %v426_v10  ;;  %v11251_v28 = vsub.f32 %v362_v8, %v428_v11  ;;  %v434_v30 = vand.u32 4294901760, %v365_v14  ;;  %v436_v31 = vand.u32 4294901760, %v370_v15 }
 0x150   :  { %17038 = vst [vmem:[#allocation56_spill] sm:$0xff] %v11235_v16  ;;  %17039 = vst [vmem:[#allocation57_spill] sm:$0xff] %v11241_v22  ;;  %v11247_v25 = vpack.c.bf16 %v432_v12, %v428_v11  ;;  %v378_v26 = vld [vmem:[#allocation13 + $0xc8] sm:$0xff]  ;;  %8550 = vmatprep.subr.bf16.mxu1 %v11235_v16  ;;  %8646 = vmatprep.subr.bf16.mxu0 %v11235_v16  ;;  %v440_v32 = vand.u32 4294901760, %v374_v19  ;;  %v438_v33 = vand.u32 4294901760, %v369_v20  ;;  %v442_v34 = vand.u32 4294901760, %v373_v21 }
 0x151   :  { %v382_v27 = vld [vmem:[#allocation13 + $0xe8] sm:$0xff]  ;;  %8552 = vmatpush1.bf16.msra.mxu1 %v11241_v22  ;;  %8648 = vmatpush1.bf16.msra.mxu0 %v11241_v22  ;;  %v444_v35 = vand.u32 4294901760, %v378_v26  ;;  %v11256_v36 = vsub.f32 %v366_v9, %v432_v12  ;;  %v11259_v37 = vpack.c.bf16 %v434_v30, %v430_v29  ;;  %v11261_v38 = vsub.f32 %v361_v13, %v430_v29  ;;  %v377_v40 = vld [vmem:[#allocation13 + $0xc0] sm:$0xff] }
 0x152   :  { %17040 = vst [vmem:[#allocation58_spill] sm:$0xff] %v11247_v25  ;;  %8554 = vmatprep.subr.bf16.mxu1 %v11247_v25  ;;  %8650 = vmatprep.subr.bf16.mxu0 %v11247_v25  ;;  %v448_v39 = vand.u32 4294901760, %v382_v27  ;;  %v381_v41 = vld [vmem:[#allocation13 + $0xe0] sm:$0xff]  ;;  %v386_v42 = vld [vmem:[#allocation13 + $0x108] sm:$0xff]  ;;  %v11263_v43 = vsub.f32 %v365_v14, %v434_v30  ;;  %v11265_v44 = vpack.c.bf16 %v440_v32, %v436_v31  ;;  %v446_v56 = vand.u32 4294901760, %v377_v40 }
 0x153   :  { %17041 = vst [vmem:[#allocation59_spill] sm:$0xff] %v11259_v37  ;;  %v11267_v45 = vsub.f32 %v370_v15, %v436_v31  ;;  %v11269_v46 = vsub.f32 %v374_v19, %v440_v32  ;;  %v390_v47 = vld [vmem:[#allocation13 + $0x128] sm:$0xff]  ;;  %v385_v48 = vld [vmem:[#allocation13 + $0x100] sm:$0xff]  ;;  %v11271_v50 = vpack.c.bf16 %v442_v34, %v438_v33  ;;  %v11273_v51 = vsub.f32 %v369_v20, %v438_v33 }
 0x154   :  { %17042 = vst [vmem:[#allocation60_spill] sm:$0xff] %v11265_v44  ;;  %v389_v49 = vld [vmem:[#allocation13 + $0x120] sm:$0xff]  ;;  %v11275_v52 = vsub.f32 %v373_v21, %v442_v34  ;;  %v11277_v53 = vpack.c.bf16 %v448_v39, %v444_v35  ;;  %v394_v54 = vld [vmem:[#allocation13 + $0x148] sm:$0xff]  ;;  %v11281_v55 = vsub.f32 %v378_v26, %v444_v35  ;;  %v450_v57 = vand.u32 4294901760, %v381_v41 }
 0x155   :  { %17043 = vst [vmem:[#allocation61_spill] sm:$0xff] %v11271_v50  ;;  %8556 = vmatpush1.bf16.msra.mxu1 %v11259_v37  ;;  %8652 = vmatpush1.bf16.msra.mxu0 %v11259_v37  ;;  %v452_v58 = vand.u32 4294901760, %v386_v42  ;;  %v11285_v59 = vsub.f32 %v382_v27, %v448_v39  ;;  %v456_v60 = vand.u32 4294901760, %v390_v47  ;;  %v454_v61 = vand.u32 4294901760, %v385_v48  ;;  %v398_v63 = vld [vmem:[#allocation13 + $0x168] sm:$0xff]  ;;  %v393_v1 = vld [vmem:[#allocation13 + $0x140] sm:$0xff] }
 0x156   :  { %17044 = vst [vmem:[#allocation62_spill] sm:$0xff] %v11277_v53  ;;  %8558 = vmatprep.subr.bf16.mxu1 %v11265_v44  ;;  %8654 = vmatprep.subr.bf16.mxu0 %v11265_v44  ;;  %v458_v62 = vand.u32 4294901760, %v389_v49  ;;  %v397_v2 = vld [vmem:[#allocation13 + $0x160] sm:$0xff]  ;;  %v11287_v3 = vpack.c.bf16 %v450_v57, %v446_v56  ;;  %v11289_v4 = vsub.f32 %v377_v40, %v446_v56  ;;  %v460_v6 = vand.u32 4294901760, %v394_v54  ;;  %v402_v7 = vld [vmem:[#allocation13 + $0x188] sm:$0xff] }
 0x157   :  { %v11291_v5 = vsub.f32 %v381_v41, %v450_v57  ;;  %v406_v8 = vld [vmem:[#allocation13 + $0x1a8] sm:$0xff]  ;;  %v401_v9 = vld [vmem:[#allocation13 + $0x180] sm:$0xff]  ;;  %v11293_v10 = vpack.c.bf16 %v456_v60, %v452_v58  ;;  %v11295_v11 = vsub.f32 %v386_v42, %v452_v58  ;;  %v11297_v12 = vsub.f32 %v390_v47, %v456_v60 }
 0x158   :  { %17045 = vst [vmem:[#allocation63_spill] sm:$0xff] %v11287_v3  ;;  %v11299_v13 = vpack.c.bf16 %v458_v62, %v454_v61  ;;  %v405_v14 = vld [vmem:[#allocation13 + $0x1a0] sm:$0xff]  ;;  %v11303_v15 = vsub.f32 %v385_v48, %v454_v61  ;;  %v11305_v19 = vsub.f32 %v389_v49, %v458_v62  ;;  %v464_v20 = vand.u32 4294901760, %v398_v63  ;;  %v410_v31 = vld [vmem:[#allocation13 + $0x1c8] sm:$0xff] }
 0x159   :  { %17046 = vst [vmem:[#allocation64_spill] sm:$0xff] %v11293_v10  ;;  %8560 = vmatpush1.bf16.msra.mxu1 %v11271_v50  ;;  %8656 = vmatpush1.bf16.msra.mxu0 %v11271_v50  ;;  %v462_v21 = vand.u32 4294901760, %v393_v1  ;;  %v466_v26 = vand.u32 4294901760, %v397_v2  ;;  %v468_v27 = vand.u32 4294901760, %v402_v7  ;;  %v472_v29 = vand.u32 4294901760, %v406_v8  ;;  %v414_v39 = vld [vmem:[#allocation13 + $0x1e8] sm:$0xff] }
 0x15a   :  { %17047 = vst [vmem:[#allocation65_spill] sm:$0xff] %v11299_v13  ;;  %8562 = vmatprep.subr.bf16.mxu1 %v11277_v53  ;;  %8658 = vmatprep.subr.bf16.mxu0 %v11277_v53  ;;  %v470_v30 = vand.u32 4294901760, %v401_v9  ;;  %v11309_v32 = vpack.c.bf16 %v464_v20, %v460_v6  ;;  %v11311_v33 = vsub.f32 %v394_v54, %v460_v6  ;;  %v474_v35 = vand.u32 4294901760, %v405_v14  ;;  %v409_v40 = vld [vmem:[#allocation13 + $0x1c0] sm:$0xff] }
 0x15b   :  { %v11313_v34 = vsub.f32 %v398_v63, %v464_v20  ;;  %v413_v41 = vld [vmem:[#allocation13 + $0x1e0] sm:$0xff]  ;;  %v11315_v42 = vpack.c.bf16 %v466_v26, %v462_v21  ;;  %v11317_v47 = vsub.f32 %v393_v1, %v462_v21  ;;  %v11319_v48 = vsub.f32 %v397_v2, %v466_v26 }
 0x15c   :  { %17048 = vst [vmem:[#allocation66_spill] sm:$0xff] %v11309_v32  ;;  %v11321_v49 = vpack.c.bf16 %v472_v29, %v468_v27  ;;  %v418_v56 = vld [vmem:[#allocation7] sm:$0xff]  ;;  %v11325_v54 = vsub.f32 %v402_v7, %v468_v27  ;;  %v11327_v57 = vsub.f32 %v406_v8, %v472_v29  ;;  %v11329_v58 = vpack.c.bf16 %v474_v35, %v470_v30 }
 0x15d   :  { %17049 = vst [vmem:[#allocation67_spill] sm:$0xff] %v11315_v42  ;;  %8564 = vmatpush1.bf16.msra.mxu1 %v11287_v3  ;;  %8660 = vmatpush1.bf16.msra.mxu0 %v11287_v3  ;;  %v476_v60 = vand.u32 4294901760, %v410_v31  ;;  %v11333_v61 = vsub.f32 %v401_v9, %v470_v30  ;;  %v480_v62 = vand.u32 4294901760, %v414_v39  ;;  %v478_v63 = vand.u32 4294901760, %v409_v40 }
 0x15e   :  { %17050 = vst [vmem:[#allocation68_spill] sm:$0xff] %v11321_v49  ;;  %17051 = vst [vmem:[#allocation69_spill] sm:$0xff] %v11329_v58  ;;  %8566 = vmatprep.subr.bf16.mxu1 %v11293_v10  ;;  %8662 = vmatprep.subr.bf16.mxu0 %v11293_v10  ;;  %v482_v1 = vand.u32 4294901760, %v413_v41  ;;  %v11335_v2 = vsub.f32 %v405_v14, %v474_v35  ;;  %v530_v6 = vand.u32 4294901760, %v11237_v17  ;;  %v542_v7 = vand.u32 4294901760, %v11239_v18 }
 0x15f   :  { %v11339_v8 = vand.u32 4294901760, %v418_v56  ;;  %v11341_v20 = vpack.c.bf16 %v480_v62, %v476_v60  ;;  %v11343_v21 = vsub.f32 %v410_v31, %v476_v60  ;;  %v11345_v26 = vsub.f32 %v414_v39, %v480_v62 }
 0x160   :  { %v11347_v27 = vpack.c.bf16 %v482_v1, %v478_v63  ;;  %v11351_v9 = vsub.f32 %v409_v40, %v478_v63  ;;  %v531_v14 = vsub.f32 %v11237_v17, %v530_v6  ;;  %v543_v29 = vsub.f32 %v11239_v18, %v542_v7 }
 0x161   :  { %17052 = vst [vmem:[#allocation70_spill] sm:$0xff] %v11339_v8  ;;  %17053 = vst [vmem:[#allocation71_spill] sm:$0xff] %v11341_v20  ;;  %8568 = vmatpush1.bf16.msra.mxu1 %v11299_v13  ;;  %8664 = vmatpush1.bf16.msra.mxu0 %v11299_v13  ;;  %v536_v30 = vand.u32 4294901760, %v11243_v23  ;;  %v11358_v31 = vsub.f32 %v413_v41, %v482_v1  ;;  %v11361_v35 = vsub.f32 %v418_v56, %v11339_v8 }
 0x162   :  { %17054 = vst [vmem:[#allocation72_spill] sm:$0xff] %v11343_v21  ;;  %17055 = vst [vmem:[#allocation73_spill] sm:$0xff] %v11345_v26  ;;  %8570 = vmatprep.subr.bf16.mxu1 %v11309_v32  ;;  %8666 = vmatprep.subr.bf16.mxu0 %v11309_v32  ;;  %v548_v39 = vand.u32 4294901760, %v11245_v24  ;;  %v554_v40 = vand.u32 4294901760, %v11251_v28  ;;  %v532_v60 = vand.u32 4294901760, %v531_v14  ;;  %v544_v62 = vand.u32 4294901760, %v543_v29 }
 0x163   :  { %17056 = vst [vmem:[#allocation74_spill] sm:$0xff] %v11347_v27  ;;  %17057 = vst [vmem:[#allocation75_spill] sm:$0xff] %v11351_v9  ;;  %v537_v63 = vsub.f32 %v11243_v23, %v536_v30  ;;  %v566_v0 = vand.u32 4294901760, %v11256_v36  ;;  %v8677_v13 = vpack.c.bf16 %v542_v7, %v530_v6  ;;  %v11368_v10 = vand.u32 4294901760, %v11361_v35 }
 0x164   :  { %17058 = vst [vmem:[#allocation76_spill] sm:$0xff] %v11358_v31  ;;  %17059 = vst [vmem:[#allocation77_spill] sm:$0xff] %v11361_v35  ;;  %v549_v41 = vsub.f32 %v11245_v24, %v548_v39  ;;  %v555_v1 = vsub.f32 %v11251_v28, %v554_v40  ;;  %v8581_v56 = vpack.c.bf16 %v544_v62, %v532_v60  ;;  %v560_v53 = vand.u32 4294901760, %v11261_v38 }
 0x165   :  { %17060 = vst [vmem:[#allocation78_spill] sm:$0xff] %v11368_v10  ;;  %8572 = vmatpush1.bf16.msra.mxu1 %v11315_v42  ;;  %8668 = vmatpush1.bf16.msra.mxu0 %v11315_v42  ;;  %v538_v32 = vand.u32 4294901760, %v537_v63  ;;  %v8679_v14 = vpack.c.bf16 %v548_v39, %v536_v30  ;;  %v567_v29 = vsub.f32 %v11256_v36, %v566_v0  ;;  %v572_v44 = vand.u32 4294901760, %v11263_v43 }
 0x166   :  { %8574 = vmatprep.subr.bf16.mxu1 %v11321_v49  ;;  %8670 = vmatprep.subr.bf16.mxu0 %v11321_v49  ;;  %v520_v6 = vsub.f32 %v11361_v35, %v11368_v10  ;;  %v550_v7 = vand.u32 4294901760, %v549_v41  ;;  %v556_v3 = vand.u32 4294901760, %v555_v1  ;;  %v578_v60 = vand.u32 4294901760, %v11267_v45 }
 0x167   :  { %v568_v50 = vand.u32 4294901760, %v567_v29  ;;  %v590_v30 = vand.u32 4294901760, %v11269_v46  ;;  %v8681_v62 = vpack.c.bf16 %v566_v0, %v554_v40  ;;  %v561_v63 = vsub.f32 %v11261_v38, %v560_v53 }
 0x168   :  { %v11383_v39 = vand.u32 4294901760, %v520_v6  ;;  %v584_v49 = vand.u32 4294901760, %v11273_v51  ;;  %v8583_v41 = vpack.c.bf16 %v550_v7, %v538_v32  ;;  %v573_v29 = vsub.f32 %v11263_v43, %v572_v44 }
 0x169   :  { %8576 = vmatpush1.bf16.msra.mxu1 %v11329_v58  ;;  %8672 = vmatpush1.bf16.msra.mxu0 %v11329_v58  ;;  %v8585_v1 = vpack.c.bf16 %v568_v50, %v556_v3  ;;  %v596_v35 = vand.u32 4294901760, %v11275_v52  ;;  %v562_v6 = vand.u32 4294901760, %v561_v63  ;;  %v8683_v0 = vpack.c.bf16 %v572_v44, %v560_v53 }
 0x16a   :  { %17061 = vst [vmem:[#allocation79_spill] sm:$0xff] %v11383_v39  ;;  %8578 = vmatprep.subr.bf16.mxu1 %v11341_v20  ;;  %8674 = vmatprep.subr.bf16.mxu0 %v11341_v20  ;;  %v579_v40 = vsub.f32 %v11267_v45, %v578_v60  ;;  %v591_v42 = vsub.f32 %v11269_v46, %v590_v30  ;;  %v574_v37 = vand.u32 4294901760, %v573_v29  ;;  %v602_v7 = vand.u32 4294901760, %v11281_v55 }
 0x16b   :  { %v8685_v25 = vpack.c.bf16 %v590_v30, %v578_v60  ;;  %v585_v58 = vsub.f32 %v11273_v51, %v584_v49  ;;  %v597_v50 = vsub.f32 %v11275_v52, %v596_v35  ;;  %v614_v22 = vand.u32 4294901760, %v11285_v59 }
 0x16c   :  { %v580_v3 = vand.u32 4294901760, %v579_v40  ;;  %v592_v32 = vand.u32 4294901760, %v591_v42  ;;  %v8687_v63 = vpack.c.bf16 %v596_v35, %v584_v49  ;;  %v608_v29 = vand.u32 4294901760, %v11289_v4 }
 0x16d   :  { %8580 = vmatpush1.bf16.msra.mxu1 %v11347_v27  ;;  %8676 = vmatpush1.bf16.msra.mxu0 %v11347_v27  ;;  %v586_v44 = vand.u32 4294901760, %v585_v58  ;;  %v598_v53 = vand.u32 4294901760, %v597_v50  ;;  %v8587_v60 = vpack.c.bf16 %v574_v37, %v562_v6  ;;  %v603_v30 = vsub.f32 %v11281_v55, %v602_v7 }
 0x16e   :  { %8582 = vmatprep.subr.bf16.mxu1 %v8581_v56  ;;  %8678 = vmatprep.subr.bf16.mxu0 %v8677_v13  ;;  %v615_v42 = vsub.f32 %v11285_v59, %v614_v22  ;;  %v620_v40 = vand.u32 4294901760, %v11291_v5  ;;  %v8589_v20 = vpack.c.bf16 %v592_v32, %v580_v3  ;;  %v609_v16 = vsub.f32 %v11289_v4, %v608_v29 }
 0x16f   :  { %v8591_v8 = vpack.c.bf16 %v598_v53, %v586_v44  ;;  %v626_v27 = vand.u32 4294901760, %v11295_v11  ;;  %v604_v49 = vand.u32 4294901760, %v603_v30  ;;  %v8689_v13 = vpack.c.bf16 %v614_v22, %v602_v7 }
 0x170   :  { %522 = vmatmul.mubr.f32.vlgmr.msra.gmra.mrb[0].mxu1 %v11383_v39  ;;  %997 = vmatmul.mubr.f32.vlgmr.msra.gmra.mrb[0].mxu0 %v11368_v10  ;;  %v616_v58 = vand.u32 4294901760, %v615_v42  ;;  %v621_v37 = vsub.f32 %v11291_v5, %v620_v40  ;;  %v610_v35 = vand.u32 4294901760, %v609_v16  ;;  %v638_v6 = vand.u32 4294901760, %v11297_v12 }
 0x171   :  { %8584 = vmatpush1.bf16.msra.mxu1 %v8583_v41  ;;  %8680 = vmatpush1.bf16.msra.mxu0 %v8679_v14  ;;  %v627_v56 = vsub.f32 %v11295_v11, %v626_v27  ;;  %v632_v50 = vand.u32 4294901760, %v11303_v15  ;;  %v8691_v32 = vpack.c.bf16 %v620_v40, %v608_v29  ;;  %v644_v44 = vand.u32 4294901760, %v11305_v19 }
 0x172   :  { %8586 = vmatprep.subr.bf16.mxu1 %v8585_v1  ;;  %8682 = vmatprep.subr.bf16.mxu0 %v8681_v62  ;;  %v622_v3 = vand.u32 4294901760, %v621_v37  ;;  %v650_v53 = vand.u32 4294901760, %v11311_v33  ;;  %v8593_v22 = vpack.c.bf16 %v616_v58, %v604_v49  ;;  %v639_v41 = vsub.f32 %v11297_v12, %v638_v6 }
 0x173   :  { %v628_v7 = vand.u32 4294901760, %v627_v56  ;;  %v633_v16 = vsub.f32 %v11303_v15, %v632_v50  ;;  %v17062_v14 = vmov 0.0   ;;  %v8693_v42 = vpack.c.bf16 %v638_v6, %v626_v27 }
 0x174   :  { %752 = vmatprep.mubr.f32.mxu1 %v17062_v14  ;;  %1163 = vmatprep.mubr.f32.mxu0 %v17062_v14  ;;  %v8595_v30 = vpack.c.bf16 %v622_v3, %v610_v35  ;;  %v645_v62 = vsub.f32 %v11305_v19, %v644_v44  ;;  %v651_v1 = vsub.f32 %v11311_v33, %v650_v53  ;;  %v640_v29 = vand.u32 4294901760, %v639_v41 }
 0x175   :  { %8588 = vmatpush1.bf16.msra.mxu1 %v8587_v60  ;;  %8684 = vmatpush1.bf16.msra.mxu0 %v8683_v0  ;;  %v634_v40 = vand.u32 4294901760, %v633_v16  ;;  %v662_v49 = vand.u32 4294901760, %v11313_v34  ;;  %v656_v58 = vand.u32 4294901760, %v11317_v47  ;;  %v8695_v56 = vpack.c.bf16 %v644_v44, %v632_v50 }
 0x176   :  { %8590 = vmatprep.subr.bf16.mxu1 %v8589_v20  ;;  %8686 = vmatprep.subr.bf16.mxu0 %v8685_v25  ;;  %v646_v37 = vand.u32 4294901760, %v645_v62  ;;  %v668_v10 = vand.u32 4294901760, %v11319_v48  ;;  %v674_v27 = vand.u32 4294901760, %v11325_v54  ;;  %v8597_v35 = vpack.c.bf16 %v640_v29, %v628_v7 }
 0x177   :  { %v652_v6 = vand.u32 4294901760, %v651_v1  ;;  %v663_v3 = vsub.f32 %v11313_v34, %v662_v49  ;;  %v657_v0 = vsub.f32 %v11317_v47, %v656_v58  ;;  %v8697_v41 = vpack.c.bf16 %v662_v49, %v650_v53 }
 0x178   :  { %v8599_v60 = vpack.c.bf16 %v646_v37, %v634_v40  ;;  %v669_v16 = vsub.f32 %v11319_v48, %v668_v10  ;;  %v675_v39 = vsub.f32 %v11325_v54, %v674_v27  ;;  %v686_v50 = vand.u32 4294901760, %v11327_v57 }
 0x179   :  { %8592 = vmatpush1.bf16.msra.mxu1 %v8591_v8  ;;  %8688 = vmatpush1.bf16.msra.mxu0 %v8687_v63  ;;  %v664_v25 = vand.u32 4294901760, %v663_v3  ;;  %v658_v20 = vand.u32 4294901760, %v657_v0  ;;  %v680_v44 = vand.u32 4294901760, %v11333_v61  ;;  %v8699_v62 = vpack.c.bf16 %v668_v10, %v656_v58 }
 0x17a   :  { %8594 = vmatprep.subr.bf16.mxu1 %v8593_v22  ;;  %8690 = vmatprep.subr.bf16.mxu0 %v8689_v13  ;;  %v670_v7 = vand.u32 4294901760, %v669_v16  ;;  %v692_v1 = vand.u32 4294901760, %v11335_v2  ;;  %v698_v53 = vand.u32 4294901760, %v11343_v21  ;;  %v676_v40 = vand.u32 4294901760, %v675_v39 }
 0x17b   :  { %v8601_v29 = vpack.c.bf16 %v664_v25, %v652_v6  ;;  %v687_v49 = vsub.f32 %v11327_v57, %v686_v50  ;;  %v681_v8 = vsub.f32 %v11333_v61, %v680_v44  ;;  %v8701_v37 = vpack.c.bf16 %v686_v50, %v674_v27 }
 0x17c   :  { %v8603_v63 = vpack.c.bf16 %v670_v7, %v658_v20  ;;  %v693_v3 = vsub.f32 %v11335_v2, %v692_v1  ;;  %v699_v0 = vsub.f32 %v11343_v21, %v698_v53  ;;  %v710_v22 = vand.u32 4294901760, %v11345_v26 }
 0x17d   :  { %8596 = vmatpush1.bf16.msra.mxu1 %v8595_v30  ;;  %8692 = vmatpush1.bf16.msra.mxu0 %v8691_v32  ;;  %v688_v13 = vand.u32 4294901760, %v687_v49  ;;  %v682_v10 = vand.u32 4294901760, %v681_v8  ;;  %v704_v58 = vand.u32 4294901760, %v11351_v9  ;;  %v11439_v6 = vpack.c.bf16 %v692_v1, %v680_v44  ;;  %v368_v49 = vld [vmem:[#allocation13 + $0x78] sm:$0xff]  ;;  %v302_v32 = vld [vmem:[#allocation12 + $0x68] sm:$0xff] }
 0x17e   :  { %8598 = vmatprep.subr.bf16.mxu1 %v8597_v35  ;;  %8694 = vmatprep.subr.bf16.mxu0 %v8693_v42  ;;  %v694_v39 = vand.u32 4294901760, %v693_v3  ;;  %v700_v16 = vand.u32 4294901760, %v699_v0  ;;  %v716_v27 = vand.u32 4294901760, %v11358_v31  ;;  %v711_v20 = vsub.f32 %v11345_v26, %v710_v22  ;;  %v360_v0 = vld [vmem:[#allocation13 + $0x38] sm:$0xff]  ;;  %v363_v26 = vld [vmem:[#allocation13 + $0x50] sm:$0xff] }
 0x17f   :  { %v8605_v25 = vpack.c.bf16 %v688_v13, %v676_v40  ;;  %v705_v30 = vsub.f32 %v11351_v9, %v704_v58  ;;  %v11446_v7 = vpack.c.bf16 %v710_v22, %v698_v53  ;;  %v290_v22 = vld [vmem:[#allocation12 + $0x8] sm:$0xff]  ;;  %v364_v3 = vld [vmem:[#allocation13 + $0x58] sm:$0xff] }
 0x180   :  { %v8607_v50 = vpack.c.bf16 %v694_v39, %v682_v10  ;;  %v717_v35 = vsub.f32 %v11358_v31, %v716_v27  ;;  %v11449_v42 = vpack.c.bf16 %v716_v27, %v704_v58  ;;  %v712_v44 = vand.u32 4294901760, %v711_v20  ;;  %v294_v58 = vld [vmem:[#allocation12 + $0x28] sm:$0xff]  ;;  %v355_v39 = vld [vmem:[#allocation13 + $0x10] sm:$0xff]  ;;  %v293_v10 = vld [vmem:[#allocation12 + $0x20] sm:$0xff] }
 0x181   :  { %8600 = vmatpush1.bf16.msra.mxu1 %v8599_v60  ;;  %8696 = vmatpush1.bf16.msra.mxu0 %v8695_v56  ;;  %v706_v1 = vand.u32 4294901760, %v705_v30  ;;  %v356_v60 = vld [vmem:[#allocation13 + $0x18] sm:$0xff]  ;;  %v1279_v30 = vand.u32 4294901760, %v360_v0  ;;  %v1277_v56 = vand.u32 4294901760, %v355_v39  ;;  %v1283_v31 = vand.u32 4294901760, %v364_v3 }
 0x182   :  { %8602 = vmatprep.subr.bf16.mxu1 %v8601_v29  ;;  %8698 = vmatprep.subr.bf16.mxu0 %v8697_v41  ;;  %v718_v8 = vand.u32 4294901760, %v717_v35  ;;  %v8609_v13 = vpack.c.bf16 %v712_v44, %v700_v16  ;;  %v359_v35 = vld [vmem:[#allocation13 + $0x30] sm:$0xff]  ;;  %v289_v44 = vld [vmem:[#allocation12] sm:$0xff]  ;;  %v1275_v20 = vand.u32 4294901760, %v356_v60  ;;  %v2130_v29 = vand.u32 4294901760, %v290_v22 }
 0x183   :  { %v2134_v16 = vand.u32 4294901760, %v294_v58  ;;  %v2132_v53 = vand.u32 4294901760, %v289_v44  ;;  %v2136_v41 = vand.u32 4294901760, %v293_v10 }
 0x184   :  { %v8611_v27 = vpack.c.bf16 %v718_v8, %v706_v1  ;;  %v11481_v40 = vpack.c.bf16 %v1279_v30, %v1275_v20  ;;  %v11483_v1 = vsub.f32 %v356_v60, %v1275_v20  ;;  %v11485_v8 = vsub.f32 %v360_v0, %v1279_v30 }
 0x185   :  { %8604 = vmatpush1.bf16.msra.mxu1 %v8603_v63  ;;  %8700 = vmatpush1.bf16.msra.mxu0 %v8699_v62  ;;  %v1281_v63 = vand.u32 4294901760, %v359_v35  ;;  %v11490_v21 = vsub.f32 %v290_v22, %v2130_v29  ;;  %v11492_v62 = vsub.f32 %v294_v58, %v2134_v16  ;;  %v11497_v60 = vsub.f32 %v355_v39, %v1277_v56  ;;  %v372_v39 = vld [vmem:[#allocation13 + $0x98] sm:$0xff] }
 0x186   :  { %8606 = vmatprep.subr.bf16.mxu1 %v8605_v25  ;;  %8702 = vmatprep.subr.bf16.mxu0 %v8701_v37  ;;  %17063 = vst [vmem:[#allocation80_spill] sm:$0xff] %v11481_v40  ;;  %17064 = vst [vmem:[#allocation81_spill] sm:$0xff] %v11483_v1  ;;  %v11487_v25 = vpack.c.bf16 %v2134_v16, %v2130_v29  ;;  %v298_v37 = vld [vmem:[#allocation12 + $0x48] sm:$0xff]  ;;  %v367_v40 = vld [vmem:[#allocation13 + $0x70] sm:$0xff]  ;;  %v11501_v20 = vpack.c.bf16 %v2136_v41, %v2132_v53  ;;  %v2142_v30 = vand.u32 4294901760, %v302_v32 }
 0x187   :  { %17065 = vst [vmem:[#allocation82_spill] sm:$0xff] %v11485_v8  ;;  %17067 = vst [vmem:[#allocation84_spill] sm:$0xff] %v11490_v21  ;;  %v11494_v9 = vpack.c.bf16 %v1281_v63, %v1277_v56  ;;  %v11499_v0 = vsub.f32 %v359_v35, %v1281_v63  ;;  %v11503_v29 = vsub.f32 %v289_v44, %v2132_v53  ;;  %v2138_v58 = vand.u32 4294901760, %v298_v37  ;;  %v301_v16 = vld [vmem:[#allocation12 + $0x60] sm:$0xff]  ;;  %v376_v35 = vld [vmem:[#allocation13 + $0xb8] sm:$0xff] }
 0x188   :  { %17066 = vst [vmem:[#allocation83_spill] sm:$0xff] %v11487_v25  ;;  %17069 = vst [vmem:[#allocation86_spill] sm:$0xff] %v11497_v60  ;;  %v11505_v22 = vsub.f32 %v293_v10, %v2136_v41  ;;  %v1289_v56 = vand.u32 4294901760, %v367_v40  ;;  %v306_v63 = vld [vmem:[#allocation12 + $0x88] sm:$0xff] }
 0x189   :  { %8608 = vmatpush1.bf16.msra.mxu1 %v8607_v50  ;;  %8704 = vmatpush1.bf16.msra.mxu0 %v11439_v6  ;;  %17068 = vst [vmem:[#allocation85_spill] sm:$0xff] %v11494_v9  ;;  %17070 = vst [vmem:[#allocation87_spill] sm:$0xff] %v11499_v0  ;;  %v1287_v50 = vand.u32 4294901760, %v368_v49  ;;  %v297_v6 = vld [vmem:[#allocation12 + $0x40] sm:$0xff]  ;;  %v11514_v53 = vpack.c.bf16 %v2142_v30, %v2138_v58  ;;  %v11516_v10 = vsub.f32 %v298_v37, %v2138_v58  ;;  %v310_v44 = vld [vmem:[#allocation12 + $0xa8] sm:$0xff] }
 0x18a   :  { %8610 = vmatprep.subr.bf16.mxu1 %v8609_v13  ;;  %8706 = vmatprep.subr.bf16.mxu0 %v11446_v7  ;;  %17071 = vst [vmem:[#allocation88_spill] sm:$0xff] %v11501_v20  ;;  %17072 = vst [vmem:[#allocation89_spill] sm:$0xff] %v11503_v29  ;;  %v11509_v13 = vsub.f32 %v364_v3, %v1283_v31  ;;  %v1285_v7 = vand.u32 4294901760, %v363_v26  ;;  %v2140_v41 = vand.u32 4294901760, %v297_v6  ;;  %v17080_v3 = vld [vmem:[#allocation56_spill] sm:$0xff]  ;;  %v1291_v37 = vand.u32 4294901760, %v372_v39 }
 0x18b   :  { %17073 = vst [vmem:[#allocation90_spill] sm:$0xff] %v11505_v22  ;;  %v11507_v9 = vpack.c.bf16 %v1287_v50, %v1283_v31  ;;  %v11512_v20 = vsub.f32 %v368_v49, %v1287_v50  ;;  %17077 = vst [vmem:[#allocation94_spill] sm:$0xff] %v11514_v53  ;;  %v371_v22 = vld [vmem:[#allocation13 + $0x90] sm:$0xff]  ;;  %v17079_v31 = vpack.c.bf16 %v11239_v18, %v11237_v17  ;;  %v2144_v49 = vand.u32 4294901760, %v301_v16  ;;  %v305_v53 = vld [vmem:[#allocation12 + $0x80] sm:$0xff] }
 0x18c   :  { %17075 = vst [vmem:[#allocation92_spill] sm:$0xff] %v11509_v13  ;;  %17078 = vst [vmem:[#allocation95_spill] sm:$0xff] %v11516_v10  ;;  %v11522_v13 = vsub.f32 %v302_v32, %v2142_v30  ;;  %v375_v50 = vld [vmem:[#allocation13 + $0xb0] sm:$0xff]  ;;  %v1295_v58 = vand.u32 4294901760, %v376_v35  ;;  %v2146_v10 = vand.u32 4294901760, %v306_v63  ;;  %v11534_v18 = vsub.f32 %v297_v6, %v2140_v41  ;;  %v314_v6 = vld [vmem:[#allocation12 + $0xc8] sm:$0xff] }
 0x18d   :  { %17074 = vst [vmem:[#allocation91_spill] sm:$0xff] %v11507_v9  ;;  %8612 = vmatpush1.bf16.msra.mxu1 %v8611_v27  ;;  %8708 = vmatpush1.bf16.msra.mxu0 %v11449_v42  ;;  %17076 = vst [vmem:[#allocation93_spill] sm:$0xff] %v11512_v20  ;;  %v11524_v27 = vpack.c.bf16 %v1289_v56, %v1285_v7  ;;  %v11526_v42 = vsub.f32 %v363_v26, %v1285_v7  ;;  %v17085_v9 = vld [vmem:[#allocation70_spill] sm:$0xff]  ;;  %v2150_v32 = vand.u32 4294901760, %v310_v44 }
 0x18e   :  { %8614 = vmatprep.subr.bf16.mxu1 %v17079_v31  ;;  %8710 = vmatprep.subr.bf16.mxu0 %v17080_v3  ;;  %17081 = vst [vmem:[#allocation56_spill] sm:$0xff] %v11522_v13  ;;  %v11528_v20 = vsub.f32 %v367_v40, %v1289_v56  ;;  %v11532_v17 = vpack.c.bf16 %v2144_v49, %v2140_v41  ;;  %17087 = vst [vmem:[#allocation100_spill] sm:$0xff] %v11534_v18  ;;  %v1293_v30 = vand.u32 4294901760, %v371_v22  ;;  %v309_v26 = vld [vmem:[#allocation12 + $0xa0] sm:$0xff]  ;;  %v17089_v40 = vld [vmem:[#allocation57_spill] sm:$0xff] }
 0x18f   :  { %17082 = vst [vmem:[#allocation96_spill] sm:$0xff] %v11524_v27  ;;  %17083 = vst [vmem:[#allocation97_spill] sm:$0xff] %v11526_v42  ;;  %v17088_v7 = vpack.c.bf16 %v11245_v24, %v11243_v23  ;;  %v11540_v56 = vsub.f32 %v301_v16, %v2144_v49  ;;  %v11542_v31 = vpack.c.bf16 %v1295_v58, %v1291_v37  ;;  %v380_v42 = vld [vmem:[#allocation13 + $0xd8] sm:$0xff]  ;;  %v17094_v18 = vld [vmem:[#allocation58_spill] sm:$0xff]  ;;  %v2148_v49 = vand.u32 4294901760, %v305_v53 }
 0x190   :  { %17084 = vst [vmem:[#allocation98_spill] sm:$0xff] %v11528_v20  ;;  %754 = vmatmul.mubr.f32.vlgmr.msra.gmra.mrb[0].mxu1 %v17085_v9  ;;  %1165 = vmatmul.mubr.f32.vlgmr.msra.gmra.mrb[0].mxu0 %v17085_v9  ;;  %17086 = vst [vmem:[#allocation99_spill] sm:$0xff] %v11532_v17  ;;  %v11544_v3 = vsub.f32 %v372_v39, %v1291_v37  ;;  %v1297_v20 = vand.u32 4294901760, %v375_v50  ;;  %v384_v13 = vld [vmem:[#allocation13 + $0xf8] sm:$0xff]  ;;  %v17093_v41 = vpack.c.bf16 %v11256_v36, %v11251_v28  ;;  %v379_v39 = vld [vmem:[#allocation13 + $0xd0] sm:$0xff] }
 0x191   :  { %8616 = vmatpush1.bf16.msra.mxu1 %v17088_v7  ;;  %8712 = vmatpush1.bf16.msra.mxu0 %v17089_v40  ;;  %17090 = vst [vmem:[#allocation57_spill] sm:$0xff] %v11540_v56  ;;  %17091 = vst [vmem:[#allocation101_spill] sm:$0xff] %v11542_v31  ;;  %v11550_v23 = vsub.f32 %v376_v35, %v1295_v58  ;;  %v11552_v24 = vpack.c.bf16 %v2150_v32, %v2146_v10  ;;  %v318_v7 = vld [vmem:[#allocation12 + $0xe8] sm:$0xff]  ;;  %v2152_v36 = vand.u32 4294901760, %v309_v26  ;;  %v383_v35 = vld [vmem:[#allocation13 + $0xf0] sm:$0xff] }
 0x192   :  { %17092 = vst [vmem:[#allocation102_spill] sm:$0xff] %v11544_v3  ;;  %8618 = vmatprep.subr.bf16.mxu1 %v17093_v41  ;;  %8714 = vmatprep.subr.bf16.mxu0 %v17094_v18  ;;  %v11554_v16 = vsub.f32 %v306_v63, %v2146_v10  ;;  %v11558_v37 = vsub.f32 %v310_v44, %v2150_v32  ;;  %v1299_v18 = vand.u32 4294901760, %v380_v42  ;;  %v1303_v63 = vand.u32 4294901760, %v384_v13 }
 0x193   :  { %17095 = vst [vmem:[#allocation58_spill] sm:$0xff] %v11550_v23  ;;  %17096 = vst [vmem:[#allocation103_spill] sm:$0xff] %v11552_v24  ;;  %888 = vmatprep.mubr.f32.mxu1 %v17062_v14  ;;  %1267 = vmatprep.mubr.f32.mxu0 %v17062_v14  ;;  %v11560_v40 = vpack.c.bf16 %v1297_v20, %v1293_v30  ;;  %v11562_v28 = vsub.f32 %v371_v22, %v1293_v30  ;;  %v2154_v10 = vand.u32 4294901760, %v314_v6  ;;  %v313_v30 = vld [vmem:[#allocation12 + $0xc0] sm:$0xff] }
 0x194   :  { %17097 = vst [vmem:[#allocation104_spill] sm:$0xff] %v11554_v16  ;;  %17098 = vst [vmem:[#allocation105_spill] sm:$0xff] %v11558_v37  ;;  %v11564_v58 = vsub.f32 %v375_v50, %v1297_v20  ;;  %v17102_v41 = vpack.c.bf16 %v11263_v43, %v11261_v38  ;;  %v17103_v16 = vld [vmem:[#allocation59_spill] sm:$0xff]  ;;  %v11570_v23 = vpack.c.bf16 %v2152_v36, %v2148_v49  ;;  %v2158_v32 = vand.u32 4294901760, %v318_v7  ;;  %v388_v37 = vld [vmem:[#allocation13 + $0x118] sm:$0xff] }
 0x195   :  { %17099 = vst [vmem:[#allocation106_spill] sm:$0xff] %v11560_v40  ;;  %17100 = vst [vmem:[#allocation107_spill] sm:$0xff] %v11562_v28  ;;  %8716 = vmatpush1.bf16.msra.mxu0 %v17103_v16  ;;  %v11572_v44 = vsub.f32 %v305_v53, %v2148_v49  ;;  %v1301_v22 = vand.u32 4294901760, %v379_v39  ;;  %v317_v28 = vld [vmem:[#allocation12 + $0xe0] sm:$0xff]  ;;  %v17106_v20 = vpack.c.bf16 %v11269_v46, %v11267_v45  ;;  %v17107_v50 = vld [vmem:[#allocation60_spill] sm:$0xff]  ;;  %v1305_v16 = vand.u32 4294901760, %v383_v35 }
 0x196   :  { %17101 = vst [vmem:[#allocation108_spill] sm:$0xff] %v11564_v58  ;;  %8620 = vmatpush1.bf16.msra.mxu1 %v17102_v41  ;;  %17104 = vst [vmem:[#allocation59_spill] sm:$0xff] %v11570_v23  ;;  %8718 = vmatprep.subr.bf16.mxu0 %v17107_v50  ;;  %v11578_v58 = vsub.f32 %v309_v26, %v2152_v36  ;;  %v11580_v38 = vpack.c.bf16 %v1303_v63, %v1299_v18  ;;  %v392_v53 = vld [vmem:[#allocation13 + $0x138] sm:$0xff]  ;;  %v322_v49 = vld [vmem:[#allocation12 + $0x108] sm:$0xff]  ;;  %v2156_v36 = vand.u32 4294901760, %v313_v30 }
 0x197   :  { %17105 = vst [vmem:[#allocation109_spill] sm:$0xff] %v11572_v44  ;;  %8622 = vmatprep.subr.bf16.mxu1 %v17106_v20  ;;  %v11582_v43 = vsub.f32 %v380_v42, %v1299_v18  ;;  %v326_v41 = vld [vmem:[#allocation12 + $0x128] sm:$0xff]  ;;  %v11584_v44 = vsub.f32 %v384_v13, %v1303_v63  ;;  %v11586_v3 = vpack.c.bf16 %v2158_v32, %v2154_v10  ;;  %v2160_v20 = vand.u32 4294901760, %v317_v28  ;;  %v387_v42 = vld [vmem:[#allocation13 + $0x110] sm:$0xff]  ;;  %v17118_v50 = vld [vmem:[#allocation61_spill] sm:$0xff] }
 0x198   :  { %17108 = vst [vmem:[#allocation60_spill] sm:$0xff] %v11578_v58  ;;  %17109 = vst [vmem:[#allocation110_spill] sm:$0xff] %v11580_v38  ;;  %v11588_v56 = vsub.f32 %v314_v6, %v2154_v10  ;;  %v11590_v45 = vsub.f32 %v318_v7, %v2158_v32  ;;  %v11592_v46 = vpack.c.bf16 %v1305_v16, %v1301_v22  ;;  %v1307_v13 = vand.u32 4294901760, %v388_v37  ;;  %v391_v10 = vld [vmem:[#allocation13 + $0x130] sm:$0xff]  ;;  %v321_v7 = vld [vmem:[#allocation12 + $0x100] sm:$0xff] }
 0x199   :  { %17110 = vst [vmem:[#allocation111_spill] sm:$0xff] %v11582_v43  ;;  %17111 = vst [vmem:[#allocation112_spill] sm:$0xff] %v11584_v44  ;;  %v11594_v26 = vsub.f32 %v379_v39, %v1301_v22  ;;  %v17117_v18 = vpack.c.bf16 %v11275_v52, %v11273_v51  ;;  %8720 = vmatpush1.bf16.msra.mxu0 %v17118_v50  ;;  %v1311_v63 = vand.u32 4294901760, %v392_v53  ;;  %v2162_v44 = vand.u32 4294901760, %v322_v49  ;;  %v17120_v39 = vld [vmem:[#allocation62_spill] sm:$0xff]  ;;  %v400_v50 = vld [vmem:[#allocation13 + $0x178] sm:$0xff] }
 0x19a   :  { %17112 = vst [vmem:[#allocation113_spill] sm:$0xff] %v11586_v3  ;;  %17113 = vst [vmem:[#allocation114_spill] sm:$0xff] %v11588_v56  ;;  %v2166_v6 = vand.u32 4294901760, %v326_v41  ;;  %v17119_v32 = vpack.c.bf16 %v11285_v59, %v11281_v55  ;;  %8722 = vmatprep.subr.bf16.mxu0 %v17120_v39  ;;  %v11604_v22 = vsub.f32 %v383_v35, %v1305_v16  ;;  %v325_v52 = vld [vmem:[#allocation12 + $0x120] sm:$0xff]  ;;  %v1309_v58 = vand.u32 4294901760, %v387_v42  ;;  %v330_v55 = vld [vmem:[#allocation12 + $0x148] sm:$0xff] }
 0x19b   :  { %17114 = vst [vmem:[#allocation115_spill] sm:$0xff] %v11590_v45  ;;  %17115 = vst [vmem:[#allocation116_spill] sm:$0xff] %v11592_v46  ;;  %8624 = vmatpush1.bf16.msra.mxu1 %v17117_v18  ;;  %v11608_v51 = vsub.f32 %v313_v30, %v2156_v36  ;;  %v396_v18 = vld [vmem:[#allocation13 + $0x158] sm:$0xff]  ;;  %v11610_v45 = vsub.f32 %v317_v28, %v2160_v20  ;;  %v11612_v56 = vpack.c.bf16 %v1311_v63, %v1307_v13  ;;  %v334_v59 = vld [vmem:[#allocation12 + $0x168] sm:$0xff] }
 0x19c   :  { %17116 = vst [vmem:[#allocation117_spill] sm:$0xff] %v11594_v26  ;;  %8626 = vmatprep.subr.bf16.mxu1 %v17119_v32  ;;  %17121 = vst [vmem:[#allocation61_spill] sm:$0xff] %v11604_v22  ;;  %v11606_v26 = vpack.c.bf16 %v2160_v20, %v2156_v36  ;;  %v11614_v43 = vsub.f32 %v388_v37, %v1307_v13  ;;  %v11616_v32 = vsub.f32 %v392_v53, %v1311_v63  ;;  %v17131_v28 = vld [vmem:[#allocation63_spill] sm:$0xff]  ;;  %v17133_v53 = vld [vmem:[#allocation64_spill] sm:$0xff] }
 0x19d   :  { %17123 = vst [vmem:[#allocation118_spill] sm:$0xff] %v11608_v51  ;;  %17124 = vst [vmem:[#allocation119_spill] sm:$0xff] %v11610_v45  ;;  %v11618_v35 = vpack.c.bf16 %v2166_v6, %v2162_v44  ;;  %v11620_v16 = vsub.f32 %v322_v49, %v2162_v44  ;;  %v1313_v30 = vand.u32 4294901760, %v391_v10  ;;  %v17130_v36 = vpack.c.bf16 %v11291_v5, %v11289_v4  ;;  %v395_v4 = vld [vmem:[#allocation13 + $0x150] sm:$0xff] }
 0x19e   :  { %17122 = vst [vmem:[#allocation62_spill] sm:$0xff] %v11606_v26  ;;  %17125 = vst [vmem:[#allocation120_spill] sm:$0xff] %v11612_v56  ;;  %8724 = vmatpush1.bf16.msra.mxu0 %v17131_v28  ;;  %v2164_v20 = vand.u32 4294901760, %v321_v7  ;;  %v2168_v39 = vand.u32 4294901760, %v325_v52  ;;  %v1315_v37 = vand.u32 4294901760, %v396_v18  ;;  %v1319_v13 = vand.u32 4294901760, %v400_v50 }
 0x19f   :  { %17126 = vst [vmem:[#allocation121_spill] sm:$0xff] %v11614_v43  ;;  %17127 = vst [vmem:[#allocation122_spill] sm:$0xff] %v11616_v32  ;;  %8628 = vmatpush1.bf16.msra.mxu1 %v17130_v36  ;;  %v17132_v43 = vpack.c.bf16 %v11297_v12, %v11295_v11  ;;  %8726 = vmatprep.subr.bf16.mxu0 %v17133_v53  ;;  %v11630_v63 = vsub.f32 %v326_v41, %v2166_v6  ;;  %v2170_v49 = vand.u32 4294901760, %v330_v55  ;;  %v399_v5 = vld [vmem:[#allocation13 + $0x170] sm:$0xff]  ;;  %v329_v36 = vld [vmem:[#allocation12 + $0x140] sm:$0xff] }
 0x1a0   :  { %17128 = vst [vmem:[#allocation123_spill] sm:$0xff] %v11618_v35  ;;  %17129 = vst [vmem:[#allocation124_spill] sm:$0xff] %v11620_v16  ;;  %v11632_v44 = vsub.f32 %v387_v42, %v1309_v58  ;;  %v2174_v16 = vand.u32 4294901760, %v334_v59  ;;  %v11634_v28 = vpack.c.bf16 %v1313_v30, %v1309_v58  ;;  %v11636_v32 = vsub.f32 %v391_v10, %v1313_v30  ;;  %v333_v11 = vld [vmem:[#allocation12 + $0x160] sm:$0xff]  ;;  %v404_v12 = vld [vmem:[#allocation13 + $0x198] sm:$0xff] }
 0x1a1   :  { %8630 = vmatprep.subr.bf16.mxu1 %v17132_v43  ;;  %17134 = vst [vmem:[#allocation63_spill] sm:$0xff] %v11630_v63  ;;  %v11638_v45 = vpack.c.bf16 %v2168_v39, %v2164_v20  ;;  %v11640_v51 = vsub.f32 %v321_v7, %v2164_v20  ;;  %v408_v43 = vld [vmem:[#allocation13 + $0x1b8] sm:$0xff]  ;;  %v11642_v41 = vsub.f32 %v325_v52, %v2168_v39  ;;  %v1317_v30 = vand.u32 4294901760, %v395_v4 }
 0x1a2   :  { %17135 = vst [vmem:[#allocation64_spill] sm:$0xff] %v11632_v44  ;;  %17136 = vst [vmem:[#allocation125_spill] sm:$0xff] %v11634_v28  ;;  %v11644_v42 = vpack.c.bf16 %v1319_v13, %v1315_v37  ;;  %v11646_v6 = vsub.f32 %v396_v18, %v1315_v37  ;;  %v11648_v53 = vsub.f32 %v400_v50, %v1319_v13  ;;  %v338_v44 = vld [vmem:[#allocation12 + $0x188] sm:$0xff]  ;;  %v17145_v10 = vld [vmem:[#allocation65_spill] sm:$0xff]  ;;  %v1321_v20 = vand.u32 4294901760, %v399_v5 }
 0x1a3   :  { %17137 = vst [vmem:[#allocation126_spill] sm:$0xff] %v11636_v32  ;;  %17138 = vst [vmem:[#allocation127_spill] sm:$0xff] %v11638_v45  ;;  %v17144_v58 = vpack.c.bf16 %v11305_v19, %v11303_v15  ;;  %8728 = vmatpush1.bf16.msra.mxu0 %v17145_v10  ;;  %v11654_v7 = vpack.c.bf16 %v2174_v16, %v2170_v49  ;;  %v17147_v52 = vpack.c.bf16 %v11313_v34, %v11311_v33  ;;  %v17148_v18 = vld [vmem:[#allocation66_spill] sm:$0xff]  ;;  %v342_v15 = vld [vmem:[#allocation12 + $0x1a8] sm:$0xff] }
 0x1a4   :  { %17139 = vst [vmem:[#allocation128_spill] sm:$0xff] %v11640_v51  ;;  %17140 = vst [vmem:[#allocation129_spill] sm:$0xff] %v11642_v41  ;;  %v2172_v51 = vand.u32 4294901760, %v329_v36  ;;  %8730 = vmatprep.subr.bf16.mxu0 %v17148_v18  ;;  %v11660_v50 = vsub.f32 %v330_v55, %v2170_v49  ;;  %v2176_v39 = vand.u32 4294901760, %v333_v11  ;;  %v1323_v37 = vand.u32 4294901760, %v404_v12  ;;  %v403_v19 = vld [vmem:[#allocation13 + $0x190] sm:$0xff] }
 0x1a5   :  { %17141 = vst [vmem:[#allocation130_spill] sm:$0xff] %v11644_v42  ;;  %17142 = vst [vmem:[#allocation131_spill] sm:$0xff] %v11646_v6  ;;  %8632 = vmatpush1.bf16.msra.mxu1 %v17144_v58  ;;  %v1327_v13 = vand.u32 4294901760, %v408_v43  ;;  %v407_v58 = vld [vmem:[#allocation13 + $0x1b0] sm:$0xff]  ;;  %v11662_v10 = vsub.f32 %v334_v59, %v2174_v16  ;;  %v11666_v6 = vsub.f32 %v395_v4, %v1317_v30  ;;  %v2178_v41 = vand.u32 4294901760, %v338_v44  ;;  %v337_v32 = vld [vmem:[#allocation12 + $0x180] sm:$0xff] }
 0x1a6   :  { %17143 = vst [vmem:[#allocation132_spill] sm:$0xff] %v11648_v53  ;;  %17146 = vst [vmem:[#allocation65_spill] sm:$0xff] %v11654_v7  ;;  %8634 = vmatprep.subr.bf16.mxu1 %v17147_v52  ;;  %v11664_v53 = vpack.c.bf16 %v1321_v20, %v1317_v30  ;;  %v341_v33 = vld [vmem:[#allocation12 + $0x1a0] sm:$0xff]  ;;  %v412_v34 = vld [vmem:[#allocation13 + $0x1d8] sm:$0xff]  ;;  %v11668_v52 = vsub.f32 %v399_v5, %v1321_v20  ;;  %v11670_v55 = vpack.c.bf16 %v2176_v39, %v2172_v51 }
 0x1a7   :  { %17149 = vst [vmem:[#allocation66_spill] sm:$0xff] %v11660_v50  ;;  %17150 = vst [vmem:[#allocation133_spill] sm:$0xff] %v11662_v10  ;;  %v11672_v49 = vsub.f32 %v329_v36, %v2172_v51  ;;  %v11674_v18 = vsub.f32 %v333_v11, %v2176_v39  ;;  %v416_v50 = vld [vmem:[#allocation13 + $0x1f8] sm:$0xff]  ;;  %v17157_v59 = vpack.c.bf16 %v11319_v48, %v11317_v47  ;;  %v17158_v16 = vld [vmem:[#allocation67_spill] sm:$0xff]  ;;  %v1325_v5 = vand.u32 4294901760, %v403_v19 }
 0x1a8   :  { %17151 = vst [vmem:[#allocation134_spill] sm:$0xff] %v11664_v53  ;;  %17152 = vst [vmem:[#allocation135_spill] sm:$0xff] %v11666_v6  ;;  %8732 = vmatpush1.bf16.msra.mxu0 %v17158_v16  ;;  %v11680_v4 = vpack.c.bf16 %v1327_v13, %v1323_v37  ;;  %v11682_v30 = vsub.f32 %v404_v12, %v1323_v37  ;;  %v2182_v6 = vand.u32 4294901760, %v342_v15  ;;  %v17162_v51 = vld [vmem:[#allocation68_spill] sm:$0xff]  ;;  %v1329_v36 = vand.u32 4294901760, %v407_v58  ;;  %v346_v47 = vld [vmem:[#allocation12 + $0x1c8] sm:$0xff] }
 0x1a9   :  { %17153 = vst [vmem:[#allocation136_spill] sm:$0xff] %v11668_v52  ;;  %17154 = vst [vmem:[#allocation137_spill] sm:$0xff] %v11670_v55  ;;  %8636 = vmatpush1.bf16.msra.mxu1 %v17157_v59  ;;  %v17161_v20 = vpack.c.bf16 %v11327_v57, %v11325_v54  ;;  %8734 = vmatprep.subr.bf16.mxu0 %v17162_v51  ;;  %v2180_v11 = vand.u32 4294901760, %v337_v32  ;;  %v2184_v39 = vand.u32 4294901760, %v341_v33  ;;  %v1335_v12 = vand.u32 4294901760, %v416_v50  ;;  %v350_v37 = vld [vmem:[#allocation12 + $0x1e8] sm:$0xff] }
 0x1aa   :  { %17155 = vst [vmem:[#allocation138_spill] sm:$0xff] %v11672_v49  ;;  %17156 = vst [vmem:[#allocation139_spill] sm:$0xff] %v11674_v18  ;;  %v1331_v18 = vand.u32 4294901760, %v412_v34  ;;  %v11688_v48 = vsub.f32 %v408_v43, %v1327_v13  ;;  %v11690_v59 = vpack.c.bf16 %v2182_v6, %v2178_v41  ;;  %v11692_v16 = vsub.f32 %v338_v44, %v2178_v41  ;;  %v415_v49 = vld [vmem:[#allocation13 + $0x1f0] sm:$0xff]  ;;  %v345_v51 = vld [vmem:[#allocation12 + $0x1c0] sm:$0xff] }
 0x1ab   :  { %17159 = vst [vmem:[#allocation67_spill] sm:$0xff] %v11680_v4  ;;  %17160 = vst [vmem:[#allocation140_spill] sm:$0xff] %v11682_v30  ;;  %8638 = vmatprep.subr.bf16.mxu1 %v17161_v20  ;;  %v411_v30 = vld [vmem:[#allocation13 + $0x1d0] sm:$0xff]  ;;  %v11694_v52 = vsub.f32 %v342_v15, %v2182_v6  ;;  %v11696_v54 = vpack.c.bf16 %v1329_v36, %v1325_v5  ;;  %v11698_v57 = vsub.f32 %v403_v19, %v1325_v5  ;;  %v349_v10 = vld [vmem:[#allocation12 + $0x1e0] sm:$0xff] }
 0x1ac   :  { %17163 = vst [vmem:[#allocation68_spill] sm:$0xff] %v11688_v48  ;;  %17164 = vst [vmem:[#allocation141_spill] sm:$0xff] %v11690_v59  ;;  %v11700_v20 = vsub.f32 %v407_v58, %v1329_v36  ;;  %v17169_v43 = vpack.c.bf16 %v11335_v2, %v11333_v61  ;;  %v17170_v44 = vld [vmem:[#allocation69_spill] sm:$0xff]  ;;  %v11706_v41 = vpack.c.bf16 %v2184_v39, %v2180_v11  ;;  %v2186_v15 = vand.u32 4294901760, %v346_v47  ;;  %v17175_v19 = vld [vmem:[#allocation72_spill] sm:$0xff] }
 0x1ad   :  { %17165 = vst [vmem:[#allocation142_spill] sm:$0xff] %v11694_v52  ;;  %17166 = vst [vmem:[#allocation143_spill] sm:$0xff] %v11696_v54  ;;  %8736 = vmatpush1.bf16.msra.mxu0 %v17170_v44  ;;  %v11708_v13 = vsub.f32 %v337_v32, %v2180_v11  ;;  %v11710_v6 = vsub.f32 %v341_v33, %v2184_v39  ;;  %v17174_v52 = vld [vmem:[#allocation73_spill] sm:$0xff]  ;;  %v17177_v58 = vld [vmem:[#allocation71_spill] sm:$0xff]  ;;  %v11716_v36 = vpack.c.bf16 %v1335_v12, %v1331_v18 }
 0x1ae   :  { %17167 = vst [vmem:[#allocation144_spill] sm:$0xff] %v11698_v57  ;;  %17168 = vst [vmem:[#allocation145_spill] sm:$0xff] %v11700_v20  ;;  %8640 = vmatpush1.bf16.msra.mxu1 %v17169_v43  ;;  %v17176_v5 = vpack.c.bf16 %v17174_v52, %v17175_v19  ;;  %8738 = vmatprep.subr.bf16.mxu0 %v17177_v58  ;;  %v2190_v20 = vand.u32 4294901760, %v350_v37  ;;  %v1333_v61 = vand.u32 4294901760, %v411_v30  ;;  %v1337_v2 = vand.u32 4294901760, %v415_v49  ;;  %v288_v19 = vld [vmem:[#allocation2] sm:$0xff] }
 0x1af   :  { %17171 = vst [vmem:[#allocation69_spill] sm:$0xff] %v11706_v41  ;;  %17172 = vst [vmem:[#allocation146_spill] sm:$0xff] %v11708_v13  ;;  %v11718_v43 = vsub.f32 %v412_v34, %v1331_v18  ;;  %v2188_v44 = vand.u32 4294901760, %v345_v51  ;;  %v2192_v57 = vand.u32 4294901760, %v349_v10  ;;  %v11721_v33 = vsub.f32 %v416_v50, %v1335_v12  ;;  %v17185_v58 = vld [vmem:[#allocation75_spill] sm:$0xff]  ;;  %v17187_v13 = vld [vmem:[#allocation74_spill] sm:$0xff] }
 0x1b0   :  { %17173 = vst [vmem:[#allocation147_spill] sm:$0xff] %v11710_v6  ;;  %8642 = vmatprep.subr.bf16.mxu1 %v17176_v5  ;;  %17178 = vst [vmem:[#allocation73_spill] sm:$0xff] %v11716_v36  ;;  %v11723_v11 = vpack.c.bf16 %v2190_v20, %v2186_v15  ;;  %v11725_v39 = vsub.f32 %v346_v47, %v2186_v15  ;;  %v11727_v52 = vsub.f32 %v350_v37, %v2190_v20  ;;  %v17184_v5 = vld [vmem:[#allocation76_spill] sm:$0xff] }
 0x1b1   :  { %17179 = vst [vmem:[#allocation72_spill] sm:$0xff] %v11718_v43  ;;  %17180 = vst [vmem:[#allocation71_spill] sm:$0xff] %v11721_v33  ;;  %v17186_v6 = vpack.c.bf16 %v17184_v5, %v17185_v58  ;;  %8740 = vmatpush1.bf16.msra.mxu0 %v17187_v13  ;;  %v11733_v34 = vpack.c.bf16 %v1337_v2, %v1333_v61  ;;  %v11735_v18 = vsub.f32 %v411_v30, %v1333_v61  ;;  %v17191_v12 = vld [vmem:[#allocation80_spill] sm:$0xff]  ;;  %v17196_v30 = vld [vmem:[#allocation85_spill] sm:$0xff] }
 0x1b2   :  { %17181 = vst [vmem:[#allocation148_spill] sm:$0xff] %v11723_v11  ;;  %17182 = vst [vmem:[#allocation149_spill] sm:$0xff] %v11725_v39  ;;  %v11737_v32 = vsub.f32 %v415_v49, %v1337_v2  ;;  %v16323_v50 = vand.u32 4294901760, %v11485_v8  ;;  %8934 = vmatprep.subr.bf16.mxu0 %v11487_v25  ;;  %v11742_v47 = vpack.c.bf16 %v2192_v57, %v2188_v44  ;;  %v17193_v37 = vand.u32 4294901760, %v11483_v1  ;;  %v17195_v2 = vld [vmem:[#allocation77_spill] sm:$0xff]  ;;  %v17197_v15 = vld [vmem:[#allocation88_spill] sm:$0xff] }
 0x1b3   :  { %17183 = vst [vmem:[#allocation150_spill] sm:$0xff] %v11727_v52  ;;  %8644 = vmatpush1.bf16.msra.mxu1 %v17186_v6  ;;  %17188 = vst [vmem:[#allocation76_spill] sm:$0xff] %v11733_v34  ;;  %v16327_v13 = vand.u32 4294901760, %v11490_v21  ;;  %v16330_v6 = vand.u32 4294901760, %v11492_v62  ;;  %v11754_v61 = vand.u32 4294901760, %v288_v19 }
 0x1b4   :  { %17189 = vst [vmem:[#allocation75_spill] sm:$0xff] %v11735_v18  ;;  %17190 = vst [vmem:[#allocation74_spill] sm:$0xff] %v11737_v32  ;;  %8742 = vmatprep.subr.bf16.mxu1 %v17191_v12  ;;  %v1386_v20 = vsub.f32 %v11483_v1, %v17193_v37  ;;  %v1398_v49 = vsub.f32 %v11485_v8, %v16323_v50  ;;  %1269 = vmatmul.mubr.f32.vlgmr.msra.gmra.mrb[0].mxu0 %v17085_v9 }
 0x1b5   :  { %17192 = vst [vmem:[#allocation151_spill] sm:$0xff] %v11742_v47  ;;  %17194 = vst [vmem:[#allocation152_spill] sm:$0xff] %v11754_v61  ;;  %v2241_v58 = vsub.f32 %v11490_v21, %v16327_v13  ;;  %v2253_v37 = vsub.f32 %v11492_v62, %v16330_v6  ;;  %8936 = vmatpush1.bf16.msra.mxu0 %v17197_v15  ;;  %v11774_v13 = vsub.f32 %v288_v19, %v11754_v61  ;;  %v17201_v21 = vld [vmem:[#allocation91_spill] sm:$0xff]  ;;  %v17202_v6 = vld [vmem:[#allocation94_spill] sm:$0xff] }
 0x1b6   :  { %891 = vmatmul.mubr.f32.vlgmr.msra.gmra.mrb[0].mxu1 %v17195_v2  ;;  %v1387_v5 = vand.u32 4294901760, %v1386_v20  ;;  %v1399_v25 = vand.u32 4294901760, %v1398_v49  ;;  %v17198_v2 = vand.u32 4294901760, %v11497_v60  ;;  %v17199_v20 = vand.u32 4294901760, %v11499_v0  ;;  %8938 = vmatprep.subr.bf16.mxu0 %v17202_v6  ;;  %v17210_v61 = vld [vmem:[#allocation95_spill] sm:$0xff] }
 0x1b7   :  { %8744 = vmatpush1.bf16.msra.mxu1 %v17196_v30  ;;  %17200 = vst [vmem:[#allocation153_spill] sm:$0xff] %v11774_v13  ;;  %v11778_v50 = vsub.f32 %v345_v51, %v2188_v44  ;;  %v11780_v30 = vsub.f32 %v349_v10, %v2192_v57  ;;  %v17205_v49 = vand.u32 4294901760, %v11503_v29  ;;  %1371 = vmatprep.mubr.f32.mxu1 %v17062_v14  ;;  %v2242_v19 = vand.u32 4294901760, %v2241_v58  ;;  %v17208_v44 = vld [vmem:[#allocation92_spill] sm:$0xff]  ;;  %v17209_v58 = vld [vmem:[#allocation93_spill] sm:$0xff] }
 0x1b8   :  { %v1392_v12 = vsub.f32 %v11497_v60, %v17198_v2  ;;  %v1404_v9 = vsub.f32 %v11499_v0, %v17199_v20  ;;  %8746 = vmatprep.subr.bf16.mxu1 %v17201_v21  ;;  %v17206_v2 = vld [vmem:[#allocation90_spill] sm:$0xff]  ;;  %v11787_v20 = vpack.c.bf16 %v1399_v25, %v1387_v5  ;;  %2226 = vmatprep.mubr.f32.mxu0 %v17062_v14  ;;  %v2254_v21 = vand.u32 4294901760, %v2253_v37 }
 0x1b9   :  { %17203 = vst [vmem:[#allocation154_spill] sm:$0xff] %v11778_v50  ;;  %17204 = vst [vmem:[#allocation155_spill] sm:$0xff] %v11780_v30  ;;  %v2247_v15 = vsub.f32 %v11503_v29, %v17205_v49  ;;  %v16337_v60 = vand.u32 4294901760, %v17206_v2  ;;  %v11791_v6 = vand.u32 4294901760, %v11774_v13  ;;  %v16353_v49 = vand.u32 4294901760, %v17208_v44  ;;  %8940 = vmatpush1.bf16.msra.mxu0 %v11532_v17  ;;  %v17212_v17 = vld [vmem:[#allocation97_spill] sm:$0xff] }
 0x1ba   :  { %v1393_v51 = vand.u32 4294901760, %v1392_v12  ;;  %v1405_v10 = vand.u32 4294901760, %v1404_v9  ;;  %v16357_v37 = vand.u32 4294901760, %v17209_v58  ;;  %v16354_v29 = vand.u32 4294901760, %v17210_v61  ;;  %8942 = vmatprep.subr.bf16.mxu0 %v11552_v24  ;;  %v17213_v24 = vld [vmem:[#allocation98_spill] sm:$0xff] }
 0x1bb   :  { %17207 = vst [vmem:[#allocation156_spill] sm:$0xff] %v11791_v6  ;;  %v2259_v57 = vsub.f32 %v17206_v2, %v16337_v60  ;;  %8748 = vmatpush1.bf16.msra.mxu1 %v11524_v27  ;;  %v2230_v25 = vsub.f32 %v11774_v13, %v11791_v6  ;;  %v2248_v5 = vand.u32 4294901760, %v2247_v15  ;;  %v1410_v12 = vsub.f32 %v17208_v44, %v16353_v49  ;;  %v17211_v60 = vld [vmem:[#allocation56_spill] sm:$0xff] }
 0x1bc   :  { %8750 = vmatprep.subr.bf16.mxu1 %v11542_v31  ;;  %v16355_v27 = vand.u32 4294901760, %v17211_v60  ;;  %v16356_v2 = vand.u32 4294901760, %v17212_v17  ;;  %v11810_v0 = vpack.c.bf16 %v2254_v21, %v2242_v19  ;;  %v1422_v15 = vsub.f32 %v17209_v58, %v16357_v37  ;;  %v17216_v37 = vld [vmem:[#allocation57_spill] sm:$0xff] }
 0x1bd   :  { %v2260_v9 = vand.u32 4294901760, %v2259_v57  ;;  %v2265_v6 = vsub.f32 %v17210_v61, %v16354_v29  ;;  %v16364_v57 = vand.u32 4294901760, %v17213_v24  ;;  %v11819_v31 = vpack.c.bf16 %v1405_v10, %v1393_v51  ;;  %8944 = vmatpush1.bf16.msra.mxu0 %v11570_v23  ;;  %v17215_v10 = vld [vmem:[#allocation100_spill] sm:$0xff] }
 0x1be   :  { %v1411_v13 = vand.u32 4294901760, %v1410_v12  ;;  %v2277_v49 = vsub.f32 %v17211_v60, %v16355_v27  ;;  %v1416_v21 = vsub.f32 %v17212_v17, %v16356_v2  ;;  %v11829_v19 = vand.u32 4294901760, %v2230_v25  ;;  %8946 = vmatprep.subr.bf16.mxu0 %v11586_v3  ;;  %v17217_v17 = vld [vmem:[#allocation102_spill] sm:$0xff] }
 0x1bf   :  { %8752 = vmatpush1.bf16.msra.mxu1 %v11560_v40  ;;  %v1423_v29 = vand.u32 4294901760, %v1422_v15  ;;  %v1428_v51 = vsub.f32 %v17213_v24, %v16364_v57  ;;  %v16369_v12 = vand.u32 4294901760, %v17215_v10  ;;  %v11837_v27 = vpack.c.bf16 %v2260_v9, %v2248_v5  ;;  %v17218_v57 = vld [vmem:[#allocation58_spill] sm:$0xff]  ;;  %v17219_v9 = vld [vmem:[#allocation104_spill] sm:$0xff] }
 0x1c0   :  { %17214 = vst [vmem:[#allocation92_spill] sm:$0xff] %v11829_v19  ;;  %8754 = vmatprep.subr.bf16.mxu1 %v11580_v38  ;;  %v2266_v2 = vand.u32 4294901760, %v2265_v6  ;;  %v16370_v40 = vand.u32 4294901760, %v17216_v37  ;;  %v16371_v23 = vand.u32 4294901760, %v17217_v17  ;;  %v2278_v25 = vand.u32 4294901760, %v2277_v49  ;;  %v17221_v38 = vld [vmem:[#allocation107_spill] sm:$0xff] }
 0x1c1   :  { %v1417_v60 = vand.u32 4294901760, %v1416_v21  ;;  %v2271_v15 = vsub.f32 %v17215_v10, %v16369_v12  ;;  %v16378_v24 = vand.u32 4294901760, %v17218_v57  ;;  %v11845_v61 = vpack.c.bf16 %v1423_v29, %v1411_v13  ;;  %8948 = vmatpush1.bf16.msra.mxu0 %v11606_v26  ;;  %v17220_v13 = vld [vmem:[#allocation105_spill] sm:$0xff] }
 0x1c2   :  { %v2283_v5 = vsub.f32 %v17216_v37, %v16370_v40  ;;  %v1434_v6 = vsub.f32 %v17217_v17, %v16371_v23  ;;  %v16386_v3 = vand.u32 4294901760, %v17219_v9  ;;  %v1429_v49 = vand.u32 4294901760, %v1428_v51  ;;  %8950 = vmatprep.subr.bf16.mxu0 %v11618_v35  ;;  %v17223_v17 = vld [vmem:[#allocation109_spill] sm:$0xff] }
 0x1c3   :  { %8756 = vmatpush1.bf16.msra.mxu1 %v11592_v46  ;;  %v2272_v21 = vand.u32 4294901760, %v2271_v15  ;;  %v1446_v29 = vsub.f32 %v17218_v57, %v16378_v24  ;;  %v16387_v12 = vand.u32 4294901760, %v17220_v13  ;;  %v16388_v26 = vand.u32 4294901760, %v17221_v38  ;;  %v17222_v24 = vld [vmem:[#allocation108_spill] sm:$0xff] }
 0x1c4   :  { %8758 = vmatprep.subr.bf16.mxu1 %v11612_v56  ;;  %v2284_v40 = vand.u32 4294901760, %v2283_v5  ;;  %v1435_v23 = vand.u32 4294901760, %v1434_v6  ;;  %v2289_v46 = vsub.f32 %v17219_v9, %v16386_v3  ;;  %v16393_v57 = vand.u32 4294901760, %v17222_v24  ;;  %v17224_v6 = vld [vmem:[#allocation60_spill] sm:$0xff] }
 0x1c5   :  { %v1447_v51 = vand.u32 4294901760, %v1446_v29  ;;  %v2301_v15 = vsub.f32 %v17220_v13, %v16387_v12  ;;  %v11871_v56 = vpack.c.bf16 %v2278_v25, %v2266_v2  ;;  %v1440_v5 = vsub.f32 %v17221_v38, %v16388_v26  ;;  %8952 = vmatpush1.bf16.msra.mxu0 %v11638_v45  ;;  %v17227_v26 = vld [vmem:[#allocation112_spill] sm:$0xff] }
 0x1c6   :  { %v2290_v35 = vand.u32 4294901760, %v2289_v46  ;;  %v16398_v3 = vand.u32 4294901760, %v17224_v6  ;;  %v11879_v29 = vpack.c.bf16 %v1429_v49, %v1417_v60  ;;  %v1452_v37 = vsub.f32 %v17222_v24, %v16393_v57  ;;  %8954 = vmatprep.subr.bf16.mxu0 %v11654_v7  ;;  %v17226_v49 = vld [vmem:[#allocation111_spill] sm:$0xff] }
 0x1c7   :  { %8760 = vmatpush1.bf16.msra.mxu1 %v11634_v28  ;;  %v2302_v12 = vand.u32 4294901760, %v2301_v15  ;;  %v17225_v2 = vand.u32 4294901760, %v17223_v17  ;;  %v11889_v25 = vpack.c.bf16 %v2284_v40, %v2272_v21  ;;  %v16402_v15 = vand.u32 4294901760, %v17226_v49 }
 0x1c8   :  { %8762 = vmatprep.subr.bf16.mxu1 %v11644_v42  ;;  %v2307_v60 = vsub.f32 %v17224_v6, %v16398_v3  ;;  %v16401_v45 = vand.u32 4294901760, %v17227_v26  ;;  %v11896_v28 = vpack.c.bf16 %v1447_v51, %v1435_v23  ;;  %v1441_v24 = vand.u32 4294901760, %v1440_v5  ;;  %v17229_v3 = vld [vmem:[#allocation115_spill] sm:$0xff] }
 0x1c9   :  { %v2295_v46 = vsub.f32 %v17223_v17, %v17225_v2  ;;  %v11898_v57 = vpack.c.bf16 %v2302_v12, %v2290_v35  ;;  %v17228_v2 = vld [vmem:[#allocation114_spill] sm:$0xff]  ;;  %v1453_v42 = vand.u32 4294901760, %v1452_v37  ;;  %v1458_v40 = vsub.f32 %v17226_v49, %v16402_v15  ;;  %8956 = vmatpush1.bf16.msra.mxu0 %v11670_v55  ;;  %v17230_v37 = vld [vmem:[#allocation117_spill] sm:$0xff] }
 0x1ca   :  { %v16405_v17 = vand.u32 4294901760, %v17228_v2  ;;  %v1470_v21 = vsub.f32 %v17227_v26, %v16401_v45  ;;  %v16415_v7 = vand.u32 4294901760, %v17229_v3  ;;  %v16416_v12 = vand.u32 4294901760, %v17230_v37  ;;  %8958 = vmatprep.subr.bf16.mxu0 %v11690_v59  ;;  %v17233_v59 = vld [vmem:[#allocation121_spill] sm:$0xff] }
 0x1cb   :  { %8764 = vmatpush1.bf16.msra.mxu1 %v11664_v53  ;;  %v2296_v23 = vand.u32 4294901760, %v2295_v46  ;;  %v16417_v51 = vand.u32 4294901760, %v11604_v22  ;;  %v2308_v5 = vand.u32 4294901760, %v2307_v60  ;;  %v1459_v45 = vand.u32 4294901760, %v1458_v40  ;;  %v17232_v40 = vld [vmem:[#allocation119_spill] sm:$0xff] }
 0x1cc   :  { %v2313_v35 = vsub.f32 %v17228_v2, %v16405_v17  ;;  %8766 = vmatprep.subr.bf16.mxu1 %v11680_v4  ;;  %v1471_v15 = vand.u32 4294901760, %v1470_v21  ;;  %v2325_v55 = vsub.f32 %v17229_v3, %v16415_v7  ;;  %v1464_v17 = vsub.f32 %v17230_v37, %v16416_v12  ;;  %v17231_v2 = vld [vmem:[#allocation118_spill] sm:$0xff] }
 0x1cd   :  { %v1476_v53 = vsub.f32 %v11604_v22, %v16417_v51  ;;  %v16422_v4 = vand.u32 4294901760, %v17231_v2  ;;  %v11927_v26 = vpack.c.bf16 %v1453_v42, %v1441_v24  ;;  %v16427_v21 = vand.u32 4294901760, %v17232_v40  ;;  %8960 = vmatpush1.bf16.msra.mxu0 %v11706_v41  ;;  %v17234_v51 = vld [vmem:[#allocation122_spill] sm:$0xff] }
 0x1ce   :  { %v2314_v46 = vand.u32 4294901760, %v2313_v35  ;;  %v2326_v60 = vand.u32 4294901760, %v2325_v55  ;;  %v16428_v49 = vand.u32 4294901760, %v17233_v59  ;;  %v1465_v35 = vand.u32 4294901760, %v1464_v17  ;;  %8962 = vmatprep.subr.bf16.mxu0 %v11723_v11 }
 0x1cf   :  { %8768 = vmatpush1.bf16.msra.mxu1 %v11696_v54  ;;  %v1477_v7 = vand.u32 4294901760, %v1476_v53  ;;  %v2319_v12 = vsub.f32 %v17231_v2, %v16422_v4  ;;  %v16432_v22 = vand.u32 4294901760, %v17234_v51  ;;  %v11939_v24 = vpack.c.bf16 %v2308_v5, %v2296_v23  ;;  %v17235_v53 = vld [vmem:[#allocation124_spill] sm:$0xff] }
 0x1d0   :  { %8770 = vmatprep.subr.bf16.mxu1 %v11716_v36  ;;  %v2331_v42 = vsub.f32 %v17232_v40, %v16427_v21  ;;  %v1482_v17 = vsub.f32 %v17233_v59, %v16428_v49  ;;  %v16431_v55 = vand.u32 4294901760, %v17235_v53  ;;  %v11948_v41 = vpack.c.bf16 %v1471_v15, %v1459_v45  ;;  %v17236_v49 = vld [vmem:[#allocation64_spill] sm:$0xff] }
 0x1d1   :  { %v11950_v4 = vpack.c.bf16 %v2326_v60, %v2314_v46  ;;  %v1494_v11 = vsub.f32 %v17234_v51, %v16432_v22  ;;  %v16438_v23 = vand.u32 4294901760, %v11630_v63  ;;  %v11956_v5 = vpack.c.bf16 %v1477_v7, %v1465_v35  ;;  %8964 = vmatpush1.bf16.msra.mxu0 %v11742_v47  ;;  %v17237_v46 = vld [vmem:[#allocation126_spill] sm:$0xff]  ;;  %v17238_v7 = vld [vmem:[#allocation128_spill] sm:$0xff]  ;;  %v17239_v47 = vld [vmem:[#allocation129_spill] sm:$0xff] }
 0x1d2   :  { %v2320_v36 = vand.u32 4294901760, %v2319_v12  ;;  %v2337_v21 = vsub.f32 %v17235_v53, %v16431_v55  ;;  %v16441_v54 = vand.u32 4294901760, %v17236_v49  ;;  %v2332_v45 = vand.u32 4294901760, %v2331_v42  ;;  %8966 = vmatprep.subr.bf16.mxu0 %v11810_v0 }
 0x1d3   :  { %8772 = vmatpush1.bf16.msra.mxu1 %v11733_v34  ;;  %v2349_v15 = vsub.f32 %v11630_v63, %v16438_v23  ;;  %v16442_v60 = vand.u32 4294901760, %v17237_v46  ;;  %v16444_v35 = vand.u32 4294901760, %v17238_v7  ;;  %v1483_v12 = vand.u32 4294901760, %v1482_v17  ;;  %v17240_v63 = vld [vmem:[#allocation79_spill] sm:$0xff] }
 0x1d4   :  { %8774 = vmatprep.subr.bf16.mxu1 %v11787_v20  ;;  %v1495_v55 = vand.u32 4294901760, %v1494_v11  ;;  %v1488_v22 = vsub.f32 %v17236_v49, %v16441_v54  ;;  %v16446_v42 = vand.u32 4294901760, %v17239_v47  ;;  %v2338_v34 = vand.u32 4294901760, %v2337_v21  ;;  %2232 = vmatmul.mubr.f32.vlgmr.msra.gmra.mrb[0].mxu0 %v11829_v19  ;;  %v17241_v17 = vld [vmem:[#allocation131_spill] sm:$0xff]  ;;  %v17244_v19 = vld [vmem:[#allocation133_spill] sm:$0xff] }
 0x1d5   :  { %v2350_v53 = vand.u32 4294901760, %v2349_v15  ;;  %v1500_v23 = vsub.f32 %v17237_v46, %v16442_v60  ;;  %v2343_v20 = vsub.f32 %v17238_v7, %v16444_v35  ;;  %v16448_v21 = vand.u32 4294901760, %v17241_v17  ;;  %v17242_v15 = vld [vmem:[#allocation132_spill] sm:$0xff]  ;;  %8968 = vmatpush1.bf16.msra.mxu0 %v11837_v27  ;;  %v17243_v7 = vld [vmem:[#allocation66_spill] sm:$0xff]  ;;  %2462 = vmatprep.mubr.f32.mxu0 %v17062_v14 }
 0x1d6   :  { %1377 = vmatmul.mubr.f32.vlgmr.msra.gmra.mrb[2].mxu1 %v17240_v63  ;;  %v1489_v0 = vand.u32 4294901760, %v1488_v22  ;;  %v2355_v11 = vsub.f32 %v17239_v47, %v16446_v42  ;;  %v16450_v54 = vand.u32 4294901760, %v17242_v15  ;;  %v8979_v60 = vpack.c.bf16 %v2332_v45, %v2320_v36  ;;  %8970 = vmatprep.subr.bf16.mxu0 %v11871_v56  ;;  %v17245_v45 = vld [vmem:[#allocation135_spill] sm:$0xff] }
 0x1d7   :  { %8776 = vmatpush1.bf16.msra.mxu1 %v11819_v31  ;;  %v1501_v46 = vand.u32 4294901760, %v1500_v23  ;;  %v2344_v35 = vand.u32 4294901760, %v2343_v20  ;;  %v16451_v63 = vand.u32 4294901760, %v17243_v7  ;;  %v1506_v42 = vsub.f32 %v17241_v17, %v16448_v21  ;;  %v17246_v20 = vld [vmem:[#allocation136_spill] sm:$0xff]  ;;  %1607 = vmatprep.mubr.f32.mxu1 %v17062_v14 }
 0x1d8   :  { %8778 = vmatprep.subr.bf16.mxu1 %v11845_v61  ;;  %v2356_v22 = vand.u32 4294901760, %v2355_v11  ;;  %v1518_v31 = vsub.f32 %v17242_v15, %v16450_v54  ;;  %v16452_v27 = vand.u32 4294901760, %v17244_v19  ;;  %v8789_v36 = vpack.c.bf16 %v1495_v55, %v1483_v12 }
 0x1d9   :  { %v2361_v23 = vsub.f32 %v17243_v7, %v16451_v63  ;;  %v16454_v61 = vand.u32 4294901760, %v17245_v45  ;;  %v16455_v56 = vand.u32 4294901760, %v17246_v20  ;;  %v8981_v11 = vpack.c.bf16 %v2350_v53, %v2338_v34  ;;  %8972 = vmatpush1.bf16.msra.mxu0 %v11889_v25  ;;  %v17247_v34 = vld [vmem:[#allocation138_spill] sm:$0xff]  ;;  %v17249_v25 = vld [vmem:[#allocation140_spill] sm:$0xff] }
 0x1da   :  { %v8791_v21 = vpack.c.bf16 %v1501_v46, %v1489_v0  ;;  %v1507_v17 = vand.u32 4294901760, %v1506_v42  ;;  %v2373_v54 = vsub.f32 %v17244_v19, %v16452_v27  ;;  %v1519_v55 = vand.u32 4294901760, %v1518_v31  ;;  %8974 = vmatprep.subr.bf16.mxu0 %v11898_v57 }
 0x1db   :  { %8780 = vmatpush1.bf16.msra.mxu1 %v11879_v29  ;;  %v1512_v12 = vsub.f32 %v17245_v45, %v16454_v61  ;;  %v1524_v63 = vsub.f32 %v17246_v20, %v16455_v56  ;;  %v16459_v53 = vand.u32 4294901760, %v17247_v34  ;;  %v8983_v46 = vpack.c.bf16 %v2356_v22, %v2344_v35  ;;  %v17248_v29 = vld [vmem:[#allocation139_spill] sm:$0xff] }
 0x1dc   :  { %8782 = vmatprep.subr.bf16.mxu1 %v11896_v28  ;;  %v2362_v42 = vand.u32 4294901760, %v2361_v23  ;;  %v16457_v0 = vand.u32 4294901760, %v17248_v29  ;;  %v16458_v31 = vand.u32 4294901760, %v17249_v25  ;;  %v2374_v27 = vand.u32 4294901760, %v2373_v54  ;;  %v17250_v23 = vld [vmem:[#allocation142_spill] sm:$0xff] }
 0x1dd   :  { %v1513_v19 = vand.u32 4294901760, %v1512_v12  ;;  %v2367_v61 = vsub.f32 %v17247_v34, %v16459_v53  ;;  %v16460_v56 = vand.u32 4294901760, %v11688_v48  ;;  %v1525_v20 = vand.u32 4294901760, %v1524_v63  ;;  %8976 = vmatpush1.bf16.msra.mxu0 %v11939_v24  ;;  %v17251_v53 = vld [vmem:[#allocation144_spill] sm:$0xff] }
 0x1de   :  { %v2379_v28 = vsub.f32 %v17248_v29, %v16457_v0  ;;  %v1530_v57 = vsub.f32 %v17249_v25, %v16458_v31  ;;  %v16465_v35 = vand.u32 4294901760, %v11692_v16  ;;  %v8793_v54 = vpack.c.bf16 %v1519_v55, %v1507_v17  ;;  %8978 = vmatprep.subr.bf16.mxu0 %v11950_v4  ;;  %v17252_v55 = vld [vmem:[#allocation145_spill] sm:$0xff] }
 0x1df   :  { %8784 = vmatpush1.bf16.msra.mxu1 %v11927_v26  ;;  %v2368_v22 = vand.u32 4294901760, %v2367_v61  ;;  %v1542_v63 = vsub.f32 %v11688_v48, %v16460_v56  ;;  %v16466_v12 = vand.u32 4294901760, %v17250_v23  ;;  %v16478_v24 = vand.u32 4294901760, %v17251_v53  ;;  %v17253_v48 = vld [vmem:[#allocation146_spill] sm:$0xff] }
 0x1e0   :  { %8786 = vmatprep.subr.bf16.mxu1 %v11948_v41  ;;  %v2380_v0 = vand.u32 4294901760, %v2379_v28  ;;  %v1531_v31 = vand.u32 4294901760, %v1530_v57  ;;  %v2385_v26 = vsub.f32 %v11692_v16, %v16465_v35  ;;  %v16467_v56 = vand.u32 4294901760, %v17252_v55  ;;  %v17254_v28 = vld [vmem:[#allocation147_spill] sm:$0xff] }
 0x1e1   :  { %v1543_v17 = vand.u32 4294901760, %v1542_v63  ;;  %v2397_v61 = vsub.f32 %v17250_v23, %v16466_v12  ;;  %v16477_v25 = vand.u32 4294901760, %v17253_v48  ;;  %v8985_v41 = vpack.c.bf16 %v2374_v27, %v2362_v42  ;;  %8980 = vmatpush1.bf16.msra.mxu0 %v8979_v60 }
 0x1e2   :  { %v8795_v29 = vpack.c.bf16 %v1525_v20, %v1513_v19  ;;  %v1536_v4 = vsub.f32 %v17251_v53, %v16478_v24  ;;  %v16468_v57 = vand.u32 4294901760, %v17254_v28  ;;  %v8987_v63 = vpack.c.bf16 %v2380_v0, %v2368_v22  ;;  %8982 = vmatprep.subr.bf16.mxu0 %v8981_v11  ;;  %v17269_v24 = vld [vmem:[#allocation111_spill] sm:$0xff] }
 0x1e3   :  { %8788 = vmatpush1.bf16.msra.mxu1 %v11956_v5  ;;  %v2386_v35 = vand.u32 4294901760, %v2385_v26  ;;  %v1548_v12 = vsub.f32 %v17252_v55, %v16467_v56  ;;  %v2391_v27 = vsub.f32 %v17253_v48, %v16477_v25  ;;  %v2398_v19 = vand.u32 4294901760, %v2397_v61 }
 0x1e4   :  { %8790 = vmatprep.subr.bf16.mxu1 %v8789_v36  ;;  %v2403_v20 = vsub.f32 %v17254_v28, %v16468_v57  ;;  %v16469_v5 = vand.u32 4294901760, %v11718_v43  ;;  %v16470_v60 = vand.u32 4294901760, %v11721_v33  ;;  %v8797_v42 = vpack.c.bf16 %v1543_v17, %v1531_v31 }
 0x1e5   :  { %v1537_v0 = vand.u32 4294901760, %v1536_v4  ;;  %v1549_v22 = vand.u32 4294901760, %v1548_v12  ;;  %v16471_v26 = vand.u32 4294901760, %v11725_v39  ;;  %v2392_v56 = vand.u32 4294901760, %v2391_v27  ;;  %8984 = vmatpush1.bf16.msra.mxu0 %v8983_v46 }
 0x1e6   :  { %v1554_v36 = vsub.f32 %v11718_v43, %v16469_v5  ;;  %v1566_v11 = vsub.f32 %v11721_v33, %v16470_v60  ;;  %v16473_v61 = vand.u32 4294901760, %v11727_v52  ;;  %v2404_v57 = vand.u32 4294901760, %v2403_v20  ;;  %8986 = vmatprep.subr.bf16.mxu0 %v8985_v41 }
 0x1e7   :  { %8792 = vmatpush1.bf16.msra.mxu1 %v8791_v21  ;;  %v2409_v31 = vsub.f32 %v11725_v39, %v16471_v26  ;;  %v16472_v12 = vand.u32 4294901760, %v11735_v18  ;;  %v16476_v17 = vand.u32 4294901760, %v11737_v32  ;;  %v8989_v4 = vpack.c.bf16 %v2398_v19, %v2386_v35 }
 0x1e8   :  { %8794 = vmatprep.subr.bf16.mxu1 %v8793_v54  ;;  %v1555_v27 = vand.u32 4294901760, %v1554_v36  ;;  %v1567_v5 = vand.u32 4294901760, %v1566_v11  ;;  %v2421_v60 = vsub.f32 %v11727_v52, %v16473_v61  ;;  %v16475_v26 = vand.u32 4294901760, %v11778_v50 }
 0x1e9   :  { %v2410_v21 = vand.u32 4294901760, %v2409_v31  ;;  %v1560_v46 = vsub.f32 %v11735_v18, %v16472_v12  ;;  %v1572_v20 = vsub.f32 %v11737_v32, %v16476_v17  ;;  %v8799_v54 = vpack.c.bf16 %v1549_v22, %v1537_v0  ;;  %8988 = vmatpush1.bf16.msra.mxu0 %v8987_v63  ;;  %v17255_v63 = vld [vmem:[#allocation84_spill] sm:$0xff]  ;;  %v17268_v17 = vld [vmem:[#allocation109_spill] sm:$0xff] }
 0x1ea   :  { %v2422_v41 = vand.u32 4294901760, %v2421_v60  ;;  %v16474_v35 = vand.u32 4294901760, %v11780_v30  ;;  %v8991_v19 = vpack.c.bf16 %v2404_v57, %v2392_v56  ;;  %v2415_v31 = vsub.f32 %v11778_v50, %v16475_v26  ;;  %8990 = vmatprep.subr.bf16.mxu0 %v8989_v4  ;;  %v17257_v4 = vld [vmem:[#allocation87_spill] sm:$0xff]  ;;  %v17273_v50 = vld [vmem:[#allocation152_spill] sm:$0xff]  ;;  %v17274_v32 = vld [vmem:[#allocation61_spill] sm:$0xff] }
 0x1eb   :  { %8796 = vmatpush1.bf16.msra.mxu1 %v8795_v29  ;;  %v1561_v36 = vand.u32 4294901760, %v1560_v46  ;;  %v1573_v11 = vand.u32 4294901760, %v1572_v20  ;;  %v8801_v12 = vpack.c.bf16 %v1567_v5, %v1555_v27  ;;  %v8805_v57 = vpack.c.bf16 %v11485_v8, %v11483_v1  ;;  %v17256_v5 = vld [vmem:[#allocation86_spill] sm:$0xff]  ;;  %v17270_v8 = vld [vmem:[#allocation112_spill] sm:$0xff] }
 0x1ec   :  { %8798 = vmatprep.subr.bf16.mxu1 %v8797_v42  ;;  %v8993_v61 = vpack.c.bf16 %v2422_v41, %v2410_v21  ;;  %v2427_v0 = vsub.f32 %v11780_v30, %v16474_v35  ;;  %v2416_v60 = vand.u32 4294901760, %v2415_v31  ;;  %v8997_v42 = vpack.c.bf16 %v11492_v62, %v17255_v63  ;;  %v17258_v21 = vld [vmem:[#allocation89_spill] sm:$0xff]  ;;  %v17259_v46 = vld [vmem:[#allocation90_spill] sm:$0xff] }
 0x1ed   :  { %8992 = vmatpush1.bf16.msra.mxu0 %v8991_v19  ;;  %v8803_v29 = vpack.c.bf16 %v1573_v11, %v1561_v36  ;;  %v8807_v27 = vpack.c.bf16 %v17257_v4, %v17256_v5  ;;  %v8999_v20 = vpack.c.bf16 %v17259_v46, %v17258_v21  ;;  %v17262_v19 = vld [vmem:[#allocation97_spill] sm:$0xff]  ;;  %v17263_v36 = vld [vmem:[#allocation98_spill] sm:$0xff]  ;;  %v9007_v25 = vpack.c.bf16 %v17224_v6, %v17268_v17 }
 0x1ee   :  { %v2428_v22 = vand.u32 4294901760, %v2427_v0  ;;  %8994 = vmatprep.subr.bf16.mxu0 %v8993_v61  ;;  %v17261_v61 = vld [vmem:[#allocation56_spill] sm:$0xff]  ;;  %v8811_v11 = vpack.c.bf16 %v17263_v36, %v17262_v19  ;;  %v17264_v31 = vld [vmem:[#allocation57_spill] sm:$0xff]  ;;  %v8817_v1 = vpack.c.bf16 %v17270_v8, %v17269_v24  ;;  %v17272_v30 = vld [vmem:[#allocation70_spill] sm:$0xff]  ;;  %v8819_v18 = vpack.c.bf16 %v17274_v32, %v17230_v37 }
 0x1ef   :  { %8800 = vmatpush1.bf16.msra.mxu1 %v8799_v54  ;;  %v8809_v54 = vpack.c.bf16 %v17209_v58, %v17208_v44  ;;  %v9003_v0 = vpack.c.bf16 %v17264_v31, %v17215_v10  ;;  %v9011_v52 = vpack.c.bf16 %v17232_v40, %v17231_v2  ;;  %v17275_v39 = vand.u32 4294901760, %v17255_v63 }
 0x1f0   :  { %8802 = vmatprep.subr.bf16.mxu1 %v8801_v12  ;;  %v8995_v56 = vpack.c.bf16 %v2428_v22, %v2416_v60  ;;  %v17260_v12 = vld [vmem:[#allocation95_spill] sm:$0xff]  ;;  %v17265_v60 = vld [vmem:[#allocation102_spill] sm:$0xff]  ;;  %v17276_v33 = vand.u32 4294901760, %v11492_v62  ;;  %v17277_v28 = vand.u32 4294901760, %v17256_v5  ;;  %v17280_v55 = vand.u32 4294901760, %v17259_v46 }
 0x1f1   :  { %v9001_v41 = vpack.c.bf16 %v17261_v61, %v17260_v12  ;;  %v17266_v22 = vld [vmem:[#allocation58_spill] sm:$0xff]  ;;  %v17281_v63 = vand.u32 4294901760, %v17208_v44  ;;  %v17282_v62 = vand.u32 4294901760, %v17209_v58  ;;  %v17284_v5 = vand.u32 4294901760, %v17261_v61 }
 0x1f2   :  { %8996 = vmatpush1.bf16.msra.mxu0 %v8995_v56  ;;  %v8813_v35 = vpack.c.bf16 %v17266_v22, %v17265_v60  ;;  %v17267_v56 = vld [vmem:[#allocation108_spill] sm:$0xff]  ;;  %v12135_v43 = vpack.c.bf16 %v17276_v33, %v17275_v39  ;;  %v17283_v39 = vand.u32 4294901760, %v17260_v12  ;;  %v17287_v44 = vand.u32 4294901760, %v17215_v10 }
 0x1f3   :  { %8804 = vmatpush1.bf16.msra.mxu1 %v8803_v29  ;;  %8998 = vmatprep.subr.bf16.mxu0 %v8997_v42  ;;  %v9005_v29 = vpack.c.bf16 %v17220_v13, %v17219_v9  ;;  %v8815_v26 = vpack.c.bf16 %v17267_v56, %v17221_v38  ;;  %v12153_v33 = vpack.c.bf16 %v17282_v62, %v17281_v63  ;;  %v17288_v58 = vand.u32 4294901760, %v17264_v31 }
 0x1f4   :  { %8806 = vmatprep.subr.bf16.mxu1 %v8805_v57  ;;  %v17271_v57 = vld [vmem:[#allocation114_spill] sm:$0xff]  ;;  %v17293_v10 = vand.u32 4294901760, %v17221_v38  ;;  %v17294_v61 = vand.u32 4294901760, %v17267_v56  ;;  %v17300_v38 = vand.u32 4294901760, %v17229_v3  ;;  %v17301_v56 = vand.u32 4294901760, %v17230_v37 }
 0x1f5   :  { %v9009_v42 = vpack.c.bf16 %v17229_v3, %v17271_v57  ;;  %2464 = vmatmul.mubr.f32.vlgmr.msra.gmra.mrb[0].mxu0 %v17273_v50  ;;  %v17279_v50 = vand.u32 4294901760, %v17258_v21  ;;  %v17290_v21 = vand.u32 4294901760, %v17266_v22  ;;  %v17307_v3 = vand.u32 4294901760, %v17234_v51 }
 0x1f6   :  { %1609 = vmatmul.mubr.f32.vlgmr.msra.gmra.mrb[2].mxu1 %v17272_v30  ;;  %9000 = vmatpush1.bf16.msra.mxu0 %v8999_v20  ;;  %v17278_v30 = vand.u32 4294901760, %v17257_v4  ;;  %v17286_v4 = vand.u32 4294901760, %v17263_v36  ;;  %v17291_v20 = vand.u32 4294901760, %v17219_v9  ;;  %v17296_v36 = vand.u32 4294901760, %v17224_v6 }
 0x1f7   :  { %8808 = vmatpush1.bf16.msra.mxu1 %v8807_v27  ;;  %v12147_v53 = vpack.c.bf16 %v17280_v55, %v17279_v50  ;;  %9002 = vmatprep.subr.bf16.mxu0 %v9001_v41  ;;  %v12171_v55 = vpack.c.bf16 %v17288_v58, %v17287_v44  ;;  %v17289_v27 = vand.u32 4294901760, %v17265_v60  ;;  %v12191_v41 = vpack.c.bf16 %v17294_v61, %v17293_v10  ;;  %v17318_v44 = vld [vmem:[#allocation128_spill] sm:$0xff] }
 0x1f8   :  { %v12141_v48 = vpack.c.bf16 %v17278_v30, %v17277_v28  ;;  %8810 = vmatprep.subr.bf16.mxu1 %v8809_v54  ;;  %v12159_v30 = vpack.c.bf16 %v17284_v5, %v17283_v39  ;;  %v17285_v28 = vand.u32 4294901760, %v17262_v19  ;;  %1743 = vmatprep.mubr.f32.mxu1 %v17062_v14  ;;  %v17292_v54 = vand.u32 4294901760, %v17220_v13  ;;  %v17309_v5 = vld [vmem:[#allocation124_spill] sm:$0xff] }
 0x1f9   :  { %2598 = vmatprep.mubr.f32.mxu0 %v17062_v14  ;;  %v12179_v46 = vpack.c.bf16 %v17290_v21, %v17289_v27  ;;  %v17295_v19 = vand.u32 4294901760, %v17268_v17  ;;  %v17297_v60 = vand.u32 4294901760, %v17269_v24  ;;  %v17298_v9 = vand.u32 4294901760, %v17270_v8 }
 0x1fa   :  { %v12165_v50 = vpack.c.bf16 %v17286_v4, %v17285_v28  ;;  %v12185_v12 = vpack.c.bf16 %v17292_v54, %v17291_v20  ;;  %v17299_v13 = vand.u32 4294901760, %v17271_v57  ;;  %v17302_v17 = vand.u32 4294901760, %v17274_v32  ;;  %9004 = vmatpush1.bf16.msra.mxu0 %v9003_v0  ;;  %v17311_v28 = vld [vmem:[#allocation63_spill] sm:$0xff] }
 0x1fb   :  { %v12197_v31 = vpack.c.bf16 %v17296_v36, %v17295_v19  ;;  %v12203_v22 = vpack.c.bf16 %v17298_v9, %v17297_v60  ;;  %8812 = vmatpush1.bf16.msra.mxu1 %v8811_v11  ;;  %v17303_v6 = vand.u32 4294901760, %v17231_v2  ;;  %v17304_v8 = vand.u32 4294901760, %v17232_v40  ;;  %9006 = vmatprep.subr.bf16.mxu0 %v9005_v29  ;;  %v17315_v11 = vld [vmem:[#allocation126_spill] sm:$0xff]  ;;  %v17322_v20 = vld [vmem:[#allocation131_spill] sm:$0xff]  ;;  %v17327_v29 = vld [vmem:[#allocation133_spill] sm:$0xff] }
 0x1fc   :  { %v12209_v63 = vpack.c.bf16 %v17300_v38, %v17299_v13  ;;  %v12215_v62 = vpack.c.bf16 %v17302_v17, %v17301_v56  ;;  %v17306_v57 = vand.u32 4294901760, %v17233_v59  ;;  %v17310_v37 = vand.u32 4294901760, %v17309_v5  ;;  %8814 = vmatprep.subr.bf16.mxu1 %v8813_v35  ;;  %v17331_v9 = vld [vmem:[#allocation136_spill] sm:$0xff]  ;;  %v17335_v17 = vld [vmem:[#allocation139_spill] sm:$0xff] }
 0x1fd   :  { %v12221_v24 = vpack.c.bf16 %v17304_v8, %v17303_v6  ;;  %v17312_v32 = vand.u32 4294901760, %v17311_v28  ;;  %v17314_v2 = vand.u32 4294901760, %v17236_v49  ;;  %v17316_v40 = vand.u32 4294901760, %v17315_v11 }
 0x1fe   :  { %v12227_v39 = vpack.c.bf16 %v17307_v3, %v17306_v57  ;;  %v17319_v58 = vand.u32 4294901760, %v17318_v44  ;;  %v17320_v27 = vand.u32 4294901760, %v17239_v47  ;;  %v17323_v54 = vand.u32 4294901760, %v17322_v20  ;;  %v17338_v57 = vld [vmem:[#allocation140_spill] sm:$0xff]  ;;  %9008 = vmatpush1.bf16.msra.mxu0 %v9007_v25 }
 0x1ff   :  { %17305 = vst [vmem:[#allocation93_spill] sm:$0xff] %v12221_v24  ;;  %v12233_v4 = vpack.c.bf16 %v17312_v32, %v17310_v37  ;;  %v12239_v0 = vpack.c.bf16 %v17316_v40, %v17314_v2  ;;  %v17324_v10 = vand.u32 4294901760, %v17242_v15  ;;  %v17326_v35 = vand.u32 4294901760, %v17243_v7  ;;  %v17340_v37 = vld [vmem:[#allocation68_spill] sm:$0xff]  ;;  %8816 = vmatpush1.bf16.msra.mxu1 %v8815_v26  ;;  %9010 = vmatprep.subr.bf16.mxu0 %v9009_v42 }
 0x200   :  { %17308 = vst [vmem:[#allocation100_spill] sm:$0xff] %v12227_v39  ;;  %v12245_v21 = vpack.c.bf16 %v17320_v27, %v17319_v58  ;;  %v17328_v19 = vand.u32 4294901760, %v17327_v29  ;;  %v17330_v60 = vand.u32 4294901760, %v17245_v45  ;;  %v17332_v13 = vand.u32 4294901760, %v17331_v9  ;;  %v17370_v39 = vld [vmem:[#allocation155_spill] sm:$0xff]  ;;  %8818 = vmatprep.subr.bf16.mxu1 %v8817_v1 }
 0x201   :  { %17313 = vst [vmem:[#allocation104_spill] sm:$0xff] %v12233_v4  ;;  %17317 = vst [vmem:[#allocation105_spill] sm:$0xff] %v12239_v0  ;;  %v12251_v61 = vpack.c.bf16 %v17324_v10, %v17323_v54  ;;  %v17334_v56 = vand.u32 4294901760, %v17247_v34  ;;  %v17336_v6 = vand.u32 4294901760, %v17335_v17  ;;  %v17339_v3 = vand.u32 4294901760, %v17338_v57  ;;  %v17346_v54 = vld [vmem:[#allocation144_spill] sm:$0xff] }
 0x202   :  { %17321 = vst [vmem:[#allocation107_spill] sm:$0xff] %v12245_v21  ;;  %v12257_v36 = vpack.c.bf16 %v17328_v19, %v17326_v35  ;;  %v12263_v38 = vpack.c.bf16 %v17332_v13, %v17330_v60  ;;  %v17341_v32 = vand.u32 4294901760, %v17340_v37  ;;  %v17343_v40 = vand.u32 4294901760, %v11692_v16  ;;  %v17348_v35 = vld [vmem:[#allocation145_spill] sm:$0xff]  ;;  %v17351_v13 = vld [vmem:[#allocation146_spill] sm:$0xff]  ;;  %9012 = vmatpush1.bf16.msra.mxu0 %v9011_v52 }
 0x203   :  { %17325 = vst [vmem:[#allocation60_spill] sm:$0xff] %v12251_v61  ;;  %v12269_v8 = vpack.c.bf16 %v17336_v6, %v17334_v56  ;;  %v17344_v58 = vand.u32 4294901760, %v17250_v23  ;;  %v17347_v10 = vand.u32 4294901760, %v17346_v54  ;;  %v17349_v19 = vand.u32 4294901760, %v17348_v35  ;;  %v17353_v6 = vld [vmem:[#allocation147_spill] sm:$0xff]  ;;  %v17366_v0 = vld [vmem:[#allocation74_spill] sm:$0xff]  ;;  %8820 = vmatpush1.bf16.msra.mxu1 %v8819_v18 }
 0x204   :  { %17329 = vst [vmem:[#allocation115_spill] sm:$0xff] %v12257_v36  ;;  %17333 = vst [vmem:[#allocation117_spill] sm:$0xff] %v12263_v38  ;;  %v12275_v2 = vpack.c.bf16 %v17341_v32, %v17339_v3  ;;  %v17352_v56 = vand.u32 4294901760, %v17351_v13  ;;  %v17356_v3 = vld [vmem:[#allocation72_spill] sm:$0xff]  ;;  %v17367_v4 = vand.u32 4294901760, %v17366_v0  ;;  %v17371_v24 = vand.u32 4294901760, %v17370_v39 }
 0x205   :  { %17337 = vst [vmem:[#allocation118_spill] sm:$0xff] %v12269_v8  ;;  %v12281_v27 = vpack.c.bf16 %v17344_v58, %v17343_v40  ;;  %v12287_v60 = vpack.c.bf16 %v17349_v19, %v17347_v10  ;;  %v17354_v8 = vand.u32 4294901760, %v17353_v6  ;;  %v17357_v32 = vand.u32 4294901760, %v17356_v3  ;;  %v17360_v40 = vld [vmem:[#allocation149_spill] sm:$0xff]  ;;  %v17364_v19 = vld [vmem:[#allocation75_spill] sm:$0xff] }
 0x206   :  { %17342 = vst [vmem:[#allocation119_spill] sm:$0xff] %v12275_v2  ;;  %v17358_v2 = vld [vmem:[#allocation71_spill] sm:$0xff]  ;;  %v17361_v58 = vand.u32 4294901760, %v17360_v40  ;;  %v8821_v25 = vpack.c.bf16 %v17234_v51, %v17233_v59  ;;  %v9013_v26 = vpack.c.bf16 %v17311_v28, %v17309_v5  ;;  %v8825_v1 = vpack.c.bf16 %v17242_v15, %v17322_v20  ;;  %v17375_v5 = vld [vmem:[#allocation153_spill] sm:$0xff] }
 0x207   :  { %17345 = vst [vmem:[#allocation121_spill] sm:$0xff] %v12281_v27  ;;  %17350 = vst [vmem:[#allocation122_spill] sm:$0xff] %v12287_v60  ;;  %v12293_v38 = vpack.c.bf16 %v17354_v8, %v17352_v56  ;;  %v17359_v36 = vand.u32 4294901760, %v17358_v2  ;;  %v17362_v27 = vld [vmem:[#allocation150_spill] sm:$0xff]  ;;  %v17365_v60 = vand.u32 4294901760, %v17364_v19  ;;  %v9017_v42 = vpack.c.bf16 %v17327_v29, %v17243_v7  ;;  %v17376_v28 = vld [vmem:[#allocation85_spill] sm:$0xff] }
 0x208   :  { %v17363_v21 = vand.u32 4294901760, %v17362_v27  ;;  %v17368_v56 = vld [vmem:[#allocation154_spill] sm:$0xff]  ;;  %8822 = vmatprep.subr.bf16.mxu1 %v8821_v25  ;;  %9014 = vmatprep.subr.bf16.mxu0 %v9013_v26  ;;  %v8827_v59 = vpack.c.bf16 %v17331_v9, %v17245_v45  ;;  %v9019_v52 = vpack.c.bf16 %v17335_v17, %v17247_v34  ;;  %v8829_v18 = vpack.c.bf16 %v17340_v37, %v17338_v57  ;;  %v17372_v34 = vld [vmem:[#allocation80_spill] sm:$0xff]  ;;  %v17381_v20 = vld [vmem:[#allocation99_spill] sm:$0xff] }
 0x209   :  { %17355 = vst [vmem:[#allocation64_spill] sm:$0xff] %v12293_v38  ;;  %v12299_v61 = vpack.c.bf16 %v17359_v36, %v17357_v32  ;;  %v12311_v8 = vpack.c.bf16 %v17367_v4, %v17365_v60  ;;  %v17369_v38 = vand.u32 4294901760, %v17368_v56  ;;  %v8823_v4 = vpack.c.bf16 %v17315_v11, %v17236_v49  ;;  %v17377_v11 = vld [vmem:[#allocation88_spill] sm:$0xff]  ;;  %v17382_v29 = vld [vmem:[#allocation101_spill] sm:$0xff]  ;;  %v17383_v9 = vld [vmem:[#allocation103_spill] sm:$0xff] }
 0x20a   :  { %v12305_v10 = vpack.c.bf16 %v17363_v21, %v17361_v58  ;;  %v9015_v21 = vpack.c.bf16 %v17239_v47, %v17318_v44  ;;  %v9021_v47 = vpack.c.bf16 %v17250_v23, %v11692_v16  ;;  %v8831_v49 = vpack.c.bf16 %v17348_v35, %v17346_v54  ;;  %v17373_v23 = vld [vmem:[#allocation83_spill] sm:$0xff]  ;;  %v17379_v44 = vld [vmem:[#allocation94_spill] sm:$0xff]  ;;  %v17387_v37 = vld [vmem:[#allocation113_spill] sm:$0xff] }
 0x20b   :  { %v12317_v36 = vpack.c.bf16 %v17371_v24, %v17369_v38  ;;  %8824 = vmatpush1.bf16.msra.mxu1 %v8823_v4  ;;  %v9023_v51 = vpack.c.bf16 %v17353_v6, %v17351_v13  ;;  %v8833_v7 = vpack.c.bf16 %v17358_v2, %v17356_v3  ;;  %v9025_v15 = vpack.c.bf16 %v17362_v27, %v17360_v40  ;;  %v17374_v24 = vld [vmem:[#allocation77_spill] sm:$0xff]  ;;  %v17384_v38 = vld [vmem:[#allocation106_spill] sm:$0xff]  ;;  %v17385_v17 = vld [vmem:[#allocation59_spill] sm:$0xff] }
 0x20c   :  { %9016 = vmatpush1.bf16.msra.mxu0 %v9015_v21  ;;  %8826 = vmatprep.subr.bf16.mxu1 %v8825_v1  ;;  %v8835_v16 = vpack.c.bf16 %v17366_v0, %v17364_v19  ;;  %v9027_v45 = vpack.c.bf16 %v17370_v39, %v17368_v56  ;;  %v17378_v0 = vld [vmem:[#allocation91_spill] sm:$0xff]  ;;  %v17380_v39 = vld [vmem:[#allocation96_spill] sm:$0xff]  ;;  %v17386_v57 = vld [vmem:[#allocation110_spill] sm:$0xff] }
 0x20d   :  { %9018 = vmatprep.subr.bf16.mxu0 %v9017_v42  ;;  %v17388_v2 = vld [vmem:[#allocation116_spill] sm:$0xff]  ;;  %v17389_v27 = vld [vmem:[#allocation62_spill] sm:$0xff]  ;;  %v17391_v35 = vld [vmem:[#allocation123_spill] sm:$0xff] }
 0x20e   :  { %v17390_v54 = vld [vmem:[#allocation120_spill] sm:$0xff]  ;;  %v17392_v60 = vld [vmem:[#allocation125_spill] sm:$0xff]  ;;  %v17393_v13 = vld [vmem:[#allocation127_spill] sm:$0xff] }
 0x20f   :  { %8828 = vmatpush1.bf16.msra.mxu1 %v8827_v59  ;;  %v17394_v6 = vld [vmem:[#allocation130_spill] sm:$0xff]  ;;  %v17395_v3 = vld [vmem:[#allocation65_spill] sm:$0xff]  ;;  %v17398_v58 = vld [vmem:[#allocation67_spill] sm:$0xff] }
 0x210   :  { %9020 = vmatpush1.bf16.msra.mxu0 %v9019_v52  ;;  %8830 = vmatprep.subr.bf16.mxu1 %v8829_v18  ;;  %v17396_v32 = vld [vmem:[#allocation134_spill] sm:$0xff]  ;;  %v17397_v40 = vld [vmem:[#allocation137_spill] sm:$0xff]  ;;  %v17400_v56 = vld [vmem:[#allocation143_spill] sm:$0xff] }
 0x211   :  { %9022 = vmatprep.subr.bf16.mxu0 %v9021_v47  ;;  %v17399_v19 = vld [vmem:[#allocation141_spill] sm:$0xff]  ;;  %v17403_v4 = vld [vmem:[#allocation148_spill] sm:$0xff]  ;;  %v17406_v42 = vld [vmem:[#allocation82_spill] sm:$0xff] }
 0x212   :  { %v17401_v25 = vld [vmem:[#allocation69_spill] sm:$0xff]  ;;  %v17407_v59 = vand.u32 4294901760, %v17406_v42  ;;  %v17408_v18 = vld [vmem:[#allocation76_spill] sm:$0xff]  ;;  %v17409_v47 = vld [vmem:[#allocation151_spill] sm:$0xff] }
 0x213   :  { %8832 = vmatpush1.bf16.msra.mxu1 %v8831_v49  ;;  %v17402_v26 = vld [vmem:[#allocation73_spill] sm:$0xff]  ;;  %v17410_v49 = vld [vmem:[#allocation78_spill] sm:$0xff] }
 0x214   :  { %9024 = vmatpush1.bf16.msra.mxu0 %v9023_v51  ;;  %8834 = vmatprep.subr.bf16.mxu1 %v8833_v7  ;;  %v17404_v21 = vld [vmem:[#allocation81_spill] sm:$0xff]  ;;  %v17411_v51 = vld [vmem:[#allocation156_spill] sm:$0xff] }
 0x215   :  { %9026 = vmatprep.subr.bf16.mxu0 %v9025_v15  ;;  %v17405_v1 = vand.u32 4294901760, %v17404_v21  ;;  %v17426_v7 = vld [vmem:[#allocation152_spill] sm:$0xff] }
 0x216   :  { %v291_v15 = vld [vmem:[#allocation12 + $0x10] sm:$0xff] }
 0x217   :  { %8836 = vmatpush1.bf16.msra.mxu1 %v8835_v16  ;;  %v8869_v52 = vpack.c.bf16 %v17407_v59, %v17405_v1  ;;  %v295_v16 = vld [vmem:[#allocation12 + $0x30] sm:$0xff] }
 0x218   :  { %9028 = vmatpush1.bf16.msra.mxu0 %v9027_v45  ;;  %8838 = vmatprep.subr.bf16.mxu1 %v17372_v34  ;;  %v300_v45 = vld [vmem:[#allocation12 + $0x58] sm:$0xff] }
 0x219   :  { %9030 = vmatprep.subr.bf16.mxu0 %v17373_v23 }
 0x21a   :  { %1746 = vmatmul.mubr.f32.vlgmr.msra.gmra.mrb[2].mxu1 %v17374_v24  ;;  %v2991_v24 = vand.u32 4294901760, %v295_v16 }
 0x21b   :  { %2601 = vmatmul.mubr.f32.vlgmr.msra.gmra.mrb[0].mxu0 %v17375_v5  ;;  %8840 = vmatpush1.bf16.msra.mxu1 %v17376_v28 }
 0x21c   :  { %9032 = vmatpush1.bf16.msra.mxu0 %v17377_v11  ;;  %8842 = vmatprep.subr.bf16.mxu1 %v17378_v0 }
 0x21d   :  { %9034 = vmatprep.subr.bf16.mxu0 %v17379_v44  ;;  %1848 = vmatprep.mubr.f32.mxu1 %v17062_v14 }
 0x21e   :  { %2703 = vmatprep.mubr.f32.mxu0 %v17062_v14 }
 0x21f   :  { %8844 = vmatpush1.bf16.msra.mxu1 %v17380_v39 }
 0x220   :  { %9036 = vmatpush1.bf16.msra.mxu0 %v17381_v20  ;;  %8846 = vmatprep.subr.bf16.mxu1 %v17382_v29 }
 0x221   :  { %9038 = vmatprep.subr.bf16.mxu0 %v17383_v9 }
 0x223   :  { %8848 = vmatpush1.bf16.msra.mxu1 %v17384_v38 }
 0x224   :  { %9040 = vmatpush1.bf16.msra.mxu0 %v17385_v17  ;;  %8850 = vmatprep.subr.bf16.mxu1 %v17386_v57 }
 0x225   :  { %9042 = vmatprep.subr.bf16.mxu0 %v17387_v37 }
 0x227   :  { %8852 = vmatpush1.bf16.msra.mxu1 %v17388_v2 }
 0x228   :  { %9044 = vmatpush1.bf16.msra.mxu0 %v17389_v27  ;;  %8854 = vmatprep.subr.bf16.mxu1 %v17390_v54 }
 0x229   :  { %9046 = vmatprep.subr.bf16.mxu0 %v17391_v35 }
 0x22b   :  { %8856 = vmatpush1.bf16.msra.mxu1 %v17392_v60 }
 0x22c   :  { %9048 = vmatpush1.bf16.msra.mxu0 %v17393_v13  ;;  %8858 = vmatprep.subr.bf16.mxu1 %v17394_v6 }
 0x22d   :  { %9050 = vmatprep.subr.bf16.mxu0 %v17395_v3 }
 0x22f   :  { %8860 = vmatpush1.bf16.msra.mxu1 %v17396_v32 }
 0x230   :  { %9052 = vmatpush1.bf16.msra.mxu0 %v17397_v40  ;;  %8862 = vmatprep.subr.bf16.mxu1 %v17398_v58 }
 0x231   :  { %9054 = vmatprep.subr.bf16.mxu0 %v17399_v19 }
 0x233   :  { %8864 = vmatpush1.bf16.msra.mxu1 %v17400_v56 }
 0x234   :  { %9056 = vmatpush1.bf16.msra.mxu0 %v17401_v25  ;;  %8866 = vmatprep.subr.bf16.mxu1 %v17402_v26 }
 0x235   :  { %9058 = vmatprep.subr.bf16.mxu0 %v17403_v4 }
 0x237   :  { %8868 = vmatpush1.bf16.msra.mxu1 %v17408_v18 }
 0x238   :  { %9060 = vmatpush1.bf16.msra.mxu0 %v17409_v47  ;;  %8870 = vmatprep.subr.bf16.mxu1 %v8869_v52 }
 0x239   :  { %9062 = vmatprep.subr.bf16.mxu0 %v12135_v43  ;;  %v17413_v43 = vld [vmem:[#allocation100_spill] sm:$0xff] }
 0x23a   :  { %1852 = vmatmul.mubr.f32.vlgmr.msra.gmra.mrb[2].mxu1 %v17410_v49 }
 0x23b   :  { %2707 = vmatmul.mubr.f32.vlgmr.msra.gmra.mrb[0].mxu0 %v17411_v51  ;;  %8872 = vmatpush1.bf16.msra.mxu1 %v12141_v48  ;;  %v17412_v48 = vld [vmem:[#allocation93_spill] sm:$0xff] }
 0x23c   :  { %9064 = vmatpush1.bf16.msra.mxu0 %v12147_v53  ;;  %8874 = vmatprep.subr.bf16.mxu1 %v12153_v33  ;;  %v17414_v53 = vld [vmem:[#allocation104_spill] sm:$0xff]  ;;  %v17415_v33 = vld [vmem:[#allocation105_spill] sm:$0xff] }
 0x23d   :  { %9066 = vmatprep.subr.bf16.mxu0 %v12159_v30  ;;  %2018 = vmatprep.mubr.f32.mxu1 %v17062_v14  ;;  %v17416_v30 = vld [vmem:[#allocation107_spill] sm:$0xff] }
 0x23e   :  { %2873 = vmatprep.mubr.f32.mxu0 %v17062_v14 }
 0x23f   :  { %8876 = vmatpush1.bf16.msra.mxu1 %v12165_v50  ;;  %v17417_v50 = vld [vmem:[#allocation60_spill] sm:$0xff] }
 0x240   :  { %9068 = vmatpush1.bf16.msra.mxu0 %v12171_v55  ;;  %8878 = vmatprep.subr.bf16.mxu1 %v12179_v46  ;;  %v17418_v55 = vld [vmem:[#allocation115_spill] sm:$0xff]  ;;  %v17419_v46 = vld [vmem:[#allocation117_spill] sm:$0xff] }
 0x241   :  { %9070 = vmatprep.subr.bf16.mxu0 %v12185_v12  ;;  %v17420_v12 = vld [vmem:[#allocation118_spill] sm:$0xff] }
 0x243   :  { %8880 = vmatpush1.bf16.msra.mxu1 %v12191_v41  ;;  %v17421_v41 = vld [vmem:[#allocation119_spill] sm:$0xff] }
 0x244   :  { %9072 = vmatpush1.bf16.msra.mxu0 %v12197_v31  ;;  %8882 = vmatprep.subr.bf16.mxu1 %v12203_v22  ;;  %v17422_v31 = vld [vmem:[#allocation121_spill] sm:$0xff]  ;;  %v17423_v22 = vld [vmem:[#allocation122_spill] sm:$0xff] }
 0x245   :  { %9074 = vmatprep.subr.bf16.mxu0 %v12209_v63  ;;  %v17424_v63 = vld [vmem:[#allocation64_spill] sm:$0xff] }
 0x247   :  { %8884 = vmatpush1.bf16.msra.mxu1 %v12215_v62  ;;  %v17425_v62 = vld [vmem:[#allocation70_spill] sm:$0xff] }
 0x248   :  { %9076 = vmatpush1.bf16.msra.mxu0 %v17412_v48  ;;  %8886 = vmatprep.subr.bf16.mxu1 %v17413_v43 }
 0x249   :  { %9078 = vmatprep.subr.bf16.mxu0 %v17414_v53  ;;  %v332_v53 = vld [vmem:[#allocation12 + $0x158] sm:$0xff] }
 0x24b   :  { %8888 = vmatpush1.bf16.msra.mxu1 %v17415_v33  ;;  %v336_v33 = vld [vmem:[#allocation12 + $0x178] sm:$0xff] }
 0x24c   :  { %9080 = vmatpush1.bf16.msra.mxu0 %v17416_v30  ;;  %8890 = vmatprep.subr.bf16.mxu1 %v17417_v50  ;;  %v12499_v30 = vsub.f32 %v295_v16, %v2991_v24 }
 0x24d   :  { %9082 = vmatprep.subr.bf16.mxu0 %v17418_v55 }
 0x24e   :  { %v17445_v51 = vand.u32 4294901760, %v12499_v30 }
 0x24f   :  { %8892 = vmatpush1.bf16.msra.mxu1 %v17419_v46 }
 0x250   :  { %9084 = vmatpush1.bf16.msra.mxu0 %v17420_v12  ;;  %8894 = vmatprep.subr.bf16.mxu1 %v17421_v41 }
 0x251   :  { %9086 = vmatprep.subr.bf16.mxu0 %v17422_v31 }
 0x253   :  { %8896 = vmatpush1.bf16.msra.mxu1 %v17423_v22 }
 0x254   :  { %9088 = vmatpush1.bf16.msra.mxu0 %v17424_v63  ;;  %8898 = vmatprep.subr.bf16.mxu1 %v12299_v61  ;;  %v12452_v61 = vld [vmem:[#allocation12 + $0x18] sm:$0xff]  ;;  %v12512_v63 = vld [vmem:[#allocation12 + $0x150] sm:$0xff] }
 0x255   :  { %9090 = vmatprep.subr.bf16.mxu0 %v12305_v10  ;;  %v12454_v10 = vld [vmem:[#allocation12 + $0x38] sm:$0xff] }
 0x257   :  { %8900 = vmatpush1.bf16.msra.mxu1 %v12311_v8  ;;  %v2985_v8 = vand.u32 4294901760, %v12452_v61 }
 0x258   :  { %9092 = vmatpush1.bf16.msra.mxu0 %v12317_v36  ;;  %8902 = vmatprep.subr.bf16.mxu1 %v17372_v34  ;;  %v2989_v36 = vand.u32 4294901760, %v12454_v10  ;;  %v304_v34 = vld [vmem:[#allocation12 + $0x78] sm:$0xff] }
 0x259   :  { %9094 = vmatprep.subr.bf16.mxu0 %v17373_v23  ;;  %v2987_v23 = vand.u32 4294901760, %v291_v15  ;;  %v12492_v49 = vsub.f32 %v12452_v61, %v2985_v8 }
 0x25a   :  { %2020 = vmatmul.mubr.f32.vlgmr.msra.gmra.mrb[2].mxu1 %v17425_v62  ;;  %v12495_v48 = vsub.f32 %v12454_v10, %v2989_v36 }
 0x25b   :  { %2875 = vmatmul.mubr.f32.vlgmr.msra.gmra.mrb[0].mxu0 %v17426_v7  ;;  %8904 = vmatpush1.bf16.msra.mxu1 %v17376_v28  ;;  %v12466_v28 = vpack.c.bf16 %v2989_v36, %v2985_v8  ;;  %v12497_v43 = vsub.f32 %v291_v15, %v2987_v23  ;;  %v3025_v8 = vand.u32 4294901760, %v332_v53  ;;  %v3029_v36 = vand.u32 4294901760, %v336_v33 }
 0x25c   :  { %9096 = vmatpush1.bf16.msra.mxu0 %v17377_v11  ;;  %8906 = vmatprep.subr.bf16.mxu1 %v17378_v0  ;;  %v2993_v11 = vand.u32 4294901760, %v300_v45  ;;  %v2997_v0 = vand.u32 4294901760, %v304_v34 }
 0x25d   :  { %9098 = vmatprep.subr.bf16.mxu0 %v17379_v44  ;;  %2977 = vmatprep.mubr.f32.mxu0 %v17062_v14  ;;  %17427 = vst [vmem:[#allocation129_spill] sm:$0xff] %v12466_v28  ;;  %v299_v44 = vld [vmem:[#allocation12 + $0x50] sm:$0xff] }
 0x25e   :  { %2122 = vmatprep.mubr.f32.mxu1 %v17062_v14  ;;  %v12501_v50 = vsub.f32 %v300_v45, %v2993_v11  ;;  %v12503_v55 = vsub.f32 %v304_v34, %v2997_v0 }
 0x25f   :  { %8908 = vmatpush1.bf16.msra.mxu1 %v17380_v39  ;;  %v303_v39 = vld [vmem:[#allocation12 + $0x70] sm:$0xff] }
 0x260   :  { %9100 = vmatpush1.bf16.msra.mxu0 %v17381_v20  ;;  %8910 = vmatprep.subr.bf16.mxu1 %v17382_v29  ;;  %v308_v20 = vld [vmem:[#allocation12 + $0x98] sm:$0xff] }
 0x261   :  { %9102 = vmatprep.subr.bf16.mxu0 %v17383_v9  ;;  %v312_v29 = vld [vmem:[#allocation12 + $0xb8] sm:$0xff]  ;;  %v12470_v9 = vpack.c.bf16 %v2991_v24, %v2987_v23 }
 0x262   :  { %v340_v23 = vld [vmem:[#allocation12 + $0x198] sm:$0xff] }
 0x263   :  { %8912 = vmatpush1.bf16.msra.mxu1 %v17384_v38  ;;  %17428 = vst [vmem:[#allocation79_spill] sm:$0xff] %v12470_v9  ;;  %v2995_v38 = vand.u32 4294901760, %v299_v44  ;;  %v12529_v24 = vld [vmem:[#allocation12 + $0x1b8] sm:$0xff] }
 0x264   :  { %9104 = vmatpush1.bf16.msra.mxu0 %v17385_v17  ;;  %8914 = vmatprep.subr.bf16.mxu1 %v17386_v57  ;;  %v2999_v17 = vand.u32 4294901760, %v303_v39  ;;  %v12473_v57 = vpack.c.bf16 %v2997_v0, %v2993_v11 }
 0x265   :  { %9106 = vmatprep.subr.bf16.mxu0 %v17387_v37  ;;  %v3001_v37 = vand.u32 4294901760, %v308_v20  ;;  %v12505_v46 = vsub.f32 %v299_v44, %v2995_v38  ;;  %v3027_v44 = vand.u32 4294901760, %v12512_v63 }
 0x266   :  { %17429 = vst [vmem:[#allocation132_spill] sm:$0xff] %v12473_v57  ;;  %v12507_v12 = vsub.f32 %v303_v39, %v2999_v17 }
 0x267   :  { %8916 = vmatpush1.bf16.msra.mxu1 %v17388_v2  ;;  %v3005_v2 = vand.u32 4294901760, %v312_v29  ;;  %v12516_v61 = vsub.f32 %v308_v20, %v3001_v37  ;;  %v12537_v20 = vld [vmem:[#allocation12 + $0x190] sm:$0xff] }
 0x268   :  { %9108 = vmatpush1.bf16.msra.mxu0 %v17389_v27  ;;  %8918 = vmatprep.subr.bf16.mxu1 %v17390_v54  ;;  %v307_v27 = vld [vmem:[#allocation12 + $0x90] sm:$0xff] }
 0x269   :  { %9110 = vmatprep.subr.bf16.mxu0 %v17391_v35  ;;  %v311_v54 = vld [vmem:[#allocation12 + $0xb0] sm:$0xff]  ;;  %v316_v35 = vld [vmem:[#allocation12 + $0xd8] sm:$0xff]  ;;  %v12521_v15 = vsub.f32 %v312_v29, %v3005_v2 }
 0x26a   :  { %v12539_v29 = vld [vmem:[#allocation12 + $0x1b0] sm:$0xff] }
 0x26b   :  { %8920 = vmatpush1.bf16.msra.mxu1 %v17392_v60  ;;  %v320_v60 = vld [vmem:[#allocation12 + $0xf8] sm:$0xff] }
 0x26c   :  { %9112 = vmatpush1.bf16.msra.mxu0 %v17393_v13  ;;  %8922 = vmatprep.subr.bf16.mxu1 %v17394_v6  ;;  %v12478_v13 = vpack.c.bf16 %v2999_v17, %v2995_v38  ;;  %v3003_v6 = vand.u32 4294901760, %v307_v27 }
 0x26d   :  { %9114 = vmatprep.subr.bf16.mxu0 %v17395_v3  ;;  %v3007_v3 = vand.u32 4294901760, %v311_v54 }
 0x26e   :  { %17430 = vst [vmem:[#allocation66_spill] sm:$0xff] %v12478_v13  ;;  %v12523_v16 = vsub.f32 %v307_v27, %v3003_v6 }
 0x26f   :  { %8924 = vmatpush1.bf16.msra.mxu1 %v17396_v32  ;;  %v12482_v32 = vpack.c.bf16 %v3005_v2, %v3001_v37  ;;  %v12525_v45 = vsub.f32 %v311_v54, %v3007_v3  ;;  %v16503_v37 = vand.u32 4294901760, %v12492_v49  ;;  %v16504_v2 = vand.u32 4294901760, %v12495_v48 }
 0x270   :  { %9116 = vmatpush1.bf16.msra.mxu0 %v17397_v40  ;;  %8926 = vmatprep.subr.bf16.mxu1 %v17398_v58  ;;  %v3009_v40 = vand.u32 4294901760, %v316_v35  ;;  %v3013_v58 = vand.u32 4294901760, %v320_v60  ;;  %v12551_v54 = vpack.c.bf16 %v3029_v36, %v3025_v8 }
 0x271   :  { %9118 = vmatprep.subr.bf16.mxu0 %v17399_v19  ;;  %17431 = vst [vmem:[#allocation135_spill] sm:$0xff] %v12482_v32  ;;  %v315_v19 = vld [vmem:[#allocation12 + $0xd0] sm:$0xff] }
 0x272   :  { %v3011_v21 = vand.u32 4294901760, %v315_v19  ;;  %v12489_v42 = vpack.c.bf16 %v3013_v58, %v3009_v40  ;;  %v12527_v34 = vsub.f32 %v316_v35, %v3009_v40  ;;  %v12531_v11 = vsub.f32 %v320_v60, %v3013_v58  ;;  %17437 = vst [vmem:[#allocation89_spill] sm:$0xff] %v12551_v54 }
 0x273   :  { %8928 = vmatpush1.bf16.msra.mxu1 %v17400_v56  ;;  %v319_v56 = vld [vmem:[#allocation12 + $0xf0] sm:$0xff]  ;;  %v3033_v35 = vand.u32 4294901760, %v340_v23  ;;  %v3037_v60 = vand.u32 4294901760, %v12529_v24  ;;  %v3035_v40 = vand.u32 4294901760, %v12537_v20  ;;  %v12584_v58 = vsub.f32 %v332_v53, %v3025_v8 }
 0x274   :  { %9120 = vmatpush1.bf16.msra.mxu0 %v17401_v25  ;;  %8930 = vmatprep.subr.bf16.mxu1 %v17402_v26  ;;  %v324_v25 = vld [vmem:[#allocation12 + $0x118] sm:$0xff]  ;;  %v3015_v1 = vand.u32 4294901760, %v319_v56  ;;  %17433 = vst [vmem:[#allocation142_spill] sm:$0xff] %v12489_v42  ;;  %v12533_v0 = vsub.f32 %v315_v19, %v3011_v21  ;;  %v17444_v8 = vand.u32 4294901760, %v12497_v43 }
 0x275   :  { %9122 = vmatprep.subr.bf16.mxu0 %v17403_v4  ;;  %v328_v26 = vld [vmem:[#allocation12 + $0x138] sm:$0xff]  ;;  %v12486_v4 = vpack.c.bf16 %v3007_v3, %v3003_v6  ;;  %v3017_v59 = vand.u32 4294901760, %v324_v25 }
 0x276   :  { %v3021_v52 = vand.u32 4294901760, %v328_v26  ;;  %v12510_v41 = vpack.c.bf16 %v3015_v1, %v3011_v21  ;;  %v12542_v38 = vsub.f32 %v319_v56, %v3015_v1  ;;  %v12560_v19 = vld [vmem:[#allocation12 + $0x1d8] sm:$0xff]  ;;  %v12568_v1 = vld [vmem:[#allocation12 + $0x1d0] sm:$0xff] }
 0x277   :  { %8932 = vmatpush1.bf16.msra.mxu1 %v17408_v18  ;;  %17432 = vst [vmem:[#allocation138_spill] sm:$0xff] %v12486_v4  ;;  %v323_v18 = vld [vmem:[#allocation12 + $0x110] sm:$0xff]  ;;  %v12549_v27 = vsub.f32 %v324_v25, %v3017_v59  ;;  %v12562_v56 = vld [vmem:[#allocation12 + $0x1f8] sm:$0xff] }
 0x278   :  { %9124 = vmatpush1.bf16.msra.mxu0 %v17409_v47  ;;  %9126 = vmatprep.subr.bf16.mxu1 %v12466_v28  ;;  %v327_v47 = vld [vmem:[#allocation12 + $0x130] sm:$0xff]  ;;  %17434 = vst [vmem:[#allocation84_spill] sm:$0xff] %v12510_v41  ;;  %v3019_v31 = vand.u32 4294901760, %v323_v18  ;;  %v12519_v10 = vpack.c.bf16 %v3021_v52, %v3017_v59  ;;  %v12554_v6 = vsub.f32 %v328_v26, %v3021_v52 }
 0x279   :  { %v3023_v22 = vand.u32 4294901760, %v327_v47  ;;  %v12570_v59 = vld [vmem:[#allocation12 + $0x1f0] sm:$0xff]  ;;  %v12586_v26 = vpack.c.bf16 %v3037_v60, %v3033_v35  ;;  %v3102_v52 = vsub.f32 %v12497_v43, %v17444_v8 }
 0x27a   :  { %2124 = vmatmul.mubr.f32.vlgmr.msra.gmra.mrb[2].mxu1 %v17425_v62  ;;  %v12514_v62 = vld [vmem:[#allocation12 + $0x170] sm:$0xff]  ;;  %17435 = vst [vmem:[#allocation86_spill] sm:$0xff] %v12519_v10  ;;  %v12556_v3 = vsub.f32 %v323_v18, %v3019_v31  ;;  %v3096_v18 = vsub.f32 %v12492_v49, %v16503_v37  ;;  %v12592_v37 = vsub.f32 %v336_v33, %v3029_v36  ;;  %v17449_v36 = vand.u32 4294901760, %v12562_v56 }
 0x27b   :  { %2979 = vmatmul.mubr.f32.vlgmr.msra.gmra.mrb[0].mxu0 %v17426_v7  ;;  %9128 = vmatpush1.bf16.msra.mxu1 %v12470_v9  ;;  %v3031_v39 = vand.u32 4294901760, %v12514_v62  ;;  %v12544_v17 = vpack.c.bf16 %v3023_v22, %v3019_v31  ;;  %v12564_v21 = vsub.f32 %v327_v47, %v3023_v22  ;;  %v3108_v47 = vsub.f32 %v12495_v48, %v16504_v2 }
 0x27c   :  { %3081 = vmatprep.mubr.f32.mxu1 %v17062_v14  ;;  %9130 = vmatprep.subr.bf16.mxu1 %v12473_v57  ;;  %17439 = vst [vmem:[#allocation95_spill] sm:$0xff] %v12586_v26  ;;  %v17441_v2 = vand.u32 4294901760, %v12539_v29  ;;  %v17446_v31 = vand.u32 4294901760, %v12501_v50 }
 0x27d   :  { %4120 = vmatprep.mubr.f32.mxu0 %v17062_v14  ;;  %17436 = vst [vmem:[#allocation87_spill] sm:$0xff] %v12544_v17  ;;  %v12566_v25 = vpack.c.bf16 %v3031_v39, %v3027_v44  ;;  %v3109_v22 = vand.u32 4294901760, %v3108_v47  ;;  %v16519_v47 = vand.u32 4294901760, %v12521_v15 }
 0x27f   :  { %9132 = vmatpush1.bf16.msra.mxu1 %v12478_v13  ;;  %17438 = vst [vmem:[#allocation90_spill] sm:$0xff] %v12566_v25 }
 0x280   :  { %9134 = vmatprep.subr.bf16.mxu1 %v12482_v32 }
 0x283   :  { %9136 = vmatpush1.bf16.msra.mxu1 %v12486_v4  ;;  %v17459_v4 = vand.u32 4294901760, %v12527_v34 }
 0x284   :  { %9138 = vmatprep.subr.bf16.mxu1 %v12489_v42  ;;  %v17451_v42 = vand.u32 4294901760, %v12505_v46 }
 0x287   :  { %9140 = vmatpush1.bf16.msra.mxu1 %v12510_v41  ;;  %v12618_v41 = vsub.f32 %v12512_v63, %v3027_v44  ;;  %v16524_v63 = vand.u32 4294901760, %v12533_v0 }
 0x288   :  { %9142 = vmatprep.subr.bf16.mxu1 %v12519_v10  ;;  %v12596_v10 = vpack.c.bf16 %v17441_v2, %v3035_v40  ;;  %v3097_v2 = vand.u32 4294901760, %v3096_v18 }
 0x28a   :  { %17442 = vst [vmem:[#allocation97_spill] sm:$0xff] %v12596_v10 }
 0x28b   :  { %9144 = vmatpush1.bf16.msra.mxu1 %v12544_v17  ;;  %v12590_v17 = vpop.f32.mrb[0].mxu1 }
 0x28c   :  { %9146 = vmatprep.subr.bf16.mxu1 %v12551_v54  ;;  %17440 = vst [vmem:[#allocation56_spill] sm:$0xff] %v12590_v17  ;;  %v12600_v53 = vpop.f32.mrb[1].mxu1  ;;  %v3114_v17 = vsub.f32 %v12499_v30, %v17445_v51  ;;  %v17447_v54 = vand.u32 4294901760, %v12503_v55  ;;  %v17448_v51 = vand.u32 4294901760, %v12560_v19 }
 0x28d   :  { %17443 = vst [vmem:[#allocation98_spill] sm:$0xff] %v12600_v53  ;;  %v3120_v53 = vsub.f32 %v12501_v50, %v17446_v31  ;;  %v12630_v31 = vsub.f32 %v12514_v62, %v3031_v39  ;;  %v17453_v62 = vand.u32 4294901760, %v12568_v1 }
 0x28e   :  { %v3132_v8 = vsub.f32 %v12503_v55, %v17447_v54  ;;  %v12625_v33 = vpack.c.bf16 %v17449_v36, %v17448_v51  ;;  %v3103_v54 = vand.u32 4294901760, %v3102_v52  ;;  %v3126_v36 = vsub.f32 %v12505_v46, %v17451_v42 }
 0x28f   :  { %9148 = vmatpush1.bf16.msra.mxu1 %v12566_v25  ;;  %v12632_v25 = vsub.f32 %v340_v23, %v3033_v35  ;;  %v17452_v51 = vand.u32 4294901760, %v12507_v12  ;;  %v17454_v23 = vand.u32 4294901760, %v12570_v59  ;;  %v9157_v35 = vpack.c.bf16 %v3109_v22, %v3097_v2 }
 0x290   :  { %9150 = vmatprep.subr.bf16.mxu1 %v12586_v26  ;;  %17450 = vst [vmem:[#allocation57_spill] sm:$0xff] %v12625_v33  ;;  %v3115_v26 = vand.u32 4294901760, %v3114_v17  ;;  %v3121_v44 = vand.u32 4294901760, %v3120_v53  ;;  %v3133_v52 = vand.u32 4294901760, %v3132_v8  ;;  %v17456_v17 = vand.u32 4294901760, %v12516_v61 }
 0x291   :  { %v3138_v18 = vsub.f32 %v12507_v12, %v17452_v51  ;;  %v12647_v39 = vpack.c.bf16 %v17454_v23, %v17453_v62  ;;  %v3156_v51 = vsub.f32 %v12521_v15, %v16519_v47  ;;  %v12659_v62 = vsub.f32 %v12529_v24, %v3037_v60 }
 0x292   :  { %v3144_v42 = vsub.f32 %v12516_v61, %v17456_v17  ;;  %v12662_v22 = vsub.f32 %v12537_v20, %v3035_v40  ;;  %v17457_v53 = vand.u32 4294901760, %v12523_v16  ;;  %v17458_v8 = vand.u32 4294901760, %v12525_v45  ;;  %v17461_v20 = vld [vmem:[#allocation92_spill] sm:$0xff] }
 0x293   :  { %9152 = vmatpush1.bf16.msra.mxu1 %v12596_v10  ;;  %17455 = vst [vmem:[#allocation102_spill] sm:$0xff] %v12647_v39  ;;  %v9159_v17 = vpack.c.bf16 %v3115_v26, %v3103_v54  ;;  %v3127_v47 = vand.u32 4294901760, %v3126_v36  ;;  %v9161_v24 = vpack.c.bf16 %v3133_v52, %v3121_v44  ;;  %v16525_v60 = vand.u32 4294901760, %v12542_v38 }
 0x294   :  { %9154 = vmatprep.subr.bf16.mxu1 %v12625_v33  ;;  %v3150_v2 = vsub.f32 %v12523_v16, %v17457_v53  ;;  %v3162_v23 = vsub.f32 %v12525_v45, %v17458_v8  ;;  %v3139_v33 = vand.u32 4294901760, %v3138_v18  ;;  %v3145_v53 = vand.u32 4294901760, %v3144_v42 }
 0x295   :  { %v3157_v10 = vand.u32 4294901760, %v3156_v51  ;;  %v3168_v26 = vsub.f32 %v12527_v34, %v17459_v4  ;;  %v17460_v18 = vand.u32 4294901760, %v12531_v11  ;;  %v16529_v44 = vand.u32 4294901760, %v12556_v3 }
 0x296   :  { %v3151_v36 = vand.u32 4294901760, %v3150_v2  ;;  %v3163_v8 = vand.u32 4294901760, %v3162_v23  ;;  %v16528_v52 = vand.u32 4294901760, %v12564_v21  ;;  %v9163_v40 = vpack.c.bf16 %v3139_v33, %v3127_v47 }
 0x297   :  { %9156 = vmatpush1.bf16.msra.mxu1 %v12647_v39  ;;  %v3180_v54 = vsub.f32 %v12531_v11, %v17460_v18  ;;  %v3186_v51 = vsub.f32 %v12542_v38, %v16525_v60  ;;  %v17462_v2 = vand.u32 4294901760, %v12549_v27  ;;  %v17464_v47 = vand.u32 4294901760, %v12539_v29 }
 0x298   :  { %9158 = vmatprep.subr.bf16.mxu1 %v9157_v35  ;;  %v3174_v35 = vsub.f32 %v12533_v0, %v16524_v63  ;;  %v3169_v63 = vand.u32 4294901760, %v3168_v26  ;;  %v17465_v60 = vand.u32 4294901760, %v12560_v19  ;;  %v3210_v39 = vsub.f32 %v12564_v21, %v16528_v52 }
 0x299   :  { %v3192_v23 = vsub.f32 %v12549_v27, %v17462_v2  ;;  %v12702_v18 = vsub.f32 %v12539_v29, %v17464_v47  ;;  %v3181_v4 = vand.u32 4294901760, %v3180_v54  ;;  %v9167_v2 = vpack.c.bf16 %v3163_v8, %v3151_v36 }
 0x29a   :  { %3087 = vmatmul.mubr.f32.vlgmr.msra.gmra.mrb[2].mxu1 %v17461_v20  ;;  %v17463_v20 = vand.u32 4294901760, %v12554_v6  ;;  %v12707_v42 = vsub.f32 %v12560_v19, %v17465_v60  ;;  %v17466_v29 = vand.u32 4294901760, %v12584_v58  ;;  %v3175_v26 = vand.u32 4294901760, %v3174_v35 }
 0x29b   :  { %9160 = vmatpush1.bf16.msra.mxu1 %v9159_v17  ;;  %3317 = vmatprep.mubr.f32.mxu1 %v17062_v14  ;;  %v9165_v17 = vpack.c.bf16 %v3157_v10, %v3145_v53  ;;  %v3187_v54 = vand.u32 4294901760, %v3186_v51  ;;  %v3193_v36 = vand.u32 4294901760, %v3192_v23  ;;  %v17468_v47 = vand.u32 4294901760, %v12562_v56 }
 0x29c   :  { %v3204_v33 = vsub.f32 %v12554_v6, %v17463_v20  ;;  %9162 = vmatprep.subr.bf16.mxu1 %v9161_v24  ;;  %v3198_v20 = vsub.f32 %v12556_v3, %v16529_v44  ;;  %v3216_v10 = vsub.f32 %v12584_v58, %v17466_v29  ;;  %v17467_v24 = vand.u32 4294901760, %v12592_v37 }
 0x29d   :  { %v12726_v52 = vsub.f32 %v12562_v56, %v17468_v47  ;;  %v9169_v29 = vpack.c.bf16 %v3181_v4, %v3169_v63  ;;  %v16530_v44 = vand.u32 4294901760, %v12632_v25  ;;  %v17469_v19 = vand.u32 4294901760, %v12568_v1 }
 0x29e   :  { %v3228_v53 = vsub.f32 %v12592_v37, %v17467_v24  ;;  %v3205_v8 = vand.u32 4294901760, %v3204_v33  ;;  %v3199_v51 = vand.u32 4294901760, %v3198_v20  ;;  %v3211_v23 = vand.u32 4294901760, %v3210_v39 }
 0x29f   :  { %9164 = vmatpush1.bf16.msra.mxu1 %v9163_v40  ;;  %v12733_v60 = vsub.f32 %v12568_v1, %v17469_v19  ;;  %v17470_v40 = vand.u32 4294901760, %v12570_v59  ;;  %v3217_v56 = vand.u32 4294901760, %v3216_v10  ;;  %v17471_v63 = vand.u32 4294901760, %v12618_v41 }
 0x2a0   :  { %9166 = vmatprep.subr.bf16.mxu1 %v9165_v17  ;;  %v3229_v33 = vand.u32 4294901760, %v3228_v53  ;;  %v17472_v17 = vand.u32 4294901760, %v12630_v31  ;;  %v9171_v1 = vpack.c.bf16 %v3187_v54, %v3175_v26  ;;  %v9173_v19 = vpack.c.bf16 %v3205_v8, %v3193_v36 }
 0x2a1   :  { %v12738_v35 = vsub.f32 %v12570_v59, %v17470_v40  ;;  %v3222_v4 = vsub.f32 %v12618_v41, %v17471_v63  ;;  %v16536_v24 = vand.u32 4294901760, %v12662_v22  ;;  %v16532_v59 = vand.u32 4294901760, %v12702_v18 }
 0x2a2   :  { %v3234_v47 = vsub.f32 %v12630_v31, %v17472_v17  ;;  %v3240_v39 = vsub.f32 %v12632_v25, %v16530_v44  ;;  %v17473_v20 = vand.u32 4294901760, %v12659_v62  ;;  %v16531_v53 = vand.u32 4294901760, %v12707_v42 }
 0x2a3   :  { %9168 = vmatpush1.bf16.msra.mxu1 %v9167_v2  ;;  %v16533_v40 = vand.u32 4294901760, %v12726_v52  ;;  %v9175_v2 = vpack.c.bf16 %v3211_v23, %v3199_v51  ;;  %v9177_v26 = vpack.c.bf16 %v3229_v33, %v3217_v56  ;;  %v3223_v54 = vand.u32 4294901760, %v3222_v4 }
 0x2a4   :  { %9170 = vmatprep.subr.bf16.mxu1 %v9169_v29  ;;  %v3252_v10 = vsub.f32 %v12659_v62, %v17473_v20  ;;  %v3235_v36 = vand.u32 4294901760, %v3234_v47  ;;  %v3246_v8 = vsub.f32 %v12662_v22, %v16536_v24  ;;  %v3258_v29 = vsub.f32 %v12702_v18, %v16532_v59 }
 0x2a5   :  { %v16535_v63 = vand.u32 4294901760, %v12733_v60  ;;  %v16534_v17 = vand.u32 4294901760, %v12738_v35  ;;  %v3241_v20 = vand.u32 4294901760, %v3240_v39  ;;  %v3264_v51 = vsub.f32 %v12707_v42, %v16531_v53 }
 0x2a6   :  { %v3253_v44 = vand.u32 4294901760, %v3252_v10  ;;  %v3276_v23 = vsub.f32 %v12726_v52, %v16533_v40  ;;  %v9179_v56 = vpack.c.bf16 %v3235_v36, %v3223_v54  ;;  %v3247_v33 = vand.u32 4294901760, %v3246_v8 }
 0x2a7   :  { %9172 = vmatpush1.bf16.msra.mxu1 %v9171_v1  ;;  %v3259_v4 = vand.u32 4294901760, %v3258_v29  ;;  %v3270_v47 = vsub.f32 %v12733_v60, %v16535_v63  ;;  %v3282_v1 = vsub.f32 %v12738_v35, %v16534_v17  ;;  %v3265_v39 = vand.u32 4294901760, %v3264_v51  ;;  %v12863_v17 = vld [vmem:[#allocation16 + $0xa8] sm:$0xff] }
 0x2a8   :  { %9174 = vmatprep.subr.bf16.mxu1 %v9173_v19  ;;  %v9181_v19 = vpack.c.bf16 %v3253_v44, %v3241_v20  ;;  %v3277_v10 = vand.u32 4294901760, %v3276_v23  ;;  %v9189_v36 = vpack.c.bf16 %v12495_v48, %v12492_v49  ;;  %v9191_v8 = vpack.c.bf16 %v12499_v30, %v12497_v43 }
 0x2a9   :  { %v9183_v53 = vpack.c.bf16 %v3259_v4, %v3247_v33  ;;  %v3271_v59 = vand.u32 4294901760, %v3270_v47  ;;  %v3283_v40 = vand.u32 4294901760, %v3282_v1  ;;  %v9193_v44 = vpack.c.bf16 %v12503_v55, %v12501_v50  ;;  %v12808_v1 = vld [vmem:[#allocation16 + $0x8] sm:$0xff] }
 0x2aa   :  { %v9203_v29 = vpack.c.bf16 %v12542_v38, %v12533_v0  ;;  %v9205_v20 = vpack.c.bf16 %v12554_v6, %v12549_v27  ;;  %v9207_v51 = vpack.c.bf16 %v12564_v21, %v12556_v3  ;;  %v9209_v23 = vpack.c.bf16 %v12592_v37, %v12584_v58 }
 0x2ab   :  { %9176 = vmatpush1.bf16.msra.mxu1 %v9175_v2  ;;  %v9185_v2 = vpack.c.bf16 %v3277_v10, %v3265_v39  ;;  %v9187_v54 = vpack.c.bf16 %v3283_v40, %v3271_v59  ;;  %v9197_v59 = vpack.c.bf16 %v12521_v15, %v12516_v61  ;;  %v9201_v40 = vpack.c.bf16 %v12531_v11, %v12527_v34 }
 0x2ac   :  { %9178 = vmatprep.subr.bf16.mxu1 %v9177_v26  ;;  %v9195_v26 = vpack.c.bf16 %v12507_v12, %v12505_v46  ;;  %v9213_v33 = vpack.c.bf16 %v12659_v62, %v12632_v25  ;;  %v9215_v4 = vpack.c.bf16 %v12702_v18, %v12662_v22  ;;  %v9217_v47 = vpack.c.bf16 %v12726_v52, %v12707_v42 }
 0x2ad   :  { %v16544_v39 = vand.u32 4294901760, %v12808_v1  ;;  %v16549_v24 = vand.u32 4294901760, %v12863_v17 }
 0x2af   :  { %9180 = vmatpush1.bf16.msra.mxu1 %v9179_v56  ;;  %v9211_v56 = vpack.c.bf16 %v12630_v31, %v12618_v41 }
 0x2b0   :  { %9182 = vmatprep.subr.bf16.mxu1 %v9181_v19  ;;  %v12810_v19 = vld [vmem:[#allocation16 + $0x28] sm:$0xff] }
 0x2b1   :  { %v16543_v10 = vand.u32 4294901760, %v12810_v19 }
 0x2b3   :  { %9184 = vmatpush1.bf16.msra.mxu1 %v9183_v53  ;;  %v9199_v53 = vpack.c.bf16 %v12525_v45, %v12523_v16 }
 0x2b4   :  { %9186 = vmatprep.subr.bf16.mxu1 %v9185_v2  ;;  %v12814_v2 = vld [vmem:[#allocation16] sm:$0xff] }
 0x2b7   :  { %9188 = vmatpush1.bf16.msra.mxu1 %v9187_v54  ;;  %v12816_v54 = vld [vmem:[#allocation16 + $0x20] sm:$0xff] }
 0x2b8   :  { %9190 = vmatprep.subr.bf16.mxu1 %v9189_v36  ;;  %v9219_v36 = vpack.c.bf16 %v12738_v35, %v12733_v60 }
 0x2ba   :  { %3319 = vmatmul.mubr.f32.vlgmr.msra.gmra.mrb[2].mxu1 %v17426_v7  ;;  %v12949_v7 = vld [vmem:[#allocation16 + $0x140] sm:$0xff] }
 0x2bb   :  { %9192 = vmatpush1.bf16.msra.mxu1 %v9191_v8  ;;  %3453 = vmatprep.mubr.f32.mxu1 %v17062_v14  ;;  %v16542_v8 = vand.u32 4294901760, %v12814_v2 }
 0x2bc   :  { %9194 = vmatprep.subr.bf16.mxu1 %v9193_v44  ;;  %v16541_v44 = vand.u32 4294901760, %v12816_v54 }
 0x2bf   :  { %9196 = vmatpush1.bf16.msra.mxu1 %v9195_v26  ;;  %v12826_v26 = vpack.c.bf16 %v16543_v10, %v16544_v39  ;;  %v12893_v10 = vld [vmem:[#allocation16 + $0xe8] sm:$0xff] }
 0x2c0   :  { %9198 = vmatprep.subr.bf16.mxu1 %v9197_v59  ;;  %v12832_v59 = vpack.c.bf16 %v16541_v44, %v16542_v8  ;;  %v12891_v8 = vld [vmem:[#allocation16 + $0xc8] sm:$0xff] }
 0x2c1   :  { %17474 = vst [vmem:[#allocation58_spill] sm:$0xff] %v12826_v26  ;;  %9318 = vmatprep.subr.bf16.mxu0 %v12826_v26  ;;  %v16563_v39 = vand.u32 4294901760, %v12891_v8  ;;  %v17485_v26 = vld [vmem:[#allocation142_spill] sm:$0xff] }
 0x2c2   :  { %17475 = vst [vmem:[#allocation108_spill] sm:$0xff] %v12832_v59  ;;  %9320 = vmatpush1.bf16.msra.mxu0 %v12832_v59  ;;  %v17484_v59 = vld [vmem:[#allocation138_spill] sm:$0xff] }
 0x2c3   :  { %9200 = vmatpush1.bf16.msra.mxu1 %v9199_v53  ;;  %v12834_v53 = vld [vmem:[#allocation16 + $0x48] sm:$0xff] }
 0x2c4   :  { %9202 = vmatprep.subr.bf16.mxu1 %v9201_v40  ;;  %v12836_v40 = vld [vmem:[#allocation16 + $0x68] sm:$0xff] }
 0x2c7   :  { %9204 = vmatpush1.bf16.msra.mxu1 %v9203_v29  ;;  %v16538_v29 = vand.u32 4294901760, %v12834_v53 }
 0x2c8   :  { %9206 = vmatprep.subr.bf16.mxu1 %v9205_v20  ;;  %v16537_v20 = vand.u32 4294901760, %v12836_v40 }
 0x2cb   :  { %9208 = vmatpush1.bf16.msra.mxu1 %v9207_v51  ;;  %v12841_v51 = vld [vmem:[#allocation16 + $0x40] sm:$0xff] }
 0x2cc   :  { %9210 = vmatprep.subr.bf16.mxu1 %v9209_v23  ;;  %v12843_v23 = vld [vmem:[#allocation16 + $0x60] sm:$0xff] }
 0x2cf   :  { %9212 = vmatpush1.bf16.msra.mxu1 %v9211_v56  ;;  %v16540_v56 = vand.u32 4294901760, %v12841_v51 }
 0x2d0   :  { %9214 = vmatprep.subr.bf16.mxu1 %v9213_v33  ;;  %v16539_v33 = vand.u32 4294901760, %v12843_v23 }
 0x2d3   :  { %9216 = vmatpush1.bf16.msra.mxu1 %v9215_v4  ;;  %v12853_v4 = vpack.c.bf16 %v16537_v20, %v16538_v29  ;;  %v12869_v20 = vld [vmem:[#allocation16 + $0x80] sm:$0xff] }
 0x2d4   :  { %9218 = vmatprep.subr.bf16.mxu1 %v9217_v47  ;;  %v12859_v47 = vpack.c.bf16 %v16539_v33, %v16540_v56  ;;  %v12871_v29 = vld [vmem:[#allocation16 + $0xa0] sm:$0xff]  ;;  %v16552_v33 = vand.u32 4294901760, %v12869_v20 }
 0x2d5   :  { %17476 = vst [vmem:[#allocation109_spill] sm:$0xff] %v12853_v4  ;;  %9322 = vmatprep.subr.bf16.mxu0 %v12853_v4  ;;  %v16551_v56 = vand.u32 4294901760, %v12871_v29  ;;  %v12898_v4 = vld [vmem:[#allocation16 + $0xc0] sm:$0xff] }
 0x2d6   :  { %17477 = vst [vmem:[#allocation111_spill] sm:$0xff] %v12859_v47  ;;  %9324 = vmatpush1.bf16.msra.mxu0 %v12859_v47  ;;  %v16562_v47 = vand.u32 4294901760, %v12893_v10  ;;  %17480 = vst [vmem:[#allocation61_spill] sm:$0xff] %v12898_v4 }
 0x2d7   :  { %9220 = vmatpush1.bf16.msra.mxu1 %v9219_v36  ;;  %v12861_v36 = vld [vmem:[#allocation16 + $0x88] sm:$0xff]  ;;  %v12889_v44 = vpack.c.bf16 %v16551_v56, %v16552_v33 }
 0x2d8   :  { %9222 = vmatprep.subr.bf16.mxu1 %v12466_v28  ;;  %v16550_v63 = vand.u32 4294901760, %v12861_v36  ;;  %v12911_v33 = vpack.c.bf16 %v16562_v47, %v16563_v39  ;;  %v12926_v47 = vld [vmem:[#allocation16 + $0x128] sm:$0xff]  ;;  %v17489_v39 = vld [vmem:[#allocation86_spill] sm:$0xff] }
 0x2d9   :  { %17479 = vst [vmem:[#allocation114_spill] sm:$0xff] %v12889_v44  ;;  %17488 = vst [vmem:[#allocation131_spill] sm:$0xff] %v12926_v47  ;;  %v12957_v28 = vld [vmem:[#allocation16 + $0x160] sm:$0xff] }
 0x2da   :  { %3456 = vmatmul.mubr.f32.vlgmr.msra.gmra.mrb[2].mxu1 %v17375_v5  ;;  %v12883_v5 = vpack.c.bf16 %v16549_v24, %v16550_v63  ;;  %v12900_v24 = vld [vmem:[#allocation16 + $0xe0] sm:$0xff]  ;;  %v16566_v63 = vand.u32 4294901760, %v12898_v4  ;;  %17482 = vst [vmem:[#allocation63_spill] sm:$0xff] %v12911_v33 }
 0x2db   :  { %9224 = vmatpush1.bf16.msra.mxu1 %v12470_v9  ;;  %3558 = vmatprep.mubr.f32.mxu1 %v17062_v14  ;;  %17481 = vst [vmem:[#allocation124_spill] sm:$0xff] %v12900_v24  ;;  %v16565_v56 = vand.u32 4294901760, %v12900_v24  ;;  %v12947_v9 = vld [vmem:[#allocation16 + $0x168] sm:$0xff]  ;;  %v17507_v24 = vand.u32 4294901760, %v12495_v48  ;;  %v17509_v48 = vld [vmem:[#allocation102_spill] sm:$0xff] }
 0x2dc   :  { %9226 = vmatprep.subr.bf16.mxu1 %v12473_v57  ;;  %17478 = vst [vmem:[#allocation112_spill] sm:$0xff] %v12883_v5  ;;  %9326 = vmatprep.subr.bf16.mxu0 %v12883_v5  ;;  %v17494_v57 = vld [vmem:[#allocation89_spill] sm:$0xff]  ;;  %17496 = vst [vmem:[#allocation68_spill] sm:$0xff] %v12947_v9 }
 0x2dd   :  { %9328 = vmatpush1.bf16.msra.mxu0 %v12889_v44  ;;  %v12917_v5 = vpack.c.bf16 %v16565_v56, %v16566_v63  ;;  %v17486_v44 = vld [vmem:[#allocation84_spill] sm:$0xff]  ;;  %v12931_v56 = vld [vmem:[#allocation16 + $0x120] sm:$0xff] }
 0x2de   :  { %9330 = vmatprep.subr.bf16.mxu0 %v12911_v33  ;;  %17491 = vst [vmem:[#allocation136_spill] sm:$0xff] %v12931_v56  ;;  %v16577_v33 = vand.u32 4294901760, %v12926_v47  ;;  %v17499_v47 = vld [vmem:[#allocation95_spill] sm:$0xff] }
 0x2df   :  { %9228 = vmatpush1.bf16.msra.mxu1 %v12478_v13  ;;  %17483 = vst [vmem:[#allocation126_spill] sm:$0xff] %v12917_v5  ;;  %v12929_v13 = vld [vmem:[#allocation16 + $0x100] sm:$0xff] }
 0x2e0   :  { %9230 = vmatprep.subr.bf16.mxu1 %v12482_v32  ;;  %v12924_v32 = vld [vmem:[#allocation16 + $0x108] sm:$0xff]  ;;  %17490 = vst [vmem:[#allocation133_spill] sm:$0xff] %v12929_v13 }
 0x2e1   :  { %9332 = vmatpush1.bf16.msra.mxu0 %v12917_v5  ;;  %17487 = vst [vmem:[#allocation128_spill] sm:$0xff] %v12924_v32  ;;  %v16578_v63 = vand.u32 4294901760, %v12924_v32  ;;  %v16584_v5 = vand.u32 4294901760, %v12929_v13  ;;  %v17498_v32 = vld [vmem:[#allocation90_spill] sm:$0xff]  ;;  %v17504_v13 = vld [vmem:[#allocation97_spill] sm:$0xff] }
 0x2e3   :  { %9232 = vmatpush1.bf16.msra.mxu1 %v17484_v59  ;;  %v17492_v59 = vld [vmem:[#allocation87_spill] sm:$0xff] }
 0x2e4   :  { %9234 = vmatprep.subr.bf16.mxu1 %v17485_v26  ;;  %v12938_v26 = vld [vmem:[#allocation16 + $0x148] sm:$0xff] }
 0x2e5   :  { %17493 = vst [vmem:[#allocation139_spill] sm:$0xff] %v12938_v26 }
 0x2e7   :  { %9236 = vmatpush1.bf16.msra.mxu1 %v17486_v44  ;;  %v16583_v44 = vand.u32 4294901760, %v12931_v56  ;;  %v16601_v56 = vand.u32 4294901760, %v12957_v28 }
 0x2e8   :  { %9238 = vmatprep.subr.bf16.mxu1 %v17489_v39  ;;  %v12945_v39 = vpack.c.bf16 %v16577_v33, %v16578_v63  ;;  %v16595_v33 = vand.u32 4294901760, %v12947_v9  ;;  %v16602_v63 = vand.u32 4294901760, %v12949_v7 }
 0x2ea   :  { %17495 = vst [vmem:[#allocation140_spill] sm:$0xff] %v12945_v39  ;;  %9334 = vmatprep.subr.bf16.mxu0 %v12945_v39 }
 0x2eb   :  { %9240 = vmatpush1.bf16.msra.mxu1 %v17492_v59  ;;  %v12955_v59 = vpack.c.bf16 %v16583_v44, %v16584_v5  ;;  %v12967_v44 = vld [vmem:[#allocation16 + $0x188] sm:$0xff] }
 0x2ec   :  { %9242 = vmatprep.subr.bf16.mxu1 %v17494_v57  ;;  %v16596_v57 = vand.u32 4294901760, %v12938_v26  ;;  %17500 = vst [vmem:[#allocation145_spill] sm:$0xff] %v12967_v44  ;;  %v12969_v5 = vld [vmem:[#allocation16 + $0x1a8] sm:$0xff]  ;;  %v16606_v26 = vand.u32 4294901760, %v12967_v44 }
 0x2ed   :  { %17497 = vst [vmem:[#allocation144_spill] sm:$0xff] %v12955_v59  ;;  %9336 = vmatpush1.bf16.msra.mxu0 %v12955_v59  ;;  %17501 = vst [vmem:[#allocation146_spill] sm:$0xff] %v12969_v5  ;;  %v12979_v59 = vld [vmem:[#allocation16 + $0x1a0] sm:$0xff]  ;;  %v16605_v9 = vand.u32 4294901760, %v12969_v5  ;;  %v17516_v5 = vand.u32 4294901760, %v12503_v55  ;;  %v17519_v55 = vld [vmem:[#allocation156_spill] sm:$0xff] }
 0x2ee   :  { %v12975_v39 = vpack.c.bf16 %v16595_v33, %v16596_v57  ;;  %v17505_v33 = vld [vmem:[#allocation57_spill] sm:$0xff]  ;;  %v17506_v57 = vand.u32 4294901760, %v12492_v49  ;;  %v13009_v49 = vld [vmem:[#allocation16 + $0x1c0] sm:$0xff] }
 0x2ef   :  { %9244 = vmatpush1.bf16.msra.mxu1 %v17498_v32  ;;  %v12977_v32 = vld [vmem:[#allocation16 + $0x180] sm:$0xff] }
 0x2f0   :  { %9246 = vmatprep.subr.bf16.mxu1 %v17499_v47  ;;  %17502 = vst [vmem:[#allocation147_spill] sm:$0xff] %v12975_v39  ;;  %v12985_v47 = vpack.c.bf16 %v16601_v56, %v16602_v63  ;;  %9338 = vmatprep.subr.bf16.mxu0 %v12975_v39  ;;  %v9253_v4 = vpack.c.bf16 %v17507_v24, %v17506_v57  ;;  %v17510_v57 = vand.u32 4294901760, %v12497_v43  ;;  %v17511_v24 = vand.u32 4294901760, %v12499_v30  ;;  %v13029_v30 = vld [vmem:[#allocation16 + $0x1e0] sm:$0xff] }
 0x2f1   :  { %v13003_v39 = vpack.c.bf16 %v16605_v9, %v16606_v26  ;;  %v17512_v63 = vand.u32 4294901760, %v12977_v32  ;;  %v17513_v9 = vand.u32 4294901760, %v12979_v59 }
 0x2f2   :  { %17503 = vst [vmem:[#allocation72_spill] sm:$0xff] %v12985_v47  ;;  %9340 = vmatpush1.bf16.msra.mxu0 %v12985_v47  ;;  %v9255_v56 = vpack.c.bf16 %v17511_v24, %v17510_v57  ;;  %v17515_v47 = vand.u32 4294901760, %v12501_v50  ;;  %v17517_v57 = vand.u32 4294901760, %v12808_v1  ;;  %v17525_v50 = vand.u32 4294901760, %v12814_v2 }
 0x2f3   :  { %9248 = vmatpush1.bf16.msra.mxu1 %v17504_v13  ;;  %17508 = vst [vmem:[#allocation71_spill] sm:$0xff] %v13003_v39  ;;  %v13005_v13 = vld [vmem:[#allocation16 + $0x1c8] sm:$0xff]  ;;  %9342 = vmatprep.subr.bf16.mxu0 %v13003_v39  ;;  %v13021_v26 = vpack.c.bf16 %v17513_v9, %v17512_v63  ;;  %v17518_v9 = vand.u32 4294901760, %v12810_v19 }
 0x2f4   :  { %9250 = vmatprep.subr.bf16.mxu1 %v17505_v33  ;;  %v13007_v33 = vld [vmem:[#allocation16 + $0x1e8] sm:$0xff]  ;;  %v9257_v44 = vpack.c.bf16 %v17516_v5, %v17515_v47  ;;  %v13034_v24 = vsub.f32 %v12808_v1, %v17517_v57  ;;  %v17521_v1 = vand.u32 4294901760, %v12505_v46  ;;  %v17522_v47 = vand.u32 4294901760, %v12507_v12 }
 0x2f5   :  { %17514 = vst [vmem:[#allocation149_spill] sm:$0xff] %v13021_v26  ;;  %v16613_v43 = vand.u32 4294901760, %v13007_v33  ;;  %v13039_v63 = vsub.f32 %v12810_v19, %v17518_v9  ;;  %v16616_v19 = vand.u32 4294901760, %v13029_v30  ;;  %v17523_v57 = vand.u32 4294901760, %v12516_v61 }
 0x2f6   :  { %9344 = vmatpush1.bf16.msra.mxu0 %v13021_v26  ;;  %v9259_v5 = vpack.c.bf16 %v17522_v47, %v17521_v1  ;;  %v17524_v9 = vand.u32 4294901760, %v12521_v15  ;;  %v17526_v46 = vand.u32 4294901760, %v12816_v54  ;;  %v16614_v15 = vand.u32 4294901760, %v13034_v24  ;;  %v17598_v26 = vld [vmem:[#allocation139_spill] sm:$0xff] }
 0x2f7   :  { %9252 = vmatpush1.bf16.msra.mxu1 %v17509_v48  ;;  %v16627_v48 = vand.u32 4294901760, %v13005_v13  ;;  %v16615_v1 = vand.u32 4294901760, %v13039_v63  ;;  %v17599_v39 = vand.u32 4294901760, %v17598_v26 }
 0x2f8   :  { %9254 = vmatprep.subr.bf16.mxu1 %v9253_v4  ;;  %v13068_v12 = vsub.f32 %v12816_v54, %v17526_v46  ;;  %v4135_v47 = vsub.f32 %v13034_v24, %v16614_v15  ;;  %v17535_v15 = vand.u32 4294901760, %v12836_v40 }
 0x2f9   :  { %v13048_v4 = vpack.c.bf16 %v16613_v43, %v16627_v48  ;;  %v13063_v43 = vsub.f32 %v12814_v2, %v17525_v50  ;;  %v17529_v2 = vand.u32 4294901760, %v12523_v16  ;;  %v17530_v50 = vand.u32 4294901760, %v12525_v45 }
 0x2fa   :  { %3562 = vmatmul.mubr.f32.vlgmr.msra.gmra.mrb[2].mxu1 %v17519_v55  ;;  %v9261_v55 = vpack.c.bf16 %v17524_v9, %v17523_v57  ;;  %v4147_v57 = vsub.f32 %v13039_v63, %v16615_v1  ;;  %v17533_v16 = vand.u32 4294901760, %v12531_v11  ;;  %v17534_v45 = vand.u32 4294901760, %v12834_v53 }
 0x2fb   :  { %17520 = vst [vmem:[#allocation150_spill] sm:$0xff] %v13048_v4  ;;  %9256 = vmatpush1.bf16.msra.mxu1 %v9255_v56  ;;  %3728 = vmatprep.mubr.f32.mxu1 %v17062_v14  ;;  %v4021_v56 = vld [vmem:[#allocation7 + $0x8] sm:$0xff]  ;;  %v9263_v54 = vpack.c.bf16 %v17530_v50, %v17529_v2  ;;  %v16626_v2 = vand.u32 4294901760, %v13063_v43  ;;  %v16625_v50 = vand.u32 4294901760, %v13068_v12  ;;  %v13106_v1 = vsub.f32 %v12836_v40, %v17535_v15 }
 0x2fc   :  { %9258 = vmatprep.subr.bf16.mxu1 %v9257_v44  ;;  %9346 = vmatprep.subr.bf16.mxu0 %v13048_v4  ;;  %v17527_v44 = vand.u32 4294901760, %v13009_v49  ;;  %v13090_v9 = vand.u32 4294901760, %v4021_v56  ;;  %v17537_v11 = vand.u32 4294901760, %v12533_v0  ;;  %v17539_v40 = vand.u32 4294901760, %v12549_v27  ;;  %v17592_v4 = vld [vmem:[#allocation152_spill] sm:$0xff] }
 0x2fd   :  { %v17540_v15 = vand.u32 4294901760, %v12554_v6 }
 0x2fe   :  { %v13075_v61 = vpack.c.bf16 %v16616_v19, %v17527_v44  ;;  %17531 = vst [vmem:[#allocation74_spill] sm:$0xff] %v13090_v9  ;;  %v13099_v44 = vsub.f32 %v12834_v53, %v17534_v45  ;;  %v4148_v19 = vand.u32 4294901760, %v4147_v57  ;;  %v4153_v45 = vsub.f32 %v13068_v12, %v16625_v50 }
 0x2ff   :  { %9260 = vmatpush1.bf16.msra.mxu1 %v9259_v5  ;;  %v17532_v5 = vand.u32 4294901760, %v12527_v34  ;;  %v13109_v34 = vsub.f32 %v4021_v56, %v13090_v9  ;;  %v9269_v56 = vpack.c.bf16 %v17540_v15, %v17539_v40 }
 0x300   :  { %17528 = vst [vmem:[#allocation75_spill] sm:$0xff] %v13075_v61  ;;  %9348 = vmatpush1.bf16.msra.mxu0 %v13075_v61  ;;  %9262 = vmatprep.subr.bf16.mxu1 %v9261_v55  ;;  %v4136_v55 = vand.u32 4294901760, %v4135_v47  ;;  %v17541_v47 = vand.u32 4294901760, %v12841_v51  ;;  %v4154_v27 = vand.u32 4294901760, %v4153_v45  ;;  %v16623_v6 = vand.u32 4294901760, %v13099_v44 }
 0x301   :  { %v9265_v46 = vpack.c.bf16 %v17533_v16, %v17532_v5  ;;  %17536 = vst [vmem:[#allocation154_spill] sm:$0xff] %v13109_v34  ;;  %v17538_v5 = vand.u32 4294901760, %v12542_v38  ;;  %v4141_v16 = vsub.f32 %v13063_v43, %v16626_v2  ;;  %v13131_v57 = vand.u32 4294901760, %v13109_v34 }
 0x302   :  { %v13128_v0 = vsub.f32 %v12841_v51, %v17541_v47  ;;  %v9349_v38 = vpack.c.bf16 %v4148_v19, %v4136_v55  ;;  %v16621_v51 = vand.u32 4294901760, %v13106_v1  ;;  %v17544_v19 = vand.u32 4294901760, %v12556_v3 }
 0x303   :  { %v9267_v53 = vpack.c.bf16 %v17538_v5, %v17537_v11  ;;  %9264 = vmatpush1.bf16.msra.mxu1 %v9263_v54  ;;  %17542 = vst [vmem:[#allocation155_spill] sm:$0xff] %v13131_v57  ;;  %v17543_v11 = vand.u32 4294901760, %v12843_v23  ;;  %v4142_v54 = vand.u32 4294901760, %v4141_v16  ;;  %v4124_v40 = vsub.f32 %v13109_v34, %v13131_v57  ;;  %v17593_v34 = vld [vmem:[#allocation79_spill] sm:$0xff] }
 0x304   :  { %9266 = vmatprep.subr.bf16.mxu1 %v9265_v46  ;;  %9350 = vmatprep.subr.bf16.mxu0 %v9349_v38  ;;  %v17545_v55 = vand.u32 4294901760, %v12564_v21  ;;  %v17546_v16 = vand.u32 4294901760, %v12861_v36  ;;  %v4171_v3 = vsub.f32 %v13106_v1, %v16621_v51  ;;  %v16620_v21 = vand.u32 4294901760, %v13128_v0 }
 0x305   :  { %v13136_v5 = vsub.f32 %v12843_v23, %v17543_v11  ;;  %v9351_v15 = vpack.c.bf16 %v4154_v27, %v4142_v54  ;;  %v4159_v23 = vsub.f32 %v13099_v44, %v16623_v6  ;;  %v13154_v47 = vand.u32 4294901760, %v4124_v40 }
 0x306   :  { %v9271_v46 = vpack.c.bf16 %v17545_v55, %v17544_v19  ;;  %v13152_v45 = vsub.f32 %v12861_v36, %v17546_v16  ;;  %v17548_v38 = vand.u32 4294901760, %v12584_v58  ;;  %v17549_v11 = vand.u32 4294901760, %v12592_v37  ;;  %v13178_v16 = vld [vmem:[#allocation16 + $0x18] sm:$0xff] }
 0x307   :  { %9268 = vmatpush1.bf16.msra.mxu1 %v9267_v53  ;;  %17547 = vst [vmem:[#allocation80_spill] sm:$0xff] %v13154_v47  ;;  %v17550_v53 = vand.u32 4294901760, %v12863_v17  ;;  %v4160_v36 = vand.u32 4294901760, %v4159_v23  ;;  %v16617_v40 = vand.u32 4294901760, %v13136_v5  ;;  %4126 = vmatmul.mubr.f32.vlgmr.msra.gmra.mrb[2].mxu0 %v13154_v47  ;;  %v4172_v19 = vand.u32 4294901760, %v4171_v3 }
 0x308   :  { %9270 = vmatprep.subr.bf16.mxu1 %v9269_v56  ;;  %v9273_v54 = vpack.c.bf16 %v17549_v11, %v17548_v38  ;;  %v4165_v56 = vsub.f32 %v13128_v0, %v16620_v21  ;;  %v17551_v58 = vand.u32 4294901760, %v12618_v41  ;;  %v17552_v37 = vand.u32 4294901760, %v12630_v31  ;;  %9352 = vmatpush1.bf16.msra.mxu0 %v9351_v15 }
 0x309   :  { %v13167_v27 = vsub.f32 %v12863_v17, %v17550_v53  ;;  %v17553_v17 = vand.u32 4294901760, %v12869_v20  ;;  %v4177_v3 = vsub.f32 %v13136_v5, %v16617_v40  ;;  %4356 = vmatprep.mubr.f32.mxu0 %v17062_v14  ;;  %v17555_v41 = vand.u32 4294901760, %v12871_v29 }
 0x30a   :  { %v9275_v55 = vpack.c.bf16 %v17552_v37, %v17551_v58  ;;  %v9353_v38 = vpack.c.bf16 %v4172_v19, %v4160_v36  ;;  %v4166_v11 = vand.u32 4294901760, %v4165_v56  ;;  %v16619_v53 = vand.u32 4294901760, %v13152_v45  ;;  %v13199_v37 = vld [vmem:[#allocation16 + $0x38] sm:$0xff]  ;;  %v13211_v56 = vld [vmem:[#allocation16 + $0x10] sm:$0xff] }
 0x30b   :  { %v13183_v23 = vsub.f32 %v12869_v20, %v17553_v17  ;;  %9272 = vmatpush1.bf16.msra.mxu1 %v9271_v46  ;;  %v13192_v31 = vsub.f32 %v12871_v29, %v17555_v41  ;;  %v17557_v20 = vand.u32 4294901760, %v12632_v25  ;;  %v17558_v15 = vand.u32 4294901760, %v12659_v62  ;;  %v13213_v62 = vld [vmem:[#allocation16 + $0x30] sm:$0xff] }
 0x30c   :  { %9274 = vmatprep.subr.bf16.mxu1 %v9273_v54  ;;  %v4178_v17 = vand.u32 4294901760, %v4177_v3  ;;  %v16618_v46 = vand.u32 4294901760, %v13167_v27  ;;  %v17559_v40 = vand.u32 4294901760, %v12662_v22  ;;  %v17560_v29 = vand.u32 4294901760, %v12702_v18  ;;  %9354 = vmatprep.subr.bf16.mxu0 %v9353_v38 }
 0x30d   :  { %17554 = vst [vmem:[#allocation83_spill] sm:$0xff] %v13183_v23  ;;  %17556 = vst [vmem:[#allocation77_spill] sm:$0xff] %v13192_v31  ;;  %v9277_v58 = vpack.c.bf16 %v17558_v15, %v17557_v20  ;;  %v17561_v36 = vand.u32 4294901760, %v12707_v42  ;;  %v17562_v19 = vand.u32 4294901760, %v12726_v52  ;;  %v16632_v25 = vand.u32 4294901760, %v13178_v16 }
 0x30e   :  { %v9279_v41 = vpack.c.bf16 %v17560_v29, %v17559_v40  ;;  %v4183_v3 = vsub.f32 %v13152_v45, %v16619_v53  ;;  %v17563_v22 = vand.u32 4294901760, %v12891_v8  ;;  %v9355_v42 = vpack.c.bf16 %v4178_v17, %v4166_v11  ;;  %v13236_v17 = vld [vmem:[#allocation16 + $0x58] sm:$0xff] }
 0x30f   :  { %v9281_v54 = vpack.c.bf16 %v17562_v19, %v17561_v36  ;;  %v4195_v52 = vsub.f32 %v13167_v27, %v16618_v46  ;;  %v16622_v40 = vand.u32 4294901760, %v13183_v23  ;;  %9276 = vmatpush1.bf16.msra.mxu1 %v9275_v55  ;;  %v16631_v20 = vand.u32 4294901760, %v13199_v37  ;;  %v13238_v19 = vld [vmem:[#allocation16 + $0x78] sm:$0xff] }
 0x310   :  { %v13221_v18 = vsub.f32 %v12891_v8, %v17563_v22  ;;  %v17565_v38 = vand.u32 4294901760, %v12893_v10  ;;  %v4184_v29 = vand.u32 4294901760, %v4183_v3  ;;  %v16624_v36 = vand.u32 4294901760, %v13192_v31  ;;  %9278 = vmatprep.subr.bf16.mxu1 %v9277_v58  ;;  %9356 = vmatpush1.bf16.msra.mxu0 %v9355_v42  ;;  %v17569_v58 = vld [vmem:[#allocation61_spill] sm:$0xff]  ;;  %v17572_v42 = vld [vmem:[#allocation124_spill] sm:$0xff] }
 0x311   :  { %v16630_v8 = vand.u32 4294901760, %v13211_v56  ;;  %v16628_v11 = vand.u32 4294901760, %v13213_v62  ;;  %v4196_v55 = vand.u32 4294901760, %v4195_v52  ;;  %v4189_v22 = vsub.f32 %v13183_v23, %v16622_v40 }
 0x312   :  { %17564 = vst [vmem:[#allocation153_spill] sm:$0xff] %v13221_v18  ;;  %v13231_v15 = vsub.f32 %v12893_v10, %v17565_v38  ;;  %v17567_v10 = vand.u32 4294901760, %v12733_v60  ;;  %v17568_v3 = vand.u32 4294901760, %v12738_v35  ;;  %v17570_v46 = vand.u32 4294901760, %v17569_v58 }
 0x313   :  { %v4201_v21 = vsub.f32 %v13192_v31, %v16624_v36  ;;  %v17573_v52 = vand.u32 4294901760, %v17572_v42  ;;  %v9357_v40 = vpack.c.bf16 %v4196_v55, %v4184_v29  ;;  %v4190_v6 = vand.u32 4294901760, %v4189_v22  ;;  %9280 = vmatpush1.bf16.msra.mxu1 %v9279_v41  ;;  %v13278_v29 = vld [vmem:[#allocation16 + $0x70] sm:$0xff]  ;;  %v13285_v55 = vld [vmem:[#allocation16 + $0xb8] sm:$0xff] }
 0x314   :  { %17566 = vst [vmem:[#allocation85_spill] sm:$0xff] %v13231_v15  ;;  %v9283_v38 = vpack.c.bf16 %v17568_v3, %v17567_v10  ;;  %v13250_v53 = vsub.f32 %v17569_v58, %v17570_v46  ;;  %v16629_v60 = vand.u32 4294901760, %v13221_v18  ;;  %v16635_v35 = vand.u32 4294901760, %v13236_v17  ;;  %v13263_v46 = vld [vmem:[#allocation16 + $0x50] sm:$0xff]  ;;  %9282 = vmatprep.subr.bf16.mxu1 %v9281_v54  ;;  %v13283_v54 = vld [vmem:[#allocation16 + $0x98] sm:$0xff] }
 0x315   :  { %v13258_v51 = vsub.f32 %v17572_v42, %v17573_v52  ;;  %v16634_v10 = vand.u32 4294901760, %v13238_v19  ;;  %v4202_v3 = vand.u32 4294901760, %v4201_v21  ;;  %v16633_v58 = vand.u32 4294901760, %v13231_v15  ;;  %9358 = vmatprep.subr.bf16.mxu0 %v9357_v40  ;;  %v17577_v22 = vld [vmem:[#allocation128_spill] sm:$0xff] }
 0x316   :  { %17571 = vst [vmem:[#allocation88_spill] sm:$0xff] %v13250_v53  ;;  %v13270_v42 = vpack.c.bf16 %v16631_v20, %v16632_v25  ;;  %v13276_v41 = vpack.c.bf16 %v16628_v11, %v16630_v8  ;;  %v4207_v21 = vsub.f32 %v13221_v18, %v16629_v60  ;;  %v17578_v52 = vand.u32 4294901760, %v17577_v22  ;;  %v17580_v11 = vld [vmem:[#allocation131_spill] sm:$0xff]  ;;  %v17666_v18 = vld [vmem:[#allocation90_spill] sm:$0xff] }
 0x317   :  { %17574 = vst [vmem:[#allocation91_spill] sm:$0xff] %v13258_v51  ;;  %v9359_v50 = vpack.c.bf16 %v4202_v3, %v4190_v6  ;;  %v4219_v2 = vsub.f32 %v13231_v15, %v16633_v58  ;;  %v16636_v40 = vand.u32 4294901760, %v13250_v53  ;;  %v17581_v60 = vand.u32 4294901760, %v17580_v11  ;;  %9284 = vmatpush1.bf16.msra.mxu1 %v9283_v38  ;;  %v17585_v3 = vld [vmem:[#allocation133_spill] sm:$0xff] }
 0x318   :  { %17575 = vst [vmem:[#allocation94_spill] sm:$0xff] %v13270_v42  ;;  %17576 = vst [vmem:[#allocation96_spill] sm:$0xff] %v13276_v41  ;;  %v13290_v36 = vsub.f32 %v17577_v22, %v17578_v52  ;;  %v4208_v20 = vand.u32 4294901760, %v4207_v21  ;;  %v13307_v6 = vpack.c.bf16 %v16634_v10, %v16635_v35  ;;  %v13310_v22 = vld [vmem:[#allocation16 + $0x90] sm:$0xff]  ;;  %v13320_v10 = vld [vmem:[#allocation16 + $0xd8] sm:$0xff]  ;;  %v17586_v48 = vand.u32 4294901760, %v17585_v3 }
 0x319   :  { %v13300_v8 = vsub.f32 %v17580_v11, %v17581_v60  ;;  %v13312_v52 = vld [vmem:[#allocation16 + $0xb0] sm:$0xff]  ;;  %9360 = vmatpush1.bf16.msra.mxu0 %v9359_v50  ;;  %v4220_v58 = vand.u32 4294901760, %v4219_v2  ;;  %v4213_v11 = vsub.f32 %v13250_v53, %v16636_v40  ;;  %v17584_v60 = vld [vmem:[#allocation129_spill] sm:$0xff]  ;;  %v17588_v2 = vand.u32 4294901760, %v13258_v51 }
 0x31a   :  { %17579 = vst [vmem:[#allocation99_spill] sm:$0xff] %v13290_v36  ;;  %17583 = vst [vmem:[#allocation103_spill] sm:$0xff] %v13307_v6  ;;  %9286 = vmatprep.subr.bf16.mxu1 %v17584_v60  ;;  %v13322_v35 = vld [vmem:[#allocation16 + $0xf8] sm:$0xff]  ;;  %v13327_v25 = vsub.f32 %v17585_v3, %v17586_v48  ;;  %v17589_v40 = vld [vmem:[#allocation136_spill] sm:$0xff]  ;;  %v16652_v61 = vand.u32 4294901760, %v13290_v36  ;;  %3730 = vmatmul.mubr.f32.vlgmr.msra.gmra.mrb[2].mxu1 %v17592_v4  ;;  %v13363_v47 = vsub.f32 %v17598_v26, %v17599_v39 }
 0x31b   :  { %17582 = vst [vmem:[#allocation101_spill] sm:$0xff] %v13300_v8  ;;  %v4225_v50 = vsub.f32 %v13258_v51, %v17588_v2  ;;  %v17590_v57 = vand.u32 4294901760, %v17589_v40  ;;  %v9361_v38 = vpack.c.bf16 %v4220_v58, %v4208_v20  ;;  %v4214_v21 = vand.u32 4294901760, %v4213_v11  ;;  %9288 = vmatpush1.bf16.msra.mxu1 %v17593_v34  ;;  %3832 = vmatprep.mubr.f32.mxu1 %v17062_v14  ;;  %v13352_v2 = vld [vmem:[#allocation16 + $0xd0] sm:$0xff] }
 0x31c   :  { %17587 = vst [vmem:[#allocation106_spill] sm:$0xff] %v13327_v25  ;;  %v17595_v20 = vand.u32 4294901760, %v13278_v29  ;;  %v17597_v48 = vld [vmem:[#allocation132_spill] sm:$0xff]  ;;  %17600 = vst [vmem:[#allocation113_spill] sm:$0xff] %v13363_v47  ;;  %v17602_v51 = vand.u32 4294901760, %v13283_v54  ;;  %v16665_v26 = vand.u32 4294901760, %v13363_v47 }
 0x31d   :  { %v13335_v60 = vsub.f32 %v17589_v40, %v17590_v57  ;;  %v4226_v3 = vand.u32 4294901760, %v4225_v50  ;;  %v17594_v57 = vand.u32 4294901760, %v13263_v46  ;;  %v4231_v50 = vsub.f32 %v13290_v36, %v16652_v61  ;;  %9290 = vmatprep.subr.bf16.mxu1 %v17597_v48  ;;  %v13358_v34 = vld [vmem:[#allocation16 + $0xf0] sm:$0xff]  ;;  %9362 = vmatprep.subr.bf16.mxu0 %v9361_v38 }
 0x31e   :  { %v17603_v61 = vand.u32 4294901760, %v13285_v55  ;;  %v17605_v36 = vld [vmem:[#allocation68_spill] sm:$0xff]  ;;  %v17608_v38 = vand.u32 4294901760, %v13310_v22  ;;  %v17667_v31 = vand.u32 4294901760, %v13358_v34 }
 0x31f   :  { %17591 = vst [vmem:[#allocation59_spill] sm:$0xff] %v13335_v60  ;;  %v13348_v58 = vpack.c.bf16 %v17595_v20, %v17594_v57  ;;  %v9363_v57 = vpack.c.bf16 %v4226_v3, %v4214_v21  ;;  %v17601_v20 = vand.u32 4294901760, %v13300_v8  ;;  %v17606_v53 = vand.u32 4294901760, %v17605_v36 }
 0x320   :  { %v13373_v48 = vpack.c.bf16 %v17603_v61, %v17602_v51  ;;  %v4232_v39 = vand.u32 4294901760, %v4231_v50  ;;  %v17609_v21 = vand.u32 4294901760, %v13312_v52  ;;  %v17611_v61 = vand.u32 4294901760, %v13327_v25 }
 0x321   :  { %17596 = vst [vmem:[#allocation110_spill] sm:$0xff] %v13348_v58  ;;  %v4243_v11 = vsub.f32 %v13300_v8, %v17601_v20  ;;  %v13378_v15 = vsub.f32 %v17605_v36, %v17606_v53  ;;  %9364 = vmatpush1.bf16.msra.mxu0 %v9363_v57  ;;  %v17612_v8 = vld [vmem:[#allocation66_spill] sm:$0xff]  ;;  %v17613_v53 = vand.u32 4294901760, %v13320_v10  ;;  %v17614_v36 = vand.u32 4294901760, %v13322_v35 }
 0x322   :  { %17604 = vst [vmem:[#allocation116_spill] sm:$0xff] %v13373_v48  ;;  %v13385_v3 = vpack.c.bf16 %v17609_v21, %v17608_v38  ;;  %v4237_v51 = vsub.f32 %v13327_v25, %v17611_v61  ;;  %9292 = vmatpush1.bf16.msra.mxu1 %v17612_v8  ;;  %v17616_v38 = vand.u32 4294901760, %v12949_v7  ;;  %v17619_v61 = vld [vmem:[#allocation135_spill] sm:$0xff]  ;;  %v17620_v8 = vand.u32 4294901760, %v12957_v28 }
 0x323   :  { %17607 = vst [vmem:[#allocation62_spill] sm:$0xff] %v13378_v15  ;;  %v4244_v40 = vand.u32 4294901760, %v4243_v11  ;;  %v13396_v50 = vpack.c.bf16 %v17614_v36, %v17613_v53  ;;  %v17618_v11 = vand.u32 4294901760, %v13335_v60  ;;  %9294 = vmatprep.subr.bf16.mxu1 %v17619_v61  ;;  %v17622_v25 = vand.u32 4294901760, %v13178_v16 }
 0x324   :  { %17610 = vst [vmem:[#allocation120_spill] sm:$0xff] %v13385_v3  ;;  %v13402_v21 = vsub.f32 %v12949_v7, %v17616_v38  ;;  %v13411_v20 = vsub.f32 %v12957_v28, %v17620_v8  ;;  %v4238_v36 = vand.u32 4294901760, %v4237_v51  ;;  %v17623_v38 = vand.u32 4294901760, %v13199_v37  ;;  %v17628_v8 = vld [vmem:[#allocation145_spill] sm:$0xff] }
 0x325   :  { %17615 = vst [vmem:[#allocation123_spill] sm:$0xff] %v13396_v50  ;;  %v4249_v57 = vsub.f32 %v13335_v60, %v17618_v11  ;;  %v9365_v53 = vpack.c.bf16 %v4244_v40, %v4232_v39  ;;  %v13417_v7 = vsub.f32 %v13178_v16, %v17622_v25  ;;  %v16668_v60 = vand.u32 4294901760, %v13378_v15  ;;  %v3998_v50 = vld [vmem:[#allocation16 + $0x158] sm:$0xff] }
 0x326   :  { %17617 = vst [vmem:[#allocation125_spill] sm:$0xff] %v13402_v21  ;;  %17621 = vst [vmem:[#allocation127_spill] sm:$0xff] %v13411_v20  ;;  %v13422_v11 = vsub.f32 %v13199_v37, %v17623_v38  ;;  %v17624_v28 = vand.u32 4294901760, %v13211_v56  ;;  %v17625_v39 = vand.u32 4294901760, %v13213_v62  ;;  %v17626_v16 = vand.u32 4294901760, %v13236_v17  ;;  %v4002_v3 = vld [vmem:[#allocation16 + $0x178] sm:$0xff] }
 0x327   :  { %v4250_v61 = vand.u32 4294901760, %v4249_v57  ;;  %9366 = vmatprep.subr.bf16.mxu0 %v9365_v53  ;;  %v4255_v37 = vsub.f32 %v13363_v47, %v16665_v26  ;;  %v17627_v57 = vld [vmem:[#allocation138_spill] sm:$0xff]  ;;  %v17632_v53 = vand.u32 4294901760, %v13238_v19 }
 0x328   :  { %v13428_v40 = vsub.f32 %v13211_v56, %v17624_v28  ;;  %v13433_v51 = vsub.f32 %v13213_v62, %v17625_v39  ;;  %v13438_v25 = vsub.f32 %v13236_v17, %v17626_v16  ;;  %9296 = vmatpush1.bf16.msra.mxu1 %v17627_v57  ;;  %v17629_v56 = vand.u32 4294901760, %v17628_v8  ;;  %v17631_v39 = vld [vmem:[#allocation142_spill] sm:$0xff] }
 0x329   :  { %v9367_v28 = vpack.c.bf16 %v4250_v61, %v4238_v36  ;;  %v4267_v62 = vsub.f32 %v13378_v15, %v16668_v60  ;;  %v16669_v17 = vand.u32 4294901760, %v13402_v21  ;;  %9298 = vmatprep.subr.bf16.mxu1 %v17631_v39  ;;  %v13457_v16 = vsub.f32 %v13238_v19, %v17632_v53  ;;  %v17633_v57 = vld [vmem:[#allocation146_spill] sm:$0xff]  ;;  %v17656_v15 = vld [vmem:[#allocation87_spill] sm:$0xff] }
 0x32a   :  { %v13447_v38 = vsub.f32 %v17628_v8, %v17629_v56  ;;  %v17634_v26 = vand.u32 4294901760, %v17633_v57  ;;  %v4256_v8 = vand.u32 4294901760, %v4255_v37  ;;  %v16670_v36 = vand.u32 4294901760, %v13411_v20 }
 0x32b   :  { %v17636_v61 = vand.u32 4294901760, %v13263_v46  ;;  %v17637_v39 = vand.u32 4294901760, %v13278_v29  ;;  %9368 = vmatpush1.bf16.msra.mxu0 %v9367_v28  ;;  %v4268_v19 = vand.u32 4294901760, %v4267_v62  ;;  %v17638_v37 = vand.u32 4294901760, %v13283_v54  ;;  %v17642_v62 = vld [vmem:[#allocation84_spill] sm:$0xff] }
 0x32c   :  { %17630 = vst [vmem:[#allocation130_spill] sm:$0xff] %v13447_v38  ;;  %v13462_v47 = vsub.f32 %v17633_v57, %v17634_v26  ;;  %v4261_v26 = vsub.f32 %v13402_v21, %v16669_v17  ;;  %v17639_v57 = vand.u32 4294901760, %v13285_v55  ;;  %v4273_v28 = vsub.f32 %v13411_v20, %v16670_v36  ;;  %9300 = vmatpush1.bf16.msra.mxu1 %v17642_v62 }
 0x32d   :  { %v13468_v56 = vsub.f32 %v13263_v46, %v17636_v61  ;;  %v13473_v60 = vsub.f32 %v13278_v29, %v17637_v39  ;;  %v13481_v53 = vsub.f32 %v13283_v54, %v17638_v37  ;;  %v17640_v61 = vand.u32 4294901760, %v12977_v32 }
 0x32e   :  { %17635 = vst [vmem:[#allocation65_spill] sm:$0xff] %v13462_v47  ;;  %v13486_v46 = vsub.f32 %v13285_v55, %v17639_v57  ;;  %v17643_v39 = vand.u32 4294901760, %v12979_v59  ;;  %v9369_v37 = vpack.c.bf16 %v4268_v19, %v4256_v8  ;;  %v4262_v17 = vand.u32 4294901760, %v4261_v26  ;;  %v17645_v57 = vld [vmem:[#allocation86_spill] sm:$0xff] }
 0x32f   :  { %v13491_v29 = vsub.f32 %v12977_v32, %v17640_v61  ;;  %v16677_v55 = vand.u32 4294901760, %v13447_v38  ;;  %9302 = vmatprep.subr.bf16.mxu1 %v17645_v57  ;;  %v17646_v32 = vand.u32 4294901760, %v13310_v22  ;;  %v17647_v36 = vand.u32 4294901760, %v13312_v52 }
 0x330   :  { %v13500_v54 = vsub.f32 %v12979_v59, %v17643_v39  ;;  %v4274_v20 = vand.u32 4294901760, %v4273_v28  ;;  %v17648_v8 = vand.u32 4294901760, %v13320_v10  ;;  %v17649_v26 = vand.u32 4294901760, %v13322_v35  ;;  %9370 = vmatprep.subr.bf16.mxu0 %v9369_v37  ;;  %9304 = vmatpush1.bf16.msra.mxu1 %v17656_v15 }
 0x331   :  { %17641 = vst [vmem:[#allocation134_spill] sm:$0xff] %v13491_v29  ;;  %v13507_v61 = vsub.f32 %v13310_v22, %v17646_v32  ;;  %v13512_v62 = vsub.f32 %v13312_v52, %v17647_v36  ;;  %v17650_v22 = vand.u32 4294901760, %v13352_v2  ;;  %v17651_v57 = vand.u32 4294901760, %v13358_v34  ;;  %v3990_v52 = vld [vmem:[#allocation16 + $0x118] sm:$0xff] }
 0x332   :  { %17644 = vst [vmem:[#allocation137_spill] sm:$0xff] %v13500_v54  ;;  %v13518_v19 = vsub.f32 %v13320_v10, %v17648_v8  ;;  %v13523_v39 = vsub.f32 %v13322_v35, %v17649_v26  ;;  %v3994_v36 = vld [vmem:[#allocation16 + $0x138] sm:$0xff]  ;;  %v4279_v28 = vsub.f32 %v13447_v38, %v16677_v55  ;;  %v3989_v10 = vld [vmem:[#allocation16 + $0x110] sm:$0xff]  ;;  %v17653_v59 = vand.u32 4294901760, %v13005_v13 }
 0x333   :  { %v13529_v32 = vpack.c.bf16 %v17651_v57, %v17650_v22  ;;  %v3993_v8 = vld [vmem:[#allocation16 + $0x130] sm:$0xff]  ;;  %v9371_v26 = vpack.c.bf16 %v4274_v20, %v4262_v17  ;;  %v17655_v21 = vand.u32 4294901760, %v13462_v47  ;;  %v17657_v37 = vand.u32 4294901760, %v13352_v2  ;;  %v17661_v17 = vld [vmem:[#allocation89_spill] sm:$0xff] }
 0x334   :  { %v13537_v35 = vsub.f32 %v13005_v13, %v17653_v59  ;;  %v17659_v38 = vand.u32 4294901760, %v13007_v33  ;;  %v4280_v13 = vand.u32 4294901760, %v4279_v28  ;;  %v16693_v20 = vand.u32 4294901760, %v13500_v54  ;;  %9306 = vmatprep.subr.bf16.mxu1 %v17661_v17 }
 0x335   :  { %17652 = vst [vmem:[#allocation67_spill] sm:$0xff] %v13529_v32  ;;  %v4291_v22 = vsub.f32 %v13462_v47, %v17655_v21  ;;  %v13547_v55 = vsub.f32 %v13352_v2, %v17657_v37  ;;  %v4911_v21 = vand.u32 4294901760, %v3990_v52  ;;  %v4915_v59 = vand.u32 4294901760, %v3994_v36  ;;  %9372 = vmatpush1.bf16.msra.mxu0 %v9371_v26  ;;  %9308 = vmatpush1.bf16.msra.mxu1 %v17666_v18 }
 0x336   :  { %17654 = vst [vmem:[#allocation141_spill] sm:$0xff] %v13537_v35  ;;  %v13552_v32 = vsub.f32 %v13007_v33, %v17659_v38  ;;  %v17662_v15 = vand.u32 4294901760, %v13491_v29  ;;  %v4913_v2 = vand.u32 4294901760, %v3989_v10  ;;  %v4917_v37 = vand.u32 4294901760, %v3993_v8 }
 0x337   :  { %17658 = vst [vmem:[#allocation143_spill] sm:$0xff] %v13547_v55  ;;  %v4292_v57 = vand.u32 4294901760, %v4291_v22  ;;  %v17663_v33 = vand.u32 4294901760, %v13009_v49  ;;  %v4297_v28 = vsub.f32 %v13500_v54, %v16693_v20  ;;  %v17665_v26 = vand.u32 4294901760, %v13029_v30  ;;  %v17670_v54 = vld [vmem:[#allocation95_spill] sm:$0xff]  ;;  %v17674_v55 = vld [vmem:[#allocation97_spill] sm:$0xff] }
 0x338   :  { %17660 = vst [vmem:[#allocation69_spill] sm:$0xff] %v13552_v32  ;;  %v4285_v47 = vsub.f32 %v13491_v29, %v17662_v15  ;;  %v16700_v29 = vand.u32 4294901760, %v13537_v35  ;;  %v16701_v20 = vand.u32 4294901760, %v13552_v32  ;;  %9310 = vmatprep.subr.bf16.mxu1 %v17670_v54 }
 0x339   :  { %v13562_v38 = vsub.f32 %v13009_v49, %v17663_v33  ;;  %v13570_v22 = vsub.f32 %v13029_v30, %v17665_v26  ;;  %v9373_v17 = vpack.c.bf16 %v4292_v57, %v4280_v13  ;;  %v13577_v49 = vsub.f32 %v13358_v34, %v17667_v31  ;;  %v3997_v13 = vld [vmem:[#allocation16 + $0x150] sm:$0xff]  ;;  %9312 = vmatpush1.bf16.msra.mxu1 %v17674_v55  ;;  %v13612_v55 = vld [vmem:[#allocation16 + $0x1f8] sm:$0xff] }
 0x33a   :  { %v4286_v15 = vand.u32 4294901760, %v4285_v47  ;;  %v13579_v33 = vsub.f32 %v3990_v52, %v4911_v21  ;;  %v4298_v23 = vand.u32 4294901760, %v4297_v28  ;;  %v13583_v30 = vpack.c.bf16 %v4915_v59, %v4911_v21  ;;  %v4001_v26 = vld [vmem:[#allocation16 + $0x170] sm:$0xff] }
 0x33b   :  { %17664 = vst [vmem:[#allocation73_spill] sm:$0xff] %v13562_v38  ;;  %17668 = vst [vmem:[#allocation148_spill] sm:$0xff] %v13577_v49  ;;  %v4919_v57 = vand.u32 4294901760, %v3998_v50  ;;  %v4923_v47 = vand.u32 4294901760, %v4002_v3  ;;  %9374 = vmatprep.subr.bf16.mxu0 %v9373_v17  ;;  %v4303_v18 = vsub.f32 %v13537_v35, %v16700_v29  ;;  %v13588_v31 = vsub.f32 %v3994_v36, %v4915_v59  ;;  %v13610_v49 = vld [vmem:[#allocation16 + $0x1d8] sm:$0xff] }
 0x33c   :  { %17669 = vst [vmem:[#allocation81_spill] sm:$0xff] %v13579_v33  ;;  %17671 = vst [vmem:[#allocation82_spill] sm:$0xff] %v13583_v30  ;;  %v9375_v34 = vpack.c.bf16 %v4298_v23, %v4286_v15  ;;  %v4315_v52 = vsub.f32 %v13552_v32, %v16701_v20  ;;  %v16708_v54 = vand.u32 4294901760, %v13562_v38  ;;  %v13594_v21 = vpack.c.bf16 %v4917_v37, %v4913_v2  ;;  %v4006_v30 = vld [vmem:[#allocation16 + $0x198] sm:$0xff]  ;;  %v4005_v23 = vld [vmem:[#allocation16 + $0x190] sm:$0xff] }
 0x33d   :  { %v13596_v28 = vsub.f32 %v3989_v10, %v4913_v2  ;;  %v4010_v33 = vld [vmem:[#allocation16 + $0x1b8] sm:$0xff]  ;;  %v4304_v17 = vand.u32 4294901760, %v4303_v18  ;;  %v4921_v36 = vand.u32 4294901760, %v3997_v13  ;;  %v4925_v59 = vand.u32 4294901760, %v4001_v26  ;;  %v4009_v15 = vld [vmem:[#allocation16 + $0x1b0] sm:$0xff] }
 0x33e   :  { %17672 = vst [vmem:[#allocation76_spill] sm:$0xff] %v13594_v21  ;;  %9376 = vmatpush1.bf16.msra.mxu0 %v9375_v34  ;;  %v4316_v29 = vand.u32 4294901760, %v4315_v52  ;;  %v4309_v20 = vsub.f32 %v13562_v38, %v16708_v54  ;;  %v17675_v32 = vld [vmem:[#allocation57_spill] sm:$0xff]  ;;  %v13604_v10 = vsub.f32 %v3993_v8, %v4917_v37  ;;  %v13606_v2 = vpack.c.bf16 %v4923_v47, %v4919_v57 }
 0x33f   :  { %17673 = vst [vmem:[#allocation151_spill] sm:$0xff] %v13596_v28  ;;  %9314 = vmatprep.subr.bf16.mxu1 %v17675_v32  ;;  %v13608_v18 = vsub.f32 %v3998_v50, %v4919_v57  ;;  %v17679_v35 = vand.u32 4294901760, %v13570_v22  ;;  %v4927_v52 = vand.u32 4294901760, %v4006_v30  ;;  %v4931_v21 = vand.u32 4294901760, %v4010_v33 }
 0x340   :  { %17676 = vst [vmem:[#allocation78_spill] sm:$0xff] %v13604_v10  ;;  %17677 = vst [vmem:[#allocation93_spill] sm:$0xff] %v13606_v2  ;;  %v9377_v28 = vpack.c.bf16 %v4316_v29, %v4304_v17  ;;  %v4310_v54 = vand.u32 4294901760, %v4309_v20  ;;  %v13617_v38 = vsub.f32 %v4002_v3, %v4923_v47  ;;  %v4929_v32 = vand.u32 4294901760, %v4005_v23  ;;  %v17680_v2 = vld [vmem:[#allocation102_spill] sm:$0xff]  ;;  %v13627_v29 = vld [vmem:[#allocation16 + $0x1d0] sm:$0xff] }
 0x341   :  { %17678 = vst [vmem:[#allocation100_spill] sm:$0xff] %v13608_v18  ;;  %v4321_v34 = vsub.f32 %v13570_v22, %v17679_v35  ;;  %v4933_v8 = vand.u32 4294901760, %v4009_v15  ;;  %9316 = vmatpush1.bf16.msra.mxu1 %v17680_v2  ;;  %v13620_v50 = vpack.c.bf16 %v4925_v59, %v4921_v36  ;;  %v13622_v57 = vsub.f32 %v3997_v13, %v4921_v36 }
 0x342   :  { %v16716_v18 = vand.u32 4294901760, %v13610_v49  ;;  %v16715_v10 = vand.u32 4294901760, %v13612_v55  ;;  %9378 = vmatprep.subr.bf16.mxu0 %v9377_v28  ;;  %9510 = vmatprep.subr.bf16.mxu1 %v13270_v42  ;;  %v16714_v35 = vand.u32 4294901760, %v13422_v11  ;;  %v9381_v47 = vpack.c.bf16 %v13039_v63, %v13034_v24  ;;  %v13641_v28 = vld [vmem:[#allocation16 + $0x1f0] sm:$0xff] }
 0x343   :  { %v4322_v37 = vand.u32 4294901760, %v4321_v34  ;;  %17681 = vst [vmem:[#allocation104_spill] sm:$0xff] %v13620_v50  ;;  %v13633_v17 = vsub.f32 %v4001_v26, %v4925_v59  ;;  %v13635_v13 = vpack.c.bf16 %v4931_v21, %v4927_v52  ;;  %v13637_v36 = vsub.f32 %v4006_v30, %v4927_v52 }
 0x344   :  { %v13639_v2 = vsub.f32 %v4010_v33, %v4931_v21  ;;  %3834 = vmatmul.mubr.f32.vlgmr.msra.gmra.mrb[2].mxu1 %v17592_v4  ;;  %v13644_v34 = vpack.c.bf16 %v4933_v8, %v4929_v32  ;;  %v13646_v3 = vsub.f32 %v4005_v23, %v4929_v32  ;;  %v13651_v26 = vsub.f32 %v4009_v15, %v4933_v8  ;;  %v17688_v8 = vld [vmem:[#allocation83_spill] sm:$0xff]  ;;  %v17689_v32 = vld [vmem:[#allocation77_spill] sm:$0xff] }
 0x345   :  { %v9379_v20 = vpack.c.bf16 %v4322_v37, %v4310_v54  ;;  %17682 = vst [vmem:[#allocation105_spill] sm:$0xff] %v13635_v13  ;;  %v9383_v54 = vpack.c.bf16 %v13068_v12, %v13063_v43  ;;  %9512 = vmatpush1.bf16.msra.mxu1 %v13276_v41  ;;  %v13657_v33 = vpack.c.bf16 %v16715_v10, %v16716_v18  ;;  %v17685_v59 = vand.u32 4294901760, %v13417_v7  ;;  %v17690_v10 = vld [vmem:[#allocation153_spill] sm:$0xff] }
 0x346   :  { %17683 = vst [vmem:[#allocation107_spill] sm:$0xff] %v13644_v34  ;;  %4975 = vmatprep.mubr.f32.mxu1 %v17062_v14  ;;  %v9385_v30 = vpack.c.bf16 %v13106_v1, %v13099_v44  ;;  %9514 = vmatprep.subr.bf16.mxu1 %v13307_v6  ;;  %v13673_v15 = vsub.f32 %v13422_v11, %v16714_v35  ;;  %v17691_v4 = vld [vmem:[#allocation85_spill] sm:$0xff]  ;;  %v17695_v35 = vand.u32 4294901760, %v13428_v40  ;;  %v17696_v21 = vand.u32 4294901760, %v13433_v51 }
 0x347   :  { %9380 = vmatpush1.bf16.msra.mxu0 %v9379_v20  ;;  %17684 = vst [vmem:[#allocation60_spill] sm:$0xff] %v13657_v33  ;;  %v13668_v23 = vsub.f32 %v13417_v7, %v17685_v59  ;;  %v9389_v59 = vpack.c.bf16 %v13167_v27, %v13152_v45  ;;  %v17687_v20 = vld [vmem:[#allocation148_spill] sm:$0xff]  ;;  %v9391_v52 = vpack.c.bf16 %v17689_v32, %v17688_v8  ;;  %v17698_v37 = vand.u32 4294901760, %v13099_v44 }
 0x348   :  { %9382 = vmatprep.subr.bf16.mxu0 %v9381_v47  ;;  %v9387_v47 = vpack.c.bf16 %v13136_v5, %v13128_v0  ;;  %v9393_v18 = vpack.c.bf16 %v17691_v4, %v17690_v10  ;;  %v17699_v41 = vand.u32 4294901760, %v13106_v1  ;;  %v17707_v44 = vand.u32 4294901760, %v13473_v60 }
 0x349   :  { %9516 = vmatpush1.bf16.msra.mxu1 %v13348_v58  ;;  %v17693_v58 = vand.u32 4294901760, %v13068_v12 }
 0x34a   :  { %4358 = vmatmul.mubr.f32.vlgmr.msra.gmra.mrb[2].mxu0 %v13090_v9  ;;  %9518 = vmatprep.subr.bf16.mxu1 %v13373_v48  ;;  %v13711_v48 = vpack.c.bf16 %v17696_v21, %v17695_v35  ;;  %v13717_v42 = vpack.c.bf16 %v17699_v41, %v17698_v37  ;;  %v17700_v9 = vand.u32 4294901760, %v13438_v25  ;;  %v17706_v35 = vand.u32 4294901760, %v13468_v56 }
 0x34b   :  { %9384 = vmatpush1.bf16.msra.mxu0 %v9383_v54  ;;  %v17686_v54 = vld [vmem:[#allocation143_spill] sm:$0xff]  ;;  %4492 = vmatprep.mubr.f32.mxu0 %v17062_v14  ;;  %v17709_v41 = vand.u32 4294901760, %v13152_v45  ;;  %v17710_v21 = vand.u32 4294901760, %v13167_v27  ;;  %v17719_v45 = vand.u32 4294901760, %v13507_v61  ;;  %v17720_v27 = vand.u32 4294901760, %v13512_v62 }
 0x34c   :  { %9386 = vmatprep.subr.bf16.mxu0 %v9385_v30  ;;  %v17692_v30 = vand.u32 4294901760, %v13063_v43  ;;  %17697 = vst [vmem:[#allocation117_spill] sm:$0xff] %v13711_v48  ;;  %v17701_v43 = vand.u32 4294901760, %v13457_v16  ;;  %v13735_v1 = vpack.c.bf16 %v17707_v44, %v17706_v35  ;;  %v17722_v44 = vld [vmem:[#allocation123_spill] sm:$0xff] }
 0x34d   :  { %v13741_v37 = vpack.c.bf16 %v17710_v21, %v17709_v41  ;;  %v13760_v35 = vpack.c.bf16 %v17720_v27, %v17719_v45  ;;  %v17724_v41 = vand.u32 4294901760, %v17691_v4  ;;  %v17734_v27 = vand.u32 4294901760, %v17686_v54 }
 0x34e   :  { %v13705_v6 = vpack.c.bf16 %v17693_v58, %v17692_v30  ;;  %v13723_v12 = vpack.c.bf16 %v17701_v43, %v17700_v9  ;;  %v17703_v58 = vand.u32 4294901760, %v13128_v0  ;;  %v17704_v30 = vand.u32 4294901760, %v13136_v5  ;;  %17708 = vst [vmem:[#allocation121_spill] sm:$0xff] %v13735_v1  ;;  %v17712_v9 = vld [vmem:[#allocation120_spill] sm:$0xff] }
 0x34f   :  { %9388 = vmatpush1.bf16.msra.mxu0 %v9387_v47  ;;  %17711 = vst [vmem:[#allocation122_spill] sm:$0xff] %v13741_v37  ;;  %9520 = vmatpush1.bf16.msra.mxu1 %v17712_v9  ;;  %v17713_v0 = vand.u32 4294901760, %v13481_v53  ;;  %v17714_v5 = vand.u32 4294901760, %v13486_v46  ;;  %v17716_v43 = vand.u32 4294901760, %v17688_v8  ;;  %17721 = vst [vmem:[#allocation92_spill] sm:$0xff] %v13760_v35  ;;  %v17726_v8 = vand.u32 4294901760, %v13518_v19 }
 0x350   :  { %17694 = vst [vmem:[#allocation115_spill] sm:$0xff] %v13705_v6  ;;  %17702 = vst [vmem:[#allocation118_spill] sm:$0xff] %v13723_v12  ;;  %v13729_v6 = vpack.c.bf16 %v17704_v30, %v17703_v58  ;;  %9390 = vmatprep.subr.bf16.mxu0 %v9389_v59  ;;  %v17717_v58 = vand.u32 4294901760, %v17689_v32  ;;  %9522 = vmatprep.subr.bf16.mxu1 %v17722_v44  ;;  %v17723_v59 = vand.u32 4294901760, %v17690_v10  ;;  %v17727_v32 = vand.u32 4294901760, %v13523_v39  ;;  %v17744_v12 = vld [vmem:[#allocation78_spill] sm:$0xff] }
 0x351   :  { %v13748_v47 = vpack.c.bf16 %v17714_v5, %v17713_v0  ;;  %v17729_v5 = vld [vmem:[#allocation88_spill] sm:$0xff]  ;;  %v17735_v10 = vand.u32 4294901760, %v17687_v20  ;;  %v17737_v4 = vand.u32 4294901760, %v13610_v49  ;;  %v17741_v1 = vand.u32 4294901760, %v13641_v28  ;;  %v17757_v9 = vld [vmem:[#allocation59_spill] sm:$0xff] }
 0x352   :  { %17705 = vst [vmem:[#allocation119_spill] sm:$0xff] %v13729_v6  ;;  %v13754_v30 = vpack.c.bf16 %v17717_v58, %v17716_v43  ;;  %v13767_v21 = vpack.c.bf16 %v17724_v41, %v17723_v59  ;;  %v13773_v0 = vpack.c.bf16 %v17727_v32, %v17726_v8  ;;  %v17730_v43 = vand.u32 4294901760, %v17729_v5  ;;  %v17731_v58 = vld [vmem:[#allocation91_spill] sm:$0xff]  ;;  %v17739_v32 = vld [vmem:[#allocation81_spill] sm:$0xff] }
 0x353   :  { %17715 = vst [vmem:[#allocation64_spill] sm:$0xff] %v13748_v47  ;;  %v17732_v47 = vand.u32 4294901760, %v17731_v58  ;;  %v13785_v35 = vpack.c.bf16 %v17735_v10, %v17734_v27  ;;  %v13790_v59 = vsub.f32 %v13610_v49, %v17737_v4  ;;  %v17738_v41 = vand.u32 4294901760, %v13612_v55  ;;  %v17743_v10 = vld [vmem:[#allocation151_spill] sm:$0xff]  ;;  %9392 = vmatpush1.bf16.msra.mxu0 %v9391_v52 }
 0x354   :  { %17718 = vst [vmem:[#allocation70_spill] sm:$0xff] %v13754_v30  ;;  %17725 = vst [vmem:[#allocation156_spill] sm:$0xff] %v13767_v21  ;;  %v9395_v4 = vpack.c.bf16 %v17731_v58, %v17729_v5  ;;  %9394 = vmatprep.subr.bf16.mxu0 %v9393_v18  ;;  %v17752_v49 = vand.u32 4294901760, %v13588_v31  ;;  %v4991_v5 = vand.u32 4294901760, %v13668_v23  ;;  %v5003_v18 = vand.u32 4294901760, %v13673_v15  ;;  %v17755_v58 = vld [vmem:[#allocation106_spill] sm:$0xff] }
 0x355   :  { %17728 = vst [vmem:[#allocation61_spill] sm:$0xff] %v13773_v0  ;;  %v13779_v45 = vpack.c.bf16 %v17732_v47, %v17730_v43  ;;  %17736 = vst [vmem:[#allocation128_spill] sm:$0xff] %v13785_v35  ;;  %v13795_v8 = vsub.f32 %v13612_v55, %v17738_v41  ;;  %v17740_v43 = vand.u32 4294901760, %v13627_v29  ;;  %v17745_v55 = vld [vmem:[#allocation67_spill] sm:$0xff]  ;;  %v17747_v0 = vld [vmem:[#allocation101_spill] sm:$0xff]  ;;  %v17764_v23 = vand.u32 4294901760, %v13641_v28 }
 0x356   :  { %9524 = vmatpush1.bf16.msra.mxu1 %v17745_v55  ;;  %v17746_v41 = vld [vmem:[#allocation99_spill] sm:$0xff]  ;;  %v17749_v44 = vand.u32 4294901760, %v17747_v0  ;;  %v17754_v35 = vld [vmem:[#allocation82_spill] sm:$0xff]  ;;  %v17756_v55 = vand.u32 4294901760, %v17755_v58 }
 0x357   :  { %17733 = vst [vmem:[#allocation124_spill] sm:$0xff] %v13779_v45  ;;  %v13803_v27 = vpack.c.bf16 %v17741_v1, %v17740_v43  ;;  %v9397_v47 = vpack.c.bf16 %v17747_v0, %v17746_v41  ;;  %v17748_v48 = vand.u32 4294901760, %v17746_v41  ;;  %v17751_v43 = vand.u32 4294901760, %v17739_v32  ;;  %9526 = vmatprep.subr.bf16.mxu1 %v17754_v35  ;;  %9396 = vmatpush1.bf16.msra.mxu0 %v9395_v4 }
 0x358   :  { %v17758_v41 = vand.u32 4294901760, %v17757_v9  ;;  %v13847_v15 = vsub.f32 %v13641_v28, %v17764_v23  ;;  %v17768_v28 = vld [vmem:[#allocation113_spill] sm:$0xff]  ;;  %v17769_v23 = vld [vmem:[#allocation62_spill] sm:$0xff] }
 0x359   :  { %17742 = vst [vmem:[#allocation131_spill] sm:$0xff] %v13803_v27  ;;  %v13816_v1 = vpack.c.bf16 %v17749_v44, %v17748_v48  ;;  %v13822_v52 = vpack.c.bf16 %v17752_v49, %v17751_v43  ;;  %v17760_v48 = vand.u32 4294901760, %v17743_v10  ;;  %v17761_v44 = vand.u32 4294901760, %v17744_v12  ;;  %9398 = vmatprep.subr.bf16.mxu0 %v9397_v47 }
 0x35a   :  { %v13831_v45 = vpack.c.bf16 %v17758_v41, %v17756_v55  ;;  %v17763_v49 = vand.u32 4294901760, %v13627_v29  ;;  %v17766_v41 = vand.u32 4294901760, %v13428_v40  ;;  %v9401_v35 = vpack.c.bf16 %v17769_v23, %v17768_v28 }
 0x35b   :  { %17750 = vst [vmem:[#allocation129_spill] sm:$0xff] %v13816_v1  ;;  %17753 = vst [vmem:[#allocation133_spill] sm:$0xff] %v13822_v52  ;;  %v13837_v0 = vpack.c.bf16 %v17761_v44, %v17760_v48  ;;  %v17765_v52 = vld [vmem:[#allocation100_spill] sm:$0xff]  ;;  %v17770_v55 = vand.u32 4294901760, %v17768_v28  ;;  %v17774_v44 = vand.u32 4294901760, %v13617_v38  ;;  %v17776_v1 = vld [vmem:[#allocation93_spill] sm:$0xff] }
 0x35c   :  { %17759 = vst [vmem:[#allocation136_spill] sm:$0xff] %v13831_v45  ;;  %v13842_v43 = vsub.f32 %v13627_v29, %v17763_v49  ;;  %v13854_v45 = vsub.f32 %v13428_v40, %v17766_v41  ;;  %v9399_v29 = vpack.c.bf16 %v17757_v9, %v17755_v58  ;;  %v17767_v49 = vld [vmem:[#allocation76_spill] sm:$0xff]  ;;  %v17773_v48 = vand.u32 4294901760, %v17765_v52  ;;  %v17780_v28 = vld [vmem:[#allocation127_spill] sm:$0xff] }
 0x35d   :  { %17762 = vst [vmem:[#allocation152_spill] sm:$0xff] %v13837_v0  ;;  %9528 = vmatpush1.bf16.msra.mxu1 %v17767_v49  ;;  %v17771_v0 = vand.u32 4294901760, %v17769_v23  ;;  %v9541_v9 = vpack.c.bf16 %v5003_v18, %v4991_v5  ;;  %v17777_v47 = vand.u32 4294901760, %v13433_v51  ;;  %v17778_v49 = vld [vmem:[#allocation125_spill] sm:$0xff]  ;;  %v17781_v30 = vand.u32 4294901760, %v17780_v28 }
 0x35e   :  { %v13873_v4 = vpack.c.bf16 %v17774_v44, %v17773_v48  ;;  %9530 = vmatprep.subr.bf16.mxu1 %v17776_v1  ;;  %v17779_v21 = vand.u32 4294901760, %v17778_v49  ;;  %v2980_v48 = vpop.f32.mrb[0].mxu0  ;;  %v17786_v44 = vand.u32 4294901760, %v13438_v25  ;;  %v16730_v18 = vand.u32 4294901760, %v13637_v36  ;;  %v17787_v1 = vld [vmem:[#allocation56_spill] sm:$0xff]  ;;  %9400 = vmatpush1.bf16.msra.mxu0 %v9399_v29 }
 0x35f   :  { %v13867_v41 = vpack.c.bf16 %v17771_v0, %v17770_v55  ;;  %v5008_v58 = vsub.f32 %v13433_v51, %v17777_v47  ;;  %v17783_v0 = vand.u32 4294901760, %v13622_v57  ;;  %v17784_v55 = vand.u32 4294901760, %v13633_v17  ;;  %9402 = vmatprep.subr.bf16.mxu0 %v9401_v35 }
 0x360   :  { %17775 = vst [vmem:[#allocation132_spill] sm:$0xff] %v13873_v4  ;;  %v13883_v23 = vpack.c.bf16 %v17781_v30, %v17779_v21  ;;  %v5014_v5 = vsub.f32 %v13438_v25, %v17786_v44  ;;  %v16729_v47 = vand.u32 4294901760, %v13639_v2  ;;  %v13898_v30 = vadd.f32 %v2980_v48, %v17787_v1  ;;  %v2982_v21 = vpop.f32.mrb[1].mxu0  ;;  %v17791_v44 = vld [vmem:[#allocation98_spill] sm:$0xff] }
 0x361   :  { %17772 = vst [vmem:[#allocation79_spill] sm:$0xff] %v13867_v41  ;;  %v13889_v41 = vpack.c.bf16 %v17784_v55, %v17783_v0  ;;  %v9403_v0 = vpack.c.bf16 %v17780_v28, %v17778_v49  ;;  %v17789_v55 = vld [vmem:[#allocation130_spill] sm:$0xff]  ;;  %v13906_v6 = vadd.f32 %v2982_v21, %v17791_v44  ;;  %9532 = vmatpush1.bf16.msra.mxu1 %v13620_v50  ;;  %v4997_v4 = vand.u32 4294901760, %v13854_v45 }
 0x362   :  { %17782 = vst [vmem:[#allocation139_spill] sm:$0xff] %v13883_v23  ;;  %17788 = vst [vmem:[#allocation66_spill] sm:$0xff] %v13898_v30  ;;  %v17793_v1 = vand.u32 4294901760, %v17789_v55  ;;  %v13920_v29 = vpack.c.bf16 %v16729_v47, %v16730_v18  ;;  %9534 = vmatprep.subr.bf16.mxu1 %v13635_v13  ;;  %v17797_v49 = vand.u32 4294901760, %v13457_v16  ;;  %v17798_v35 = vand.u32 4294901760, %v13468_v56  ;;  %v17799_v21 = vld [vmem:[#allocation134_spill] sm:$0xff] }
 0x363   :  { %17785 = vst [vmem:[#allocation68_spill] sm:$0xff] %v13889_v41  ;;  %v17790_v41 = vld [vmem:[#allocation65_spill] sm:$0xff]  ;;  %17792 = vst [vmem:[#allocation135_spill] sm:$0xff] %v13906_v6  ;;  %v17805_v47 = vand.u32 4294901760, %v13651_v26  ;;  %v17807_v6 = vand.u32 4294901760, %v13473_v60  ;;  %v17808_v30 = vand.u32 4294901760, %v13481_v53  ;;  %9404 = vmatpush1.bf16.msra.mxu0 %v9403_v0 }
 0x364   :  { %v9405_v37 = vpack.c.bf16 %v17790_v41, %v17789_v55  ;;  %v17794_v48 = vand.u32 4294901760, %v17790_v41  ;;  %17796 = vst [vmem:[#allocation145_spill] sm:$0xff] %v13920_v29  ;;  %v5026_v28 = vsub.f32 %v13457_v16, %v17797_v49  ;;  %v5020_v45 = vsub.f32 %v13468_v56, %v17798_v35  ;;  %v17801_v55 = vld [vmem:[#allocation137_spill] sm:$0xff] }
 0x365   :  { %v17800_v41 = vand.u32 4294901760, %v17799_v21  ;;  %v17802_v44 = vand.u32 4294901760, %v17801_v55  ;;  %v5032_v49 = vsub.f32 %v13473_v60, %v17807_v6  ;;  %v5038_v35 = vsub.f32 %v13481_v53, %v17808_v30  ;;  %9536 = vmatpush1.bf16.msra.mxu1 %v13644_v34  ;;  %v17810_v30 = vld [vmem:[#allocation141_spill] sm:$0xff] }
 0x366   :  { %v13914_v23 = vpack.c.bf16 %v17794_v48, %v17793_v1  ;;  %v17804_v48 = vand.u32 4294901760, %v13646_v3  ;;  %v9407_v6 = vpack.c.bf16 %v17801_v55, %v17799_v21  ;;  %9406 = vmatprep.subr.bf16.mxu0 %v9405_v37  ;;  %v17811_v29 = vld [vmem:[#allocation69_spill] sm:$0xff]  ;;  %v17812_v13 = vand.u32 4294901760, %v17810_v30  ;;  %9538 = vmatprep.subr.bf16.mxu1 %v13657_v33  ;;  %v17843_v33 = vld [vmem:[#allocation111_spill] sm:$0xff] }
 0x367   :  { %v13933_v1 = vpack.c.bf16 %v17802_v44, %v17800_v41  ;;  %v17809_v41 = vand.u32 4294901760, %v13486_v46  ;;  %v17815_v50 = vand.u32 4294901760, %v13790_v59  ;;  %v17816_v0 = vand.u32 4294901760, %v13795_v8  ;;  %v17818_v37 = vld [vmem:[#allocation73_spill] sm:$0xff] }
 0x368   :  { %17795 = vst [vmem:[#allocation138_spill] sm:$0xff] %v13914_v23  ;;  %v13939_v18 = vpack.c.bf16 %v17805_v47, %v17804_v48  ;;  %v5009_v48 = vand.u32 4294901760, %v5008_v58  ;;  %v5015_v21 = vand.u32 4294901760, %v5014_v5  ;;  %v5027_v58 = vand.u32 4294901760, %v5026_v28  ;;  %9408 = vmatpush1.bf16.msra.mxu0 %v9407_v6  ;;  %v17828_v6 = vld [vmem:[#allocation80_spill] sm:$0xff] }
 0x369   :  { %17803 = vst [vmem:[#allocation142_spill] sm:$0xff] %v13933_v1  ;;  %v5050_v44 = vsub.f32 %v13486_v46, %v17809_v41  ;;  %v17813_v1 = vand.u32 4294901760, %v17811_v29  ;;  %v13969_v47 = vpack.c.bf16 %v17816_v0, %v17815_v50  ;;  %v17819_v55 = vand.u32 4294901760, %v17818_v37  ;;  %9540 = vmatpush1.bf16.msra.mxu1 %v13803_v27 }
 0x36a   :  { %17806 = vst [vmem:[#allocation146_spill] sm:$0xff] %v13939_v18  ;;  %v9409_v18 = vpack.c.bf16 %v17811_v29, %v17810_v30  ;;  %v17820_v34 = vand.u32 4294901760, %v13570_v22  ;;  %v17821_v29 = vand.u32 4294901760, %v13842_v43  ;;  %v5021_v30 = vand.u32 4294901760, %v5020_v45  ;;  %9542 = vmatprep.subr.bf16.mxu1 %v9541_v9 }
 0x36b   :  { %v13963_v41 = vpack.c.bf16 %v17813_v1, %v17812_v13  ;;  %17817 = vst [vmem:[#allocation86_spill] sm:$0xff] %v13969_v47  ;;  %v17822_v13 = vand.u32 4294901760, %v13847_v15  ;;  %v17824_v50 = vand.u32 4294901760, %v13507_v61  ;;  %v17825_v5 = vand.u32 4294901760, %v13512_v62 }
 0x36c   :  { %v13976_v23 = vpack.c.bf16 %v17820_v34, %v17819_v55  ;;  %v9411_v34 = vpack.c.bf16 %v13570_v22, %v17818_v37  ;;  %v9543_v55 = vpack.c.bf16 %v5009_v48, %v4997_v4  ;;  %v5039_v47 = vand.u32 4294901760, %v5038_v35  ;;  %9410 = vmatprep.subr.bf16.mxu0 %v9409_v18  ;;  %4981 = vmatmul.mubr.f32.vlgmr.msra.gmra.mrb[4].mxu1 %v17828_v6 }
 0x36d   :  { %17814 = vst [vmem:[#allocation84_spill] sm:$0xff] %v13963_v41  ;;  %v13982_v1 = vpack.c.bf16 %v17822_v13, %v17821_v29  ;;  %v5033_v41 = vand.u32 4294901760, %v5032_v49  ;;  %v5044_v0 = vsub.f32 %v13507_v61, %v17824_v50  ;;  %v5056_v28 = vsub.f32 %v13512_v62, %v17825_v5  ;;  %5211 = vmatprep.mubr.f32.mxu1 %v17062_v14 }
 0x36e   :  { %v5051_v29 = vand.u32 4294901760, %v5050_v44  ;;  %v9545_v45 = vpack.c.bf16 %v5027_v58, %v5015_v21  ;;  %v17826_v49 = vand.u32 4294901760, %v13518_v19  ;;  %v17827_v50 = vand.u32 4294901760, %v13523_v39  ;;  %9412 = vmatpush1.bf16.msra.mxu0 %v9411_v34  ;;  %9544 = vmatpush1.bf16.msra.mxu1 %v9543_v55 }
 0x36f   :  { %17823 = vst [vmem:[#allocation87_spill] sm:$0xff] %v13982_v1  ;;  %v9547_v1 = vpack.c.bf16 %v5033_v41, %v5021_v30  ;;  %v5045_v22 = vand.u32 4294901760, %v5044_v0  ;;  %v5057_v37 = vand.u32 4294901760, %v5056_v28  ;;  %v17829_v18 = vand.u32 4294901760, %v17686_v54  ;;  %v17833_v0 = vld [vmem:[#allocation58_spill] sm:$0xff] }
 0x370   :  { %v5062_v13 = vsub.f32 %v13518_v19, %v17826_v49  ;;  %v5074_v5 = vsub.f32 %v13523_v39, %v17827_v50  ;;  %v9549_v4 = vpack.c.bf16 %v5051_v29, %v5039_v47  ;;  %v17830_v35 = vand.u32 4294901760, %v17687_v20  ;;  %9546 = vmatprep.subr.bf16.mxu1 %v9545_v45  ;;  %9414 = vmatprep.subr.bf16.mxu0 %v17833_v0  ;;  %v17834_v28 = vld [vmem:[#allocation154_spill] sm:$0xff] }
 0x371   :  { %v5068_v9 = vsub.f32 %v17686_v54, %v17829_v18  ;;  %v17831_v41 = vand.u32 4294901760, %v17739_v32  ;;  %v17832_v30 = vand.u32 4294901760, %v13588_v31  ;;  %4495 = vmatmul.mubr.f32.vlgmr.msra.gmra.mrb[2].mxu0 %v17834_v28  ;;  %v9551_v34 = vpack.c.bf16 %v5057_v37, %v5045_v22 }
 0x372   :  { %v5080_v44 = vsub.f32 %v17687_v20, %v17830_v35  ;;  %v5063_v48 = vand.u32 4294901760, %v5062_v13  ;;  %v5075_v21 = vand.u32 4294901760, %v5074_v5  ;;  %v17835_v55 = vand.u32 4294901760, %v17743_v10  ;;  %v17837_v13 = vld [vmem:[#allocation108_spill] sm:$0xff]  ;;  %4597 = vmatprep.mubr.f32.mxu0 %v17062_v14  ;;  %9548 = vmatpush1.bf16.msra.mxu1 %v9547_v1  ;;  %v17840_v35 = vld [vmem:[#allocation109_spill] sm:$0xff] }
 0x373   :  { %v5086_v58 = vsub.f32 %v17739_v32, %v17831_v41  ;;  %v5098_v47 = vsub.f32 %v13588_v31, %v17832_v30  ;;  %v17836_v45 = vand.u32 4294901760, %v17744_v12  ;;  %9416 = vmatpush1.bf16.msra.mxu0 %v17837_v13  ;;  %v5069_v50 = vand.u32 4294901760, %v5068_v9  ;;  %9550 = vmatprep.subr.bf16.mxu1 %v9549_v4  ;;  %v17844_v4 = vld [vmem:[#allocation112_spill] sm:$0xff] }
 0x374   :  { %v5092_v29 = vsub.f32 %v17743_v10, %v17835_v55  ;;  %v5081_v5 = vand.u32 4294901760, %v5080_v44  ;;  %v17838_v6 = vand.u32 4294901760, %v17765_v52  ;;  %v17839_v22 = vand.u32 4294901760, %v13617_v38  ;;  %9418 = vmatprep.subr.bf16.mxu0 %v17840_v35 }
 0x375   :  { %v5104_v49 = vsub.f32 %v17744_v12, %v17836_v45  ;;  %v9553_v41 = vpack.c.bf16 %v5075_v21, %v5063_v48  ;;  %v5087_v30 = vand.u32 4294901760, %v5086_v58  ;;  %v5099_v55 = vand.u32 4294901760, %v5098_v47 }
 0x376   :  { %v5110_v18 = vsub.f32 %v17765_v52, %v17838_v6  ;;  %v5122_v37 = vsub.f32 %v13617_v38, %v17839_v22  ;;  %v5093_v45 = vand.u32 4294901760, %v5092_v29  ;;  %v17841_v1 = vand.u32 4294901760, %v13622_v57  ;;  %9552 = vmatpush1.bf16.msra.mxu1 %v9551_v34 }
 0x377   :  { %v5105_v27 = vand.u32 4294901760, %v5104_v49  ;;  %v17842_v44 = vand.u32 4294901760, %v13633_v17  ;;  %9420 = vmatpush1.bf16.msra.mxu0 %v17843_v33  ;;  %v9555_v22 = vpack.c.bf16 %v5081_v5, %v5069_v50  ;;  %9554 = vmatprep.subr.bf16.mxu1 %v9553_v41  ;;  %v9557_v48 = vpack.c.bf16 %v5099_v55, %v5087_v30  ;;  %v17847_v33 = vld [vmem:[#allocation114_spill] sm:$0xff]  ;;  %v17850_v41 = vld [vmem:[#allocation63_spill] sm:$0xff] }
 0x378   :  { %v5116_v9 = vsub.f32 %v13622_v57, %v17841_v1  ;;  %v5111_v13 = vand.u32 4294901760, %v5110_v18  ;;  %v5123_v35 = vand.u32 4294901760, %v5122_v37  ;;  %9422 = vmatprep.subr.bf16.mxu0 %v17844_v4  ;;  %v17845_v21 = vand.u32 4294901760, %v13637_v36 }
 0x379   :  { %v5128_v6 = vsub.f32 %v13633_v17, %v17842_v44  ;;  %v17846_v47 = vand.u32 4294901760, %v13639_v2  ;;  %v9559_v49 = vpack.c.bf16 %v5105_v27, %v5093_v45  ;;  %v17848_v50 = vand.u32 4294901760, %v13646_v3 }
 0x37a   :  { %v5134_v58 = vsub.f32 %v13637_v36, %v17845_v21  ;;  %v5117_v1 = vand.u32 4294901760, %v5116_v9  ;;  %9556 = vmatpush1.bf16.msra.mxu1 %v9555_v22  ;;  %v9561_v34 = vpack.c.bf16 %v5123_v35, %v5111_v13  ;;  %v17849_v18 = vand.u32 4294901760, %v13651_v26 }
 0x37b   :  { %v5146_v29 = vsub.f32 %v13639_v2, %v17846_v47  ;;  %v5129_v44 = vand.u32 4294901760, %v5128_v6  ;;  %9424 = vmatpush1.bf16.msra.mxu0 %v17847_v33  ;;  %v5140_v5 = vsub.f32 %v13646_v3, %v17848_v50  ;;  %9558 = vmatprep.subr.bf16.mxu1 %v9557_v48  ;;  %v17851_v27 = vand.u32 4294901760, %v13790_v59  ;;  %v17853_v6 = vld [vmem:[#allocation126_spill] sm:$0xff]  ;;  %v17856_v50 = vld [vmem:[#allocation140_spill] sm:$0xff] }
 0x37c   :  { %v5152_v37 = vsub.f32 %v13651_v26, %v17849_v18  ;;  %9426 = vmatprep.subr.bf16.mxu0 %v17850_v41  ;;  %v5135_v30 = vand.u32 4294901760, %v5134_v58  ;;  %v17852_v9 = vand.u32 4294901760, %v13795_v8  ;;  %v17854_v47 = vand.u32 4294901760, %v13842_v43  ;;  %v17860_v41 = vld [vmem:[#allocation71_spill] sm:$0xff] }
 0x37d   :  { %v5147_v55 = vand.u32 4294901760, %v5146_v29  ;;  %v5158_v45 = vsub.f32 %v13790_v59, %v17851_v27  ;;  %v9563_v35 = vpack.c.bf16 %v5129_v44, %v5117_v1  ;;  %v5141_v22 = vand.u32 4294901760, %v5140_v5  ;;  %v17857_v1 = vld [vmem:[#allocation144_spill] sm:$0xff] }
 0x37e   :  { %v5170_v13 = vsub.f32 %v13795_v8, %v17852_v9  ;;  %9560 = vmatpush1.bf16.msra.mxu1 %v9559_v49  ;;  %v5153_v21 = vand.u32 4294901760, %v5152_v37  ;;  %v5164_v48 = vsub.f32 %v13842_v43, %v17854_v47  ;;  %v17855_v58 = vand.u32 4294901760, %v13847_v15  ;;  %v17858_v37 = vld [vmem:[#allocation147_spill] sm:$0xff] }
 0x37f   :  { %9428 = vmatpush1.bf16.msra.mxu0 %v17853_v6  ;;  %9562 = vmatprep.subr.bf16.mxu1 %v9561_v34  ;;  %v9565_v18 = vpack.c.bf16 %v5147_v55, %v5135_v30  ;;  %v5159_v27 = vand.u32 4294901760, %v5158_v45  ;;  %v17859_v6 = vld [vmem:[#allocation72_spill] sm:$0xff]  ;;  %v9573_v34 = vpack.c.bf16 %v13422_v11, %v13417_v7  ;;  %v17861_v30 = vld [vmem:[#allocation149_spill] sm:$0xff]  ;;  %v9575_v55 = vpack.c.bf16 %v13433_v51, %v13428_v40  ;;  %v17862_v45 = vld [vmem:[#allocation150_spill] sm:$0xff] }
 0x380   :  { %v5176_v29 = vsub.f32 %v13847_v15, %v17855_v58  ;;  %9430 = vmatprep.subr.bf16.mxu0 %v17856_v50  ;;  %v5171_v9 = vand.u32 4294901760, %v5170_v13  ;;  %v9567_v49 = vpack.c.bf16 %v5153_v21, %v5141_v22  ;;  %v5165_v44 = vand.u32 4294901760, %v5164_v48  ;;  %v17865_v48 = vld [vmem:[#allocation74_spill] sm:$0xff]  ;;  %v17867_v51 = vld [vmem:[#allocation155_spill] sm:$0xff] }
 0x381   :  { %v9577_v13 = vpack.c.bf16 %v13457_v16, %v13438_v25  ;;  %v17864_v22 = vand.u32 4294901760, %v13039_v63  ;;  %v9581_v40 = vpack.c.bf16 %v13486_v46, %v13481_v53  ;;  %v9583_v63 = vpack.c.bf16 %v13512_v62, %v13507_v61  ;;  %v17869_v25 = vld [vmem:[#allocation119_spill] sm:$0xff]  ;;  %v17871_v46 = vld [vmem:[#allocation70_spill] sm:$0xff]  ;;  %v17872_v61 = vld [vmem:[#allocation156_spill] sm:$0xff] }
 0x382   :  { %9564 = vmatpush1.bf16.msra.mxu1 %v9563_v35  ;;  %v5177_v5 = vand.u32 4294901760, %v5176_v29  ;;  %v9569_v47 = vpack.c.bf16 %v5171_v9, %v5159_v27  ;;  %v17863_v35 = vand.u32 4294901760, %v13034_v24  ;;  %v17866_v29 = vld [vmem:[#allocation75_spill] sm:$0xff]  ;;  %v9587_v16 = vpack.c.bf16 %v17687_v20, %v17686_v54  ;;  %v17874_v20 = vld [vmem:[#allocation129_spill] sm:$0xff]  ;;  %v17875_v54 = vld [vmem:[#allocation136_spill] sm:$0xff] }
 0x383   :  { %9432 = vmatpush1.bf16.msra.mxu0 %v17857_v1  ;;  %9566 = vmatprep.subr.bf16.mxu1 %v9565_v18  ;;  %v9579_v18 = vpack.c.bf16 %v13473_v60, %v13468_v56  ;;  %v17868_v24 = vld [vmem:[#allocation115_spill] sm:$0xff]  ;;  %v9585_v60 = vpack.c.bf16 %v13523_v39, %v13518_v19  ;;  %v17870_v56 = vld [vmem:[#allocation122_spill] sm:$0xff]  ;;  %v9589_v53 = vpack.c.bf16 %v13588_v31, %v17739_v32  ;;  %v17873_v19 = vld [vmem:[#allocation124_spill] sm:$0xff] }
 0x384   :  { %9434 = vmatprep.subr.bf16.mxu0 %v17858_v37  ;;  %v9571_v58 = vpack.c.bf16 %v5177_v5, %v5165_v44  ;;  %v9445_v21 = vpack.c.bf16 %v17864_v22, %v17863_v35  ;;  %v9593_v62 = vpack.c.bf16 %v13617_v38, %v17765_v52  ;;  %v9595_v39 = vpack.c.bf16 %v13633_v17, %v13622_v57  ;;  %v17876_v32 = vld [vmem:[#allocation79_spill] sm:$0xff]  ;;  %v17878_v17 = vld [vmem:[#allocation138_spill] sm:$0xff]  ;;  %v17895_v35 = vld [vmem:[#allocation76_spill] sm:$0xff] }
 0x385   :  { %v9597_v31 = vpack.c.bf16 %v13639_v2, %v13637_v36  ;;  %v9601_v38 = vpack.c.bf16 %v13795_v8, %v13790_v59  ;;  %v9603_v57 = vpack.c.bf16 %v13847_v15, %v13842_v43  ;;  %v17879_v36 = vld [vmem:[#allocation142_spill] sm:$0xff]  ;;  %v17880_v2 = vld [vmem:[#allocation84_spill] sm:$0xff]  ;;  %v17883_v59 = vld [vmem:[#allocation103_spill] sm:$0xff]  ;;  %v17896_v22 = vand.u32 4294901760, %v13417_v7 }
 0x386   :  { %9568 = vmatpush1.bf16.msra.mxu1 %v9567_v49  ;;  %v17884_v8 = vld [vmem:[#allocation108_spill] sm:$0xff]  ;;  %v17885_v52 = vld [vmem:[#allocation110_spill] sm:$0xff]  ;;  %v17886_v43 = vld [vmem:[#allocation109_spill] sm:$0xff] }
 0x387   :  { %9436 = vmatpush1.bf16.msra.mxu0 %v17859_v6  ;;  %9570 = vmatprep.subr.bf16.mxu1 %v9569_v47  ;;  %v17887_v15 = vld [vmem:[#allocation116_spill] sm:$0xff]  ;;  %v17890_v27 = vld [vmem:[#allocation123_spill] sm:$0xff]  ;;  %v17893_v49 = vld [vmem:[#allocation82_spill] sm:$0xff] }
 0x388   :  { %9438 = vmatprep.subr.bf16.mxu0 %v17860_v41  ;;  %v17892_v9 = vld [vmem:[#allocation63_spill] sm:$0xff]  ;;  %v14150_v5 = vld [vmem:[#allocation15] sm:$0xff] }
 0x389   :  { %v14148_v44 = vld [vmem:[#allocation15 + $0x8] sm:$0xff]  ;;  %v14152_v47 = vld [vmem:[#allocation15 + $0x20] sm:$0xff] }
 0x38a   :  { %9572 = vmatpush1.bf16.msra.mxu1 %v9571_v58  ;;  %v14154_v58 = vld [vmem:[#allocation15 + $0x28] sm:$0xff]  ;;  %v14285_v7 = vld [vmem:[#allocation15 + $0x140] sm:$0xff] }
 0x38b   :  { %9440 = vmatpush1.bf16.msra.mxu0 %v17861_v30  ;;  %9574 = vmatprep.subr.bf16.mxu1 %v9573_v34  ;;  %v14156_v34 = vld [vmem:[#allocation15 + $0x48] sm:$0xff] }
 0x38c   :  { %9442 = vmatprep.subr.bf16.mxu0 %v17862_v45 }
 0x38d   :  { %5213 = vmatmul.mubr.f32.vlgmr.msra.gmra.mrb[4].mxu1 %v17865_v48 }
 0x38e   :  { %9576 = vmatpush1.bf16.msra.mxu1 %v9575_v55  ;;  %5347 = vmatprep.mubr.f32.mxu1 %v17062_v14  ;;  %v17894_v55 = vld [vmem:[#allocation126_spill] sm:$0xff] }
 0x38f   :  { %9444 = vmatpush1.bf16.msra.mxu0 %v17866_v29  ;;  %9578 = vmatprep.subr.bf16.mxu1 %v9577_v13  ;;  %v14163_v13 = vld [vmem:[#allocation15 + $0x60] sm:$0xff] }
 0x390   :  { %9446 = vmatprep.subr.bf16.mxu0 %v9445_v21  ;;  %v17897_v21 = vand.u32 4294901760, %v13422_v11  ;;  %v16746_v11 = vand.u32 4294901760, %v14156_v34 }
 0x392   :  { %4601 = vmatmul.mubr.f32.vlgmr.msra.gmra.mrb[2].mxu0 %v17867_v51  ;;  %9580 = vmatpush1.bf16.msra.mxu1 %v9579_v18  ;;  %v14170_v18 = vpack.c.bf16 %v17897_v21, %v17896_v22  ;;  %v14252_v22 = vld [vmem:[#allocation15 + $0x100] sm:$0xff] }
 0x393   :  { %9448 = vmatpush1.bf16.msra.mxu0 %v17868_v24  ;;  %4767 = vmatprep.mubr.f32.mxu0 %v17062_v14  ;;  %v16749_v24 = vand.u32 4294901760, %v14152_v47  ;;  %v14254_v21 = vld [vmem:[#allocation15 + $0x120] sm:$0xff] }
 0x394   :  { %9450 = vmatprep.subr.bf16.mxu0 %v13717_v42  ;;  %9582 = vmatprep.subr.bf16.mxu1 %v9581_v40  ;;  %v9591_v42 = vpack.c.bf16 %v17744_v12, %v17743_v10  ;;  %v9599_v12 = vpack.c.bf16 %v13651_v26, %v13646_v3  ;;  %v17877_v10 = vld [vmem:[#allocation139_spill] sm:$0xff]  ;;  %v17881_v3 = vld [vmem:[#allocation94_spill] sm:$0xff]  ;;  %v17882_v26 = vld [vmem:[#allocation96_spill] sm:$0xff]  ;;  %v16750_v40 = vand.u32 4294901760, %v14150_v5 }
 0x396   :  { %9584 = vmatpush1.bf16.msra.mxu1 %v9583_v63  ;;  %v14175_v63 = vld [vmem:[#allocation15 + $0x88] sm:$0xff] }
 0x397   :  { %9452 = vmatpush1.bf16.msra.mxu0 %v17869_v25  ;;  %9586 = vmatprep.subr.bf16.mxu1 %v9585_v60  ;;  %v14177_v60 = vld [vmem:[#allocation15 + $0xa8] sm:$0xff]  ;;  %v17898_v25 = vld [vmem:[#allocation93_spill] sm:$0xff] }
 0x398   :  { %9454 = vmatprep.subr.bf16.mxu0 %v17870_v56 }
 0x39a   :  { %9588 = vmatpush1.bf16.msra.mxu1 %v9587_v16  ;;  %v17912_v16 = vld [vmem:[#allocation107_spill] sm:$0xff] }
 0x39b   :  { %9456 = vmatpush1.bf16.msra.mxu0 %v17871_v46  ;;  %9590 = vmatprep.subr.bf16.mxu1 %v9589_v53  ;;  %v14184_v53 = vld [vmem:[#allocation15 + $0x80] sm:$0xff]  ;;  %v14191_v46 = vsub.f32 %v14150_v5, %v16750_v40  ;;  %v14318_v40 = vld [vmem:[#allocation15 + $0x1a8] sm:$0xff] }
 0x39c   :  { %9458 = vmatprep.subr.bf16.mxu0 %v17872_v61 }
 0x39d   :  { %17899 = vst [vmem:[#allocation89_spill] sm:$0xff] %v14191_v46 }
 0x39e   :  { %9592 = vmatpush1.bf16.msra.mxu1 %v9591_v42  ;;  %v14196_v42 = vsub.f32 %v14152_v47, %v16749_v24  ;;  %v14301_v24 = vld [vmem:[#allocation15 + $0x160] sm:$0xff] }
 0x39f   :  { %9460 = vmatpush1.bf16.msra.mxu0 %v17873_v19  ;;  %9594 = vmatprep.subr.bf16.mxu1 %v9593_v62  ;;  %v16741_v62 = vand.u32 4294901760, %v14163_v13  ;;  %v14200_v19 = vld [vmem:[#allocation15 + $0xc8] sm:$0xff] }
 0x3a0   :  { %9462 = vmatprep.subr.bf16.mxu0 %v17874_v20  ;;  %v14208_v20 = vsub.f32 %v14156_v34, %v16746_v11  ;;  %v14270_v11 = vld [vmem:[#allocation15 + $0x168] sm:$0xff] }
 0x3a2   :  { %9596 = vmatpush1.bf16.msra.mxu1 %v9595_v39  ;;  %v14202_v39 = vld [vmem:[#allocation15 + $0xe8] sm:$0xff]  ;;  %17900 = vst [vmem:[#allocation90_spill] sm:$0xff] %v14208_v20 }
 0x3a3   :  { %9464 = vmatpush1.bf16.msra.mxu0 %v17875_v54  ;;  %9598 = vmatprep.subr.bf16.mxu1 %v9597_v31  ;;  %v16742_v54 = vand.u32 4294901760, %v14175_v63 }
 0x3a4   :  { %9466 = vmatprep.subr.bf16.mxu0 %v17876_v32  ;;  %v14217_v32 = vld [vmem:[#allocation15 + $0xc0] sm:$0xff] }
 0x3a6   :  { %9600 = vmatpush1.bf16.msra.mxu1 %v9599_v12  ;;  %v16743_v12 = vand.u32 4294901760, %v14177_v60 }
 0x3a7   :  { %9468 = vmatpush1.bf16.msra.mxu0 %v17877_v10  ;;  %9602 = vmatprep.subr.bf16.mxu1 %v9601_v38  ;;  %v14219_v38 = vld [vmem:[#allocation15 + $0xe0] sm:$0xff]  ;;  %v17902_v10 = vld [vmem:[#allocation104_spill] sm:$0xff] }
 0x3a8   :  { %9470 = vmatprep.subr.bf16.mxu0 %v17878_v17  ;;  %v16747_v17 = vand.u32 4294901760, %v14184_v53 }
 0x3aa   :  { %9604 = vmatpush1.bf16.msra.mxu1 %v9603_v57  ;;  %v14231_v57 = vsub.f32 %v14163_v13, %v16741_v62  ;;  %v14259_v62 = vsub.f32 %v14184_v53, %v16747_v17 }
 0x3ab   :  { %9472 = vmatpush1.bf16.msra.mxu0 %v17879_v36  ;;  %9606 = vmatprep.subr.bf16.mxu1 %v17881_v3 }
 0x3ac   :  { %9474 = vmatprep.subr.bf16.mxu0 %v17880_v2  ;;  %17904 = vst [vmem:[#allocation57_spill] sm:$0xff] %v14231_v57  ;;  %v14235_v2 = vld [vmem:[#allocation15 + $0x108] sm:$0xff]  ;;  %17908 = vst [vmem:[#allocation148_spill] sm:$0xff] %v14259_v62 }
 0x3ad   :  { %5350 = vmatmul.mubr.f32.vlgmr.msra.gmra.mrb[4].mxu1 %v17834_v28  ;;  %v17889_v28 = vld [vmem:[#allocation120_spill] sm:$0xff] }
 0x3ae   :  { %9608 = vmatpush1.bf16.msra.mxu1 %v17882_v26  ;;  %5452 = vmatprep.mubr.f32.mxu1 %v17062_v14 }
 0x3af   :  { %9476 = vmatpush1.bf16.msra.mxu0 %v13976_v23  ;;  %9610 = vmatprep.subr.bf16.mxu1 %v17883_v59  ;;  %v17888_v23 = vld [vmem:[#allocation111_spill] sm:$0xff] }
 0x3b0   :  { %9478 = vmatprep.subr.bf16.mxu0 %v17833_v0  ;;  %v17891_v0 = vld [vmem:[#allocation67_spill] sm:$0xff] }
 0x3b2   :  { %4769 = vmatmul.mubr.f32.vlgmr.msra.gmra.mrb[2].mxu0 %v17865_v48  ;;  %9612 = vmatpush1.bf16.msra.mxu1 %v17885_v52  ;;  %v14356_v52 = vld [vmem:[#allocation15 + $0x1c8] sm:$0xff] }
 0x3b3   :  { %9480 = vmatpush1.bf16.msra.mxu0 %v17884_v8  ;;  %4871 = vmatprep.mubr.f32.mxu0 %v17062_v14  ;;  %v14237_v8 = vld [vmem:[#allocation15 + $0x128] sm:$0xff] }
 0x3b4   :  { %9482 = vmatprep.subr.bf16.mxu0 %v17886_v43  ;;  %9614 = vmatprep.subr.bf16.mxu1 %v17887_v15  ;;  %v17905_v43 = vld [vmem:[#allocation105_spill] sm:$0xff]  ;;  %v17927_v15 = vld [vmem:[#allocation131_spill] sm:$0xff] }
 0x3b6   :  { %9616 = vmatpush1.bf16.msra.mxu1 %v17889_v28  ;;  %v17930_v28 = vand.u32 4294901760, %v14154_v58 }
 0x3b7   :  { %9484 = vmatpush1.bf16.msra.mxu0 %v17888_v23  ;;  %9618 = vmatprep.subr.bf16.mxu1 %v17890_v27  ;;  %v14248_v23 = vsub.f32 %v14177_v60, %v16743_v12  ;;  %v16753_v12 = vand.u32 4294901760, %v14217_v32  ;;  %v17925_v27 = vand.u32 4294901760, %v14270_v11 }
 0x3b8   :  { %9486 = vmatprep.subr.bf16.mxu0 %v17844_v4  ;;  %v14158_v4 = vld [vmem:[#allocation15 + $0x68] sm:$0xff] }
 0x3b9   :  { %v16745_v56 = vand.u32 4294901760, %v14158_v4  ;;  %17907 = vst [vmem:[#allocation143_spill] sm:$0xff] %v14248_v23 }
 0x3ba   :  { %9620 = vmatpush1.bf16.msra.mxu1 %v17891_v0  ;;  %v14331_v0 = vld [vmem:[#allocation15 + $0x180] sm:$0xff] }
 0x3bb   :  { %9488 = vmatpush1.bf16.msra.mxu0 %v17847_v33  ;;  %9622 = vmatprep.subr.bf16.mxu1 %v17893_v49  ;;  %v14161_v33 = vld [vmem:[#allocation15 + $0x40] sm:$0xff]  ;;  %v14213_v31 = vsub.f32 %v14158_v4, %v16745_v56  ;;  %v14268_v56 = vld [vmem:[#allocation15 + $0x148] sm:$0xff] }
 0x3bc   :  { %9490 = vmatprep.subr.bf16.mxu0 %v17892_v9  ;;  %v16744_v61 = vand.u32 4294901760, %v14161_v33  ;;  %v16752_v9 = vand.u32 4294901760, %v14200_v19 }
 0x3bd   :  { %17901 = vst [vmem:[#allocation95_spill] sm:$0xff] %v14213_v31 }
 0x3be   :  { %9624 = vmatpush1.bf16.msra.mxu1 %v17895_v35  ;;  %v14276_v17 = vsub.f32 %v14200_v19, %v16752_v9 }
 0x3bf   :  { %9492 = vmatpush1.bf16.msra.mxu0 %v17894_v55  ;;  %9626 = vmatprep.subr.bf16.mxu1 %v17898_v25  ;;  %v16751_v55 = vand.u32 4294901760, %v14202_v39  ;;  %v14316_v25 = vld [vmem:[#allocation15 + $0x188] sm:$0xff] }
 0x3c0   :  { %9494 = vmatprep.subr.bf16.mxu0 %v17856_v50  ;;  %v14186_v50 = vld [vmem:[#allocation15 + $0xa0] sm:$0xff]  ;;  %17910 = vst [vmem:[#allocation77_spill] sm:$0xff] %v14276_v17 }
 0x3c1   :  { %v16748_v36 = vand.u32 4294901760, %v14186_v50 }
 0x3c2   :  { %9628 = vmatpush1.bf16.msra.mxu1 %v17902_v10 }
 0x3c3   :  { %9496 = vmatpush1.bf16.msra.mxu0 %v17857_v1  ;;  %v14226_v1 = vsub.f32 %v14161_v33, %v16744_v61  ;;  %9630 = vmatprep.subr.bf16.mxu1 %v17905_v43  ;;  %v16754_v61 = vand.u32 4294901760, %v14219_v38  ;;  %v17915_v43 = vld [vmem:[#allocation60_spill] sm:$0xff] }
 0x3c4   :  { %9498 = vmatprep.subr.bf16.mxu0 %v17858_v37  ;;  %v14243_v37 = vsub.f32 %v14175_v63, %v16742_v54  ;;  %v14264_v54 = vsub.f32 %v14186_v50, %v16748_v36  ;;  %v14281_v36 = vsub.f32 %v14202_v39, %v16751_v55 }
 0x3c5   :  { %17903 = vst [vmem:[#allocation97_spill] sm:$0xff] %v14226_v1  ;;  %v14297_v55 = vsub.f32 %v14219_v38, %v16754_v61  ;;  %v16755_v61 = vand.u32 4294901760, %v14268_v56 }
 0x3c6   :  { %17906 = vst [vmem:[#allocation102_spill] sm:$0xff] %v14243_v37  ;;  %17909 = vst [vmem:[#allocation83_spill] sm:$0xff] %v14264_v54  ;;  %9632 = vmatpush1.bf16.msra.mxu1 %v17912_v16 }
 0x3c7   :  { %9500 = vmatpush1.bf16.msra.mxu0 %v17859_v6  ;;  %17911 = vst [vmem:[#allocation153_spill] sm:$0xff] %v14281_v36  ;;  %v14292_v6 = vsub.f32 %v14217_v32, %v16753_v12  ;;  %17914 = vst [vmem:[#allocation88_spill] sm:$0xff] %v14297_v55  ;;  %9634 = vmatprep.subr.bf16.mxu1 %v17915_v43  ;;  %v17918_v12 = vand.u32 4294901760, %v14237_v8  ;;  %v17920_v43 = vand.u32 4294901760, %v14252_v22 }
 0x3c8   :  { %9502 = vmatprep.subr.bf16.mxu0 %v17860_v41  ;;  %v17916_v41 = vand.u32 4294901760, %v14235_v2  ;;  %v14337_v9 = vsub.f32 %v14268_v56, %v16755_v61  ;;  %v14371_v61 = vld [vmem:[#allocation15 + $0x1e8] sm:$0xff] }
 0x3c9   :  { %17913 = vst [vmem:[#allocation85_spill] sm:$0xff] %v14292_v6  ;;  %v14312_v10 = vsub.f32 %v14237_v8, %v17918_v12  ;;  %v14323_v35 = vsub.f32 %v14252_v22, %v17920_v43  ;;  %v16758_v12 = vand.u32 4294901760, %v14285_v7  ;;  %v14342_v43 = vsub.f32 %v14270_v11, %v17925_v27 }
 0x3ca   :  { %v14307_v16 = vsub.f32 %v14235_v2, %v17916_v41  ;;  %v17922_v41 = vand.u32 4294901760, %v14254_v21  ;;  %17924 = vst [vmem:[#allocation99_spill] sm:$0xff] %v14337_v9  ;;  %9636 = vmatpush1.bf16.msra.mxu1 %v17927_v15  ;;  %v17929_v27 = vand.u32 4294901760, %v14148_v44  ;;  %v17934_v9 = vand.u32 4294901760, %v14316_v25 }
 0x3cb   :  { %17919 = vst [vmem:[#allocation81_spill] sm:$0xff] %v14312_v10  ;;  %17921 = vst [vmem:[#allocation151_spill] sm:$0xff] %v14323_v35  ;;  %9504 = vmatpush1.bf16.msra.mxu0 %v17861_v30  ;;  %v14352_v30 = vsub.f32 %v14285_v7, %v16758_v12  ;;  %9638 = vmatprep.subr.bf16.mxu1 %v14170_v18  ;;  %v17936_v18 = vand.u32 4294901760, %v14318_v40 }
 0x3cc   :  { %17917 = vst [vmem:[#allocation91_spill] sm:$0xff] %v14307_v16  ;;  %v14328_v49 = vsub.f32 %v14254_v21, %v17922_v41  ;;  %17926 = vst [vmem:[#allocation101_spill] sm:$0xff] %v14342_v43  ;;  %v14345_v41 = vld [vmem:[#allocation15 + $0x1a0] sm:$0xff]  ;;  %9506 = vmatprep.subr.bf16.mxu0 %v17862_v45  ;;  %v14363_v15 = vpack.c.bf16 %v17930_v28, %v17929_v27  ;;  %v17932_v45 = vand.u32 4294901760, %v14301_v24  ;;  %v17938_v27 = vand.u32 4294901760, %v14150_v5 }
 0x3cd   :  { %17928 = vst [vmem:[#allocation106_spill] sm:$0xff] %v14352_v30  ;;  %v14376_v30 = vsub.f32 %v14316_v25, %v17934_v9  ;;  %5456 = vmatmul.mubr.f32.vlgmr.msra.gmra.mrb[4].mxu1 %v17867_v51  ;;  %v17941_v9 = vand.u32 4294901760, %v14331_v0  ;;  %v14400_v28 = vld [vmem:[#allocation15 + $0x1e0] sm:$0xff]  ;;  %v17943_v51 = vld [vmem:[#allocation117_spill] sm:$0xff]  ;;  %v17945_v5 = vand.u32 4294901760, %v14158_v4  ;;  %v17958_v4 = vand.u32 4294901760, %v14177_v60 }
 0x3ce   :  { %17923 = vst [vmem:[#allocation78_spill] sm:$0xff] %v14328_v49  ;;  %17931 = vst [vmem:[#allocation59_spill] sm:$0xff] %v14363_v15  ;;  %v14368_v43 = vsub.f32 %v14301_v24, %v17932_v45  ;;  %v14381_v49 = vsub.f32 %v14318_v40, %v17936_v18  ;;  %v17939_v45 = vand.u32 4294901760, %v14152_v47  ;;  %9640 = vmatpush1.bf16.msra.mxu1 %v17943_v51  ;;  %5622 = vmatprep.mubr.f32.mxu1 %v17062_v14  ;;  %v17949_v18 = vld [vmem:[#allocation118_spill] sm:$0xff] }
 0x3cf   :  { %17935 = vst [vmem:[#allocation113_spill] sm:$0xff] %v14376_v30  ;;  %9508 = vmatpush1.bf16.msra.mxu0 %v17866_v29  ;;  %v14395_v30 = vsub.f32 %v14331_v0, %v17941_v9  ;;  %v17944_v29 = vand.u32 4294901760, %v14156_v34  ;;  %v16764_v9 = vand.u32 4294901760, %v14371_v61  ;;  %9642 = vmatprep.subr.bf16.mxu1 %v17949_v18  ;;  %v17950_v51 = vand.u32 4294901760, %v14356_v52 }
 0x3d0   :  { %17933 = vst [vmem:[#allocation100_spill] sm:$0xff] %v14368_v43  ;;  %17937 = vst [vmem:[#allocation62_spill] sm:$0xff] %v14381_v49  ;;  %v14390_v12 = vpack.c.bf16 %v17939_v45, %v17938_v27  ;;  %v14398_v49 = vld [vmem:[#allocation15 + $0x1c0] sm:$0xff]  ;;  %v17947_v27 = vand.u32 4294901760, %v14345_v41  ;;  %9702 = vmatprep.subr.bf16.mxu0 %v14363_v15  ;;  %v17953_v18 = vand.u32 4294901760, %v14161_v33  ;;  %v17966_v60 = vand.u32 4294901760, %v14186_v50 }
 0x3d1   :  { %17942 = vst [vmem:[#allocation127_spill] sm:$0xff] %v14395_v30  ;;  %v14408_v47 = vpack.c.bf16 %v17945_v5, %v17944_v29  ;;  %v14421_v30 = vsub.f32 %v14356_v52, %v17950_v51  ;;  %v14427_v34 = vsub.f32 %v14371_v61, %v16764_v9  ;;  %v17954_v5 = vand.u32 4294901760, %v14163_v13  ;;  %v17956_v51 = vld [vmem:[#allocation121_spill] sm:$0xff] }
 0x3d2   :  { %17940 = vst [vmem:[#allocation125_spill] sm:$0xff] %v14390_v12  ;;  %v14413_v45 = vsub.f32 %v14345_v41, %v17947_v27  ;;  %4873 = vmatmul.mubr.f32.vlgmr.msra.gmra.mrb[2].mxu0 %v17865_v48  ;;  %9644 = vmatpush1.bf16.msra.mxu1 %v17956_v51  ;;  %v17957_v9 = vand.u32 4294901760, %v14175_v63  ;;  %v17960_v29 = vand.u32 4294901760, %v14398_v49  ;;  %v17962_v13 = vand.u32 4294901760, %v14400_v28 }
 0x3d3   :  { %17946 = vst [vmem:[#allocation56_spill] sm:$0xff] %v14408_v47  ;;  %17951 = vst [vmem:[#allocation65_spill] sm:$0xff] %v14421_v30  ;;  %9704 = vmatpush1.bf16.msra.mxu0 %v14390_v12  ;;  %v14436_v27 = vpack.c.bf16 %v17954_v5, %v17953_v18  ;;  %5830 = vmatprep.mubr.f32.mxu0 %v17062_v14  ;;  %v17964_v5 = vld [vmem:[#allocation64_spill] sm:$0xff]  ;;  %v16771_v51 = vand.u32 4294901760, %v14191_v46  ;;  %v17965_v63 = vand.u32 4294901760, %v14184_v53  ;;  %v18043_v12 = vld [vmem:[#allocation66_spill] sm:$0xff] }
 0x3d4   :  { %17948 = vst [vmem:[#allocation130_spill] sm:$0xff] %v14413_v45  ;;  %17952 = vst [vmem:[#allocation98_spill] sm:$0xff] %v14427_v34  ;;  %9706 = vmatprep.subr.bf16.mxu0 %v14408_v47  ;;  %v14445_v15 = vpack.c.bf16 %v17958_v4, %v17957_v9  ;;  %v14450_v33 = vsub.f32 %v14398_v49, %v17960_v29  ;;  %v14455_v18 = vsub.f32 %v14400_v28, %v17962_v13  ;;  %v17968_v29 = vld [vmem:[#allocation92_spill] sm:$0xff] }
 0x3d5   :  { %17955 = vst [vmem:[#allocation134_spill] sm:$0xff] %v14436_v27  ;;  %9646 = vmatprep.subr.bf16.mxu1 %v17964_v5  ;;  %v14464_v9 = vpack.c.bf16 %v17966_v60, %v17965_v63  ;;  %v16772_v4 = vand.u32 4294901760, %v14196_v42  ;;  %v17969_v13 = vand.u32 4294901760, %v14200_v19  ;;  %v17970_v5 = vand.u32 4294901760, %v14202_v39 }
 0x3d6   :  { %17959 = vst [vmem:[#allocation137_spill] sm:$0xff] %v14445_v15  ;;  %17961 = vst [vmem:[#allocation141_spill] sm:$0xff] %v14450_v33  ;;  %9648 = vmatpush1.bf16.msra.mxu1 %v17968_v29  ;;  %v5851_v53 = vsub.f32 %v14191_v46, %v16771_v51  ;;  %v17973_v29 = vand.u32 4294901760, %v14148_v44  ;;  %v17974_v39 = vand.u32 4294901760, %v14217_v32  ;;  %v17977_v51 = vld [vmem:[#allocation128_spill] sm:$0xff]  ;;  %v17982_v32 = vand.u32 4294901760, %v14208_v20 }
 0x3d7   :  { %17963 = vst [vmem:[#allocation69_spill] sm:$0xff] %v14455_v18  ;;  %9708 = vmatpush1.bf16.msra.mxu0 %v14436_v27  ;;  %17967 = vst [vmem:[#allocation73_spill] sm:$0xff] %v14464_v9  ;;  %v14473_v47 = vpack.c.bf16 %v17970_v5, %v17969_v13  ;;  %v17972_v27 = vld [vmem:[#allocation61_spill] sm:$0xff]  ;;  %v5863_v50 = vsub.f32 %v14196_v42, %v16772_v4  ;;  %v17975_v13 = vand.u32 4294901760, %v14219_v38 }
 0x3d8   :  { %9710 = vmatprep.subr.bf16.mxu0 %v14445_v15  ;;  %9650 = vmatprep.subr.bf16.mxu1 %v17972_v27  ;;  %v5852_v63 = vand.u32 4294901760, %v5851_v53  ;;  %v14486_v19 = vsub.f32 %v14148_v44, %v17973_v29  ;;  %v17978_v53 = vand.u32 4294901760, %v14154_v58  ;;  %v17979_v44 = vand.u32 4294901760, %v14235_v2 }
 0x3d9   :  { %17971 = vst [vmem:[#allocation80_spill] sm:$0xff] %v14473_v47  ;;  %v14493_v5 = vpack.c.bf16 %v17975_v13, %v17974_v39  ;;  %v5864_v27 = vand.u32 4294901760, %v5863_v50  ;;  %v17980_v29 = vand.u32 4294901760, %v14237_v8  ;;  %v5869_v38 = vsub.f32 %v14208_v20, %v17982_v32 }
 0x3da   :  { %9652 = vmatpush1.bf16.msra.mxu1 %v17977_v51  ;;  %v14499_v4 = vsub.f32 %v14154_v58, %v17978_v53  ;;  %v16773_v50 = vand.u32 4294901760, %v14213_v31  ;;  %v17983_v51 = vld [vmem:[#allocation133_spill] sm:$0xff]  ;;  %v16774_v58 = vand.u32 4294901760, %v14226_v1  ;;  %v16775_v8 = vand.u32 4294901760, %v14231_v57 }
 0x3db   :  { %9712 = vmatpush1.bf16.msra.mxu0 %v14464_v9  ;;  %17976 = vst [vmem:[#allocation58_spill] sm:$0xff] %v14493_v5  ;;  %v14506_v60 = vpack.c.bf16 %v17980_v29, %v17979_v44  ;;  %9654 = vmatprep.subr.bf16.mxu1 %v17983_v51  ;;  %v14513_v39 = vpack.c.bf16 %v5864_v27, %v5852_v63  ;;  %v5870_v13 = vand.u32 4294901760, %v5869_v38  ;;  %v17985_v53 = vand.u32 4294901760, %v14252_v22 }
 0x3dc   :  { %9714 = vmatprep.subr.bf16.mxu0 %v14473_v47  ;;  %v5881_v2 = vsub.f32 %v14213_v31, %v16773_v50  ;;  %v17986_v44 = vand.u32 4294901760, %v14254_v21  ;;  %v17988_v63 = vand.u32 4294901760, %v14268_v56  ;;  %v17989_v27 = vand.u32 4294901760, %v14270_v11  ;;  %v17991_v50 = vld [vmem:[#allocation152_spill] sm:$0xff]  ;;  %v3898_v47 = vld [vmem:[#allocation15 + $0x38] sm:$0xff] }
 0x3dd   :  { %17981 = vst [vmem:[#allocation154_spill] sm:$0xff] %v14506_v60  ;;  %17984 = vst [vmem:[#allocation112_spill] sm:$0xff] %v14513_v39  ;;  %v16778_v38 = vand.u32 4294901760, %v14486_v19  ;;  %v5875_v51 = vsub.f32 %v14226_v1, %v16774_v58  ;;  %v5887_v56 = vsub.f32 %v14231_v57, %v16775_v8  ;;  %v16776_v11 = vand.u32 4294901760, %v14243_v37 }
 0x3de   :  { %v14525_v29 = vpack.c.bf16 %v17986_v44, %v17985_v53  ;;  %v14531_v32 = vpack.c.bf16 %v17989_v27, %v17988_v63  ;;  %9656 = vmatpush1.bf16.msra.mxu1 %v17991_v50  ;;  %v5882_v21 = vand.u32 4294901760, %v5881_v2  ;;  %v17992_v53 = vld [vmem:[#allocation132_spill] sm:$0xff]  ;;  %v16777_v58 = vand.u32 4294901760, %v14248_v23 }
 0x3df   :  { %9716 = vmatpush1.bf16.msra.mxu0 %v14493_v5  ;;  %9658 = vmatprep.subr.bf16.mxu1 %v17992_v53  ;;  %v5876_v44 = vand.u32 4294901760, %v5875_v51  ;;  %v5888_v27 = vand.u32 4294901760, %v5887_v56  ;;  %v5893_v50 = vsub.f32 %v14243_v37, %v16776_v11  ;;  %v17994_v2 = vand.u32 4294901760, %v14285_v7  ;;  %v18000_v56 = vld [vmem:[#allocation68_spill] sm:$0xff] }
 0x3e0   :  { %17987 = vst [vmem:[#allocation114_spill] sm:$0xff] %v14525_v29  ;;  %17990 = vst [vmem:[#allocation140_spill] sm:$0xff] %v14531_v32  ;;  %9718 = vmatprep.subr.bf16.mxu0 %v14506_v60  ;;  %v14545_v63 = vpack.c.bf16 %v5882_v21, %v5870_v13  ;;  %v17995_v8 = vand.u32 4294901760, %v14301_v24  ;;  %v17997_v53 = vand.u32 4294901760, %v14316_v25  ;;  %v17998_v13 = vand.u32 4294901760, %v14318_v40  ;;  %v18003_v25 = vld [vmem:[#allocation145_spill] sm:$0xff] }
 0x3e1   :  { %v5845_v21 = vsub.f32 %v14486_v19, %v16778_v38  ;;  %v18001_v7 = vand.u32 4294901760, %v14499_v4  ;;  %v5905_v40 = vsub.f32 %v14248_v23, %v16777_v58  ;;  %v18004_v11 = vand.u32 4294901760, %v14331_v0  ;;  %v18007_v58 = vld [vmem:[#allocation146_spill] sm:$0xff]  ;;  %v3894_v60 = vld [vmem:[#allocation15 + $0x18] sm:$0xff]  ;;  %v18038_v5 = vld [vmem:[#allocation76_spill] sm:$0xff] }
 0x3e2   :  { %17993 = vst [vmem:[#allocation144_spill] sm:$0xff] %v14545_v63  ;;  %v14556_v22 = vpack.c.bf16 %v17995_v8, %v17994_v2  ;;  %v14562_v51 = vpack.c.bf16 %v17998_v13, %v17997_v53  ;;  %9660 = vmatpush1.bf16.msra.mxu1 %v18000_v56  ;;  %v14572_v8 = vpack.c.bf16 %v5888_v27, %v5876_v44  ;;  %v5894_v2 = vand.u32 4294901760, %v5893_v50 }
 0x3e3   :  { %9720 = vmatpush1.bf16.msra.mxu0 %v14525_v29  ;;  %v5857_v24 = vsub.f32 %v14499_v4, %v18001_v7  ;;  %9662 = vmatprep.subr.bf16.mxu1 %v18003_v25  ;;  %v16779_v53 = vand.u32 4294901760, %v14259_v62  ;;  %v16782_v13 = vand.u32 4294901760, %v14264_v54  ;;  %v5906_v56 = vand.u32 4294901760, %v5905_v40  ;;  %v18037_v29 = vld [vmem:[#allocation62_spill] sm:$0xff] }
 0x3e4   :  { %17996 = vst [vmem:[#allocation147_spill] sm:$0xff] %v14556_v22  ;;  %17999 = vst [vmem:[#allocation72_spill] sm:$0xff] %v14562_v51  ;;  %9722 = vmatprep.subr.bf16.mxu0 %v14531_v32  ;;  %v18005_v7 = vand.u32 4294901760, %v14345_v41  ;;  %v16792_v25 = vand.u32 4294901760, %v14276_v17  ;;  %v18008_v0 = vand.u32 4294901760, %v14356_v52  ;;  %v18009_v41 = vand.u32 4294901760, %v14371_v61 }
 0x3e5   :  { %18002 = vst [vmem:[#allocation71_spill] sm:$0xff] %v14572_v8  ;;  %v5899_v27 = vsub.f32 %v14259_v62, %v16779_v53  ;;  %v5911_v50 = vsub.f32 %v14264_v54, %v16782_v13  ;;  %v5846_v40 = vand.u32 4294901760, %v5845_v21  ;;  %v14602_v38 = vpack.c.bf16 %v5906_v56, %v5894_v2  ;;  %v18012_v53 = vld [vmem:[#allocation86_spill] sm:$0xff]  ;;  %v18017_v56 = vld [vmem:[#allocation87_spill] sm:$0xff]  ;;  %v14762_v8 = vld [vmem:[#allocation15 + $0x98] sm:$0xff] }
 0x3e6   :  { %v14585_v44 = vpack.c.bf16 %v18005_v7, %v18004_v11  ;;  %9664 = vmatpush1.bf16.msra.mxu1 %v18007_v58  ;;  %v14600_v11 = vpack.c.bf16 %v18009_v41, %v18008_v0  ;;  %v5858_v7 = vand.u32 4294901760, %v5857_v24  ;;  %v5917_v58 = vsub.f32 %v14276_v17, %v16792_v25 }
 0x3e7   :  { %9724 = vmatpush1.bf16.msra.mxu0 %v14556_v22  ;;  %18011 = vst [vmem:[#allocation74_spill] sm:$0xff] %v14602_v38  ;;  %9666 = vmatprep.subr.bf16.mxu1 %v18012_v53  ;;  %v5900_v22 = vand.u32 4294901760, %v5899_v27  ;;  %v5912_v13 = vand.u32 4294901760, %v5911_v50  ;;  %v18013_v52 = vand.u32 4294901760, %v14398_v49  ;;  %v18014_v61 = vand.u32 4294901760, %v14400_v28 }
 0x3e8   :  { %18006 = vst [vmem:[#allocation149_spill] sm:$0xff] %v14585_v44  ;;  %9726 = vmatprep.subr.bf16.mxu0 %v14562_v51  ;;  %18010 = vst [vmem:[#allocation150_spill] sm:$0xff] %v14600_v11  ;;  %v16790_v51 = vand.u32 4294901760, %v14281_v36  ;;  %v5918_v2 = vand.u32 4294901760, %v5917_v58  ;;  %v16788_v27 = vand.u32 4294901760, %v14292_v6  ;;  %v16786_v50 = vand.u32 4294901760, %v14297_v55 }
 0x3e9   :  { %v14614_v21 = vpack.c.bf16 %v18014_v61, %v18013_v52  ;;  %v14616_v24 = vpack.c.bf16 %v5912_v13, %v5900_v22  ;;  %v9733_v49 = vpack.c.bf16 %v5858_v7, %v5846_v40  ;;  %v16785_v0 = vand.u32 4294901760, %v14307_v16 }
 0x3ea   :  { %v5929_v53 = vsub.f32 %v14281_v36, %v16790_v51  ;;  %9668 = vmatpush1.bf16.msra.mxu1 %v18017_v56  ;;  %v5923_v22 = vsub.f32 %v14292_v6, %v16788_v27  ;;  %v5935_v13 = vsub.f32 %v14297_v55, %v16786_v50  ;;  %v16787_v58 = vand.u32 4294901760, %v14312_v10  ;;  %v18020_v56 = vld [vmem:[#allocation78_spill] sm:$0xff]  ;;  %v18023_v50 = vld [vmem:[#allocation116_spill] sm:$0xff]  ;;  %v18029_v51 = vld [vmem:[#allocation123_spill] sm:$0xff] }
 0x3eb   :  { %9728 = vmatpush1.bf16.msra.mxu0 %v14585_v44  ;;  %18015 = vst [vmem:[#allocation75_spill] sm:$0xff] %v14614_v21  ;;  %18016 = vst [vmem:[#allocation155_spill] sm:$0xff] %v14616_v24  ;;  %9670 = vmatprep.subr.bf16.mxu1 %v17881_v3  ;;  %v5941_v7 = vsub.f32 %v14307_v16, %v16785_v0  ;;  %v3841_v52 = vlaneseq  ;;  %v18035_v44 = vld [vmem:[#allocation82_spill] sm:$0xff]  ;;  %v16826_v15 = vand.u32 4294901760, %v14413_v45  ;;  %v14946_v6 = vld [vmem:[#allocation15 + $0x1f8] sm:$0xff] }
 0x3ec   :  { %9730 = vmatprep.subr.bf16.mxu0 %v14600_v11  ;;  %v5930_v28 = vand.u32 4294901760, %v5929_v53  ;;  %v5924_v3 = vand.u32 4294901760, %v5923_v22  ;;  %v5936_v40 = vand.u32 4294901760, %v5935_v13  ;;  %v16789_v53 = vand.u32 4294901760, %v14323_v35  ;;  %v18021_v22 = vld [vmem:[#allocation110_spill] sm:$0xff] }
 0x3ed   :  { %5624 = vmatmul.mubr.f32.vlgmr.msra.gmra.mrb[4].mxu1 %v17865_v48  ;;  %v14652_v0 = vshrl.u32 %v3841_v52, 7 }
 0x3ee   :  { %v14635_v41 = vpack.c.bf16 %v5930_v28, %v5918_v2  ;;  %9672 = vmatpush1.bf16.msra.mxu1 %v17882_v26  ;;  %5726 = vmatprep.mubr.f32.mxu1 %v17062_v14  ;;  %v14644_v61 = vpack.c.bf16 %v5936_v40, %v5924_v3  ;;  %v5942_v2 = vand.u32 4294901760, %v5941_v7  ;;  %v5953_v26 = vsub.f32 %v14312_v10, %v16787_v58  ;;  %v18024_v3 = vld [vmem:[#allocation99_spill] sm:$0xff]  ;;  %v14944_v10 = vld [vmem:[#allocation15 + $0x1d8] sm:$0xff] }
 0x3ef   :  { %9732 = vmatpush1.bf16.msra.mxu0 %v14614_v21  ;;  %9674 = vmatprep.subr.bf16.mxu1 %v17883_v59  ;;  %v16791_v28 = vand.u32 4294901760, %v18020_v56  ;;  %18022 = vst [vmem:[#allocation122_spill] sm:$0xff] %v14652_v0  ;;  %v5947_v59 = vsub.f32 %v14323_v35, %v16789_v53  ;;  %v16793_v40 = vand.u32 4294901760, %v18024_v3  ;;  %v14670_v53 = vsub.s32 0, %v14652_v0  ;;  %v18032_v21 = vld [vmem:[#allocation67_spill] sm:$0xff]  ;;  %v14869_v35 = vld [vmem:[#allocation15 + $0x110] sm:$0xff] }
 0x3f0   :  { %18018 = vst [vmem:[#allocation115_spill] sm:$0xff] %v14635_v41  ;;  %9734 = vmatprep.subr.bf16.mxu0 %v9733_v49  ;;  %18019 = vst [vmem:[#allocation119_spill] sm:$0xff] %v14644_v61  ;;  %v5954_v13 = vand.u32 4294901760, %v5953_v26  ;;  %v18026_v26 = vld [vmem:[#allocation101_spill] sm:$0xff]  ;;  %v14696_v11 = vsub.s32 1, %v14652_v0  ;;  %v16828_v41 = vand.u32 4294901760, %v14427_v34 }
 0x3f1   :  { %v5959_v49 = vsub.f32 %v18020_v56, %v16791_v28  ;;  %v5948_v58 = vand.u32 4294901760, %v5947_v59  ;;  %v5965_v52 = vsub.f32 %v18024_v3, %v16793_v40  ;;  %18028 = vst [vmem:[#allocation156_spill] sm:$0xff] %v14670_v53  ;;  %v18031_v59 = vld [vmem:[#allocation106_spill] sm:$0xff]  ;;  %v14914_v3 = vld [vmem:[#allocation15 + $0x198] sm:$0xff]  ;;  %v18076_v56 = vand.u32 4294901760, %v14869_v35 }
 0x3f2   :  { %9676 = vmatpush1.bf16.msra.mxu1 %v18021_v22  ;;  %v14662_v7 = vpack.c.bf16 %v5954_v13, %v5942_v2  ;;  %v18027_v22 = vld [vmem:[#allocation120_spill] sm:$0xff]  ;;  %v14681_v13 = vld [vmem:[%s16236_s6] sm:$0xf]  ;;  %18034 = vst [vmem:[#allocation129_spill] sm:$0xff] %v14696_v11  ;;  %v18082_v17 = vsub.s32 2, %v14652_v0  ;;  %v18087_v62 = vand.u32 4294901760, %v14914_v3 }
 0x3f3   :  { %9678 = vmatprep.subr.bf16.mxu1 %v18023_v50  ;;  %v5960_v27 = vand.u32 4294901760, %v5959_v49  ;;  %v16796_v50 = vand.u32 4294901760, %v18026_v26  ;;  %v5966_v25 = vand.u32 4294901760, %v5965_v52  ;;  %v16803_v49 = vand.u32 4294901760, %v18031_v59 }
 0x3f4   :  { %18025 = vst [vmem:[#allocation70_spill] sm:$0xff] %v14662_v7  ;;  %v14734_v7 = vld [vmem:[#allocation15 + $0x58] sm:$0xff]  ;;  %v3852_v36 = vrot.slane %v14681_v13, %v18082_v17 }
 0x3f5   :  { %v14673_v28 = vpack.c.bf16 %v5960_v27, %v5948_v58  ;;  %v5977_v2 = vsub.f32 %v18026_v26, %v16796_v50  ;;  %v18033_v58 = vld [vmem:[#allocation113_spill] sm:$0xff]  ;;  %v3844_v50 = vrot.slane %v14681_v13, %v14670_v53 }
 0x3f6   :  { %9680 = vmatpush1.bf16.msra.mxu1 %v18027_v22  ;;  %v16806_v22 = vand.u32 4294901760, %v14368_v43  ;;  %v16817_v52 = vand.u32 4294901760, %v18033_v58 }
 0x3f7   :  { %9682 = vmatprep.subr.bf16.mxu1 %v18029_v51  ;;  %18030 = vst [vmem:[#allocation124_spill] sm:$0xff] %v14673_v28  ;;  %v5978_v40 = vand.u32 4294901760, %v5977_v2  ;;  %v5971_v51 = vsub.f32 %v18031_v59, %v16803_v49  ;;  %v18044_v28 = vld [vmem:[#allocation104_spill] sm:$0xff] }
 0x3f8   :  { %v5983_v27 = vsub.f32 %v14368_v43, %v16806_v22  ;;  %v5989_v49 = vsub.f32 %v18033_v58, %v16817_v52  ;;  %v16822_v22 = vand.u32 4294901760, %v18037_v29 }
 0x3f9   :  { %v14699_v2 = vpack.c.bf16 %v5978_v40, %v5966_v25  ;;  %v18040_v25 = vld [vmem:[#allocation93_spill] sm:$0xff]  ;;  %v14712_v40 = vld [vmem:[#allocation15 + $0x10] sm:$0xff] }
 0x3fa   :  { %9684 = vmatpush1.bf16.msra.mxu1 %v18032_v21  ;;  %v5972_v21 = vand.u32 4294901760, %v5971_v51  ;;  %v5984_v32 = vand.u32 4294901760, %v5983_v27  ;;  %v5990_v9 = vand.u32 4294901760, %v5989_v49  ;;  %v14714_v51 = vld [vmem:[#allocation15 + $0x30] sm:$0xff]  ;;  %v18042_v27 = vld [vmem:[#allocation127_spill] sm:$0xff]  ;;  %v6589_v49 = vand.u32 4294901760, %v3894_v60 }
 0x3fb   :  { %9686 = vmatprep.subr.bf16.mxu1 %v18035_v44  ;;  %18036 = vst [vmem:[#allocation136_spill] sm:$0xff] %v14699_v2  ;;  %v6001_v44 = vsub.f32 %v18037_v29, %v16822_v22  ;;  %18041 = vst [vmem:[#allocation139_spill] sm:$0xff] %v14714_v51  ;;  %v16825_v52 = vand.u32 4294901760, %v18042_v27  ;;  %v6007_v22 = vsub.f32 %v14413_v45, %v16826_v15  ;;  %v16827_v2 = vand.u32 4294901760, %v14421_v30  ;;  %v14888_v29 = vld [vmem:[#allocation15 + $0x158] sm:$0xff] }
 0x3fc   :  { %v14706_v53 = vpack.c.bf16 %v5984_v32, %v5972_v21  ;;  %v3848_v32 = vrot.slane %v14681_v13, %v14696_v11 }
 0x3fd   :  { %v6002_v21 = vand.u32 4294901760, %v6001_v44  ;;  %v18046_v44 = vld [vmem:[#allocation105_spill] sm:$0xff]  ;;  %v6013_v15 = vsub.f32 %v14421_v30, %v16827_v2  ;;  %v18051_v2 = vand.u32 4294901760, %v14712_v40 }
 0x3fe   :  { %9688 = vmatpush1.bf16.msra.mxu1 %v18038_v5  ;;  %18039 = vst [vmem:[#allocation79_spill] sm:$0xff] %v14706_v53  ;;  %v3861_v5 = vadd.f32 %v18043_v12, %v3844_v50  ;;  %v6593_v53 = vand.u32 4294901760, %v3898_v47  ;;  %v14741_v12 = vld [vmem:[#allocation15 + $0x78] sm:$0xff]  ;;  %v14743_v50 = vld [vmem:[#allocation15 + $0x50] sm:$0xff] }
 0x3ff   :  { %9690 = vmatprep.subr.bf16.mxu1 %v18040_v25  ;;  %v5995_v25 = vsub.f32 %v18042_v27, %v16825_v52  ;;  %v14731_v11 = vpack.c.bf16 %v6002_v21, %v5990_v9  ;;  %v6008_v52 = vand.u32 4294901760, %v6007_v22  ;;  %v6025_v22 = vsub.f32 %v14427_v34, %v16828_v41  ;;  %v18054_v41 = vld [vmem:[#allocation60_spill] sm:$0xff] }
 0x400   :  { %v8535_v24 = vmul.f32 -1.442695, %v3861_v5  ;;  %v14745_v9 = vpack.c.bf16 %v6593_v53, %v6589_v49  ;;  %v18052_v5 = vand.u32 4294901760, %v14714_v51 }
 0x401   :  { %18045 = vst [vmem:[#allocation138_spill] sm:$0xff] %v14731_v11  ;;  %v5996_v61 = vand.u32 4294901760, %v5995_v25  ;;  %v18050_v25 = vld [vmem:[#allocation107_spill] sm:$0xff]  ;;  %v14760_v11 = vld [vmem:[#allocation15 + $0x70] sm:$0xff] }
 0x402   :  { %9692 = vmatpush1.bf16.msra.mxu1 %v18044_v28  ;;  %v18047_v28 = vld [vmem:[#allocation135_spill] sm:$0xff]  ;;  %18048 = vst [vmem:[#allocation142_spill] sm:$0xff] %v14745_v9  ;;  %10403 = vpow2.f32 %v8535_v24 }
 0x403   :  { %9694 = vmatprep.subr.bf16.mxu1 %v18046_v44  ;;  %v3862_v38 = vadd.f32 %v18047_v28, %v3848_v32  ;;  %v14747_v21 = vpack.c.bf16 %v6008_v52, %v5996_v61  ;;  %v6014_v44 = vand.u32 4294901760, %v6013_v15  ;;  %v14757_v32 = vpack.c.bf16 %v18052_v5, %v18051_v2  ;;  %v14764_v61 = vld [vmem:[#allocation15 + $0xb8] sm:$0xff] }
 0x404   :  { %v16829_v15 = vand.u32 4294901760, %v14450_v33  ;;  %v16832_v52 = vand.u32 4294901760, %v14455_v18  ;;  %v6026_v5 = vand.u32 4294901760, %v6025_v22  ;;  %v14773_v28 = vsub.f32 %v3898_v47, %v6593_v53  ;;  %v18055_v47 = vld [vmem:[#allocation131_spill] sm:$0xff]  ;;  %v14789_v53 = vld [vmem:[#allocation15 + $0x90] sm:$0xff] }
 0x405   :  { %18049 = vst [vmem:[#allocation84_spill] sm:$0xff] %v14747_v21  ;;  %18053 = vst [vmem:[#allocation94_spill] sm:$0xff] %v14757_v32  ;;  %v18056_v2 = vand.u32 4294901760, %v14734_v7 }
 0x406   :  { %9696 = vmatpush1.bf16.msra.mxu1 %v18050_v25  ;;  %v14769_v25 = vsub.f32 %v3894_v60, %v6589_v49  ;;  %v6019_v63 = vsub.f32 %v14450_v33, %v16829_v15  ;;  %v6031_v39 = vsub.f32 %v14455_v18, %v16832_v52  ;;  %v14786_v22 = vpack.c.bf16 %v6026_v5, %v6014_v44  ;;  %v14791_v15 = vld [vmem:[#allocation15 + $0xb0] sm:$0xff]  ;;  %v14804_v49 = vld [vmem:[#allocation15 + $0xd8] sm:$0xff] }
 0x407   :  { %9698 = vmatprep.subr.bf16.mxu1 %v18054_v41  ;;  %v18057_v44 = vand.u32 4294901760, %v14741_v12  ;;  %v14806_v60 = vld [vmem:[#allocation15 + $0xf8] sm:$0xff]  ;;  %v18059_v52 = vand.u32 4294901760, %v14743_v50 }
 0x408   :  { %v6020_v21 = vand.u32 4294901760, %v6019_v63  ;;  %v6032_v51 = vand.u32 4294901760, %v6031_v39  ;;  %v14840_v63 = vld [vmem:[#allocation15 + $0xd0] sm:$0xff] }
 0x409   :  { %v14802_v5 = vpack.c.bf16 %v18057_v44, %v18056_v2  ;;  %v18060_v2 = vand.u32 4294901760, %v14760_v11 }
 0x40a   :  { %9700 = vmatpush1.bf16.msra.mxu1 %v18055_v47  ;;  %v8536_v47 = vmul.f32 -1.442695, %v3862_v38  ;;  %v14808_v39 = vpack.c.bf16 %v6032_v51, %v6020_v21  ;;  %v16841_v38 = vand.u32 4294901760, %v14789_v53  ;;  %v18062_v21 = vand.u32 4294901760, %v14762_v8  ;;  %v14871_v51 = vld [vmem:[#allocation15 + $0x130] sm:$0xff] }
 0x40b   :  { %9894 = vmatprep.subr.bf16.mxu1 %v14745_v9  ;;  %18058 = vst [vmem:[#allocation96_spill] sm:$0xff] %v14802_v5  ;;  %v14819_v44 = vpack.c.bf16 %v18060_v2, %v18059_v52  ;;  %v14842_v9 = vld [vmem:[#allocation15 + $0xf0] sm:$0xff]  ;;  %v14848_v52 = vld [vmem:[#allocation15 + $0x118] sm:$0xff] }
 0x40c   :  { %10405 = vpow2.f32 %v8536_v47  ;;  %v14850_v2 = vld [vmem:[#allocation15 + $0x138] sm:$0xff]  ;;  %v18067_v47 = vand.u32 4294901760, %v14804_v49  ;;  %v18073_v58 = vand.u32 4294901760, %v14848_v52 }
 0x40d   :  { %5728 = vmatmul.mubr.f32.vlgmr.msra.gmra.mrb[4].mxu1 %v17865_v48  ;;  %18061 = vst [vmem:[#allocation103_spill] sm:$0xff] %v14819_v44  ;;  %v18063_v48 = vand.u32 4294901760, %v14764_v61  ;;  %v18074_v59 = vand.u32 4294901760, %v14850_v2 }
 0x40e   :  { %9896 = vmatpush1.bf16.msra.mxu1 %v14757_v32  ;;  %6685 = vmatprep.mubr.f32.mxu1 %v17062_v14 }
 0x40f   :  { %v14830_v41 = vpack.c.bf16 %v18063_v48, %v18062_v21  ;;  %9898 = vmatprep.subr.bf16.mxu1 %v14802_v5  ;;  %v18065_v5 = vand.u32 4294901760, %v14791_v15  ;;  %v18068_v48 = vand.u32 4294901760, %v14806_v60  ;;  %v14901_v21 = vld [vmem:[#allocation15 + $0x150] sm:$0xff]  ;;  %v14908_v43 = vpack.c.bf16 %v18074_v59, %v18073_v58 }
 0x410   :  { %v18077_v59 = vand.u32 4294901760, %v14871_v51 }
 0x411   :  { %18064 = vst [vmem:[#allocation108_spill] sm:$0xff] %v14830_v41  ;;  %v14860_v32 = vpack.c.bf16 %v18065_v5, %v16841_v38  ;;  %v14890_v5 = vld [vmem:[#allocation15 + $0x178] sm:$0xff]  ;;  %18075 = vst [vmem:[#allocation126_spill] sm:$0xff] %v14908_v43  ;;  %v18084_v38 = vand.u32 4294901760, %v14901_v21 }
 0x412   :  { %9900 = vmatpush1.bf16.msra.mxu1 %v14819_v44  ;;  %v14882_v44 = vpack.c.bf16 %v18068_v48, %v18067_v47  ;;  %v18070_v48 = vand.u32 4294901760, %v14840_v63  ;;  %v18071_v47 = vand.u32 4294901760, %v14842_v9  ;;  %v14924_v58 = vpack.c.bf16 %v18077_v59, %v18076_v56  ;;  %v14938_v56 = vld [vmem:[#allocation15 + $0x190] sm:$0xff] }
 0x413   :  { %18066 = vst [vmem:[#allocation109_spill] sm:$0xff] %v14860_v32  ;;  %9902 = vmatprep.subr.bf16.mxu1 %v14830_v41  ;;  %v18080_v26 = vand.u32 4294901760, %v14890_v5  ;;  %v14940_v59 = vld [vmem:[#allocation15 + $0x1b0] sm:$0xff] }
 0x414   :  { %18069 = vst [vmem:[#allocation111_spill] sm:$0xff] %v14882_v44  ;;  %v14899_v24 = vpack.c.bf16 %v18071_v47, %v18070_v48  ;;  %v14916_v48 = vld [vmem:[#allocation15 + $0x1b8] sm:$0xff]  ;;  %v10404_v47 = vpop.eup %10403  ;;  %18078 = vst [vmem:[#allocation117_spill] sm:$0xff] %v14924_v58  ;;  %v18093_v23 = vand.u32 4294901760, %v14940_v59 }
 0x416   :  { %9904 = vmatpush1.bf16.msra.mxu1 %v14860_v32  ;;  %18072 = vst [vmem:[#allocation63_spill] sm:$0xff] %v14899_v24  ;;  %v14912_v32 = vld [vmem:[#allocation15 + $0x170] sm:$0xff]  ;;  %v10406_v41 = vpop.eup %10405 }
 0x417   :  { %9906 = vmatprep.subr.bf16.mxu1 %v14882_v44  ;;  %v18079_v44 = vand.u32 4294901760, %v14888_v29  ;;  %v18085_v16 = vand.u32 4294901760, %v14912_v32 }
 0x419   :  { %v14936_v55 = vpack.c.bf16 %v18080_v26, %v18079_v44  ;;  %v18083_v26 = vsub.s32 3, %v14652_v0  ;;  %v3835_v0 = vpop.f32.mrb[2].mxu1 }
 0x41a   :  { %9908 = vmatpush1.bf16.msra.mxu1 %v14899_v24  ;;  %v3868_v24 = vadd.f32 1.0, %v10404_v47  ;;  %v14959_v47 = vpack.c.bf16 %v18085_v16, %v18084_v38  ;;  %v14974_v16 = vld [vmem:[#allocation15 + $0x1f0] sm:$0xff]  ;;  %v18090_v38 = vand.u32 4294901760, %v14769_v25  ;;  %v3863_v17 = vadd.f32 %v3852_v36, %v3835_v0 }
 0x41b   :  { %9910 = vmatprep.subr.bf16.mxu1 %v14908_v43  ;;  %18081 = vst [vmem:[#allocation118_spill] sm:$0xff] %v14936_v55  ;;  %v3874_v43 = vadd.f32 1.0, %v10406_v41  ;;  %v3856_v44 = vrot.slane %v14681_v13, %v18083_v26  ;;  %v18088_v41 = vand.u32 4294901760, %v14916_v48  ;;  %v18092_v26 = vand.u32 4294901760, %v14938_v56 }
 0x41c   :  { %18086 = vst [vmem:[#allocation121_spill] sm:$0xff] %v14959_v47  ;;  %v6700_v37 = vsub.f32 %v14769_v25, %v18090_v38  ;;  %10407 = vrcp.f32 %v3868_v24  ;;  %v16896_v57 = vand.u32 4294901760, %v14974_v16  ;;  %v18096_v36 = vand.u32 4294901760, %v14946_v6 }
 0x41d   :  { %v14965_v54 = vpack.c.bf16 %v18088_v41, %v18087_v62  ;;  %v18091_v62 = vand.u32 4294901760, %v14773_v28  ;;  %10409 = vrcp.f32 %v3874_v43  ;;  %v14987_v1 = vpack.c.bf16 %v18093_v23, %v18092_v26 }
 0x41e   :  { %9912 = vmatpush1.bf16.msra.mxu1 %v14924_v58  ;;  %v14972_v58 = vld [vmem:[#allocation15 + $0x1d0] sm:$0xff]  ;;  %10411 = vtanh.f32 %v3863_v17  ;;  %v18095_v43 = vand.u32 4294901760, %v14944_v10  ;;  %v6701_v0 = vand.u32 4294901760, %v6700_v37 }
 0x41f   :  { %18089 = vst [vmem:[#allocation64_spill] sm:$0xff] %v14965_v54  ;;  %9914 = vmatprep.subr.bf16.mxu1 %v14936_v55  ;;  %v6712_v41 = vsub.f32 %v14773_v28, %v18091_v62  ;;  %v3837_v55 = vpop.f32.mrb[3].mxu1  ;;  %18094 = vst [vmem:[#allocation92_spill] sm:$0xff] %v14987_v1  ;;  %v16897_v38 = vand.u32 4294901760, %v14972_v58 }
 0x420   :  { %v3864_v13 = vadd.f32 %v3856_v44, %v3837_v55  ;;  %v14996_v55 = vpack.c.bf16 %v18096_v36, %v18095_v43  ;;  %v419_v43 = vld [vmem:[#allocation10] sm:$0xff] }
 0x421   :  { %v6713_v24 = vand.u32 4294901760, %v6712_v41  ;;  %v15003_v23 = vpack.c.bf16 %v16896_v57, %v16897_v38  ;;  %v18100_v38 = vld [vmem:[#allocation139_spill] sm:$0xff] }
 0x422   :  { %9916 = vmatpush1.bf16.msra.mxu1 %v14959_v47  ;;  %18097 = vst [vmem:[#allocation61_spill] sm:$0xff] %v14996_v55  ;;  %v8537_v44 = vmul.f32 -1.442695, %v3864_v13 }
 0x423   :  { %9918 = vmatprep.subr.bf16.mxu1 %v14965_v54  ;;  %18098 = vst [vmem:[#allocation128_spill] sm:$0xff] %v15003_v23  ;;  %v9925_v17 = vpack.c.bf16 %v6713_v24, %v6701_v0  ;;  %v18099_v54 = vand.u32 4294901760, %v14712_v40  ;;  %v18102_v24 = vand.u32 4294901760, %v14734_v7 }
 0x424   :  { %10413 = vpow2.f32 %v8537_v44 }
 0x425   :  { %v15010_v57 = vsub.f32 %v14712_v40, %v18099_v54  ;;  %v18104_v54 = vand.u32 4294901760, %v14743_v50 }
 0x426   :  { %9920 = vmatpush1.bf16.msra.mxu1 %v14987_v1  ;;  %v10408_v26 = vpop.eup %10407 }
 0x427   :  { %9922 = vmatprep.subr.bf16.mxu1 %v14996_v55  ;;  %v10410_v62 = vpop.eup %10409  ;;  %v18101_v55 = vand.u32 4294901760, %v18100_v38  ;;  %v15030_v40 = vsub.f32 %v14743_v50, %v18104_v54  ;;  %v18109_v50 = vand.u32 4294901760, %v14789_v53 }
 0x428   :  { %v10412_v37 = vpop.eup %10411  ;;  %v3884_v13 = vmul.f32 %v10410_v62, %v419_v43  ;;  %v18106_v43 = vand.u32 4294901760, %v14762_v8 }
 0x429   :  { %v3885_v41 = vmul.f32 %v10412_v37, %v10408_v26  ;;  %v15015_v0 = vsub.f32 %v18100_v38, %v18101_v55  ;;  %v18103_v26 = vand.u32 4294901760, %v14741_v12  ;;  %v18105_v38 = vand.u32 4294901760, %v14760_v11 }
 0x42a   :  { %9924 = vmatpush1.bf16.msra.mxu1 %v15003_v23  ;;  %v16903_v37 = vand.u32 4294901760, %v15010_v57 }
 0x42b   :  { %9926 = vmatprep.subr.bf16.mxu1 %v9925_v17  ;;  %v3886_v44 = vadd.f32 %v3885_v41, %v3884_v13  ;;  %v15020_v17 = vsub.f32 %v14734_v7, %v18102_v24  ;;  %v15025_v62 = vsub.f32 %v14741_v12, %v18103_v26  ;;  %v15035_v55 = vsub.f32 %v14760_v11, %v18105_v38 }
 0x42c   :  { %v15040_v7 = vsub.f32 %v14762_v8, %v18106_v43  ;;  %v16902_v12 = vand.u32 4294901760, %v15015_v0  ;;  %v15052_v41 = vsub.f32 %v14789_v53, %v18109_v50  ;;  %v18111_v8 = vand.u32 4294901760, %v14791_v15 }
 0x42d   :  { %10415 = vtanh.f32 %v3886_v44  ;;  %3890 = vst [vmem:[#allocation22] sm:$0xff] %v3886_v44  ;;  %v16900_v11 = vand.u32 4294901760, %v15020_v17  ;;  %v18113_v24 = vand.u32 4294901760, %v14804_v49  ;;  %v18117_v53 = vand.u32 4294901760, %v14840_v63 }
 0x42e   :  { %v10414_v36 = vpop.eup %10413  ;;  %18110 = vst [vmem:[#allocation152_spill] sm:$0xff] %v15052_v41  ;;  %v15059_v44 = vsub.f32 %v14791_v15, %v18111_v8  ;;  %v18118_v43 = vand.u32 4294901760, %v14842_v9  ;;  %v18120_v50 = vand.u32 4294901760, %v14850_v2  ;;  %v18121_v8 = vand.u32 4294901760, %v14869_v35 }
 0x42f   :  { %v3881_v1 = vadd.f32 1.0, %v10414_v36  ;;  %v16901_v36 = vand.u32 4294901760, %v15025_v62  ;;  %v15064_v26 = vsub.f32 %v14804_v49, %v18113_v24  ;;  %v15074_v38 = vsub.f32 %v14840_v63, %v18117_v53 }
 0x430   :  { %18112 = vst [vmem:[#allocation132_spill] sm:$0xff] %v15059_v44  ;;  %v15079_v15 = vsub.f32 %v14842_v9, %v18118_v43  ;;  %v15094_v63 = vsub.f32 %v14869_v35, %v18121_v8  ;;  %v18123_v24 = vand.u32 4294901760, %v14871_v51  ;;  %v6718_v53 = vsub.f32 %v15015_v0, %v16902_v12 }
 0x431   :  { %10417 = vrcp.f32 %v3881_v1  ;;  %v18107_v1 = vand.u32 4294901760, %v14764_v61  ;;  %18114 = vst [vmem:[#allocation68_spill] sm:$0xff] %v15064_v26  ;;  %v18127_v35 = vand.u32 4294901760, %v14890_v5  ;;  %v18131_v8 = vand.u32 4294901760, %v14912_v32 }
 0x432   :  { %18122 = vst [vmem:[#allocation146_spill] sm:$0xff] %v15094_v63  ;;  %v15099_v9 = vsub.f32 %v14871_v51, %v18123_v24  ;;  %v18129_v51 = vand.u32 4294901760, %v14901_v21 }
 0x433   :  { %v15047_v13 = vsub.f32 %v14764_v61, %v18107_v1  ;;  %v18115_v61 = vand.u32 4294901760, %v14806_v60  ;;  %v18119_v1 = vand.u32 4294901760, %v14848_v52  ;;  %v15115_v43 = vsub.f32 %v14890_v5, %v18127_v35 }
 0x434   :  { %18124 = vst [vmem:[#allocation86_spill] sm:$0xff] %v15099_v9  ;;  %v15131_v24 = vsub.f32 %v14912_v32, %v18131_v8  ;;  %v18133_v5 = vand.u32 4294901760, %v14938_v56  ;;  %v18137_v32 = vand.u32 4294901760, %v14944_v10 }
 0x435   :  { %18108 = vst [vmem:[#allocation133_spill] sm:$0xff] %v15047_v13  ;;  %v15069_v54 = vsub.f32 %v14806_v60, %v18115_v61  ;;  %v15084_v49 = vsub.f32 %v14848_v52, %v18119_v1  ;;  %v15089_v60 = vsub.f32 %v14850_v2, %v18120_v50  ;;  %v18125_v61 = vand.u32 4294901760, %v14888_v29  ;;  %18128 = vst [vmem:[#allocation110_spill] sm:$0xff] %v15115_v43 }
 0x436   :  { %v6706_v2 = vsub.f32 %v15010_v57, %v16903_v37  ;;  %v15120_v1 = vsub.f32 %v14901_v21, %v18129_v51  ;;  %v6736_v50 = vsub.f32 %v15025_v62, %v16901_v36  ;;  %18132 = vst [vmem:[#allocation120_spill] sm:$0xff] %v15131_v24  ;;  %v18134_v21 = vand.u32 4294901760, %v14940_v59 }
 0x437   :  { %18116 = vst [vmem:[#allocation145_spill] sm:$0xff] %v15069_v54  ;;  %v15104_v52 = vsub.f32 %v14888_v29, %v18125_v61  ;;  %v6724_v29 = vsub.f32 %v15020_v17, %v16900_v11  ;;  %v15136_v61 = vsub.f32 %v14938_v56, %v18133_v5  ;;  %v10416_v11 = vpop.eup %10415  ;;  %v18135_v36 = vand.u32 4294901760, %v14914_v3 }
 0x438   :  { %18130 = vst [vmem:[#allocation116_spill] sm:$0xff] %v15120_v1  ;;  %v15141_v35 = vsub.f32 %v14940_v59, %v18134_v21  ;;  %v15152_v8 = vsub.f32 %v14944_v10, %v18137_v32  ;;  %v18138_v56 = vand.u32 4294901760, %v14946_v6  ;;  %v18139_v37 = vand.u32 4294901760, %v14972_v58 }
 0x439   :  { %18126 = vst [vmem:[#allocation87_spill] sm:$0xff] %v15104_v52  ;;  %v15147_v12 = vsub.f32 %v14914_v3, %v18135_v36  ;;  %v18140_v3 = vand.u32 4294901760, %v14974_v16  ;;  %v6707_v10 = vand.u32 4294901760, %v6706_v2  ;;  %v6719_v32 = vand.u32 4294901760, %v6718_v53 }
 0x43a   :  { %v15157_v5 = vsub.f32 %v14946_v6, %v18138_v56  ;;  %v15163_v51 = vsub.f32 %v14972_v58, %v18139_v37  ;;  %v6725_v47 = vand.u32 4294901760, %v6724_v29  ;;  %v6737_v20 = vand.u32 4294901760, %v6736_v50 }
 0x43b   :  { %18136 = vst [vmem:[#allocation123_spill] sm:$0xff] %v15147_v12  ;;  %v10418_v21 = vpop.eup %10417  ;;  %v15168_v36 = vsub.f32 %v14974_v16, %v18140_v3  ;;  %v16916_v6 = vand.u32 4294901760, %v15040_v7  ;;  %v18141_v56 = vand.u32 4294901760, %v15030_v40  ;;  %v16915_v58 = vand.u32 4294901760, %v15136_v61 }
 0x43c   :  { %v3888_v23 = vmul.f32 %v10418_v21, %v10416_v11  ;;  %v16914_v37 = vand.u32 4294901760, %v15141_v35  ;;  %v18143_v16 = vand.u32 4294901760, %v15035_v55  ;;  %v18144_v53 = vand.u32 4294901760, %v18042_v27 }
 0x43d   :  { %v6730_v59 = vsub.f32 %v15030_v40, %v18141_v56  ;;  %v18145_v29 = vand.u32 4294901760, %v14413_v45  ;;  %v18148_v3 = vand.u32 4294901760, %v15047_v13  ;;  %v18161_v27 = vand.u32 4294901760, %v15069_v54 }
 0x43e   :  { %v15177_v46 = vand.u32 4294901760, %v3888_v23  ;;  %3889 = vst [vmem:[#allocation20] sm:$0xff] %v3888_v23  ;;  %v6742_v11 = vsub.f32 %v15035_v55, %v18143_v16  ;;  %v15196_v31 = vpack.c.bf16 %v16914_v37, %v16915_v58  ;;  %v18149_v58 = vand.u32 4294901760, %v14421_v30 }
 0x43f   :  { %v15187_v50 = vpack.c.bf16 %v18145_v29, %v18144_v53  ;;  %v6748_v53 = vsub.f32 %v15040_v7, %v16916_v6  ;;  %v6760_v56 = vsub.f32 %v15047_v13, %v18148_v3  ;;  %v18152_v29 = vand.u32 4294901760, %v15052_v41 }
 0x440   :  { %18142 = vst [vmem:[#allocation67_spill] sm:$0xff] %v15177_v46  ;;  %18147 = vst [vmem:[#allocation76_spill] sm:$0xff] %v15196_v31  ;;  %v15199_v16 = vsub.f32 %v3888_v23, %v15177_v46  ;;  %v18150_v23 = vand.u32 4294901760, %v14427_v34  ;;  %v18154_v3 = vand.u32 4294901760, %v15157_v5  ;;  %v18156_v37 = vand.u32 4294901760, %v14450_v33 }
 0x441   :  { %18146 = vst [vmem:[#allocation82_spill] sm:$0xff] %v15187_v50  ;;  %v6754_v21 = vsub.f32 %v15052_v41, %v18152_v29  ;;  %v18153_v50 = vand.u32 4294901760, %v15152_v8  ;;  %v18157_v30 = vand.u32 4294901760, %v14455_v18  ;;  %v6784_v45 = vsub.f32 %v15069_v54, %v18161_v27 }
 0x442   :  { %v15215_v31 = vpack.c.bf16 %v18150_v23, %v18149_v58  ;;  %v15218_v6 = vand.u32 4294901760, %v15199_v16  ;;  %v18159_v58 = vand.u32 4294901760, %v15059_v44  ;;  %v9929_v33 = vpack.c.bf16 %v6737_v20, %v6725_v47 }
 0x443   :  { %v15227_v2 = vpack.c.bf16 %v18154_v3, %v18153_v50  ;;  %v15233_v34 = vpack.c.bf16 %v18157_v30, %v18156_v37  ;;  %v18162_v50 = vand.u32 4294901760, %v15163_v51  ;;  %v18163_v3 = vand.u32 4294901760, %v15168_v36 }
 0x444   :  { %18151 = vst [vmem:[#allocation93_spill] sm:$0xff] %v15215_v31  ;;  %v6766_v23 = vsub.f32 %v15059_v44, %v18159_v58  ;;  %v18160_v31 = vand.u32 4294901760, %v15064_v26  ;;  %v5834_v30 = vsub.f32 %v15199_v16, %v15218_v6  ;;  %v9927_v37 = vpack.c.bf16 %v6719_v32, %v6707_v10 }
 0x445   :  { %18155 = vst [vmem:[#allocation66_spill] sm:$0xff] %v15227_v2  ;;  %18158 = vst [vmem:[#allocation104_spill] sm:$0xff] %v15233_v34  ;;  %v15248_v2 = vpack.c.bf16 %v18163_v3, %v18162_v50  ;;  %v6731_v34 = vand.u32 4294901760, %v6730_v59  ;;  %v6743_v58 = vand.u32 4294901760, %v6742_v11  ;;  %v6749_v18 = vand.u32 4294901760, %v6748_v53  ;;  %v18167_v11 = vld [vmem:[#allocation112_spill] sm:$0xff] }
 0x446   :  { %v6772_v29 = vsub.f32 %v15064_v26, %v18160_v31  ;;  %v16944_v31 = vand.u32 4294901760, %v15074_v38  ;;  %v16943_v26 = vand.u32 4294901760, %v15079_v15  ;;  %v5835_v44 = vand.u32 4294901760, %v5834_v30 }
 0x447   :  { %18164 = vst [vmem:[#allocation105_spill] sm:$0xff] %v15248_v2  ;;  %v6761_v27 = vand.u32 4294901760, %v6760_v56  ;;  %v16942_v54 = vand.u32 4294901760, %v15084_v49  ;;  %v16939_v41 = vand.u32 4294901760, %v15089_v60  ;;  %v6755_v50 = vand.u32 4294901760, %v6754_v21 }
 0x448   :  { %v6767_v3 = vand.u32 4294901760, %v6766_v23  ;;  %v6773_v2 = vand.u32 4294901760, %v6772_v29  ;;  %v6785_v13 = vand.u32 4294901760, %v6784_v45  ;;  %v18165_v10 = vand.u32 4294901760, %v14916_v48  ;;  %5836 = vmatmul.mubr.f32.vlgmr.msra.gmra.mrb[2].mxu0 %v5835_v44  ;;  %6691 = vmatmul.mubr.f32.vlgmr.msra.gmra.mrb[4].mxu1 %v5835_v44 }
 0x449   :  { %v9931_v20 = vpack.c.bf16 %v6743_v58, %v6731_v34  ;;  %v16936_v47 = vand.u32 4294901760, %v15094_v63  ;;  %v16933_v32 = vand.u32 4294901760, %v15099_v9  ;;  %9736 = vmatpush1.bf16.msra.mxu0 %v18167_v11  ;;  %9928 = vmatpush1.bf16.msra.mxu1 %v9927_v37  ;;  %v6778_v21 = vsub.f32 %v15074_v38, %v16944_v31  ;;  %v18168_v34 = vld [vmem:[#allocation144_spill] sm:$0xff]  ;;  %v18220_v31 = vld [vmem:[#allocation99_spill] sm:$0xff] }
 0x44a   :  { %v15259_v59 = vsub.f32 %v14916_v48, %v18165_v10  ;;  %v6790_v45 = vsub.f32 %v15079_v15, %v16943_v26  ;;  %v16934_v48 = vand.u32 4294901760, %v15104_v52  ;;  %v16935_v44 = vand.u32 4294901760, %v15115_v43  ;;  %9738 = vmatprep.subr.bf16.mxu0 %v18168_v34  ;;  %9930 = vmatprep.subr.bf16.mxu1 %v9929_v33  ;;  %v18170_v10 = vld [vmem:[#allocation74_spill] sm:$0xff] }
 0x44b   :  { %v9933_v56 = vpack.c.bf16 %v6761_v27, %v6749_v18  ;;  %v6796_v53 = vsub.f32 %v15084_v49, %v16942_v54  ;;  %v6808_v23 = vsub.f32 %v15089_v60, %v16939_v41  ;;  %v9935_v29 = vpack.c.bf16 %v6767_v3, %v6755_v50  ;;  %6066 = vmatprep.mubr.f32.mxu0 %v17062_v14  ;;  %v18169_v27 = vld [vmem:[#allocation71_spill] sm:$0xff] }
 0x44c   :  { %18166 = vst [vmem:[#allocation135_spill] sm:$0xff] %v15259_v59  ;;  %v9937_v30 = vpack.c.bf16 %v6785_v13, %v6773_v2  ;;  %6921 = vmatprep.mubr.f32.mxu1 %v17062_v14  ;;  %v6802_v37 = vsub.f32 %v15094_v63, %v16936_v47  ;;  %v6814_v33 = vsub.f32 %v15099_v9, %v16933_v32  ;;  %v16937_v18 = vand.u32 4294901760, %v15120_v1  ;;  %v18217_v54 = vld [vmem:[#allocation151_spill] sm:$0xff] }
 0x44d   :  { %v16938_v58 = vand.u32 4294901760, %v15131_v24  ;;  %9740 = vmatpush1.bf16.msra.mxu0 %v18169_v27  ;;  %9932 = vmatpush1.bf16.msra.mxu1 %v9931_v20  ;;  %v6779_v13 = vand.u32 4294901760, %v6778_v21  ;;  %v6791_v2 = vand.u32 4294901760, %v6790_v45  ;;  %v6820_v50 = vsub.f32 %v15104_v52, %v16934_v48 }
 0x44e   :  { %v6832_v3 = vsub.f32 %v15115_v43, %v16935_v44  ;;  %9742 = vmatprep.subr.bf16.mxu0 %v18170_v10  ;;  %9934 = vmatprep.subr.bf16.mxu1 %v9933_v56  ;;  %v6797_v11 = vand.u32 4294901760, %v6796_v53  ;;  %v6809_v34 = vand.u32 4294901760, %v6808_v23  ;;  %v16941_v32 = vand.u32 4294901760, %v15147_v12  ;;  %v18171_v44 = vld [vmem:[#allocation155_spill] sm:$0xff] }
 0x44f   :  { %v16940_v27 = vand.u32 4294901760, %v15259_v59  ;;  %v6803_v20 = vand.u32 4294901760, %v6802_v37  ;;  %v6815_v21 = vand.u32 4294901760, %v6814_v33  ;;  %v6826_v45 = vsub.f32 %v15120_v1, %v16937_v18  ;;  %v18172_v10 = vld [vmem:[#allocation115_spill] sm:$0xff] }
 0x450   :  { %v6838_v48 = vsub.f32 %v15131_v24, %v16938_v58  ;;  %v9939_v56 = vpack.c.bf16 %v6791_v2, %v6779_v13  ;;  %v6821_v53 = vand.u32 4294901760, %v6820_v50  ;;  %v6833_v23 = vand.u32 4294901760, %v6832_v3  ;;  %v18176_v3 = vld [vmem:[#allocation70_spill] sm:$0xff] }
 0x451   :  { %9744 = vmatpush1.bf16.msra.mxu0 %v18171_v44  ;;  %9936 = vmatpush1.bf16.msra.mxu1 %v9935_v29  ;;  %v9941_v47 = vpack.c.bf16 %v6809_v34, %v6797_v11  ;;  %v6844_v37 = vsub.f32 %v15147_v12, %v16941_v32  ;;  %v6856_v33 = vsub.f32 %v15259_v59, %v16940_v27  ;;  %v6827_v58 = vand.u32 4294901760, %v6826_v45  ;;  %v18173_v44 = vld [vmem:[#allocation119_spill] sm:$0xff] }
 0x452   :  { %9746 = vmatprep.subr.bf16.mxu0 %v18172_v10  ;;  %9938 = vmatprep.subr.bf16.mxu1 %v9937_v30  ;;  %v9943_v18 = vpack.c.bf16 %v6815_v21, %v6803_v20  ;;  %v6839_v41 = vand.u32 4294901760, %v6838_v48  ;;  %v9945_v29 = vpack.c.bf16 %v6833_v23, %v6821_v53  ;;  %v18174_v13 = vand.u32 4294901760, %v15136_v61  ;;  %v18179_v53 = vld [vmem:[#allocation124_spill] sm:$0xff]  ;;  %v18214_v27 = vld [vmem:[#allocation91_spill] sm:$0xff] }
 0x453   :  { %v18175_v2 = vand.u32 4294901760, %v15141_v35  ;;  %v6845_v11 = vand.u32 4294901760, %v6844_v37  ;;  %v6857_v34 = vand.u32 4294901760, %v6856_v33  ;;  %v18177_v20 = vand.u32 4294901760, %v15152_v8 }
 0x454   :  { %v6850_v30 = vsub.f32 %v15136_v61, %v18174_v13  ;;  %v18178_v21 = vand.u32 4294901760, %v15157_v5  ;;  %v18181_v37 = vand.u32 4294901760, %v15168_v36  ;;  %v18182_v13 = vld [vmem:[#allocation136_spill] sm:$0xff] }
 0x455   :  { %9748 = vmatpush1.bf16.msra.mxu0 %v18173_v44  ;;  %9940 = vmatpush1.bf16.msra.mxu1 %v9939_v56  ;;  %v6862_v50 = vsub.f32 %v15141_v35, %v18175_v2  ;;  %v6868_v48 = vsub.f32 %v15152_v8, %v18177_v20  ;;  %v9947_v56 = vpack.c.bf16 %v6839_v41, %v6827_v58  ;;  %v18180_v44 = vand.u32 4294901760, %v15163_v51  ;;  %v18183_v41 = vld [vmem:[#allocation79_spill] sm:$0xff] }
 0x456   :  { %9750 = vmatprep.subr.bf16.mxu0 %v18176_v3  ;;  %9942 = vmatprep.subr.bf16.mxu1 %v9941_v47  ;;  %v6880_v45 = vsub.f32 %v15157_v5, %v18178_v21  ;;  %v6851_v23 = vand.u32 4294901760, %v6850_v30  ;;  %v6886_v33 = vsub.f32 %v15168_v36, %v18181_v37  ;;  %v9949_v2 = vpack.c.bf16 %v6857_v34, %v6845_v11 }
 0x457   :  { %v6863_v10 = vand.u32 4294901760, %v6862_v50  ;;  %v6874_v47 = vsub.f32 %v15163_v51, %v18180_v44  ;;  %v6869_v3 = vand.u32 4294901760, %v6868_v48  ;;  %v18184_v50 = vld [vmem:[#allocation138_spill] sm:$0xff]  ;;  %v18186_v11 = vpack.c.bf16 %v14499_v4, %v14486_v19 }
 0x458   :  { %v6881_v20 = vand.u32 4294901760, %v6880_v45  ;;  %v6887_v30 = vand.u32 4294901760, %v6886_v33  ;;  %v18187_v34 = vpack.c.bf16 %v14773_v28, %v14769_v25  ;;  %v9961_v48 = vpack.c.bf16 %v15025_v62, %v15020_v17  ;;  %v18194_v33 = vld [vmem:[#allocation57_spill] sm:$0xff] }
 0x459   :  { %9752 = vmatpush1.bf16.msra.mxu0 %v18179_v53  ;;  %9944 = vmatpush1.bf16.msra.mxu1 %v9943_v18  ;;  %v9951_v18 = vpack.c.bf16 %v6863_v10, %v6851_v23  ;;  %v6875_v58 = vand.u32 4294901760, %v6874_v47  ;;  %v18185_v53 = vld [vmem:[#allocation84_spill] sm:$0xff]  ;;  %v9963_v45 = vpack.c.bf16 %v15035_v55, %v15030_v40  ;;  %v18191_v23 = vld [vmem:[#allocation90_spill] sm:$0xff]  ;;  %v18193_v47 = vld [vmem:[#allocation133_spill] sm:$0xff] }
 0x45a   :  { %9754 = vmatprep.subr.bf16.mxu0 %v18182_v13  ;;  %9946 = vmatprep.subr.bf16.mxu1 %v9945_v29  ;;  %v9953_v21 = vpack.c.bf16 %v6881_v20, %v6869_v3  ;;  %v9959_v29 = vpack.c.bf16 %v15015_v0, %v15010_v57  ;;  %v9965_v37 = vpack.c.bf16 %v18193_v47, %v15040_v7  ;;  %v18195_v13 = vld [vmem:[#allocation97_spill] sm:$0xff]  ;;  %v18197_v3 = vld [vmem:[#allocation152_spill] sm:$0xff] }
 0x45b   :  { %v9955_v44 = vpack.c.bf16 %v6887_v30, %v6875_v58  ;;  %v18198_v20 = vld [vmem:[#allocation132_spill] sm:$0xff]  ;;  %v18200_v58 = vld [vmem:[#allocation102_spill] sm:$0xff] }
 0x45d   :  { %9756 = vmatpush1.bf16.msra.mxu0 %v18183_v41  ;;  %9948 = vmatpush1.bf16.msra.mxu1 %v9947_v56  ;;  %v18190_v56 = vld [vmem:[#allocation95_spill] sm:$0xff]  ;;  %v9967_v41 = vpack.c.bf16 %v18198_v20, %v18197_v3 }
 0x45e   :  { %9758 = vmatprep.subr.bf16.mxu0 %v18184_v50  ;;  %9950 = vmatprep.subr.bf16.mxu1 %v9949_v2  ;;  %v18192_v10 = vpack.c.bf16 %v18190_v56, %v18191_v23  ;;  %v18196_v2 = vpack.c.bf16 %v18194_v33, %v18195_v13  ;;  %v18202_v50 = vld [vmem:[#allocation68_spill] sm:$0xff] }
 0x461   :  { %9760 = vmatpush1.bf16.msra.mxu0 %v18185_v53  ;;  %9952 = vmatpush1.bf16.msra.mxu1 %v9951_v18  ;;  %v18199_v18 = vld [vmem:[#allocation143_spill] sm:$0xff] }
 0x462   :  { %9762 = vmatprep.subr.bf16.mxu0 %v14786_v22  ;;  %9954 = vmatprep.subr.bf16.mxu1 %v9953_v21  ;;  %v18188_v22 = vld [vmem:[#allocation89_spill] sm:$0xff]  ;;  %v18201_v30 = vpack.c.bf16 %v18199_v18, %v18200_v58 }
 0x463   :  { %v18203_v21 = vld [vmem:[#allocation145_spill] sm:$0xff] }
 0x464   :  { %v9969_v53 = vpack.c.bf16 %v18203_v21, %v18202_v50 }
 0x465   :  { %9764 = vmatpush1.bf16.msra.mxu0 %v14808_v39  ;;  %9956 = vmatpush1.bf16.msra.mxu1 %v9955_v44  ;;  %v18189_v39 = vpack.c.bf16 %v14196_v42, %v18188_v22  ;;  %v18204_v44 = vld [vmem:[#allocation83_spill] sm:$0xff] }
 0x466   :  { %9766 = vmatprep.subr.bf16.mxu0 %v18186_v11  ;;  %9958 = vmatprep.subr.bf16.mxu1 %v18187_v34  ;;  %v9971_v34 = vpack.c.bf16 %v15079_v15, %v15074_v38 }
 0x468   :  { %6068 = vmatmul.mubr.f32.vlgmr.msra.gmra.mrb[2].mxu0 %v15177_v46  ;;  %6923 = vmatmul.mubr.f32.vlgmr.msra.gmra.mrb[4].mxu1 %v15177_v46 }
 0x469   :  { %9768 = vmatpush1.bf16.msra.mxu0 %v18189_v39  ;;  %9960 = vmatpush1.bf16.msra.mxu1 %v9959_v29  ;;  %v18205_v29 = vld [vmem:[#allocation148_spill] sm:$0xff]  ;;  %v18208_v39 = vld [vmem:[#allocation77_spill] sm:$0xff] }
 0x46a   :  { %9770 = vmatprep.subr.bf16.mxu0 %v18192_v10  ;;  %9962 = vmatprep.subr.bf16.mxu1 %v9961_v48  ;;  %v18206_v11 = vpack.c.bf16 %v18204_v44, %v18205_v29  ;;  %v18207_v48 = vld [vmem:[#allocation153_spill] sm:$0xff]  ;;  %v9973_v10 = vpack.c.bf16 %v15089_v60, %v15084_v49 }
 0x46b   :  { %6202 = vmatprep.mubr.f32.mxu0 %v17062_v14  ;;  %7057 = vmatprep.mubr.f32.mxu1 %v17062_v14 }
 0x46d   :  { %9772 = vmatpush1.bf16.msra.mxu0 %v18196_v2  ;;  %9964 = vmatpush1.bf16.msra.mxu1 %v9963_v45  ;;  %v18209_v45 = vpack.c.bf16 %v18207_v48, %v18208_v39  ;;  %v18211_v2 = vld [vmem:[#allocation85_spill] sm:$0xff] }
 0x46e   :  { %9774 = vmatprep.subr.bf16.mxu0 %v18201_v30  ;;  %9966 = vmatprep.subr.bf16.mxu1 %v9965_v37  ;;  %v18210_v37 = vld [vmem:[#allocation88_spill] sm:$0xff] }
 0x46f   :  { %v18212_v30 = vpack.c.bf16 %v18210_v37, %v18211_v2 }
 0x471   :  { %9776 = vmatpush1.bf16.msra.mxu0 %v18206_v11  ;;  %9968 = vmatpush1.bf16.msra.mxu1 %v9967_v41  ;;  %v9975_v11 = vpack.c.bf16 %v15099_v9, %v15094_v63  ;;  %v18213_v41 = vld [vmem:[#allocation81_spill] sm:$0xff]  ;;  %v18223_v9 = vld [vmem:[#allocation106_spill] sm:$0xff] }
 0x472   :  { %9778 = vmatprep.subr.bf16.mxu0 %v18209_v45  ;;  %9970 = vmatprep.subr.bf16.mxu1 %v9969_v53  ;;  %v18215_v32 = vpack.c.bf16 %v18213_v41, %v18214_v27  ;;  %v9977_v45 = vpack.c.bf16 %v15115_v43, %v15104_v52  ;;  %v18216_v53 = vld [vmem:[#allocation78_spill] sm:$0xff]  ;;  %v18226_v43 = vld [vmem:[#allocation113_spill] sm:$0xff] }
 0x473   :  { %v18218_v26 = vpack.c.bf16 %v18216_v53, %v18217_v54 }
 0x475   :  { %9780 = vmatpush1.bf16.msra.mxu0 %v18212_v30  ;;  %9972 = vmatpush1.bf16.msra.mxu1 %v9971_v34  ;;  %v9979_v30 = vpack.c.bf16 %v15131_v24, %v15120_v1  ;;  %v18219_v34 = vld [vmem:[#allocation101_spill] sm:$0xff]  ;;  %v18229_v24 = vld [vmem:[#allocation127_spill] sm:$0xff] }
 0x476   :  { %9782 = vmatprep.subr.bf16.mxu0 %v18215_v32  ;;  %9974 = vmatprep.subr.bf16.mxu1 %v9973_v10  ;;  %v18221_v46 = vpack.c.bf16 %v18219_v34, %v18220_v31  ;;  %v9981_v32 = vpack.c.bf16 %v15259_v59, %v15147_v12  ;;  %v18222_v10 = vld [vmem:[#allocation100_spill] sm:$0xff]  ;;  %v18232_v59 = vld [vmem:[#allocation65_spill] sm:$0xff] }
 0x477   :  { %v18224_v63 = vpack.c.bf16 %v18222_v10, %v18223_v9 }
 0x479   :  { %9784 = vmatpush1.bf16.msra.mxu0 %v18218_v26  ;;  %9976 = vmatpush1.bf16.msra.mxu1 %v9975_v11  ;;  %v9983_v26 = vpack.c.bf16 %v15141_v35, %v15136_v61  ;;  %v18225_v11 = vld [vmem:[#allocation62_spill] sm:$0xff]  ;;  %v18234_v61 = vld [vmem:[#allocation69_spill] sm:$0xff] }
 0x47a   :  { %9786 = vmatprep.subr.bf16.mxu0 %v18221_v46  ;;  %9978 = vmatprep.subr.bf16.mxu1 %v9977_v45  ;;  %v18227_v52 = vpack.c.bf16 %v18225_v11, %v18226_v43  ;;  %v9985_v46 = vpack.c.bf16 %v15157_v5, %v15152_v8  ;;  %v18228_v45 = vld [vmem:[#allocation130_spill] sm:$0xff]  ;;  %v18235_v35 = vld [vmem:[#allocation141_spill] sm:$0xff] }
 0x47b   :  { %v18230_v1 = vpack.c.bf16 %v18228_v45, %v18229_v24  ;;  %v18238_v8 = vld [vmem:[#allocation142_spill] sm:$0xff]  ;;  %v18249_v45 = vld [vmem:[#allocation80_spill] sm:$0xff] }
 0x47c   :  { %v18240_v24 = vld [vmem:[#allocation94_spill] sm:$0xff] }
 0x47d   :  { %9788 = vmatpush1.bf16.msra.mxu0 %v18224_v63  ;;  %9980 = vmatpush1.bf16.msra.mxu1 %v9979_v30  ;;  %v9987_v63 = vpack.c.bf16 %v15168_v36, %v15163_v51  ;;  %v18231_v30 = vld [vmem:[#allocation98_spill] sm:$0xff]  ;;  %v18241_v51 = vld [vmem:[#allocation56_spill] sm:$0xff]  ;;  %v18244_v36 = vld [vmem:[#allocation103_spill] sm:$0xff] }
 0x47e   :  { %9790 = vmatprep.subr.bf16.mxu0 %v18227_v52  ;;  %9982 = vmatprep.subr.bf16.mxu1 %v9981_v32  ;;  %v18233_v12 = vpack.c.bf16 %v18231_v30, %v18232_v59  ;;  %v18236_v52 = vpack.c.bf16 %v18234_v61, %v18235_v35  ;;  %v18237_v32 = vld [vmem:[#allocation59_spill] sm:$0xff]  ;;  %v18243_v5 = vld [vmem:[#allocation134_spill] sm:$0xff]  ;;  %v18245_v59 = vld [vmem:[#allocation137_spill] sm:$0xff] }
 0x47f   :  { %v18251_v30 = vld [vmem:[#allocation58_spill] sm:$0xff]  ;;  %v18252_v61 = vld [vmem:[#allocation63_spill] sm:$0xff] }
 0x480   :  { %v18253_v35 = vld [vmem:[#allocation154_spill] sm:$0xff] }
 0x481   :  { %9792 = vmatpush1.bf16.msra.mxu0 %v18230_v1  ;;  %9984 = vmatpush1.bf16.msra.mxu1 %v9983_v26  ;;  %v18239_v1 = vld [vmem:[#allocation125_spill] sm:$0xff]  ;;  %v18246_v26 = vld [vmem:[#allocation108_spill] sm:$0xff] }
 0x482   :  { %9794 = vmatprep.subr.bf16.mxu0 %v18233_v12  ;;  %9986 = vmatprep.subr.bf16.mxu1 %v9985_v46  ;;  %v18242_v12 = vld [vmem:[#allocation96_spill] sm:$0xff]  ;;  %v18248_v46 = vld [vmem:[#allocation109_spill] sm:$0xff] }
 0x485   :  { %9796 = vmatpush1.bf16.msra.mxu0 %v18236_v52  ;;  %9988 = vmatpush1.bf16.msra.mxu1 %v9987_v63  ;;  %v18250_v63 = vld [vmem:[#allocation111_spill] sm:$0xff]  ;;  %v18254_v52 = vld [vmem:[#allocation126_spill] sm:$0xff] }
 0x486   :  { %9798 = vmatprep.subr.bf16.mxu0 %v18237_v32  ;;  %9990 = vmatprep.subr.bf16.mxu1 %v18238_v8 }
 0x488   :  { %6205 = vmatmul.mubr.f32.vlgmr.msra.gmra.mrb[2].mxu0 %v15199_v16  ;;  %7060 = vmatmul.mubr.f32.vlgmr.msra.gmra.mrb[4].mxu1 %v15199_v16  ;;  %v18247_v16 = vld [vmem:[#allocation73_spill] sm:$0xff] }
 0x489   :  { %9800 = vmatpush1.bf16.msra.mxu0 %v18239_v1  ;;  %9992 = vmatpush1.bf16.msra.mxu1 %v18240_v24 }
 0x48a   :  { %9802 = vmatprep.subr.bf16.mxu0 %v18241_v51  ;;  %9994 = vmatprep.subr.bf16.mxu1 %v18242_v12 }
 0x48b   :  { %6307 = vmatprep.mubr.f32.mxu0 %v17062_v14  ;;  %7162 = vmatprep.mubr.f32.mxu1 %v17062_v14 }
 0x48d   :  { %9804 = vmatpush1.bf16.msra.mxu0 %v18243_v5  ;;  %9996 = vmatpush1.bf16.msra.mxu1 %v18244_v36  ;;  %v18255_v36 = vld [vmem:[#allocation114_spill] sm:$0xff]  ;;  %v18271_v5 = vld [vmem:[#allocation75_spill] sm:$0xff] }
 0x48e   :  { %9806 = vmatprep.subr.bf16.mxu0 %v18245_v59  ;;  %9998 = vmatprep.subr.bf16.mxu1 %v18246_v26  ;;  %v18256_v59 = vld [vmem:[#allocation117_spill] sm:$0xff]  ;;  %v18257_v26 = vld [vmem:[#allocation140_spill] sm:$0xff] }
 0x491   :  { %9808 = vmatpush1.bf16.msra.mxu0 %v18247_v16  ;;  %10000 = vmatpush1.bf16.msra.mxu1 %v18248_v46  ;;  %v18258_v16 = vld [vmem:[#allocation118_spill] sm:$0xff]  ;;  %v18259_v46 = vld [vmem:[#allocation147_spill] sm:$0xff] }
 0x492   :  { %9810 = vmatprep.subr.bf16.mxu0 %v18249_v45  ;;  %10002 = vmatprep.subr.bf16.mxu1 %v18250_v63  ;;  %v18260_v45 = vld [vmem:[#allocation121_spill] sm:$0xff]  ;;  %v18261_v63 = vld [vmem:[#allocation72_spill] sm:$0xff] }
 0x495   :  { %9812 = vmatpush1.bf16.msra.mxu0 %v18251_v30  ;;  %10004 = vmatpush1.bf16.msra.mxu1 %v18252_v61  ;;  %v18262_v30 = vld [vmem:[#allocation64_spill] sm:$0xff]  ;;  %v18263_v61 = vld [vmem:[#allocation149_spill] sm:$0xff] }
 0x496   :  { %9814 = vmatprep.subr.bf16.mxu0 %v18253_v35  ;;  %10006 = vmatprep.subr.bf16.mxu1 %v18254_v52  ;;  %v18264_v35 = vld [vmem:[#allocation92_spill] sm:$0xff]  ;;  %v18265_v52 = vld [vmem:[#allocation150_spill] sm:$0xff] }
 0x499   :  { %9816 = vmatpush1.bf16.msra.mxu0 %v18255_v36  ;;  %10008 = vmatpush1.bf16.msra.mxu1 %v18256_v59  ;;  %v18266_v36 = vld [vmem:[#allocation61_spill] sm:$0xff] }
 0x49a   :  { %9818 = vmatprep.subr.bf16.mxu0 %v18257_v26  ;;  %10010 = vmatprep.subr.bf16.mxu1 %v18258_v16  ;;  %v18267_v26 = vand.u32 4294901760, %v14486_v19  ;;  %v18268_v16 = vand.u32 4294901760, %v14499_v4  ;;  %v18276_v19 = vand.u32 4294901760, %v15015_v0 }
 0x49c   :  { %v9829_v59 = vpack.c.bf16 %v18268_v16, %v18267_v26  ;;  %v18279_v16 = vand.u32 4294901760, %v15020_v17  ;;  %v18285_v17 = vand.u32 4294901760, %v18200_v58  ;;  %v18291_v58 = vand.u32 4294901760, %v18197_v3 }
 0x49d   :  { %9820 = vmatpush1.bf16.msra.mxu0 %v18259_v46  ;;  %10012 = vmatpush1.bf16.msra.mxu1 %v18260_v45  ;;  %v18269_v46 = vand.u32 4294901760, %v14769_v25  ;;  %v18270_v45 = vand.u32 4294901760, %v14773_v28  ;;  %v18277_v25 = vand.u32 4294901760, %v18191_v23  ;;  %v18278_v28 = vand.u32 4294901760, %v18190_v56 }
 0x49e   :  { %9822 = vmatprep.subr.bf16.mxu0 %v18261_v63  ;;  %10014 = vmatprep.subr.bf16.mxu1 %v18262_v30  ;;  %v18272_v30 = vld [vmem:[#allocation128_spill] sm:$0xff]  ;;  %v18283_v23 = vand.u32 4294901760, %v15030_v40  ;;  %v18284_v56 = vand.u32 4294901760, %v15035_v55  ;;  %v18289_v40 = vand.u32 4294901760, %v18205_v29  ;;  %v18290_v55 = vand.u32 4294901760, %v18204_v44 }
 0x49f   :  { %v10021_v63 = vpack.c.bf16 %v18270_v45, %v18269_v46  ;;  %v9833_v26 = vpack.c.bf16 %v18278_v28, %v18277_v25  ;;  %v18280_v46 = vand.u32 4294901760, %v15025_v62  ;;  %v18286_v62 = vand.u32 4294901760, %v18199_v18 }
 0x4a0   :  { %v18288_v45 = vand.u32 4294901760, %v18193_v47  ;;  %v18292_v18 = vand.u32 4294901760, %v18198_v20  ;;  %v18294_v47 = vand.u32 4294901760, %v18207_v48  ;;  %v18297_v44 = vand.u32 4294901760, %v18211_v2 }
 0x4a1   :  { %9824 = vmatpush1.bf16.msra.mxu0 %v18263_v61  ;;  %10016 = vmatpush1.bf16.msra.mxu1 %v18264_v35  ;;  %v18273_v35 = vand.u32 4294901760, %v18188_v22  ;;  %v10025_v22 = vpack.c.bf16 %v18280_v46, %v18279_v16  ;;  %v18298_v3 = vand.u32 4294901760, %v18210_v37  ;;  %v18301_v48 = vand.u32 4294901760, %v18214_v27  ;;  %v18309_v46 = vld [vmem:[#allocation86_spill] sm:$0xff] }
 0x4a2   :  { %9826 = vmatprep.subr.bf16.mxu0 %v18265_v52  ;;  %10018 = vmatprep.subr.bf16.mxu1 %v18266_v36  ;;  %v18274_v52 = vand.u32 4294901760, %v14196_v42  ;;  %v18275_v36 = vand.u32 4294901760, %v15010_v57  ;;  %v18281_v42 = vand.u32 4294901760, %v18195_v13  ;;  %v18282_v57 = vand.u32 4294901760, %v18194_v33 }
 0x4a3   :  { %v9839_v33 = vpack.c.bf16 %v18290_v55, %v18289_v40  ;;  %v9843_v20 = vpack.c.bf16 %v18298_v3, %v18297_v44  ;;  %v18303_v25 = vand.u32 4294901760, %v15084_v49  ;;  %v18304_v28 = vand.u32 4294901760, %v15089_v60  ;;  %v18325_v40 = vld [vmem:[#allocation123_spill] sm:$0xff]  ;;  %v18346_v44 = vld [vmem:[#allocation154_spill] sm:$0xff] }
 0x4a4   :  { %v9831_v61 = vpack.c.bf16 %v18274_v52, %v18273_v35  ;;  %v10023_v4 = vpack.c.bf16 %v18276_v19, %v18275_v36  ;;  %v9835_v0 = vpack.c.bf16 %v18282_v57, %v18281_v42  ;;  %v10027_v36 = vpack.c.bf16 %v18284_v56, %v18283_v23  ;;  %v18313_v42 = vld [vmem:[#allocation87_spill] sm:$0xff]  ;;  %v18347_v3 = vld [vmem:[#allocation126_spill] sm:$0xff] }
 0x4a5   :  { %9828 = vmatpush1.bf16.msra.mxu0 %v18271_v5  ;;  %10020 = vmatpush1.bf16.msra.mxu1 %v18272_v30  ;;  %v18295_v35 = vand.u32 4294901760, %v18202_v50  ;;  %v18296_v52 = vand.u32 4294901760, %v18203_v21  ;;  %v18299_v19 = vand.u32 4294901760, %v15074_v38  ;;  %v18302_v50 = vand.u32 4294901760, %v18213_v41 }
 0x4a6   :  { %9830 = vmatprep.subr.bf16.mxu0 %v9829_v59  ;;  %10022 = vmatprep.subr.bf16.mxu1 %v10021_v63  ;;  %v9837_v59 = vpack.c.bf16 %v18286_v62, %v18285_v17  ;;  %v10031_v63 = vpack.c.bf16 %v18292_v18, %v18291_v58  ;;  %v10037_v2 = vpack.c.bf16 %v18304_v28, %v18303_v25  ;;  %v18305_v37 = vand.u32 4294901760, %v18217_v54  ;;  %v18319_v17 = vld [vmem:[#allocation116_spill] sm:$0xff]  ;;  %v18356_v28 = vld [vmem:[#allocation149_spill] sm:$0xff] }
 0x4a7   :  { %v10033_v29 = vpack.c.bf16 %v18296_v52, %v18295_v35  ;;  %v9845_v21 = vpack.c.bf16 %v18302_v50, %v18301_v48  ;;  %v18306_v38 = vand.u32 4294901760, %v18216_v53  ;;  %v18311_v41 = vand.u32 4294901760, %v18220_v31  ;;  %v18330_v18 = vld [vmem:[#allocation76_spill] sm:$0xff]  ;;  %v18340_v52 = vld [vmem:[#allocation73_spill] sm:$0xff]  ;;  %v18352_v48 = vld [vmem:[#allocation147_spill] sm:$0xff] }
 0x4a8   :  { %6311 = vmatmul.mubr.f32.vlgmr.msra.gmra.mrb[2].mxu0 %v15218_v6  ;;  %7166 = vmatmul.mubr.f32.vlgmr.msra.gmra.mrb[4].mxu1 %v15218_v6  ;;  %v18287_v6 = vand.u32 4294901760, %v15040_v7  ;;  %v18293_v7 = vand.u32 4294901760, %v18208_v39  ;;  %v18312_v49 = vand.u32 4294901760, %v18219_v34  ;;  %v18314_v57 = vand.u32 4294901760, %v18313_v42  ;;  %v18339_v35 = vld [vmem:[#allocation108_spill] sm:$0xff]  ;;  %v18353_v50 = vld [vmem:[#allocation121_spill] sm:$0xff] }
 0x4a9   :  { %9832 = vmatpush1.bf16.msra.mxu0 %v9831_v61  ;;  %10024 = vmatpush1.bf16.msra.mxu1 %v10023_v4  ;;  %v18300_v4 = vand.u32 4294901760, %v15079_v15  ;;  %v9847_v15 = vpack.c.bf16 %v18306_v38, %v18305_v37  ;;  %v18317_v53 = vand.u32 4294901760, %v18223_v9  ;;  %v18318_v56 = vand.u32 4294901760, %v18222_v10  ;;  %v18329_v10 = vld [vmem:[#allocation82_spill] sm:$0xff]  ;;  %v18355_v25 = vld [vmem:[#allocation64_spill] sm:$0xff]  ;;  %v18359_v38 = vld [vmem:[#allocation61_spill] sm:$0xff] }
 0x4aa   :  { %9834 = vmatprep.subr.bf16.mxu0 %v9833_v26  ;;  %10026 = vmatprep.subr.bf16.mxu1 %v10025_v22  ;;  %v10029_v13 = vpack.c.bf16 %v18288_v45, %v18287_v6  ;;  %v9841_v61 = vpack.c.bf16 %v18294_v47, %v18293_v7  ;;  %v18307_v26 = vld [vmem:[#allocation146_spill] sm:$0xff]  ;;  %v18310_v22 = vand.u32 4294901760, %v18309_v46  ;;  %v9849_v60 = vpack.c.bf16 %v18312_v49, %v18311_v41  ;;  %v18335_v47 = vld [vmem:[#allocation67_spill] sm:$0xff]  ;;  %v15640_v42 = vld [vmem:[#allocation18 + $0x38] sm:$0xff] }
 0x4ab   :  { %6477 = vmatprep.mubr.f32.mxu0 %v17062_v14  ;;  %7332 = vmatprep.mubr.f32.mxu1 %v17062_v14  ;;  %v10035_v39 = vpack.c.bf16 %v18300_v4, %v18299_v19  ;;  %v18308_v16 = vand.u32 4294901760, %v18307_v26  ;;  %v18320_v62 = vand.u32 4294901760, %v18319_v17  ;;  %v18323_v34 = vand.u32 4294901760, %v18226_v43  ;;  %v18332_v7 = vld [vmem:[#allocation66_spill] sm:$0xff]  ;;  %v18333_v43 = vld [vmem:[#allocation104_spill] sm:$0xff]  ;;  %v18349_v19 = vld [vmem:[#allocation117_spill] sm:$0xff] }
 0x4ac   :  { %v18324_v45 = vand.u32 4294901760, %v18225_v11  ;;  %v18326_v55 = vand.u32 4294901760, %v18325_v40  ;;  %v18334_v11 = vld [vmem:[#allocation105_spill] sm:$0xff]  ;;  %v18350_v4 = vld [vmem:[#allocation140_spill] sm:$0xff]  ;;  %v18358_v37 = vld [vmem:[#allocation150_spill] sm:$0xff] }
 0x4ad   :  { %9836 = vmatpush1.bf16.msra.mxu0 %v9835_v0  ;;  %10028 = vmatpush1.bf16.msra.mxu1 %v10027_v36  ;;  %v10039_v27 = vpack.c.bf16 %v18310_v22, %v18308_v16  ;;  %v18315_v0 = vld [vmem:[#allocation110_spill] sm:$0xff]  ;;  %v9851_v36 = vpack.c.bf16 %v18318_v56, %v18317_v53  ;;  %v15616_v26 = vld [vmem:[#allocation18 + $0x18] sm:$0xff] }
 0x4ae   :  { %9838 = vmatprep.subr.bf16.mxu0 %v9837_v59  ;;  %10030 = vmatprep.subr.bf16.mxu1 %v10029_v13  ;;  %v18316_v23 = vand.u32 4294901760, %v18315_v0  ;;  %v18321_v59 = vld [vmem:[#allocation120_spill] sm:$0xff]  ;;  %v9853_v13 = vpack.c.bf16 %v18324_v45, %v18323_v34  ;;  %v7547_v46 = vand.u32 4294901760, %v15616_v26  ;;  %v15620_v22 = vld [vmem:[#allocation18] sm:$0xff]  ;;  %v16959_v0 = vand.u32 4294901760, %v15640_v42 }
 0x4af   :  { %v18322_v6 = vand.u32 4294901760, %v18321_v59  ;;  %v15666_v59 = vld [vmem:[#allocation18 + $0x58] sm:$0xff]  ;;  %v15671_v34 = vld [vmem:[#allocation18 + $0x40] sm:$0xff]  ;;  %v15673_v45 = vld [vmem:[#allocation18 + $0x50] sm:$0xff] }
 0x4b0   :  { %v10041_v54 = vpack.c.bf16 %v18316_v23, %v18314_v57  ;;  %v15645_v23 = vld [vmem:[#allocation18 + $0x20] sm:$0xff]  ;;  %v7565_v40 = vand.u32 4294901760, %v15673_v45 }
 0x4b1   :  { %9840 = vmatpush1.bf16.msra.mxu0 %v9839_v33  ;;  %10032 = vmatpush1.bf16.msra.mxu1 %v10031_v63  ;;  %v10043_v31 = vpack.c.bf16 %v18322_v6, %v18320_v62  ;;  %v18327_v33 = vld [vmem:[#allocation135_spill] sm:$0xff]  ;;  %v18331_v63 = vld [vmem:[#allocation93_spill] sm:$0xff]  ;;  %v16958_v53 = vand.u32 4294901760, %v15645_v23 }
 0x4b2   :  { %9842 = vmatprep.subr.bf16.mxu0 %v9841_v61  ;;  %10034 = vmatprep.subr.bf16.mxu1 %v10033_v29  ;;  %v18328_v58 = vand.u32 4294901760, %v18327_v33  ;;  %v18336_v61 = vld [vmem:[#allocation134_spill] sm:$0xff]  ;;  %v18345_v29 = vld [vmem:[#allocation63_spill] sm:$0xff] }
 0x4b3   :  { %v15664_v62 = vld [vmem:[#allocation18 + $0x48] sm:$0xff] }
 0x4b4   :  { %v10045_v9 = vpack.c.bf16 %v18328_v58, %v18326_v55  ;;  %v16956_v6 = vand.u32 4294901760, %v15664_v62  ;;  %v7512_v58 = vld [vmem:[#allocation18 + $0x68] sm:$0xff] }
 0x4b5   :  { %9844 = vmatpush1.bf16.msra.mxu0 %v9843_v20  ;;  %10036 = vmatpush1.bf16.msra.mxu1 %v10035_v39  ;;  %v18348_v20 = vld [vmem:[#allocation114_spill] sm:$0xff] }
 0x4b6   :  { %9846 = vmatprep.subr.bf16.mxu0 %v9845_v21  ;;  %10038 = vmatprep.subr.bf16.mxu1 %v10037_v2  ;;  %v18351_v39 = vld [vmem:[#allocation118_spill] sm:$0xff]  ;;  %v18354_v21 = vld [vmem:[#allocation72_spill] sm:$0xff] }
 0x4b7   :  { %v18357_v2 = vld [vmem:[#allocation92_spill] sm:$0xff] }
 0x4b9   :  { %9848 = vmatpush1.bf16.msra.mxu0 %v9847_v15  ;;  %10040 = vmatpush1.bf16.msra.mxu1 %v10039_v27  ;;  %v15614_v15 = vld [vmem:[#allocation18 + $0x8] sm:$0xff]  ;;  %v15622_v27 = vld [vmem:[#allocation18 + $0x10] sm:$0xff] }
 0x4ba   :  { %9850 = vmatprep.subr.bf16.mxu0 %v9849_v60  ;;  %10042 = vmatprep.subr.bf16.mxu1 %v10041_v54  ;;  %v7543_v16 = vand.u32 4294901760, %v15614_v15  ;;  %v15638_v60 = vld [vmem:[#allocation18 + $0x28] sm:$0xff]  ;;  %v15647_v54 = vld [vmem:[#allocation18 + $0x30] sm:$0xff] }
 0x4bb   :  { %v16960_v57 = vand.u32 4294901760, %v15638_v60  ;;  %v16957_v56 = vand.u32 4294901760, %v15647_v54 }
 0x4bc   :  { %v15630_v41 = vpack.c.bf16 %v7547_v46, %v7543_v16 }
 0x4bd   :  { %9852 = vmatpush1.bf16.msra.mxu0 %v9851_v36  ;;  %10044 = vmatpush1.bf16.msra.mxu1 %v10043_v31  ;;  %v15656_v36 = vpack.c.bf16 %v16959_v0, %v16960_v57  ;;  %v15662_v17 = vpack.c.bf16 %v16957_v56, %v16958_v53  ;;  %v16955_v31 = vand.u32 4294901760, %v15666_v59  ;;  %v15709_v57 = vsub.f32 %v15614_v15, %v7543_v16 }
 0x4be   :  { %9854 = vmatprep.subr.bf16.mxu0 %v9853_v13  ;;  %10046 = vmatprep.subr.bf16.mxu1 %v10045_v9  ;;  %18360 = vst [vmem:[#allocation107_spill] sm:$0xff] %v15630_v41  ;;  %v7561_v13 = vand.u32 4294901760, %v15671_v34  ;;  %v7514_v9 = vld [vmem:[#allocation18 + $0x78] sm:$0xff]  ;;  %v18374_v16 = vand.u32 4294901760, %v15640_v42 }
 0x4bf   :  { %18362 = vst [vmem:[#allocation131_spill] sm:$0xff] %v15656_v36  ;;  %18363 = vst [vmem:[#allocation139_spill] sm:$0xff] %v15662_v17  ;;  %v15682_v55 = vpack.c.bf16 %v16955_v31, %v16956_v6  ;;  %v7525_v31 = vld [vmem:[#allocation18 + $0xd0] sm:$0xff] }
 0x4c0   :  { %v15684_v33 = vpack.c.bf16 %v7565_v40, %v7561_v13  ;;  %v7597_v0 = vand.u32 4294901760, %v7525_v31 }
 0x4c1   :  { %9856 = vmatpush1.bf16.msra.mxu0 %v18329_v10  ;;  %10048 = vmatpush1.bf16.msra.mxu1 %v18330_v18  ;;  %18364 = vst [vmem:[#allocation112_spill] sm:$0xff] %v15682_v55  ;;  %v7567_v10 = vand.u32 4294901760, %v7512_v58  ;;  %v7571_v18 = vand.u32 4294901760, %v7514_v9 }
 0x4c2   :  { %9858 = vmatprep.subr.bf16.mxu0 %v18331_v63  ;;  %10050 = vmatprep.subr.bf16.mxu1 %v18332_v7  ;;  %18365 = vst [vmem:[#allocation144_spill] sm:$0xff] %v15684_v33  ;;  %v7511_v63 = vld [vmem:[#allocation18 + $0x60] sm:$0xff]  ;;  %v7513_v7 = vld [vmem:[#allocation18 + $0x70] sm:$0xff] }
 0x4c5   :  { %9860 = vmatpush1.bf16.msra.mxu0 %v18333_v43  ;;  %10052 = vmatpush1.bf16.msra.mxu1 %v18334_v11  ;;  %v7569_v43 = vand.u32 4294901760, %v7511_v63  ;;  %v7573_v11 = vand.u32 4294901760, %v7513_v7 }
 0x4c6   :  { %9862 = vmatprep.subr.bf16.mxu0 %v18237_v32  ;;  %10054 = vmatprep.subr.bf16.mxu1 %v18238_v8  ;;  %v18337_v32 = vld [vmem:[#allocation103_spill] sm:$0xff]  ;;  %v18338_v8 = vld [vmem:[#allocation137_spill] sm:$0xff] }
 0x4c8   :  { %6479 = vmatmul.mubr.f32.vlgmr.msra.gmra.mrb[2].mxu0 %v18335_v47  ;;  %7334 = vmatmul.mubr.f32.vlgmr.msra.gmra.mrb[4].mxu1 %v18335_v47 }
 0x4c9   :  { %9864 = vmatpush1.bf16.msra.mxu0 %v18239_v1  ;;  %10056 = vmatpush1.bf16.msra.mxu1 %v18240_v24  ;;  %v18341_v1 = vld [vmem:[#allocation109_spill] sm:$0xff]  ;;  %v18342_v24 = vld [vmem:[#allocation80_spill] sm:$0xff] }
 0x4ca   :  { %9866 = vmatprep.subr.bf16.mxu0 %v18241_v51  ;;  %10058 = vmatprep.subr.bf16.mxu1 %v18242_v12  ;;  %v18343_v51 = vld [vmem:[#allocation111_spill] sm:$0xff]  ;;  %v18344_v12 = vld [vmem:[#allocation58_spill] sm:$0xff] }
 0x4cb   :  { %6581 = vmatprep.mubr.f32.mxu0 %v17062_v14  ;;  %7436 = vmatprep.mubr.f32.mxu1 %v17062_v14 }
 0x4cd   :  { %9868 = vmatpush1.bf16.msra.mxu0 %v18336_v61  ;;  %10060 = vmatpush1.bf16.msra.mxu1 %v18337_v32  ;;  %v15690_v61 = vpack.c.bf16 %v7573_v11, %v7569_v43  ;;  %v7516_v32 = vld [vmem:[#allocation18 + $0x88] sm:$0xff] }
 0x4ce   :  { %9870 = vmatprep.subr.bf16.mxu0 %v18338_v8  ;;  %10062 = vmatprep.subr.bf16.mxu1 %v18339_v35  ;;  %v7518_v8 = vld [vmem:[#allocation18 + $0x98] sm:$0xff]  ;;  %v7575_v35 = vand.u32 4294901760, %v7516_v32 }
 0x4cf   :  { %18367 = vst [vmem:[#allocation74_spill] sm:$0xff] %v15690_v61 }
 0x4d1   :  { %9872 = vmatpush1.bf16.msra.mxu0 %v18340_v52  ;;  %10064 = vmatpush1.bf16.msra.mxu1 %v18341_v1  ;;  %v7579_v52 = vand.u32 4294901760, %v7518_v8  ;;  %v7515_v1 = vld [vmem:[#allocation18 + $0x80] sm:$0xff] }
 0x4d2   :  { %9874 = vmatprep.subr.bf16.mxu0 %v18342_v24  ;;  %10066 = vmatprep.subr.bf16.mxu1 %v18343_v51  ;;  %v7517_v24 = vld [vmem:[#allocation18 + $0x90] sm:$0xff]  ;;  %v7577_v51 = vand.u32 4294901760, %v7515_v1 }
 0x4d5   :  { %9876 = vmatpush1.bf16.msra.mxu0 %v18344_v12  ;;  %10068 = vmatpush1.bf16.msra.mxu1 %v18345_v29  ;;  %v7581_v12 = vand.u32 4294901760, %v7517_v24  ;;  %v15694_v29 = vpack.c.bf16 %v7579_v52, %v7575_v35 }
 0x4d6   :  { %9878 = vmatprep.subr.bf16.mxu0 %v18346_v44  ;;  %10070 = vmatprep.subr.bf16.mxu1 %v18347_v3  ;;  %v7520_v3 = vld [vmem:[#allocation18 + $0xa8] sm:$0xff] }
 0x4d7   :  { %18368 = vst [vmem:[#allocation155_spill] sm:$0xff] %v15694_v29  ;;  %v15696_v44 = vpack.c.bf16 %v7581_v12, %v7577_v51 }
 0x4d9   :  { %9880 = vmatpush1.bf16.msra.mxu0 %v18348_v20  ;;  %10072 = vmatpush1.bf16.msra.mxu1 %v18349_v19  ;;  %18369 = vst [vmem:[#allocation115_spill] sm:$0xff] %v15696_v44  ;;  %v7522_v20 = vld [vmem:[#allocation18 + $0xb8] sm:$0xff]  ;;  %v7583_v19 = vand.u32 4294901760, %v7520_v3 }
 0x4da   :  { %9882 = vmatprep.subr.bf16.mxu0 %v18350_v4  ;;  %10074 = vmatprep.subr.bf16.mxu1 %v18351_v39  ;;  %v7587_v4 = vand.u32 4294901760, %v7522_v20  ;;  %v7519_v39 = vld [vmem:[#allocation18 + $0xa0] sm:$0xff] }
 0x4dd   :  { %9884 = vmatpush1.bf16.msra.mxu0 %v18352_v48  ;;  %10076 = vmatpush1.bf16.msra.mxu1 %v18353_v50  ;;  %v7521_v48 = vld [vmem:[#allocation18 + $0xb0] sm:$0xff]  ;;  %v7585_v50 = vand.u32 4294901760, %v7519_v39 }
 0x4de   :  { %9886 = vmatprep.subr.bf16.mxu0 %v18354_v21  ;;  %10078 = vmatprep.subr.bf16.mxu1 %v18355_v25  ;;  %v7589_v21 = vand.u32 4294901760, %v7521_v48  ;;  %v15700_v25 = vpack.c.bf16 %v7587_v4, %v7583_v19 }
 0x4e0   :  { %18370 = vst [vmem:[#allocation119_spill] sm:$0xff] %v15700_v25 }
 0x4e1   :  { %9888 = vmatpush1.bf16.msra.mxu0 %v18356_v28  ;;  %10080 = vmatpush1.bf16.msra.mxu1 %v18357_v2  ;;  %v15702_v28 = vpack.c.bf16 %v7589_v21, %v7585_v50  ;;  %v7524_v2 = vld [vmem:[#allocation18 + $0xc8] sm:$0xff] }
 0x4e2   :  { %9890 = vmatprep.subr.bf16.mxu0 %v18358_v37  ;;  %10082 = vmatprep.subr.bf16.mxu1 %v18359_v38  ;;  %v7526_v37 = vld [vmem:[#allocation18 + $0xd8] sm:$0xff]  ;;  %v7523_v38 = vld [vmem:[#allocation18 + $0xc0] sm:$0xff]  ;;  %v7591_v6 = vand.u32 4294901760, %v7524_v2 }
 0x4e3   :  { %18371 = vst [vmem:[#allocation70_spill] sm:$0xff] %v15702_v28  ;;  %v7595_v56 = vand.u32 4294901760, %v7526_v37  ;;  %v7593_v53 = vand.u32 4294901760, %v7523_v38 }
 0x4e5   :  { %9892 = vmatpush1.bf16.msra.mxu0 %v18271_v5  ;;  %10084 = vmatpush1.bf16.msra.mxu1 %v18272_v30  ;;  %v7545_v5 = vand.u32 4294901760, %v15620_v22  ;;  %v16961_v30 = vand.u32 4294901760, %v15622_v27 }
 0x4e6   :  { %10086 = vmatprep.subr.bf16.mxu0 %v15630_v41 }
 0x4e7   :  { %v15636_v49 = vpack.c.bf16 %v16961_v30, %v7545_v5  ;;  %v15714_v30 = vsub.f32 %v15616_v26, %v7547_v46  ;;  %v15734_v26 = vsub.f32 %v15640_v42, %v18374_v16  ;;  %v18375_v46 = vand.u32 4294901760, %v15645_v23 }
 0x4e8   :  { %6583 = vmatmul.mubr.f32.vlgmr.msra.gmra.mrb[2].mxu0 %v18335_v47  ;;  %7438 = vmatmul.mubr.f32.vlgmr.msra.gmra.mrb[4].mxu1 %v18335_v47  ;;  %v15688_v47 = vpack.c.bf16 %v7571_v18, %v7567_v10  ;;  %v15757_v16 = vsub.f32 %v15671_v34, %v7561_v13  ;;  %v7528_v34 = vld [vmem:[#allocation18 + $0xe8] sm:$0xff]  ;;  %v7530_v13 = vld [vmem:[#allocation18 + $0xf8] sm:$0xff] }
 0x4e9   :  { %7639 = vmatprep.mubr.f32.mxu0 %v17062_v14  ;;  %18361 = vst [vmem:[#allocation60_spill] sm:$0xff] %v15636_v49  ;;  %10088 = vmatpush1.bf16.msra.mxu0 %v15636_v49 }
 0x4ea   :  { %10090 = vmatprep.subr.bf16.mxu0 %v15656_v36  ;;  %18366 = vst [vmem:[#allocation71_spill] sm:$0xff] %v15688_v47 }
 0x4ed   :  { %10092 = vmatpush1.bf16.msra.mxu0 %v15662_v17 }
 0x4ee   :  { %10094 = vmatprep.subr.bf16.mxu0 %v15682_v55 }
 0x4f1   :  { %10096 = vmatpush1.bf16.msra.mxu0 %v15684_v33 }
 0x4f2   :  { %10098 = vmatprep.subr.bf16.mxu0 %v15688_v47 }
 0x4f5   :  { %10100 = vmatpush1.bf16.msra.mxu0 %v15690_v61  ;;  %v15768_v61 = vsub.f32 %v7513_v7, %v7573_v11  ;;  %v15788_v7 = vsub.f32 %v7524_v2, %v7591_v6  ;;  %v15792_v11 = vpack.c.bf16 %v7597_v0, %v7593_v53  ;;  %v16976_v2 = vand.u32 4294901760, %v15734_v26 }
 0x4f6   :  { %10102 = vmatprep.subr.bf16.mxu0 %v15694_v29  ;;  %v18373_v29 = vand.u32 4294901760, %v15638_v60 }
 0x4f7   :  { %18380 = vst [vmem:[#allocation136_spill] sm:$0xff] %v15792_v11 }
 0x4f8   :  { %v15729_v15 = vsub.f32 %v15638_v60, %v18373_v29  ;;  %v18378_v29 = vand.u32 4294901760, %v15666_v59 }
 0x4f9   :  { %10104 = vmatpush1.bf16.msra.mxu0 %v15696_v44 }
 0x4fa   :  { %10106 = vmatprep.subr.bf16.mxu0 %v15700_v25  ;;  %v15719_v25 = vsub.f32 %v15620_v22, %v7545_v5  ;;  %v15739_v22 = vsub.f32 %v15645_v23, %v18375_v46  ;;  %v18376_v5 = vand.u32 4294901760, %v15647_v54  ;;  %v15754_v42 = vsub.f32 %v15666_v59, %v18378_v29 }
 0x4fb   :  { %v15760_v23 = vsub.f32 %v15673_v45, %v7565_v40  ;;  %v15762_v46 = vsub.f32 %v7512_v58, %v7567_v10  ;;  %v15774_v59 = vsub.f32 %v7515_v1, %v7577_v51  ;;  %v15776_v29 = vsub.f32 %v7517_v24, %v7581_v12  ;;  %v7527_v10 = vld [vmem:[#allocation18 + $0xe0] sm:$0xff] }
 0x4fc   :  { %v15778_v45 = vsub.f32 %v7520_v3, %v7583_v19  ;;  %v15780_v40 = vsub.f32 %v7522_v20, %v7587_v4  ;;  %v15782_v58 = vsub.f32 %v7519_v39, %v7585_v50  ;;  %v7601_v1 = vand.u32 4294901760, %v7527_v10 }
 0x4fd   :  { %10108 = vmatpush1.bf16.msra.mxu0 %v15702_v28  ;;  %v18372_v28 = vand.u32 4294901760, %v15622_v27  ;;  %v16985_v51 = vand.u32 4294901760, %v15709_v57  ;;  %v16975_v12 = vand.u32 4294901760, %v15714_v30  ;;  %v16973_v50 = vand.u32 4294901760, %v15729_v15 }
 0x4fe   :  { %v15811_v3 = vsub.f32 %v7527_v10, %v7601_v1 }
 0x4ff   :  { %v15724_v44 = vsub.f32 %v15622_v27, %v18372_v28  ;;  %v15744_v27 = vsub.f32 %v15647_v54, %v18376_v5  ;;  %v18377_v28 = vand.u32 4294901760, %v15664_v62  ;;  %v15764_v54 = vsub.f32 %v7514_v9, %v7571_v18  ;;  %v7529_v18 = vld [vmem:[#allocation18 + $0xf0] sm:$0xff] }
 0x500   :  { %v15766_v5 = vsub.f32 %v7511_v63, %v7569_v43  ;;  %v15784_v9 = vsub.f32 %v7521_v48, %v7589_v21  ;;  %v15786_v63 = vpack.c.bf16 %v7595_v56, %v7591_v6  ;;  %v15790_v43 = vsub.f32 %v7526_v37, %v7595_v56  ;;  %18387 = vst [vmem:[#allocation133_spill] sm:$0xff] %v15811_v3 }
 0x501   :  { %v15749_v60 = vsub.f32 %v15664_v62, %v18377_v28  ;;  %v15770_v62 = vsub.f32 %v7516_v32, %v7575_v35  ;;  %v15772_v28 = vsub.f32 %v7518_v8, %v7579_v52  ;;  %v15794_v32 = vsub.f32 %v7523_v38, %v7593_v53 }
 0x502   :  { %18379 = vst [vmem:[#allocation124_spill] sm:$0xff] %v15786_v63  ;;  %v15796_v8 = vsub.f32 %v7525_v31, %v7597_v0  ;;  %v7599_v35 = vand.u32 4294901760, %v7528_v34  ;;  %v7603_v52 = vand.u32 4294901760, %v7530_v13  ;;  %10110 = vmatprep.subr.bf16.mxu0 %v15786_v63  ;;  %v7605_v24 = vand.u32 4294901760, %v7529_v18 }
 0x503   :  { %18381 = vst [vmem:[#allocation79_spill] sm:$0xff] %v15794_v32  ;;  %10112 = vmatpush1.bf16.msra.mxu0 %v15792_v11  ;;  %v16974_v0 = vand.u32 4294901760, %v15719_v25  ;;  %v7654_v19 = vsub.f32 %v15709_v57, %v16985_v51  ;;  %v7666_v4 = vsub.f32 %v15714_v30, %v16975_v12  ;;  %v16972_v48 = vand.u32 4294901760, %v15724_v44 }
 0x504   :  { %18382 = vst [vmem:[#allocation138_spill] sm:$0xff] %v15796_v8  ;;  %v15802_v56 = vpack.c.bf16 %v7603_v52, %v7599_v35  ;;  %v15804_v6 = vsub.f32 %v7528_v34, %v7599_v35  ;;  %v15806_v53 = vsub.f32 %v7530_v13, %v7603_v52  ;;  %v15809_v31 = vpack.c.bf16 %v7605_v24, %v7601_v1 }
 0x505   :  { %v15813_v20 = vsub.f32 %v7529_v18, %v7605_v24  ;;  %v7660_v39 = vsub.f32 %v15719_v25, %v16974_v0  ;;  %v7655_v21 = vand.u32 4294901760, %v7654_v19  ;;  %v16977_v37 = vand.u32 4294901760, %v15739_v22 }
 0x506   :  { %18383 = vst [vmem:[#allocation84_spill] sm:$0xff] %v15802_v56  ;;  %18384 = vst [vmem:[#allocation89_spill] sm:$0xff] %v15804_v6  ;;  %10114 = vmatprep.subr.bf16.mxu0 %v15802_v56  ;;  %v16978_v38 = vand.u32 4294901760, %v15744_v27  ;;  %v7667_v34 = vand.u32 4294901760, %v7666_v4  ;;  %v7672_v10 = vsub.f32 %v15724_v44, %v16972_v48  ;;  %v7678_v18 = vsub.f32 %v15729_v15, %v16973_v50 }
 0x507   :  { %18385 = vst [vmem:[#allocation95_spill] sm:$0xff] %v15806_v53  ;;  %18386 = vst [vmem:[#allocation90_spill] sm:$0xff] %v15809_v31  ;;  %10116 = vmatpush1.bf16.msra.mxu0 %v15809_v31  ;;  %v7661_v13 = vand.u32 4294901760, %v7660_v39  ;;  %v7690_v35 = vsub.f32 %v15734_v26, %v16976_v2  ;;  %v7684_v52 = vsub.f32 %v15739_v22, %v16977_v37  ;;  %v16982_v24 = vand.u32 4294901760, %v15749_v60 }
 0x508   :  { %18388 = vst [vmem:[#allocation57_spill] sm:$0xff] %v15813_v20  ;;  %v7696_v1 = vsub.f32 %v15744_v27, %v16978_v38  ;;  %v10117_v19 = vpack.c.bf16 %v7667_v34, %v7655_v21  ;;  %v7673_v4 = vand.u32 4294901760, %v7672_v10  ;;  %v7679_v39 = vand.u32 4294901760, %v7678_v18 }
 0x509   :  { %v16981_v48 = vand.u32 4294901760, %v15754_v42  ;;  %v7691_v50 = vand.u32 4294901760, %v7690_v35  ;;  %v7685_v0 = vand.u32 4294901760, %v7684_v52  ;;  %v7702_v2 = vsub.f32 %v15749_v60, %v16982_v24 }
 0x50a   :  { %v7697_v12 = vand.u32 4294901760, %v7696_v1  ;;  %10118 = vmatprep.subr.bf16.mxu0 %v10117_v19  ;;  %v15851_v37 = vpack.c.bf16 %v7673_v4, %v7661_v13  ;;  %v16979_v21 = vand.u32 4294901760, %v15757_v16  ;;  %v16980_v34 = vand.u32 4294901760, %v15760_v23 }
 0x50b   :  { %v7714_v38 = vsub.f32 %v15754_v42, %v16981_v48  ;;  %v15858_v10 = vpack.c.bf16 %v7691_v50, %v7679_v39  ;;  %v7703_v35 = vand.u32 4294901760, %v7702_v2  ;;  %v16983_v52 = vand.u32 4294901760, %v15762_v46 }
 0x50c   :  { %v15860_v18 = vpack.c.bf16 %v7697_v12, %v7685_v0  ;;  %v7708_v13 = vsub.f32 %v15757_v16, %v16979_v21  ;;  %v7720_v19 = vsub.f32 %v15760_v23, %v16980_v34  ;;  %v16984_v4 = vand.u32 4294901760, %v15764_v54 }
 0x50d   :  { %v7715_v1 = vand.u32 4294901760, %v7714_v38  ;;  %v7726_v50 = vsub.f32 %v15762_v46, %v16983_v52  ;;  %v16988_v12 = vand.u32 4294901760, %v15766_v5  ;;  %v16991_v0 = vand.u32 4294901760, %v15768_v61 }
 0x50e   :  { %v16994_v2 = vand.u32 4294901760, %v15770_v62  ;;  %v7709_v39 = vand.u32 4294901760, %v7708_v13  ;;  %v7721_v21 = vand.u32 4294901760, %v7720_v19  ;;  %v7738_v34 = vsub.f32 %v15764_v54, %v16984_v4 }
 0x50f   :  { %v15876_v38 = vpack.c.bf16 %v7715_v1, %v7703_v35  ;;  %v7727_v48 = vand.u32 4294901760, %v7726_v50  ;;  %v7732_v24 = vsub.f32 %v15766_v5, %v16988_v12  ;;  %v7744_v52 = vsub.f32 %v15768_v61, %v16991_v0 }
 0x510   :  { %v7750_v35 = vsub.f32 %v15770_v62, %v16994_v2  ;;  %v15890_v1 = vpack.c.bf16 %v7721_v21, %v7709_v39  ;;  %v7739_v13 = vand.u32 4294901760, %v7738_v34  ;;  %v16992_v19 = vand.u32 4294901760, %v15772_v28 }
 0x511   :  { %v16993_v4 = vand.u32 4294901760, %v15774_v59  ;;  %v7733_v50 = vand.u32 4294901760, %v7732_v24  ;;  %v7745_v51 = vand.u32 4294901760, %v7744_v52  ;;  %v16995_v12 = vand.u32 4294901760, %v15776_v29 }
 0x512   :  { %v7751_v31 = vand.u32 4294901760, %v7750_v35  ;;  %v15895_v56 = vpack.c.bf16 %v7739_v13, %v7727_v48  ;;  %v7762_v0 = vsub.f32 %v15772_v28, %v16992_v19  ;;  %v16998_v34 = vand.u32 4294901760, %v15778_v45 }
 0x513   :  { %v7756_v21 = vsub.f32 %v15774_v59, %v16993_v4  ;;  %v15904_v39 = vpack.c.bf16 %v7745_v51, %v7733_v50  ;;  %v7768_v24 = vsub.f32 %v15776_v29, %v16995_v12  ;;  %v17003_v52 = vand.u32 4294901760, %v15780_v40 }
 0x514   :  { %v17004_v48 = vand.u32 4294901760, %v15782_v58  ;;  %v7763_v35 = vand.u32 4294901760, %v7762_v0  ;;  %v7774_v19 = vsub.f32 %v15778_v45, %v16998_v34  ;;  %v17005_v4 = vand.u32 4294901760, %v15784_v9 }
 0x515   :  { %v7757_v13 = vand.u32 4294901760, %v7756_v21  ;;  %v7769_v2 = vand.u32 4294901760, %v7768_v24  ;;  %v7786_v51 = vsub.f32 %v15780_v40, %v17003_v52  ;;  %v17010_v12 = vand.u32 4294901760, %v15788_v7 }
 0x516   :  { %v7780_v50 = vsub.f32 %v15782_v58, %v17004_v48  ;;  %v15922_v11 = vpack.c.bf16 %v7763_v35, %v7751_v31  ;;  %v7775_v0 = vand.u32 4294901760, %v7774_v19  ;;  %v7792_v21 = vsub.f32 %v15784_v9, %v17005_v4 }
 0x517   :  { %v17008_v34 = vand.u32 4294901760, %v15790_v43  ;;  %v15928_v24 = vpack.c.bf16 %v7769_v2, %v7757_v13  ;;  %v7787_v63 = vand.u32 4294901760, %v7786_v51  ;;  %v7798_v52 = vsub.f32 %v15788_v7, %v17010_v12 }
 0x518   :  { %v7781_v47 = vand.u32 4294901760, %v7780_v50  ;;  %v7793_v48 = vand.u32 4294901760, %v7792_v21  ;;  %v17009_v19 = vand.u32 4294901760, %v15794_v32  ;;  %v17013_v35 = vand.u32 4294901760, %v15796_v8 }
 0x519   :  { %v7810_v31 = vsub.f32 %v15790_v43, %v17008_v34  ;;  %v15938_v4 = vpack.c.bf16 %v7787_v63, %v7775_v0  ;;  %v7799_v33 = vand.u32 4294901760, %v7798_v52  ;;  %v17014_v2 = vand.u32 4294901760, %v15804_v6 }
 0x51a   :  { %v17017_v13 = vand.u32 4294901760, %v15806_v53  ;;  %v15942_v51 = vpack.c.bf16 %v7793_v48, %v7781_v47  ;;  %v7804_v21 = vsub.f32 %v15794_v32, %v17009_v19  ;;  %v7816_v34 = vsub.f32 %v15796_v8, %v17013_v35 }
 0x51b   :  { %v7811_v50 = vand.u32 4294901760, %v7810_v31  ;;  %v7822_v63 = vsub.f32 %v15804_v6, %v17014_v2  ;;  %v17023_v47 = vand.u32 4294901760, %v15811_v3  ;;  %v17022_v48 = vand.u32 4294901760, %v15813_v20 }
 0x51c   :  { %v7834_v52 = vsub.f32 %v15806_v53, %v17017_v13  ;;  %v7805_v31 = vand.u32 4294901760, %v7804_v21  ;;  %v7817_v19 = vand.u32 4294901760, %v7816_v34 }
 0x51d   :  { %v15958_v0 = vpack.c.bf16 %v7811_v50, %v7799_v33  ;;  %v7823_v12 = vand.u32 4294901760, %v7822_v63  ;;  %v7828_v35 = vsub.f32 %v15811_v3, %v17023_v47  ;;  %v7840_v2 = vsub.f32 %v15813_v20, %v17022_v48  ;;  %v18391_v47 = vld [vmem:[#allocation122_spill] sm:$0xff] }
 0x51e   :  { %v7835_v55 = vand.u32 4294901760, %v7834_v52  ;;  %v15966_v17 = vpack.c.bf16 %v7817_v19, %v7805_v31  ;;  %v18392_v41 = vsub.s32 3, %v18391_v47  ;;  %v18393_v3 = vsub.s32 2, %v18391_v47 }
 0x51f   :  { %v7829_v36 = vand.u32 4294901760, %v7828_v35  ;;  %v7841_v49 = vand.u32 4294901760, %v7840_v2  ;;  %v4019_v35 = vld [vmem:[%s16239_s9] sm:$0xf]  ;;  %v18389_v2 = vld [vmem:[#allocation156_spill] sm:$0xff]  ;;  %s10910_s9 = smov [#allocation20]  }
 0x520   :  { %v15968_v13 = vpack.c.bf16 %v7835_v55, %v7823_v12  ;;  %v7460_v6 = vrot.slane %v4019_v35, %v18392_v41  ;;  %v7456_v20 = vrot.slane %v4019_v35, %v18393_v3  ;;  %s8415_s18 = sshll.u32 %s10910_s9, 4  ;;  %s8416_s18 = int_to_ptr.vmem [resolvable:$true] %s8415_s18 }
 0x521   :  { %v15970_v33 = vpack.c.bf16 %v7841_v49, %v7829_v36  ;;  %v7448_v36 = vrot.slane %v4019_v35, %v18389_v2  ;;  %v18390_v49 = vld [vmem:[#allocation129_spill] sm:$0xff]  ;;  %s10791_s2 = scalar_lea.vmem %s8416_s18, 256  ;;  %p10796_p2 = scmp.lt.s32.totalorder %s8416_s18, %s8416_s18 }
 0x522   :  { %v7452_v52 = vrot.slane %v4019_v35, %v18390_v49  ;;  %p10792_p1 = scmp.ne.s32.totalorder %s8416_s18, %s10791_s2  ;;  %p10797_p3 = scmp.lt.s32.totalorder %s10791_s2, %s10791_s2 }
 0x524   :  { %p10798_p4 = por %p10797_p3, %p10796_p2 }
 0x526   :  { %p10799_p5 = pnand %p10798_p4, %p10792_p1 }
 0x5bb   :  { %v6584_v12 = vpop.f32.mrb[2].mxu0  ;;  %v7439_v55 = vpop.f32.mrb[4].mxu1 }
 0x5bc   :  { %v7465_v31 = vadd.f32 %v7448_v36, %v6584_v12  ;;  %v6586_v63 = vpop.f32.mrb[3].mxu0  ;;  %v7441_v21 = vpop.f32.mrb[5].mxu1  ;;  %v7467_v53 = vadd.f32 %v7456_v20, %v7439_v55  ;;  %v4023_v36 = vld [vmem:[#allocation10 + $0x8] sm:$0xff] }
 0x5bd   :  { %v7466_v48 = vadd.f32 %v7452_v52, %v6586_v63  ;;  %v7468_v19 = vadd.f32 %v7460_v6, %v7441_v21  ;;  %v18411_v52 = vld [vmem:[#allocation89_spill] sm:$0xff] }
 0x5be   :  { %v8538_v50 = vmul.f32 -1.442695, %v7465_v31 }
 0x5bf   :  { %v8539_v34 = vmul.f32 -1.442695, %v7466_v48  ;;  %v8540_v2 = vmul.f32 -1.442695, %v7468_v19 }
 0x5c0   :  { %10419 = vpow2.f32 %v8538_v50 }
 0x5c1   :  { %10421 = vpow2.f32 %v8539_v34 }
 0x5c2   :  { %10423 = vpow2.f32 %v8540_v2  ;;  %v18410_v2 = vld [vmem:[#allocation95_spill] sm:$0xff] }
 0x5c3   :  { %10425 = vtanh.f32 %v7467_v53  ;;  %v18412_v31 = vpack.c.bf16 %v18410_v2, %v18411_v52 }
 0x5ca   :  { %v10420_v49 = vpop.eup %10419 }
 0x5cb   :  { %v10422_v32 = vpop.eup %10421  ;;  %v7472_v8 = vadd.f32 1.0, %v10420_v49 }
 0x5cc   :  { %v7478_v12 = vadd.f32 1.0, %v10422_v32  ;;  %v10424_v48 = vpop.eup %10423 }
 0x5cd   :  { %10427 = vrcp.f32 %v7472_v8  ;;  %v10426_v63 = vpop.eup %10425  ;;  %v7485_v6 = vadd.f32 1.0, %v10424_v48  ;;  %v18414_v48 = vld [vmem:[#allocation133_spill] sm:$0xff] }
 0x5ce   :  { %10429 = vrcp.f32 %v7478_v12  ;;  %v18413_v12 = vld [vmem:[#allocation57_spill] sm:$0xff] }
 0x5cf   :  { %10431 = vrcp.f32 %v7485_v6  ;;  %v18420_v6 = vld [vmem:[#allocation112_spill] sm:$0xff] }
 0x5d7   :  { %v10428_v41 = vpop.eup %10427 }
 0x5d8   :  { %v10430_v50 = vpop.eup %10429  ;;  %v7489_v34 = vmul.f32 %v10428_v41, %v10426_v63  ;;  %v18415_v63 = vpack.c.bf16 %v18413_v12, %v18414_v48  ;;  %v18417_v41 = vld [vmem:[#allocation60_spill] sm:$0xff] }
 0x5d9   :  { %v7488_v21 = vmul.f32 %v10430_v50, %v4023_v36  ;;  %v10432_v3 = vpop.eup %10431  ;;  %v18416_v36 = vld [vmem:[#allocation107_spill] sm:$0xff] }
 0x5da   :  { %v18418_v50 = vld [vmem:[#allocation131_spill] sm:$0xff] }
 0x5db   :  { %v7490_v47 = vadd.f32 %v7489_v34, %v7488_v21  ;;  %v18419_v34 = vld [vmem:[#allocation139_spill] sm:$0xff]  ;;  %v18421_v21 = vld [vmem:[#allocation144_spill] sm:$0xff] }
 0x5dd   :  { %10433 = vtanh.f32 %v7490_v47  ;;  %7496 = vst [vmem:[#allocation22 + $0x8] sm:$0xff] %v7490_v47  ;;  %v18422_v47 = vld [vmem:[#allocation71_spill] sm:$0xff] }
 0x5e7   :  { %v10434_v20 = vpop.eup %10433 }
 0x5e8   :  { %v7492_v55 = vmul.f32 %v10434_v20, %v10432_v3  ;;  %v18423_v3 = vld [vmem:[#allocation74_spill] sm:$0xff]  ;;  %v18424_v20 = vld [vmem:[#allocation155_spill] sm:$0xff] }
 0x5ea   :  { %v16013_v49 = vand.u32 4294901760, %v7492_v55  ;;  %7494 = vst [vmem:[#allocation20 + $0x8] sm:$0xff] %v7492_v55 }
 0x5ec   :  { %v7641_v32 = vsub.f32 %v7492_v55, %v16013_v49  ;;  %v18425_v55 = vld [vmem:[#allocation115_spill] sm:$0xff] }
 0x5ee   :  { %v7642_v8 = vand.u32 4294901760, %v7641_v32 }
 0x5f0   :  { %v7643_v53 = vsub.f32 %v7641_v32, %v7642_v8 }
 0x5f2   :  { %v7644_v19 = vand.u32 4294901760, %v7643_v53  ;;  %v18427_v53 = vld [vmem:[#allocation70_spill] sm:$0xff] }
 0x5f4   :  { %7645 = vmatmul.mubr.f32.vlgmr.msra.gmra.mrb[4].mxu0 %v7644_v19  ;;  %v18428_v19 = vld [vmem:[#allocation124_spill] sm:$0xff] }
 0x5f5   :  { %10120 = vmatpush1.bf16.msra.mxu0 %v15851_v37  ;;  %7875 = vmatprep.mubr.f32.mxu0 %v17062_v14  ;;  %v18396_v37 = vpack.c.bf16 %v15734_v26, %v15729_v15 }
 0x5f6   :  { %10122 = vmatprep.subr.bf16.mxu0 %v15858_v10  ;;  %v18398_v10 = vpack.c.bf16 %v15754_v42, %v15749_v60 }
 0x5f9   :  { %10124 = vmatpush1.bf16.msra.mxu0 %v15860_v18  ;;  %v18399_v18 = vpack.c.bf16 %v15760_v23, %v15757_v16 }
 0x5fa   :  { %10126 = vmatprep.subr.bf16.mxu0 %v15876_v38  ;;  %v18401_v38 = vpack.c.bf16 %v15768_v61, %v15766_v5 }
 0x5fd   :  { %10128 = vmatpush1.bf16.msra.mxu0 %v15890_v1  ;;  %v18402_v1 = vpack.c.bf16 %v15772_v28, %v15770_v62 }
 0x5fe   :  { %10130 = vmatprep.subr.bf16.mxu0 %v15895_v56  ;;  %v18394_v56 = vpack.c.bf16 %v15714_v30, %v15709_v57 }
 0x601   :  { %10132 = vmatpush1.bf16.msra.mxu0 %v15904_v39  ;;  %v18403_v39 = vpack.c.bf16 %v15776_v29, %v15774_v59 }
 0x602   :  { %10134 = vmatprep.subr.bf16.mxu0 %v15922_v11  ;;  %v18395_v11 = vpack.c.bf16 %v15724_v44, %v15719_v25 }
 0x605   :  { %10136 = vmatpush1.bf16.msra.mxu0 %v15928_v24  ;;  %v18404_v24 = vpack.c.bf16 %v15780_v40, %v15778_v45 }
 0x606   :  { %10138 = vmatprep.subr.bf16.mxu0 %v15938_v4  ;;  %v18400_v4 = vpack.c.bf16 %v15764_v54, %v15762_v46 }
 0x609   :  { %10140 = vmatpush1.bf16.msra.mxu0 %v15942_v51  ;;  %v18406_v51 = vpack.c.bf16 %v15790_v43, %v15788_v7 }
 0x60a   :  { %10142 = vmatprep.subr.bf16.mxu0 %v15958_v0  ;;  %v18407_v0 = vld [vmem:[#allocation138_spill] sm:$0xff] }
 0x60d   :  { %10144 = vmatpush1.bf16.msra.mxu0 %v15966_v17  ;;  %v18397_v17 = vpack.c.bf16 %v15744_v27, %v15739_v22 }
 0x60e   :  { %10146 = vmatprep.subr.bf16.mxu0 %v15968_v13  ;;  %v18405_v13 = vpack.c.bf16 %v15784_v9, %v15782_v58 }
 0x611   :  { %10148 = vmatpush1.bf16.msra.mxu0 %v15970_v33  ;;  %v18408_v33 = vld [vmem:[#allocation79_spill] sm:$0xff] }
 0x612   :  { %10150 = vmatprep.subr.bf16.mxu0 %v18394_v56  ;;  %v18409_v35 = vpack.c.bf16 %v18407_v0, %v18408_v33  ;;  %v18429_v56 = vld [vmem:[#allocation136_spill] sm:$0xff] }
 0x614   :  { %7877 = vmatmul.mubr.f32.vlgmr.msra.gmra.mrb[4].mxu0 %v16013_v49 }
 0x615   :  { %10152 = vmatpush1.bf16.msra.mxu0 %v18395_v11  ;;  %8011 = vmatprep.mubr.f32.mxu0 %v17062_v14  ;;  %v18430_v11 = vld [vmem:[#allocation84_spill] sm:$0xff] }
 0x616   :  { %10154 = vmatprep.subr.bf16.mxu0 %v18396_v37  ;;  %v18431_v37 = vand.u32 4294901760, %v15709_v57  ;;  %v18438_v57 = vand.u32 4294901760, %v15739_v22  ;;  %v18444_v22 = vand.u32 4294901760, %v15762_v46  ;;  %v18451_v46 = vand.u32 4294901760, %v15776_v29 }
 0x617   :  { %v18458_v29 = vand.u32 4294901760, %v18408_v33 }
 0x619   :  { %10156 = vmatpush1.bf16.msra.mxu0 %v18397_v17  ;;  %v18432_v17 = vand.u32 4294901760, %v15714_v30  ;;  %v18439_v30 = vand.u32 4294901760, %v15744_v27  ;;  %v18445_v27 = vand.u32 4294901760, %v15764_v54  ;;  %v18452_v54 = vand.u32 4294901760, %v15778_v45 }
 0x61a   :  { %10158 = vmatprep.subr.bf16.mxu0 %v18398_v10  ;;  %v18459_v45 = vand.u32 4294901760, %v18407_v0 }
 0x61b   :  { %v10213_v10 = vpack.c.bf16 %v18432_v17, %v18431_v37 }
 0x61d   :  { %10160 = vmatpush1.bf16.msra.mxu0 %v18399_v18  ;;  %v18433_v18 = vld [vmem:[#allocation90_spill] sm:$0xff] }
 0x61e   :  { %10162 = vmatprep.subr.bf16.mxu0 %v18400_v4  ;;  %v18434_v4 = vand.u32 4294901760, %v15719_v25  ;;  %v18440_v25 = vand.u32 4294901760, %v15749_v60  ;;  %v18447_v60 = vand.u32 4294901760, %v15768_v61  ;;  %v18454_v61 = vand.u32 4294901760, %v15782_v58 }
 0x61f   :  { %v18461_v58 = vand.u32 4294901760, %v18410_v2 }
 0x621   :  { %10164 = vmatpush1.bf16.msra.mxu0 %v18401_v38  ;;  %v18435_v38 = vand.u32 4294901760, %v15724_v44  ;;  %v18441_v44 = vand.u32 4294901760, %v15754_v42  ;;  %v18448_v42 = vand.u32 4294901760, %v15770_v62  ;;  %v18455_v62 = vand.u32 4294901760, %v15784_v9 }
 0x622   :  { %10166 = vmatprep.subr.bf16.mxu0 %v18402_v1  ;;  %v18462_v9 = vand.u32 4294901760, %v18414_v48 }
 0x623   :  { %v10215_v1 = vpack.c.bf16 %v18435_v38, %v18434_v4  ;;  %v10235_v38 = vpack.c.bf16 %v18455_v62, %v18454_v61 }
 0x625   :  { %10168 = vmatpush1.bf16.msra.mxu0 %v18403_v39  ;;  %v18436_v39 = vand.u32 4294901760, %v15729_v15  ;;  %v18442_v15 = vand.u32 4294901760, %v15757_v16  ;;  %v18449_v16 = vand.u32 4294901760, %v15772_v28  ;;  %v18456_v28 = vand.u32 4294901760, %v15788_v7 }
 0x626   :  { %10170 = vmatprep.subr.bf16.mxu0 %v18404_v24  ;;  %v18437_v24 = vand.u32 4294901760, %v15734_v26  ;;  %v18443_v26 = vand.u32 4294901760, %v15760_v23  ;;  %v18450_v23 = vand.u32 4294901760, %v15774_v59  ;;  %v18457_v59 = vand.u32 4294901760, %v15790_v43 }
 0x627   :  { %v10229_v17 = vpack.c.bf16 %v18449_v16, %v18448_v42  ;;  %v18463_v7 = vand.u32 4294901760, %v18413_v12 }
 0x629   :  { %10172 = vmatpush1.bf16.msra.mxu0 %v18405_v13  ;;  %v10217_v13 = vpack.c.bf16 %v18437_v24, %v18436_v39  ;;  %v10239_v39 = vpack.c.bf16 %v18459_v45, %v18458_v29 }
 0x62a   :  { %10174 = vmatprep.subr.bf16.mxu0 %v18406_v51  ;;  %v10219_v51 = vpack.c.bf16 %v18439_v30, %v18438_v57 }
 0x62d   :  { %10176 = vmatpush1.bf16.msra.mxu0 %v18409_v35  ;;  %v10221_v35 = vpack.c.bf16 %v18441_v44, %v18440_v25 }
 0x62e   :  { %10178 = vmatprep.subr.bf16.mxu0 %v18412_v31  ;;  %v10225_v31 = vpack.c.bf16 %v18445_v27, %v18444_v22 }
 0x631   :  { %10180 = vmatpush1.bf16.msra.mxu0 %v18415_v63  ;;  %v18446_v63 = vand.u32 4294901760, %v15766_v5  ;;  %v18453_v5 = vand.u32 4294901760, %v15780_v40  ;;  %v18460_v40 = vand.u32 4294901760, %v18411_v52 }
 0x632   :  { %10182 = vmatprep.subr.bf16.mxu0 %v18416_v36 }
 0x633   :  { %v10227_v37 = vpack.c.bf16 %v18447_v60, %v18446_v63  ;;  %v10233_v4 = vpack.c.bf16 %v18453_v5, %v18452_v54  ;;  %v10241_v24 = vpack.c.bf16 %v18461_v58, %v18460_v40 }
 0x634   :  { %8014 = vmatmul.mubr.f32.vlgmr.msra.gmra.mrb[4].mxu0 %v7641_v32  ;;  %v18426_v32 = vld [vmem:[#allocation119_spill] sm:$0xff] }
 0x635   :  { %10184 = vmatpush1.bf16.msra.mxu0 %v18417_v41  ;;  %8116 = vmatprep.mubr.f32.mxu0 %v17062_v14 }
 0x636   :  { %10186 = vmatprep.subr.bf16.mxu0 %v18418_v50 }
 0x639   :  { %10188 = vmatpush1.bf16.msra.mxu0 %v18419_v34 }
 0x63a   :  { %10190 = vmatprep.subr.bf16.mxu0 %v18420_v6 }
 0x63d   :  { %10192 = vmatpush1.bf16.msra.mxu0 %v18421_v21 }
 0x63e   :  { %10194 = vmatprep.subr.bf16.mxu0 %v18422_v47 }
 0x641   :  { %10196 = vmatpush1.bf16.msra.mxu0 %v18423_v3 }
 0x642   :  { %10198 = vmatprep.subr.bf16.mxu0 %v18424_v20 }
 0x645   :  { %10200 = vmatpush1.bf16.msra.mxu0 %v18425_v55 }
 0x646   :  { %10202 = vmatprep.subr.bf16.mxu0 %v18426_v32 }
 0x649   :  { %10204 = vmatpush1.bf16.msra.mxu0 %v18427_v53 }
 0x64a   :  { %10206 = vmatprep.subr.bf16.mxu0 %v18428_v19 }
 0x64d   :  { %10208 = vmatpush1.bf16.msra.mxu0 %v18429_v56 }
 0x64e   :  { %10210 = vmatprep.subr.bf16.mxu0 %v18430_v11 }
 0x651   :  { %10212 = vmatpush1.bf16.msra.mxu0 %v18433_v18 }
 0x652   :  { %10214 = vmatprep.subr.bf16.mxu0 %v10213_v10  ;;  %v10231_v10 = vpack.c.bf16 %v18451_v46, %v18450_v23 }
 0x654   :  { %8120 = vmatmul.mubr.f32.vlgmr.msra.gmra.mrb[4].mxu0 %v7642_v8  ;;  %v10223_v8 = vpack.c.bf16 %v18443_v26, %v18442_v15 }
 0x655   :  { %10216 = vmatpush1.bf16.msra.mxu0 %v10215_v1  ;;  %8286 = vmatprep.mubr.f32.mxu0 %v17062_v14  ;;  %v10237_v1 = vpack.c.bf16 %v18457_v59, %v18456_v28 }
 0x656   :  { %10218 = vmatprep.subr.bf16.mxu0 %v10217_v13  ;;  %v10243_v13 = vpack.c.bf16 %v18463_v7, %v18462_v9 }
 0x659   :  { %10220 = vmatpush1.bf16.msra.mxu0 %v10219_v51 }
 0x65a   :  { %10222 = vmatprep.subr.bf16.mxu0 %v10221_v35 }
 0x65d   :  { %10224 = vmatpush1.bf16.msra.mxu0 %v10223_v8 }
 0x65e   :  { %10226 = vmatprep.subr.bf16.mxu0 %v10225_v31 }
 0x661   :  { %10228 = vmatpush1.bf16.msra.mxu0 %v10227_v37 }
 0x662   :  { %10230 = vmatprep.subr.bf16.mxu0 %v10229_v17 }
 0x665   :  { %10232 = vmatpush1.bf16.msra.mxu0 %v10231_v10 }
 0x666   :  { %10234 = vmatprep.subr.bf16.mxu0 %v10233_v4 }
 0x669   :  { %10236 = vmatpush1.bf16.msra.mxu0 %v10235_v38 }
 0x66a   :  { %10238 = vmatprep.subr.bf16.mxu0 %v10237_v1 }
 0x66d   :  { %10240 = vmatpush1.bf16.msra.mxu0 %v10239_v39 }
 0x66e   :  { %10242 = vmatprep.subr.bf16.mxu0 %v10241_v24 }
 0x671   :  { %10244 = vmatpush1.bf16.msra.mxu0 %v10243_v13 }
 0x672   :  { %10246 = vmatprep.subr.bf16.mxu0 %v18416_v36 }
 0x674   :  { %8288 = vmatmul.mubr.f32.vlgmr.msra.gmra.mrb[4].mxu0 %v16013_v49 }
 0x675   :  { %10248 = vmatpush1.bf16.msra.mxu0 %v18417_v41  ;;  %8390 = vmatprep.mubr.f32.mxu0 %v17062_v14 }
 0x676   :  { %10250 = vmatprep.subr.bf16.mxu0 %v18418_v50 }
 0x679   :  { %10252 = vmatpush1.bf16.msra.mxu0 %v18419_v34 }
 0x67a   :  { %10254 = vmatprep.subr.bf16.mxu0 %v18420_v6 }
 0x67d   :  { %10256 = vmatpush1.bf16.msra.mxu0 %v18421_v21 }
 0x67e   :  { %10258 = vmatprep.subr.bf16.mxu0 %v18422_v47 }
 0x681   :  { %10260 = vmatpush1.bf16.msra.mxu0 %v18423_v3 }
 0x682   :  { %10262 = vmatprep.subr.bf16.mxu0 %v18424_v20 }
 0x685   :  { %10264 = vmatpush1.bf16.msra.mxu0 %v18425_v55 }
 0x686   :  { %10266 = vmatprep.subr.bf16.mxu0 %v18426_v32 }
 0x689   :  { %10268 = vmatpush1.bf16.msra.mxu0 %v18427_v53 }
 0x68a   :  { %10270 = vmatprep.subr.bf16.mxu0 %v18428_v19 }
 0x68d   :  { %10272 = vmatpush1.bf16.msra.mxu0 %v18429_v56 }
 0x68e   :  { %10274 = vmatprep.subr.bf16.mxu0 %v18430_v11 }
 0x691   :  { %10276 = vmatpush1.bf16.msra.mxu0 %v18433_v18 }
 0x694   :  { %8392 = vmatmul.mubr.f32.vlgmr.msra.gmra.mrb[4].mxu0 %v16013_v49 }
 0x695   :  { %10802 = shalt.err (!%p10799_p5)
}
 0x696   :  { %s10803_s22 = scalar_lea.hbm %s16243_s13, 256 }
 0x697   :  { %p10804_p6 = scmp.ne.s32.totalorder %s16243_s13, %s10803_s22  ;;  %p10807_p7 = scmp.lt.u32.totalorder %s10803_s22, %s16243_s13 }
 0x699   :  { %p10809_p8 = pnand %p10807_p7, %p10804_p6 }
 0x69b   :  { %10812 = shalt.err (!%p10809_p8)
}
 0x69c   :  { %8421 = dma.vmem_to_hbm [thread:$0]  %s8416_s18, 256, %s16243_s13, [#allocation21], %s10889_s16, %s10889_s16, %s10890_s17  }
 0x69d   :  { %s10911_s5 = smov [#allocation22]  }
 0x69e   :  { %s8427_s27 = sshll.u32 %s10911_s5, 4  ;;  %s8428_s27 = int_to_ptr.vmem [resolvable:$true] %s8427_s27 }
 0x69f   :  { %s10813_s8 = scalar_lea.vmem %s8428_s27, 256  ;;  %p10818_p10 = scmp.lt.s32.totalorder %s8428_s27, %s8428_s27 }
 0x6a0   :  { %p10814_p9 = scmp.ne.s32.totalorder %s8428_s27, %s10813_s8  ;;  %p10819_p11 = scmp.lt.s32.totalorder %s10813_s8, %s10813_s8 }
 0x6a2   :  { %p10820_p12 = por %p10819_p11, %p10818_p10 }
 0x6a4   :  { %p10821_p13 = pnand %p10820_p12, %p10814_p9 }
 0x6a6   :  { %10824 = shalt.err (!%p10821_p13)
}
 0x6a7   :  { %s10825_s23 = scalar_lea.hbm %s16244_s14, 256 }
 0x6a8   :  { %p10826_p0 = scmp.ne.s32.totalorder %s16244_s14, %s10825_s23  ;;  %p10829_p1 = scmp.lt.u32.totalorder %s10825_s23, %s16244_s14 }
 0x6aa   :  { %p10831_p2 = pnand %p10829_p1, %p10826_p0 }
 0x6ac   :  { %10834 = shalt.err (!%p10831_p2)
}
 0x6ad   :  { %8433 = dma.vmem_to_hbm [thread:$0]  %s8428_s27, 256, %s16244_s14, [#allocation21], %s10889_s16, %s10889_s16, %s10890_s17   ;;  %v18464_v43 = vld [vmem:[#allocation156_spill] sm:$0xff]  ;;  %v18465_v0 = vld [vmem:[#allocation129_spill] sm:$0xff] }
 0x6ae   :  { %v7531_v14 = vld [vmem:[%s16241_s11] sm:$0x3]  ;;  %s10912_s9 = smov [#allocation19]  }
 0x6af   :  { %v7536_v49 = vrot.slane %v7531_v14, %v18464_v43  ;;  %v7540_v33 = vrot.slane %v7531_v14, %v18465_v0  ;;  %s8406_s18 = sshll.u32 %s10912_s9, 4  ;;  %s8407_s18 = int_to_ptr.vmem [resolvable:$true] %s8406_s18 }
 0x6b0   :  { %s10835_s2 = scalar_lea.vmem %s8407_s18, 256  ;;  %p10840_p4 = scmp.lt.s32.totalorder %s8407_s18, %s8407_s18 }
 0x6b1   :  { %p10836_p3 = scmp.ne.s32.totalorder %s8407_s18, %s10835_s2  ;;  %p10841_p5 = scmp.lt.s32.totalorder %s10835_s2, %s10835_s2 }
 0x6b3   :  { %p10842_p6 = por %p10841_p5, %p10840_p4 }
 0x6b5   :  { %p10843_p7 = pnand %p10842_p6, %p10836_p3 }
 0x767   :  { %v8393_v2 = vpop.f32.mrb[4].mxu0 }
 0x768   :  { %v10279_v52 = vadd.f32 %v8393_v2, %v7536_v49  ;;  %v8395_v12 = vpop.f32.mrb[5].mxu0 }
 0x769   :  { %v10280_v48 = vadd.f32 %v8395_v12, %v7540_v33 }
 0x76a   :  { %8398 = vst [vmem:[#allocation19] sm:$0xff] %v10279_v52 }
 0x76b   :  { %8399 = vst [vmem:[#allocation19 + $0x8] sm:$0xff] %v10280_v48 }
 0x76c   :  { %10846 = shalt.err (!%p10843_p7)
}
 0x76d   :  { %s10847_s16 = scalar_lea.hbm %s16242_s12, 256 }
 0x76e   :  { %p10848_p8 = scmp.ne.s32.totalorder %s16242_s12, %s10847_s16  ;;  %p10851_p9 = scmp.lt.u32.totalorder %s10847_s16, %s16242_s12 }
 0x770   :  { %p10853_p10 = pnand %p10851_p9, %p10848_p8 }
 0x772   :  { %10856 = shalt.err (!%p10853_p10)
}
 0x773   :  { %8409 = dma.vmem_to_hbm [thread:$0]  %s8407_s18, 256, %s16242_s12, [#allocation9]  }
 0x774   :  { %10883 = dma.done.wait [#allocation9], 256  }
 0x775   :  { %10884 = vsyncadd [#allocation9], 4294967040 }
 0x776   :  { %10885 = dma.done.wait [#allocation21], 512  }
 0x777   :  { %10886 = vsyncadd [#allocation21], 4294966784 }
 0x778   :  { %8443 = vsyncpa [#allocation8], 1 }
 0x779   :  { %8444 = vsyncpa [#allocation11], 1 }
 0x77a   :  { %8445 = vsyncpa [#allocation14], 1 }
 0x77b   :  { %8446 = vsyncpa [#allocation17], 1 }
 0x77c   :  { %8447 = vsyncpa [#allocation9], 1 }
 0x77d   :  { %8448 = vsyncpa [#allocation21], 1 }
 0x77e   :  { %8449 = vsyncmov [#allocation4] }
 0x781   :  { %s8450_s25 = vpop.sfrf %8449 }
 0x782   :  { %p8541_p11 = scmp.ne.s32.totalorder %s8450_s25, 0 }
 0x784   :  { %8454 = shalt.err (%p8541_p11)  }
 0x785   :  { %8456 = vsyncmov [#allocation4 + $0x1] }
 0x788   :  { %s8457_s26 = vpop.sfrf %8456 }
 0x789   :  { %p8542_p12 = scmp.ne.s32.totalorder %s8457_s26, 0 }
 0x78b   :  { %8461 = shalt.err (%p8542_p12)  }
 0x78c   :  { %8463 = vsyncmov [#allocation4 + $0x2] }
 0x78f   :  { %s8464_s12 = vpop.sfrf %8463 }
 0x790   :  { %p8543_p13 = scmp.ne.s32.totalorder %s8464_s12, 0 }
 0x792   :  { %8468 = shalt.err (%p8543_p13)  }
 0x793   :  { %8470 = vsyncmov [#allocation4 + $0x3] }
 0x796   :  { %s8471_s3 = vpop.sfrf %8470 }
 0x797   :  { %p8544_p0 = scmp.ne.s32.totalorder %s8471_s3, 0 }
 0x799   :  { %8475 = shalt.err (%p8544_p0)  }
 0x79a   :  { %8477 = vsyncmov [#allocation4 + $0x4] }
 0x79d   :  { %s8478_s7 = vpop.sfrf %8477 }
 0x79e   :  { %p8545_p1 = scmp.ne.s32.totalorder %s8478_s7, 0 }
 0x7a0   :  { %8482 = shalt.err (%p8545_p1)  }
 0x7a1   :  { %8484 = vsyncmov [#allocation4 + $0x5] }
 0x7a4   :  { %s8485_s5 = vpop.sfrf %8484 }
 0x7a5   :  { %p8546_p2 = scmp.ne.s32.totalorder %s8485_s5, 0 }
 0x7a7   :  { %8489 = shalt.err (%p8546_p2)  }
 0x7a8   :  { %8491 = vsyncmov [#allocation4 + $0x6] }
 0x7ab   :  { %s8492_s27 = vpop.sfrf %8491 }
 0x7ac   :  { %p8547_p3 = scmp.ne.s32.totalorder %s8492_s27, 0 }
 0x7ae   :  { %8496 = shalt.err (%p8547_p3)  }
 0x7af   :  { %8498 = vsyncmov [#allocation4 + $0x7] }
 0x7b2   :  { %s8499_s8 = vpop.sfrf %8498 }
 0x7b3   :  { %p8548_p4 = scmp.ne.s32.totalorder %s8499_s8, 0 }
 0x7b5   :  { %8503 = shalt.err (%p8548_p4)  }

</bundles_post_ra>
